<compile_context>
chip_gen: v6e
topology: v6e:2x2x1
jax: 0.10.0
libtpu: 0.0.40
codegen_flags: <defaults>
</compile_context>

<pallas_src>
import math
import functools
from functools import partial

import jax
import jax.numpy as jnp
from jax.experimental import pallas as pl
from jax.experimental.pallas import tpu as pltpu

# ---------------- scaled-down config (roles mirror the real APViT sizes) ----------------
BATCH = 2
IMG = 32                       # stand-in for 112x112 face crops
STEM1 = 64
STEM2 = 128
FEAT_CH = 128                  # stand-in for IR-50 stage-2 256-channel feature (lane aligned)
GRID = 4                       # 4x4 feature map -> patch_num = 16 (real: 14x14 = 196)
PATCH_NUM = GRID * GRID
CNN_KEEP = 12                  # cnn_pool_config keep_num (160/196 in the real model)
S_PAD = 16                     # fixed padded sequence: cls + 12 tokens + 3 pad (sublane aligned)
EMBED = 128                    # stand-in for vit_small embed_dim = 768 (kept lane aligned)
HEADS = 4
HEAD_DIM = EMBED // HEADS
MLP_RATIO = 3
MLP_HIDDEN = EMBED * MLP_RATIO
DEPTH = 8
KEEP_RATES = [1.0] * 4 + [0.9] * 4     # vit_pool_configs keep_rates
NUM_CLASSES = 7
LN_EPS = 1e-6
_ATTN_SCALE = 1.0 / math.sqrt(HEAD_DIM)

# Depth segments: consecutive blocks fused into one pallas_call; a segment ends at every
# block whose keep_rate < 1.0 (token pooling glue must run between segments).
_SEGMENTS = []
_start = 0
for _d in range(DEPTH):
    if KEEP_RATES[_d] < 1.0:
        _SEGMENTS.append((_start, _d - _start + 1))
        _start = _d + 1
if _start < DEPTH:
    _SEGMENTS.append((_start, DEPTH - _start))
# With the default keep_rates: [(0, 5), (5, 1), (6, 1), (7, 1)]


# ---------------------------------- in-kernel helpers ----------------------------------
def _ln(x, g, b):
    mu = jnp.mean(x, axis=-1, keepdims=True)
    xc = x - mu
    var = jnp.mean(xc * xc, axis=-1, keepdims=True)
    return xc * jax.lax.rsqrt(var + LN_EPS) * g + b


# ---------------------------------- Pallas kernels ----------------------------------
def _matmul_kernel(x_ref, w_ref, b_ref, o_ref, *, act):
    # x: bf16, w: bf16, b: f32 ; accumulate f32
    y = jnp.dot(x_ref[...], w_ref[...], preferred_element_type=jnp.float32) + b_ref[...]
    if act == "relu":
        y = jnp.maximum(y, 0.0)
    o_ref[...] = y


def _conv_score_kernel(x_ref, w_ref, b_ref, y_ref, s_ref):
    # last stem conv + fused SUM_ABS_1 token score (per spatial token = per row)
    y = jnp.dot(x_ref[...], w_ref[...], preferred_element_type=jnp.float32) + b_ref[...]
    y = jnp.maximum(y, 0.0)
    y_ref[...] = y
    s_ref[...] = jnp.sum(jnp.abs(y), axis=-1, keepdims=True)


def _embed_kernel(kept_ref, posg_ref, cls_ref, w_ref, b_ref, o_ref):
    # 1x1 projection of kept tokens + gathered pos embed, cls token at row 0, zero padding.
    tok = jnp.dot(kept_ref[...], w_ref[...], preferred_element_type=jnp.float32)
    tok = tok + b_ref[...] + posg_ref[...]
    o_ref[0:1, :] = cls_ref[...]
    o_ref[1:1 + CNN_KEEP, :] = tok
    o_ref[1 + CNN_KEEP:, :] = jnp.zeros((S_PAD - 1 - CNN_KEEP, EMBED), jnp.float32)


def _block_stack_kernel(x_ref, mrow_ref, mcol_ref,
                        ln1g_ref, ln1b_ref, wqkv_ref, wproj_ref, bproj_ref,
                        ln2g_ref, ln2b_ref, wfc1_ref, bfc1_ref, wfc2_ref, bfc2_ref,
                        xo_ref, sc_ref):
    """One grid step = one transformer block for one sample.

    grid = (BATCH, seg_depth).  The residual stream lives in xo_ref (same output block for
    every depth index -> resident accumulator); per-depth weights are streamed via the depth
    index in their BlockSpecs.  sc_ref holds the 'SUM' pooling score of the *last* block of
    the segment (the only one consumed by the glue).
    """
    f32 = jnp.float32
    bf16 = jnp.bfloat16

    @pl.when(pl.program_id(1) == 0)
    def _():
        xo_ref[...] = x_ref[...]

    x = xo_ref[...]                    # (S_PAD, EMBED) f32 residual stream
    mrow = mrow_ref[...]               # (1, S_PAD) valid-token mask (keys)
    mcol = mcol_ref[...]               # (S_PAD, 1) valid-token mask (queries)
    kbias = (mrow - 1.0) * 1e9         # 0 for valid keys, -1e9 for dropped/pad keys

    # ---- attention (pre-norm, qkv_bias=False) ----
    y = _ln(x, ln1g_ref[...], ln1b_ref[...]).astype(bf16)
    qkv = jnp.dot(y, wqkv_ref[...], preferred_element_type=f32)     # (S, 3E)

    o = jnp.zeros((S_PAD, EMBED), f32)
    recv = jnp.zeros((1, S_PAD), f32)
    for h in range(HEADS):
        lo = h * HEAD_DIM
        hi = lo + HEAD_DIM
        q = qkv[:, lo:hi].astype(bf16)
        k = qkv[:, EMBED + lo:EMBED + hi].astype(bf16)
        v = qkv[:, 2 * EMBED + lo:2 * EMBED + hi].astype(bf16)
        logits = jax.lax.dot_general(q, k, (((1,), (1,)), ((), ())),
                                     preferred_element_type=f32) * _ATTN_SCALE + kbias
        mx = jnp.max(logits, axis=-1, keepdims=True)
        p = jnp.exp(logits - mx)
        attn = p / jnp.sum(p, axis=-1, keepdims=True)                # (Sq, Sk) f32
        # 'SUM' vit-pooling score: attention mass each key receives from valid queries
        recv = recv + jnp.sum(attn * mcol, axis=0, keepdims=True)
        oh = jnp.dot(attn.astype(bf16), v, preferred_element_type=f32)          # (S, HD)
        # fold the head-concat into the output projection: concat(o_h) @ Wp == sum_h o_h @ Wp[h]
        o = o + jnp.dot(oh.astype(bf16), wproj_ref[lo:hi, :], preferred_element_type=f32)

    x = x + o + bproj_ref[...]

    # ---- MLP (pre-norm) ----
    y2 = _ln(x, ln2g_ref[...], ln2b_ref[...]).astype(bf16)
    h1 = jnp.dot(y2, wfc1_ref[...], preferred_element_type=f32) + bfc1_ref[...]
    h1 = jax.nn.gelu(h1, approximate=True)   # TODO(synk): PyTorch default GELU is exact erf
    h2 = jnp.dot(h1.astype(bf16), wfc2_ref[...], preferred_element_type=f32) + bfc2_ref[...]

    xo_ref[...] = x + h2
    sc_ref[...] = recv


def _head_kernel(x_ref, g_ref, b_ref, w_ref, bh_ref, o_ref):
    # final LayerNorm on cls rows + classifier head
    y = _ln(x_ref[...], g_ref[...], b_ref[...])
    o_ref[...] = jnp.dot(y.astype(jnp.bfloat16), w_ref[...],
                         preferred_element_type=jnp.float32) + bh_ref[...]


# -------------------------- pallas_call wrappers (built once) --------------------------
@functools.lru_cache(maxsize=None)
def _linear_call(M, K, N, act):
    tm = 128 if (M % 256 == 0) else M
    return pl.pallas_call(
        partial(_matmul_kernel, act=act),
        out_shape=jax.ShapeDtypeStruct((M, N), jnp.float32),
        grid=(M // tm,),
        in_specs=[pl.BlockSpec((tm, K), lambda i: (i, 0)),
                  pl.BlockSpec((K, N), lambda i: (0, 0)),
                  pl.BlockSpec((1, N), lambda i: (0, 0))],
        out_specs=pl.BlockSpec((tm, N), lambda i: (i, 0)),
        compiler_params=pltpu.CompilerParams(dimension_semantics=("parallel",)),
    )


_CONV3_M = BATCH * PATCH_NUM
_CONV3_K = 9 * STEM2

_conv3_call = pl.pallas_call(
    _conv_score_kernel,
    out_shape=(jax.ShapeDtypeStruct((_CONV3_M, FEAT_CH), jnp.float32),
               jax.ShapeDtypeStruct((_CONV3_M, 1), jnp.float32)),
    grid=(1,),
    in_specs=[pl.BlockSpec((_CONV3_M, _CONV3_K), lambda i: (0, 0)),
              pl.BlockSpec((_CONV3_K, FEAT_CH), lambda i: (0, 0)),
              pl.BlockSpec((1, FEAT_CH), lambda i: (0, 0))],
    out_specs=(pl.BlockSpec((_CONV3_M, FEAT_CH), lambda i: (0, 0)),
               pl.BlockSpec((_CONV3_M, 1), lambda i: (0, 0))),
)

_embed_call = pl.pallas_call(
    _embed_kernel,
    out_shape=jax.ShapeDtypeStruct((BATCH, S_PAD, EMBED), jnp.float32),
    grid=(BATCH,),
    in_specs=[pl.BlockSpec((None, CNN_KEEP, FEAT_CH), lambda b: (b, 0, 0)),
              pl.BlockSpec((None, CNN_KEEP, EMBED), lambda b: (b, 0, 0)),
              pl.BlockSpec((1, EMBED), lambda b: (0, 0)),
              pl.BlockSpec((FEAT_CH, EMBED), lambda b: (0, 0)),
              pl.BlockSpec((1, EMBED), lambda b: (0, 0))],
    out_specs=pl.BlockSpec((None, S_PAD, EMBED), lambda b: (b, 0, 0)),
    compiler_params=pltpu.CompilerParams(dimension_semantics=("parallel",)),
)


@functools.lru_cache(maxsize=None)
def _block_seg_call(seg_depth):
    """Fused multi-block transformer segment: grid=(BATCH, seg_depth)."""
    def wspec(shape):
        return pl.BlockSpec((None,) + shape, lambda b, d: (d, 0, 0))

    x_spec = pl.BlockSpec((None, S_PAD, EMBED), lambda b, d: (b, 0, 0))
    mrow_spec = pl.BlockSpec((None, 1, S_PAD), lambda b, d: (b, 0, 0))
    mcol_spec = pl.BlockSpec((None, S_PAD, 1), lambda b, d: (b, 0, 0))

    return pl.pallas_call(
        _block_stack_kernel,
        out_shape=(jax.ShapeDtypeStruct((BATCH, S_PAD, EMBED), jnp.float32),
                   jax.ShapeDtypeStruct((BATCH, 1, S_PAD), jnp.float32)),
        grid=(BATCH, seg_depth),
        in_specs=[x_spec, mrow_spec, mcol_spec,
                  wspec((1, EMBED)), wspec((1, EMBED)),
                  wspec((EMBED, 3 * EMBED)),
                  wspec((EMBED, EMBED)), wspec((1, EMBED)),
                  wspec((1, EMBED)), wspec((1, EMBED)),
                  wspec((EMBED, MLP_HIDDEN)), wspec((1, MLP_HIDDEN)),
                  wspec((MLP_HIDDEN, EMBED)), wspec((1, EMBED))],
        out_specs=(x_spec, mrow_spec),
        compiler_params=pltpu.CompilerParams(
            dimension_semantics=("parallel", "arbitrary")),
    )


_head_call = pl.pallas_call(
    _head_kernel,
    out_shape=jax.ShapeDtypeStruct((BATCH, NUM_CLASSES), jnp.float32),
    grid=(1,),
    in_specs=[pl.BlockSpec((BATCH, EMBED), lambda i: (0, 0)),
              pl.BlockSpec((1, EMBED), lambda i: (0, 0)),
              pl.BlockSpec((1, EMBED), lambda i: (0, 0)),
              pl.BlockSpec((EMBED, NUM_CLASSES), lambda i: (0, 0)),
              pl.BlockSpec((1, NUM_CLASSES), lambda i: (0, 0))],
    out_specs=pl.BlockSpec((BATCH, NUM_CLASSES), lambda i: (0, 0)),
)


# ------------------------------------ glue ops ------------------------------------
def _im2col_nhwc(x, stride, padding):
    patches = jax.lax.conv_general_dilated_patches(
        x, filter_shape=(3, 3), window_strides=(stride, stride),
        padding=((padding, padding), (padding, padding)),
        dimension_numbers=("NHWC", "HWIO", "NHWC"))
    Bn, Ho, Wo, CKK = patches.shape
    return patches.reshape(Bn * Ho * Wo, CKK).astype(jnp.bfloat16), Bn, Ho, Wo, CKK


def conv2d_nhwc(x, w, b, stride=2, padding=1, act="relu"):
    """NHWC 3x3 conv as im2col (glue) + Pallas matmul; stays channel-last throughout."""
    pm, Bn, Ho, Wo, CKK = _im2col_nhwc(x, stride, padding)
    Cout = w.shape[1]
    y = _linear_call(Bn * Ho * Wo, CKK, Cout, act)(pm, w, b)
    return y.reshape(Bn, Ho, Wo, Cout)


# ------------------------------------ model ------------------------------------
@jax.jit
def apvit_forward(params, x_nchw):
    x = jnp.transpose(x_nchw, (0, 2, 3, 1))        # NCHW -> NHWC once, stay NHWC afterwards
    bb = params["backbone"]

    # TODO(synk): the full IR-50 (IRSE) residual stack is not reproduced (its definition was
    # not provided); this small NHWC conv stem emits the stage-2 feature map `mid2`.
    h = conv2d_nhwc(x, bb["c1_w"], bb["c1_b"])     # (B, 16, 16, 64)
    h = conv2d_nhwc(h, bb["c2_w"], bb["c2_b"])     # (B,  8,  8, 128)

    # last stem conv fused with the SUM_ABS_1 tokenization score
    pm, _, _, _, _ = _im2col_nhwc(h, 2, 1)                        # (B*16, 1152)
    feat_flat, score_flat = _conv3_call(pm, bb["c3_w"], bb["c3_b"])
    feat = feat_flat.reshape(BATCH, PATCH_NUM, FEAT_CH)           # (B, 16, 128) tokens
    scores0 = score_flat.reshape(BATCH, PATCH_NUM)                # (B, 16)

    # CNN attention pooling (attn_method='SUM_ABS_1', keep_num=CNN_KEEP)  [data-dependent glue]
    idx = jnp.sort(jax.lax.top_k(scores0, CNN_KEEP)[1], axis=-1)  # keep original token order
    kept = jnp.take_along_axis(feat, idx[..., None], axis=1).astype(jnp.bfloat16)

    p = params["vit"]
    posg = jnp.take(p["pos_embed"][1:], idx, axis=0)              # gathered positional embed
    cls0 = p["cls_token"] + p["pos_embed"][:1]
    xseq = _embed_call(kept, posg, cls0, p["proj_w"], p["proj_b"])   # (B, S_PAD, EMBED)

    # fixed padded sequence + validity mask (dropped/pad tokens are masked, not removed)
    mask = jnp.concatenate(
        [jnp.ones((BATCH, 1 + CNN_KEEP), jnp.float32),
         jnp.zeros((BATCH, S_PAD - 1 - CNN_KEEP), jnp.float32)], axis=1)
    n_valid = CNN_KEEP

    blocks = p["blocks"]
    for (seg_start, seg_depth) in _SEGMENTS:
        bp = {k: v[seg_start:seg_start + seg_depth] for k, v in blocks.items()}
        xseq, recv3 = _block_seg_call(seg_depth)(
            xseq, mask[:, None, :], mask[:, :, None],
            bp["ln1_g"], bp["ln1_b"], bp["w_qkv"], bp["w_proj"], bp["b_proj"],
            bp["ln2_g"], bp["ln2_b"], bp["w_fc1"], bp["b_fc1"], bp["w_fc2"], bp["b_fc2"])

        d_last = seg_start + seg_depth - 1
        if KEEP_RATES[d_last] < 1.0 and d_last < DEPTH - 1:
            # ViT token pooling ('SUM', exclude_first=True): rank non-cls valid tokens by
            # attention mass received in the segment's last block, keep top
            # ceil(keep_rate * n_valid); cls always kept.  (Skipped after the final block —
            # its mask is never consumed, so the logits are unchanged.)
            recv = recv3[:, 0, :]
            n_keep = int(math.ceil(KEEP_RATES[d_last] * n_valid))
            cand = jnp.where(mask[:, 1:] > 0.5, recv[:, 1:], -jnp.inf)
            kidx = jax.lax.top_k(cand, n_keep)[1]
            tok_mask = jnp.zeros((BATCH, S_PAD - 1), jnp.float32).at[
                jnp.arange(BATCH)[:, None], kidx].set(1.0)
            mask = jnp.concatenate([jnp.ones((BATCH, 1), jnp.float32), tok_mask], axis=1)
            n_valid = n_keep

    head = params["clshead"]
    return _head_call(xseq[:, 0, :], p["lnf_g"], p["lnf_b"], head["w"], head["b"])


# ------------------------------------ params ------------------------------------
def init_params(key):
    def nrm(k, shape, scale=0.02, dtype=jnp.float32):
        return (scale * jax.random.normal(k, shape, jnp.float32)).astype(dtype)

    bf16 = jnp.bfloat16
    keys = iter(jax.random.split(key, 64))

    backbone = dict(
        c1_w=nrm(next(keys), (9 * 3, STEM1), 0.1, bf16), c1_b=jnp.zeros((1, STEM1), jnp.float32),
        c2_w=nrm(next(keys), (9 * STEM1, STEM2), 0.1, bf16), c2_b=jnp.zeros((1, STEM2), jnp.float32),
        c3_w=nrm(next(keys), (9 * STEM2, FEAT_CH), 0.1, bf16), c3_b=jnp.zeros((1, FEAT_CH), jnp.float32),
    )
    # Block weights stacked along a leading depth axis (streamed per-depth by the fused kernel).
    blocks = dict(
        ln1_g=jnp.ones((DEPTH, 1, EMBED), jnp.float32),
        ln1_b=jnp.zeros((DEPTH, 1, EMBED), jnp.float32),
        w_qkv=nrm(next(keys), (DEPTH, EMBED, 3 * EMBED), 0.02, bf16),      # qkv_bias=False
        w_proj=nrm(next(keys), (DEPTH, EMBED, EMBED), 0.02, bf16),
        b_proj=jnp.zeros((DEPTH, 1, EMBED), jnp.float32),
        ln2_g=jnp.ones((DEPTH, 1, EMBED), jnp.float32),
        ln2_b=jnp.zeros((DEPTH, 1, EMBED), jnp.float32),
        w_fc1=nrm(next(keys), (DEPTH, EMBED, MLP_HIDDEN), 0.02, bf16),
        b_fc1=jnp.zeros((DEPTH, 1, MLP_HIDDEN), jnp.float32),
        w_fc2=nrm(next(keys), (DEPTH, MLP_HIDDEN, EMBED), 0.02, bf16),
        b_fc2=jnp.zeros((DEPTH, 1, EMBED), jnp.float32),
    )
    vit = dict(
        proj_w=nrm(next(keys), (FEAT_CH, EMBED), 0.02, bf16),
        proj_b=jnp.zeros((1, EMBED), jnp.float32),
        cls_token=nrm(next(keys), (1, EMBED)),
        pos_embed=nrm(next(keys), (PATCH_NUM + 1, EMBED)),
        blocks=blocks,
        lnf_g=jnp.ones((1, EMBED), jnp.float32), lnf_b=jnp.zeros((1, EMBED), jnp.float32),
    )
    clshead = dict(w=nrm(next(keys), (EMBED, NUM_CLASSES), 0.02, bf16),
                   b=jnp.zeros((1, NUM_CLASSES), jnp.float32))
    return dict(backbone=backbone, vit=vit, clshead=clshead)


if __name__ == "__main__":
    x = jax.random.normal(jax.random.PRNGKey(0), (BATCH, 3, IMG, IMG), jnp.float32)
    params = init_params(jax.random.PRNGKey(1))
    logits = apvit_forward(params, x)
    logits = jax.block_until_ready(logits)
    assert logits.shape == (BATCH, NUM_CLASSES) and logits.dtype == jnp.float32
    assert bool(jnp.all(jnp.isfinite(logits)))
    print("KERNEL_OK")
</pallas_src>

<mosaic_0001>
module attributes {stable_mosaic.version = 11 : i64} {
  func.func @_matmul_kernel(%arg0: i32, %arg1: memref<128x27xbf16, #tpu.memory_space<vmem>>, %arg2: memref<27x64xbf16, #tpu.memory_space<vmem>>, %arg3: memref<1x64xf32, #tpu.memory_space<vmem>>, %arg4: memref<128x64xf32, #tpu.memory_space<vmem>>) attributes {dimension_semantics = [#tpu.dimension_semantics<parallel>], iteration_bounds = array<i64: 4>, scalar_prefetch = 0 : i64, scratch_operands = 0 : i64, tpu.core_type = #tpu.core_type<tc>, window_params = [{transform_indices = @transform_0, window_bounds = array<i64: 128, 27>}, {pipeline_mode = #tpu.pipeline_mode<synchronous>, transform_indices = @transform_1, window_bounds = array<i64: 27, 64>}, {pipeline_mode = #tpu.pipeline_mode<synchronous>, transform_indices = @transform_2, window_bounds = array<i64: 1, 64>}, {transform_indices = @transform_3, window_bounds = array<i64: 128, 64>}]} {
    %c0 = arith.constant 0 : index
    %c0_0 = arith.constant 0 : index
    %0 = vector.load %arg1[%c0, %c0_0] : memref<128x27xbf16, #tpu.memory_space<vmem>>, vector<128x27xbf16>
    %c0_1 = arith.constant 0 : index
    %c0_2 = arith.constant 0 : index
    %1 = vector.load %arg2[%c0_1, %c0_2] : memref<27x64xbf16, #tpu.memory_space<vmem>>, vector<27x64xbf16>
    %cst = arith.constant dense<0.000000e+00> : vector<128x64xf32>
    %2 = tpu.matmul %0, %1, %cst {dimension_numbers = #tpu.dot_dimension_numbers<[1], [0], [0], [1], [0, 0, 1, 1], [], []>} : vector<128x27xbf16>, vector<27x64xbf16>, vector<128x64xf32> -> vector<128x64xf32>
    %c0_3 = arith.constant 0 : index
    %c0_4 = arith.constant 0 : index
    %3 = vector.load %arg3[%c0_3, %c0_4] : memref<1x64xf32, #tpu.memory_space<vmem>>, vector<1x64xf32>
    %4 = vector.broadcast %3 : vector<1x64xf32> to vector<128x64xf32>
    %5 = arith.addf %2, %4 : vector<128x64xf32>
    %cst_5 = arith.constant 0.000000e+00 : f32
    %6 = vector.broadcast %cst_5 : f32 to vector<128x64xf32>
    %7 = arith.maximumf %5, %6 : vector<128x64xf32>
    %c0_6 = arith.constant 0 : index
    %c0_7 = arith.constant 0 : index
    %8 = vector.load %arg4[%c0_6, %c0_7] : memref<128x64xf32, #tpu.memory_space<vmem>>, vector<128x64xf32>
    tpu.vector_store %arg4[%c0_6, %c0_7], %7 {strides = array<i32>} : memref<128x64xf32, #tpu.memory_space<vmem>>, vector<128x64xf32>,
    return
  }
  func.func @transform_0(%arg0: i32) -> (i32, i32) {
    %c0_i32 = arith.constant 0 : i32
    %c0_i32_0 = arith.constant 0 : i32
    return %arg0, %c0_i32 : i32, i32
  }
  func.func @transform_1(%arg0: i32) -> (i32, i32) {
    %c0_i32 = arith.constant 0 : i32
    %c0_i32_0 = arith.constant 0 : i32
    %c0_i32_1 = arith.constant 0 : i32
    return %c0_i32, %c0_i32_0 : i32, i32
  }
  func.func @transform_2(%arg0: i32) -> (i32, i32) {
    %c0_i32 = arith.constant 0 : i32
    %c0_i32_0 = arith.constant 0 : i32
    %c0_i32_1 = arith.constant 0 : i32
    return %c0_i32, %c0_i32_0 : i32, i32
  }
  func.func @transform_3(%arg0: i32) -> (i32, i32) {
    %c0_i32 = arith.constant 0 : i32
    %c0_i32_0 = arith.constant 0 : i32
    return %arg0, %c0_i32 : i32, i32
  }
}

module attributes {stable_mosaic.version = 11 : i64} {
  func.func @_matmul_kernel(%arg0: i32, %arg1: memref<128x576xbf16, #tpu.memory_space<vmem>>, %arg2: memref<576x128xbf16, #tpu.memory_space<vmem>>, %arg3: memref<1x128xf32, #tpu.memory_space<vmem>>, %arg4: memref<128x128xf32, #tpu.memory_space<vmem>>) attributes {dimension_semantics = [#tpu.dimension_semantics<parallel>], iteration_bounds = array<i64: 1>, scalar_prefetch = 0 : i64, scratch_operands = 0 : i64, tpu.core_type = #tpu.core_type<tc>, window_params = [{transform_indices = @transform_0, window_bounds = array<i64: 128, 576>}, {pipeline_mode = #tpu.pipeline_mode<synchronous>, transform_indices = @transform_1, window_bounds = array<i64: 576, 128>}, {pipeline_mode = #tpu.pipeline_mode<synchronous>, transform_indices = @transform_2, window_bounds = array<i64: 1, 128>}, {transform_indices = @transform_3, window_bounds = array<i64: 128, 128>}]} {
    %c0 = arith.constant 0 : index
    %c0_0 = arith.constant 0 : index
    %0 = vector.load %arg1[%c0, %c0_0] : memref<128x576xbf16, #tpu.memory_space<vmem>>, vector<128x576xbf16>
    %c0_1 = arith.constant 0 : index
    %c0_2 = arith.constant 0 : index
    %1 = vector.load %arg2[%c0_1, %c0_2] : memref<576x128xbf16, #tpu.memory_space<vmem>>, vector<576x128xbf16>
    %cst = arith.constant dense<0.000000e+00> : vector<128x128xf32>
    %2 = tpu.matmul %0, %1, %cst {dimension_numbers = #tpu.dot_dimension_numbers<[1], [0], [0], [1], [0, 0, 1, 1], [], []>} : vector<128x576xbf16>, vector<576x128xbf16>, vector<128x128xf32> -> vector<128x128xf32>
    %c0_3 = arith.constant 0 : index
    %c0_4 = arith.constant 0 : index
    %3 = vector.load %arg3[%c0_3, %c0_4] : memref<1x128xf32, #tpu.memory_space<vmem>>, vector<1x128xf32>
    %4 = vector.broadcast %3 : vector<1x128xf32> to vector<128x128xf32>
    %5 = arith.addf %2, %4 : vector<128x128xf32>
    %cst_5 = arith.constant 0.000000e+00 : f32
    %6 = vector.broadcast %cst_5 : f32 to vector<128x128xf32>
    %7 = arith.maximumf %5, %6 : vector<128x128xf32>
    %c0_6 = arith.constant 0 : index
    %c0_7 = arith.constant 0 : index
    %8 = vector.load %arg4[%c0_6, %c0_7] : memref<128x128xf32, #tpu.memory_space<vmem>>, vector<128x128xf32>
    tpu.vector_store %arg4[%c0_6, %c0_7], %7 {strides = array<i32>} : memref<128x128xf32, #tpu.memory_space<vmem>>, vector<128x128xf32>,
    return
  }
  func.func @transform_0(%arg0: i32) -> (i32, i32) {
    %c0_i32 = arith.constant 0 : i32
    %c0_i32_0 = arith.constant 0 : i32
    return %arg0, %c0_i32 : i32, i32
  }
  func.func @transform_1(%arg0: i32) -> (i32, i32) {
    %c0_i32 = arith.constant 0 : i32
    %c0_i32_0 = arith.constant 0 : i32
    %c0_i32_1 = arith.constant 0 : i32
    return %c0_i32, %c0_i32_0 : i32, i32
  }
  func.func @transform_2(%arg0: i32) -> (i32, i32) {
    %c0_i32 = arith.constant 0 : i32
    %c0_i32_0 = arith.constant 0 : i32
    %c0_i32_1 = arith.constant 0 : i32
    return %c0_i32, %c0_i32_0 : i32, i32
  }
  func.func @transform_3(%arg0: i32) -> (i32, i32) {
    %c0_i32 = arith.constant 0 : i32
    %c0_i32_0 = arith.constant 0 : i32
    return %arg0, %c0_i32 : i32, i32
  }
}

module attributes {stable_mosaic.version = 11 : i64} {
  func.func @_conv_score_kernel(%arg0: i32, %arg1: memref<32x1152xbf16, #tpu.memory_space<vmem>>, %arg2: memref<1152x128xbf16, #tpu.memory_space<vmem>>, %arg3: memref<1x128xf32, #tpu.memory_space<vmem>>, %arg4: memref<32x128xf32, #tpu.memory_space<vmem>>, %arg5: memref<32x1xf32, #tpu.memory_space<vmem>>) attributes {dimension_semantics = [#tpu.dimension_semantics<arbitrary>], iteration_bounds = array<i64: 1>, scalar_prefetch = 0 : i64, scratch_operands = 0 : i64, tpu.core_type = #tpu.core_type<tc>, window_params = [{pipeline_mode = #tpu.pipeline_mode<synchronous>, transform_indices = @transform_0, window_bounds = array<i64: 32, 1152>}, {pipeline_mode = #tpu.pipeline_mode<synchronous>, transform_indices = @transform_1, window_bounds = array<i64: 1152, 128>}, {pipeline_mode = #tpu.pipeline_mode<synchronous>, transform_indices = @transform_2, window_bounds = array<i64: 1, 128>}, {pipeline_mode = #tpu.pipeline_mode<synchronous>, transform_indices = @transform_3, window_bounds = array<i64: 32, 128>}, {pipeline_mode = #tpu.pipeline_mode<synchronous>, transform_indices = @transform_4, window_bounds = array<i64: 32, 1>}]} {
    %c0 = arith.constant 0 : index
    %c0_0 = arith.constant 0 : index
    %0 = vector.load %arg1[%c0, %c0_0] : memref<32x1152xbf16, #tpu.memory_space<vmem>>, vector<32x1152xbf16>
    %c0_1 = arith.constant 0 : index
    %c0_2 = arith.constant 0 : index
    %1 = vector.load %arg2[%c0_1, %c0_2] : memref<1152x128xbf16, #tpu.memory_space<vmem>>, vector<1152x128xbf16>
    %cst = arith.constant dense<0.000000e+00> : vector<32x128xf32>
    %2 = tpu.matmul %0, %1, %cst {dimension_numbers = #tpu.dot_dimension_numbers<[1], [0], [0], [1], [0, 0, 1, 1], [], []>} : vector<32x1152xbf16>, vector<1152x128xbf16>, vector<32x128xf32> -> vector<32x128xf32>
    %c0_3 = arith.constant 0 : index
    %c0_4 = arith.constant 0 : index
    %3 = vector.load %arg3[%c0_3, %c0_4] : memref<1x128xf32, #tpu.memory_space<vmem>>, vector<1x128xf32>
    %4 = vector.broadcast %3 : vector<1x128xf32> to vector<32x128xf32>
    %5 = arith.addf %2, %4 : vector<32x128xf32>
    %cst_5 = arith.constant 0.000000e+00 : f32
    %6 = vector.broadcast %cst_5 : f32 to vector<32x128xf32>
    %7 = arith.maximumf %5, %6 : vector<32x128xf32>
    %c0_6 = arith.constant 0 : index
    %c0_7 = arith.constant 0 : index
    %8 = vector.load %arg4[%c0_6, %c0_7] : memref<32x128xf32, #tpu.memory_space<vmem>>, vector<32x128xf32>
    tpu.vector_store %arg4[%c0_6, %c0_7], %7 {strides = array<i32>} : memref<32x128xf32, #tpu.memory_space<vmem>>, vector<32x128xf32>,
    %9 = math.absf %7 : vector<32x128xf32>
    %cst_8 = arith.constant dense<0.000000e+00> : vector<32xf32>
    %10 = vector.multi_reduction <add>, %9, %cst_8 [1] : vector<32x128xf32> to vector<32xf32>
    %11 = vector.shape_cast %10 : vector<32xf32> to vector<32x1xf32>
    %c0_9 = arith.constant 0 : index
    %c0_10 = arith.constant 0 : index
    %12 = vector.load %arg5[%c0_9, %c0_10] : memref<32x1xf32, #tpu.memory_space<vmem>>, vector<32x1xf32>
    tpu.vector_store %arg5[%c0_9, %c0_10], %11 {strides = array<i32>} : memref<32x1xf32, #tpu.memory_space<vmem>>, vector<32x1xf32>,
    return
  }
  func.func @transform_0(%arg0: i32) -> (i32, i32) {
    %c0_i32 = arith.constant 0 : i32
    %c0_i32_0 = arith.constant 0 : i32
    %c0_i32_1 = arith.constant 0 : i32
    return %c0_i32, %c0_i32_0 : i32, i32
  }
  func.func @transform_1(%arg0: i32) -> (i32, i32) {
    %c0_i32 = arith.constant 0 : i32
    %c0_i32_0 = arith.constant 0 : i32
    %c0_i32_1 = arith.constant 0 : i32
    return %c0_i32, %c0_i32_0 : i32, i32
  }
  func.func @transform_2(%arg0: i32) -> (i32, i32) {
    %c0_i32 = arith.constant 0 : i32
    %c0_i32_0 = arith.constant 0 : i32
    %c0_i32_1 = arith.constant 0 : i32
    return %c0_i32, %c0_i32_0 : i32, i32
  }
  func.func @transform_3(%arg0: i32) -> (i32, i32) {
    %c0_i32 = arith.constant 0 : i32
    %c0_i32_0 = arith.constant 0 : i32
    %c0_i32_1 = arith.constant 0 : i32
    return %c0_i32, %c0_i32_0 : i32, i32
  }
  func.func @transform_4(%arg0: i32) -> (i32, i32) {
    %c0_i32 = arith.constant 0 : i32
    %c0_i32_0 = arith.constant 0 : i32
    %c0_i32_1 = arith.constant 0 : i32
    return %c0_i32, %c0_i32_0 : i32, i32
  }
}

module attributes {stable_mosaic.version = 11 : i64} {
  func.func @_embed_kernel(%arg0: i32, %arg1: memref<1x12x128xbf16, #tpu.memory_space<vmem>>, %arg2: memref<1x12x128xf32, #tpu.memory_space<vmem>>, %arg3: memref<1x128xf32, #tpu.memory_space<vmem>>, %arg4: memref<128x128xbf16, #tpu.memory_space<vmem>>, %arg5: memref<1x128xf32, #tpu.memory_space<vmem>>, %arg6: memref<1x16x128xf32, #tpu.memory_space<vmem>>) attributes {dimension_semantics = [#tpu.dimension_semantics<parallel>], iteration_bounds = array<i64: 2>, scalar_prefetch = 0 : i64, scratch_operands = 0 : i64, tpu.core_type = #tpu.core_type<tc>, window_params = [{transform_indices = @transform_0, window_bounds = array<i64: 1, 12, 128>}, {transform_indices = @transform_1, window_bounds = array<i64: 1, 12, 128>}, {pipeline_mode = #tpu.pipeline_mode<synchronous>, transform_indices = @transform_2, window_bounds = array<i64: 1, 128>}, {pipeline_mode = #tpu.pipeline_mode<synchronous>, transform_indices = @transform_3, window_bounds = array<i64: 128, 128>}, {pipeline_mode = #tpu.pipeline_mode<synchronous>, transform_indices = @transform_4, window_bounds = array<i64: 1, 128>}, {transform_indices = @transform_5, window_bounds = array<i64: 1, 16, 128>}]} {
    %c0 = arith.constant 0 : index
    %c0_0 = arith.constant 0 : index
    %c0_1 = arith.constant 0 : index
    %0 = vector.load %arg1[%c0, %c0_0, %c0_1] : memref<1x12x128xbf16, #tpu.memory_space<vmem>>, vector<1x12x128xbf16>
    %1 = vector.shape_cast %0 : vector<1x12x128xbf16> to vector<12x128xbf16>
    %c0_2 = arith.constant 0 : index
    %c0_3 = arith.constant 0 : index
    %2 = vector.load %arg4[%c0_2, %c0_3] : memref<128x128xbf16, #tpu.memory_space<vmem>>, vector<128x128xbf16>
    %cst = arith.constant dense<0.000000e+00> : vector<12x128xf32>
    %3 = tpu.matmul %1, %2, %cst {dimension_numbers = #tpu.dot_dimension_numbers<[1], [0], [0], [1], [0, 0, 1, 1], [], []>} : vector<12x128xbf16>, vector<128x128xbf16>, vector<12x128xf32> -> vector<12x128xf32>
    %c0_4 = arith.constant 0 : index
    %c0_5 = arith.constant 0 : index
    %4 = vector.load %arg5[%c0_4, %c0_5] : memref<1x128xf32, #tpu.memory_space<vmem>>, vector<1x128xf32>
    %5 = vector.broadcast %4 : vector<1x128xf32> to vector<12x128xf32>
    %6 = arith.addf %3, %5 : vector<12x128xf32>
    %c0_6 = arith.constant 0 : index
    %c0_7 = arith.constant 0 : index
    %c0_8 = arith.constant 0 : index
    %7 = vector.load %arg2[%c0_6, %c0_7, %c0_8] : memref<1x12x128xf32, #tpu.memory_space<vmem>>, vector<1x12x128xf32>
    %8 = vector.shape_cast %7 : vector<1x12x128xf32> to vector<12x128xf32>
    %9 = arith.addf %6, %8 : vector<12x128xf32>
    %c0_9 = arith.constant 0 : index
    %c0_10 = arith.constant 0 : index
    %10 = vector.load %arg3[%c0_9, %c0_10] : memref<1x128xf32, #tpu.memory_space<vmem>>, vector<1x128xf32>
    %c0_11 = arith.constant 0 : index
    %c0_12 = arith.constant 0 : index
    %c0_13 = arith.constant 0 : index
    %11 = vector.load %arg6[%c0_11, %c0_12, %c0_13] : memref<1x16x128xf32, #tpu.memory_space<vmem>>, vector<1x1x128xf32>
    %12 = vector.shape_cast %11 : vector<1x1x128xf32> to vector<1x128xf32>
    %13 = vector.shape_cast %10 : vector<1x128xf32> to vector<1x1x128xf32>
    tpu.vector_store %arg6[%c0_11, %c0_12, %c0_13], %13 {strides = array<i32>} : memref<1x16x128xf32, #tpu.memory_space<vmem>>, vector<1x1x128xf32>,
    %c0_14 = arith.constant 0 : index
    %c1 = arith.constant 1 : index
    %c0_15 = arith.constant 0 : index
    %14 = vector.load %arg6[%c0_14, %c1, %c0_15] : memref<1x16x128xf32, #tpu.memory_space<vmem>>, vector<1x12x128xf32>
    %15 = vector.shape_cast %14 : vector<1x12x128xf32> to vector<12x128xf32>
    %16 = vector.shape_cast %9 : vector<12x128xf32> to vector<1x12x128xf32>
    tpu.vector_store %arg6[%c0_14, %c1, %c0_15], %16 {strides = array<i32>} : memref<1x16x128xf32, #tpu.memory_space<vmem>>, vector<1x12x128xf32>,
    %cst_16 = arith.constant 0.000000e+00 : f32
    %17 = vector.broadcast %cst_16 : f32 to vector<3x128xf32>
    %c0_17 = arith.constant 0 : index
    %c13 = arith.constant 13 : index
    %c0_18 = arith.constant 0 : index
    %18 = vector.load %arg6[%c0_17, %c13, %c0_18] : memref<1x16x128xf32, #tpu.memory_space<vmem>>, vector<1x3x128xf32>
    %19 = vector.shape_cast %18 : vector<1x3x128xf32> to vector<3x128xf32>
    %20 = vector.shape_cast %17 : vector<3x128xf32> to vector<1x3x128xf32>
    tpu.vector_store %arg6[%c0_17, %c13, %c0_18], %20 {strides = array<i32>} : memref<1x16x128xf32, #tpu.memory_space<vmem>>, vector<1x3x128xf32>,
    return
  }
  func.func @transform_0(%arg0: i32) -> (i32, i32, i32) {
    %c0_i32 = arith.constant 0 : i32
    %c0_i32_0 = arith.constant 0 : i32
    %c0_i32_1 = arith.constant 0 : i32
    return %arg0, %c0_i32, %c0_i32_0 : i32, i32, i32
  }
  func.func @transform_1(%arg0: i32) -> (i32, i32, i32) {
    %c0_i32 = arith.constant 0 : i32
    %c0_i32_0 = arith.constant 0 : i32
    %c0_i32_1 = arith.constant 0 : i32
    return %arg0, %c0_i32, %c0_i32_0 : i32, i32, i32
  }
  func.func @transform_2(%arg0: i32) -> (i32, i32) {
    %c0_i32 = arith.constant 0 : i32
    %c0_i32_0 = arith.constant 0 : i32
    %c0_i32_1 = arith.constant 0 : i32
    return %c0_i32, %c0_i32_0 : i32, i32
  }
  func.func @transform_3(%arg0: i32) -> (i32, i32) {
    %c0_i32 = arith.constant 0 : i32
    %c0_i32_0 = arith.constant 0 : i32
    %c0_i32_1 = arith.constant 0 : i32
    return %c0_i32, %c0_i32_0 : i32, i32
  }
  func.func @transform_4(%arg0: i32) -> (i32, i32) {
    %c0_i32 = arith.constant 0 : i32
    %c0_i32_0 = arith.constant 0 : i32
    %c0_i32_1 = arith.constant 0 : i32
    return %c0_i32, %c0_i32_0 : i32, i32
  }
  func.func @transform_5(%arg0: i32) -> (i32, i32, i32) {
    %c0_i32 = arith.constant 0 : i32
    %c0_i32_0 = arith.constant 0 : i32
    %c0_i32_1 = arith.constant 0 : i32
    return %arg0, %c0_i32, %c0_i32_0 : i32, i32, i32
  }
}

module attributes {stable_mosaic.version = 11 : i64} {
  func.func @_block_stack_kernel(%arg0: i32, %arg1: i32, %arg2: memref<1x16x128xf32, #tpu.memory_space<vmem>>, %arg3: memref<1x1x16xf32, #tpu.memory_space<vmem>>, %arg4: memref<1x16x1xf32, #tpu.memory_space<vmem>>, %arg5: memref<1x1x128xf32, #tpu.memory_space<vmem>>, %arg6: memref<1x1x128xf32, #tpu.memory_space<vmem>>, %arg7: memref<1x128x384xbf16, #tpu.memory_space<vmem>>, %arg8: memref<1x128x128xbf16, #tpu.memory_space<vmem>>, %arg9: memref<1x1x128xf32, #tpu.memory_space<vmem>>, %arg10: memref<1x1x128xf32, #tpu.memory_space<vmem>>, %arg11: memref<1x1x128xf32, #tpu.memory_space<vmem>>, %arg12: memref<1x128x384xbf16, #tpu.memory_space<vmem>>, %arg13: memref<1x1x384xf32, #tpu.memory_space<vmem>>, %arg14: memref<1x384x128xbf16, #tpu.memory_space<vmem>>, %arg15: memref<1x1x128xf32, #tpu.memory_space<vmem>>, %arg16: memref<1x16x128xf32, #tpu.memory_space<vmem>>, %arg17: memref<1x1x16xf32, #tpu.memory_space<vmem>>) attributes {dimension_semantics = [#tpu.dimension_semantics<parallel>, #tpu.dimension_semantics<arbitrary>], iteration_bounds = array<i64: 2, 5>, scalar_prefetch = 0 : i64, scratch_operands = 0 : i64, tpu.core_type = #tpu.core_type<tc>, window_params = [{transform_indices = @transform_0, window_bounds = array<i64: 1, 16, 128>}, {transform_indices = @transform_1, window_bounds = array<i64: 1, 1, 16>}, {transform_indices = @transform_2, window_bounds = array<i64: 1, 16, 1>}, {transform_indices = @transform_3, window_bounds = array<i64: 1, 1, 128>}, {transform_indices = @transform_4, window_bounds = array<i64: 1, 1, 128>}, {transform_indices = @transform_5, window_bounds = array<i64: 1, 128, 384>}, {transform_indices = @transform_6, window_bounds = array<i64: 1, 128, 128>}, {transform_indices = @transform_7, window_bounds = array<i64: 1, 1, 128>}, {transform_indices = @transform_8, window_bounds = array<i64: 1, 1, 128>}, {transform_indices = @transform_9, window_bounds = array<i64: 1, 1, 128>}, {transform_indices = @transform_10, window_bounds = array<i64: 1, 128, 384>}, {transform_indices = @transform_11, window_bounds = array<i64: 1, 1, 384>}, {transform_indices = @transform_12, window_bounds = array<i64: 1, 384, 128>}, {transform_indices = @transform_13, window_bounds = array<i64: 1, 1, 128>}, {transform_indices = @transform_14, window_bounds = array<i64: 1, 16, 128>}, {transform_indices = @transform_15, window_bounds = array<i64: 1, 1, 16>}]} {
    %c0_i32 = arith.constant 0 : i32
    %0 = arith.cmpi eq, %arg1, %c0_i32 : i32
    %1 = arith.extui %0 : i1 to i32
    %c0_i32_0 = arith.constant 0 : i32
    %2 = arith.cmpi ne, %1, %c0_i32_0 : i32
    scf.if %2 {
      %c0_102 = arith.constant 0 : index
      %c0_103 = arith.constant 0 : index
      %c0_104 = arith.constant 0 : index
      %236 = vector.load %arg2[%c0_102, %c0_103, %c0_104] : memref<1x16x128xf32, #tpu.memory_space<vmem>>, vector<1x16x128xf32>
      %237 = vector.shape_cast %236 : vector<1x16x128xf32> to vector<16x128xf32>
      %c0_105 = arith.constant 0 : index
      %c0_106 = arith.constant 0 : index
      %c0_107 = arith.constant 0 : index
      %238 = vector.load %arg16[%c0_105, %c0_106, %c0_107] : memref<1x16x128xf32, #tpu.memory_space<vmem>>, vector<1x16x128xf32>
      %239 = vector.shape_cast %238 : vector<1x16x128xf32> to vector<16x128xf32>
      %240 = vector.shape_cast %237 : vector<16x128xf32> to vector<1x16x128xf32>
      tpu.vector_store %arg16[%c0_105, %c0_106, %c0_107], %240 {strides = array<i32>} : memref<1x16x128xf32, #tpu.memory_space<vmem>>, vector<1x16x128xf32>,
    } else {
    }
    %c0 = arith.constant 0 : index
    %c0_1 = arith.constant 0 : index
    %c0_2 = arith.constant 0 : index
    %3 = vector.load %arg16[%c0, %c0_1, %c0_2] : memref<1x16x128xf32, #tpu.memory_space<vmem>>, vector<1x16x128xf32>
    %4 = vector.shape_cast %3 : vector<1x16x128xf32> to vector<16x128xf32>
    %c0_3 = arith.constant 0 : index
    %c0_4 = arith.constant 0 : index
    %c0_5 = arith.constant 0 : index
    %5 = vector.load %arg3[%c0_3, %c0_4, %c0_5] : memref<1x1x16xf32, #tpu.memory_space<vmem>>, vector<1x1x16xf32>
    %6 = vector.shape_cast %5 : vector<1x1x16xf32> to vector<1x16xf32>
    %c0_6 = arith.constant 0 : index
    %c0_7 = arith.constant 0 : index
    %c0_8 = arith.constant 0 : index
    %7 = vector.load %arg4[%c0_6, %c0_7, %c0_8] : memref<1x16x1xf32, #tpu.memory_space<vmem>>, vector<1x16x1xf32>
    %8 = vector.shape_cast %7 : vector<1x16x1xf32> to vector<16x1xf32>
    %cst = arith.constant 1.000000e+00 : f32
    %9 = vector.broadcast %cst : f32 to vector<1x16xf32>
    %10 = arith.subf %6, %9 : vector<1x16xf32>
    %cst_9 = arith.constant 1.000000e+09 : f32
    %11 = vector.broadcast %cst_9 : f32 to vector<1x16xf32>
    %12 = arith.mulf %10, %11 : vector<1x16xf32>
    %c0_10 = arith.constant 0 : index
    %c0_11 = arith.constant 0 : index
    %c0_12 = arith.constant 0 : index
    %13 = vector.load %arg5[%c0_10, %c0_11, %c0_12] : memref<1x1x128xf32, #tpu.memory_space<vmem>>, vector<1x1x128xf32>
    %14 = vector.shape_cast %13 : vector<1x1x128xf32> to vector<1x128xf32>
    %c0_13 = arith.constant 0 : index
    %c0_14 = arith.constant 0 : index
    %c0_15 = arith.constant 0 : index
    %15 = vector.load %arg6[%c0_13, %c0_14, %c0_15] : memref<1x1x128xf32, #tpu.memory_space<vmem>>, vector<1x1x128xf32>
    %16 = vector.shape_cast %15 : vector<1x1x128xf32> to vector<1x128xf32>
    %cst_16 = arith.constant dense<0.000000e+00> : vector<16xf32>
    %17 = vector.multi_reduction <add>, %4, %cst_16 [1] : vector<16x128xf32> to vector<16xf32>
    %18 = vector.shape_cast %17 : vector<16xf32> to vector<16x1xf32>
    %cst_17 = arith.constant 1.280000e+02 : f32
    %19 = vector.broadcast %cst_17 : f32 to vector<16x1xf32>
    %20 = arith.divf %18, %19 : vector<16x1xf32>
    %21 = vector.broadcast %20 : vector<16x1xf32> to vector<16x128xf32>
    %22 = arith.subf %4, %21 : vector<16x128xf32>
    %23 = arith.mulf %22, %22 : vector<16x128xf32>
    %cst_18 = arith.constant dense<0.000000e+00> : vector<16xf32>
    %24 = vector.multi_reduction <add>, %23, %cst_18 [1] : vector<16x128xf32> to vector<16xf32>
    %25 = vector.shape_cast %24 : vector<16xf32> to vector<16x1xf32>
    %cst_19 = arith.constant 1.280000e+02 : f32
    %26 = vector.broadcast %cst_19 : f32 to vector<16x1xf32>
    %27 = arith.divf %25, %26 : vector<16x1xf32>
    %cst_20 = arith.constant 9.99999997E-7 : f32
    %28 = vector.broadcast %cst_20 : f32 to vector<16x1xf32>
    %29 = arith.addf %27, %28 : vector<16x1xf32>
    %30 = math.rsqrt %29 : vector<16x1xf32>
    %31 = vector.broadcast %30 : vector<16x1xf32> to vector<16x128xf32>
    %32 = arith.mulf %22, %31 : vector<16x128xf32>
    %33 = vector.broadcast %14 : vector<1x128xf32> to vector<16x128xf32>
    %34 = arith.mulf %32, %33 : vector<16x128xf32>
    %35 = vector.broadcast %16 : vector<1x128xf32> to vector<16x128xf32>
    %36 = arith.addf %34, %35 : vector<16x128xf32>
    %37 = arith.truncf %36 : vector<16x128xf32> to vector<16x128xbf16>
    %c0_21 = arith.constant 0 : index
    %c0_22 = arith.constant 0 : index
    %c0_23 = arith.constant 0 : index
    %38 = vector.load %arg7[%c0_21, %c0_22, %c0_23] : memref<1x128x384xbf16, #tpu.memory_space<vmem>>, vector<1x128x384xbf16>
    %39 = vector.shape_cast %38 : vector<1x128x384xbf16> to vector<128x384xbf16>
    %cst_24 = arith.constant dense<0.000000e+00> : vector<16x384xf32>
    %40 = tpu.matmul %37, %39, %cst_24 {dimension_numbers = #tpu.dot_dimension_numbers<[1], [0], [0], [1], [0, 0, 1, 1], [], []>} : vector<16x128xbf16>, vector<128x384xbf16>, vector<16x384xf32> -> vector<16x384xf32>
    %cst_25 = arith.constant 0.000000e+00 : f32
    %41 = vector.broadcast %cst_25 : f32 to vector<16x128xf32>
    %cst_26 = arith.constant 0.000000e+00 : f32
    %42 = vector.broadcast %cst_26 : f32 to vector<1x16xf32>
    %43 = vector.extract_strided_slice %40 {offsets = [0, 0], sizes = [16, 32], strides = [1, 1]} : vector<16x384xf32> to vector<16x32xf32>
    %44 = arith.truncf %43 : vector<16x32xf32> to vector<16x32xbf16>
    %45 = vector.extract_strided_slice %40 {offsets = [0, 128], sizes = [16, 32], strides = [1, 1]} : vector<16x384xf32> to vector<16x32xf32>
    %46 = arith.truncf %45 : vector<16x32xf32> to vector<16x32xbf16>
    %47 = vector.extract_strided_slice %40 {offsets = [0, 256], sizes = [16, 32], strides = [1, 1]} : vector<16x384xf32> to vector<16x32xf32>
    %48 = arith.truncf %47 : vector<16x32xf32> to vector<16x32xbf16>
    %cst_27 = arith.constant dense<0.000000e+00> : vector<16x16xf32>
    %49 = tpu.matmul %44, %46, %cst_27 {dimension_numbers = #tpu.dot_dimension_numbers<[1], [1], [0], [0], [0, 0, 1, 0], [], []>} : vector<16x32xbf16>, vector<16x32xbf16>, vector<16x16xf32> -> vector<16x16xf32>
    %cst_28 = arith.constant 0.176776692 : f32
    %50 = vector.broadcast %cst_28 : f32 to vector<16x16xf32>
    %51 = arith.mulf %49, %50 : vector<16x16xf32>
    %52 = vector.broadcast %12 : vector<1x16xf32> to vector<16x16xf32>
    %53 = arith.addf %51, %52 : vector<16x16xf32>
    %cst_29 = arith.constant dense<0xFF800000> : vector<16xf32>
    %54 = vector.multi_reduction <maximumf>, %53, %cst_29 [1] : vector<16x16xf32> to vector<16xf32>
    %55 = vector.shape_cast %54 : vector<16xf32> to vector<16x1xf32>
    %56 = vector.broadcast %55 : vector<16x1xf32> to vector<16x16xf32>
    %57 = arith.subf %53, %56 : vector<16x16xf32>
    %58 = math.exp %57 : vector<16x16xf32>
    %cst_30 = arith.constant dense<0.000000e+00> : vector<16xf32>
    %59 = vector.multi_reduction <add>, %58, %cst_30 [1] : vector<16x16xf32> to vector<16xf32>
    %60 = vector.shape_cast %59 : vector<16xf32> to vector<16x1xf32>
    %61 = vector.broadcast %60 : vector<16x1xf32> to vector<16x16xf32>
    %62 = arith.divf %58, %61 : vector<16x16xf32>
    %63 = vector.broadcast %8 : vector<16x1xf32> to vector<16x16xf32>
    %64 = arith.mulf %62, %63 : vector<16x16xf32>
    %cst_31 = arith.constant dense<0.000000e+00> : vector<16xf32>
    %65 = vector.multi_reduction <add>, %64, %cst_31 [0] : vector<16x16xf32> to vector<16xf32>
    %66 = vector.shape_cast %65 : vector<16xf32> to vector<1x16xf32>
    %67 = arith.addf %42, %66 : vector<1x16xf32>
    %68 = arith.truncf %62 : vector<16x16xf32> to vector<16x16xbf16>
    %cst_32 = arith.constant dense<0.000000e+00> : vector<16x32xf32>
    %69 = tpu.matmul %68, %48, %cst_32 {dimension_numbers = #tpu.dot_dimension_numbers<[1], [0], [0], [1], [0, 0, 1, 1], [], []>} : vector<16x16xbf16>, vector<16x32xbf16>, vector<16x32xf32> -> vector<16x32xf32>
    %70 = arith.truncf %69 : vector<16x32xf32> to vector<16x32xbf16>
    %c0_33 = arith.constant 0 : index
    %c0_34 = arith.constant 0 : index
    %c0_35 = arith.constant 0 : index
    %71 = vector.load %arg8[%c0_33, %c0_34, %c0_35] : memref<1x128x128xbf16, #tpu.memory_space<vmem>>, vector<1x32x128xbf16>
    %72 = vector.shape_cast %71 : vector<1x32x128xbf16> to vector<32x128xbf16>
    %cst_36 = arith.constant dense<0.000000e+00> : vector<16x128xf32>
    %73 = tpu.matmul %70, %72, %cst_36 {dimension_numbers = #tpu.dot_dimension_numbers<[1], [0], [0], [1], [0, 0, 1, 1], [], []>} : vector<16x32xbf16>, vector<32x128xbf16>, vector<16x128xf32> -> vector<16x128xf32>
    %74 = arith.addf %41, %73 : vector<16x128xf32>
    %75 = vector.extract_strided_slice %40 {offsets = [0, 32], sizes = [16, 32], strides = [1, 1]} : vector<16x384xf32> to vector<16x32xf32>
    %76 = arith.truncf %75 : vector<16x32xf32> to vector<16x32xbf16>
    %77 = vector.extract_strided_slice %40 {offsets = [0, 160], sizes = [16, 32], strides = [1, 1]} : vector<16x384xf32> to vector<16x32xf32>
    %78 = arith.truncf %77 : vector<16x32xf32> to vector<16x32xbf16>
    %79 = vector.extract_strided_slice %40 {offsets = [0, 288], sizes = [16, 32], strides = [1, 1]} : vector<16x384xf32> to vector<16x32xf32>
    %80 = arith.truncf %79 : vector<16x32xf32> to vector<16x32xbf16>
    %cst_37 = arith.constant dense<0.000000e+00> : vector<16x16xf32>
    %81 = tpu.matmul %76, %78, %cst_37 {dimension_numbers = #tpu.dot_dimension_numbers<[1], [1], [0], [0], [0, 0, 1, 0], [], []>} : vector<16x32xbf16>, vector<16x32xbf16>, vector<16x16xf32> -> vector<16x16xf32>
    %cst_38 = arith.constant 0.176776692 : f32
    %82 = vector.broadcast %cst_38 : f32 to vector<16x16xf32>
    %83 = arith.mulf %81, %82 : vector<16x16xf32>
    %84 = vector.broadcast %12 : vector<1x16xf32> to vector<16x16xf32>
    %85 = arith.addf %83, %84 : vector<16x16xf32>
    %cst_39 = arith.constant dense<0xFF800000> : vector<16xf32>
    %86 = vector.multi_reduction <maximumf>, %85, %cst_39 [1] : vector<16x16xf32> to vector<16xf32>
    %87 = vector.shape_cast %86 : vector<16xf32> to vector<16x1xf32>
    %88 = vector.broadcast %87 : vector<16x1xf32> to vector<16x16xf32>
    %89 = arith.subf %85, %88 : vector<16x16xf32>
    %90 = math.exp %89 : vector<16x16xf32>
    %cst_40 = arith.constant dense<0.000000e+00> : vector<16xf32>
    %91 = vector.multi_reduction <add>, %90, %cst_40 [1] : vector<16x16xf32> to vector<16xf32>
    %92 = vector.shape_cast %91 : vector<16xf32> to vector<16x1xf32>
    %93 = vector.broadcast %92 : vector<16x1xf32> to vector<16x16xf32>
    %94 = arith.divf %90, %93 : vector<16x16xf32>
    %95 = vector.broadcast %8 : vector<16x1xf32> to vector<16x16xf32>
    %96 = arith.mulf %94, %95 : vector<16x16xf32>
    %cst_41 = arith.constant dense<0.000000e+00> : vector<16xf32>
    %97 = vector.multi_reduction <add>, %96, %cst_41 [0] : vector<16x16xf32> to vector<16xf32>
    %98 = vector.shape_cast %97 : vector<16xf32> to vector<1x16xf32>
    %99 = arith.addf %67, %98 : vector<1x16xf32>
    %100 = arith.truncf %94 : vector<16x16xf32> to vector<16x16xbf16>
    %cst_42 = arith.constant dense<0.000000e+00> : vector<16x32xf32>
    %101 = tpu.matmul %100, %80, %cst_42 {dimension_numbers = #tpu.dot_dimension_numbers<[1], [0], [0], [1], [0, 0, 1, 1], [], []>} : vector<16x16xbf16>, vector<16x32xbf16>, vector<16x32xf32> -> vector<16x32xf32>
    %102 = arith.truncf %101 : vector<16x32xf32> to vector<16x32xbf16>
    %c0_43 = arith.constant 0 : index
    %c32 = arith.constant 32 : index
    %c0_44 = arith.constant 0 : index
    %103 = vector.load %arg8[%c0_43, %c32, %c0_44] : memref<1x128x128xbf16, #tpu.memory_space<vmem>>, vector<1x32x128xbf16>
    %104 = vector.shape_cast %103 : vector<1x32x128xbf16> to vector<32x128xbf16>
    %cst_45 = arith.constant dense<0.000000e+00> : vector<16x128xf32>
    %105 = tpu.matmul %102, %104, %cst_45 {dimension_numbers = #tpu.dot_dimension_numbers<[1], [0], [0], [1], [0, 0, 1, 1], [], []>} : vector<16x32xbf16>, vector<32x128xbf16>, vector<16x128xf32> -> vector<16x128xf32>
    %106 = arith.addf %74, %105 : vector<16x128xf32>
    %107 = vector.extract_strided_slice %40 {offsets = [0, 64], sizes = [16, 32], strides = [1, 1]} : vector<16x384xf32> to vector<16x32xf32>
    %108 = arith.truncf %107 : vector<16x32xf32> to vector<16x32xbf16>
    %109 = vector.extract_strided_slice %40 {offsets = [0, 192], sizes = [16, 32], strides = [1, 1]} : vector<16x384xf32> to vector<16x32xf32>
    %110 = arith.truncf %109 : vector<16x32xf32> to vector<16x32xbf16>
    %111 = vector.extract_strided_slice %40 {offsets = [0, 320], sizes = [16, 32], strides = [1, 1]} : vector<16x384xf32> to vector<16x32xf32>
    %112 = arith.truncf %111 : vector<16x32xf32> to vector<16x32xbf16>
    %cst_46 = arith.constant dense<0.000000e+00> : vector<16x16xf32>
    %113 = tpu.matmul %108, %110, %cst_46 {dimension_numbers = #tpu.dot_dimension_numbers<[1], [1], [0], [0], [0, 0, 1, 0], [], []>} : vector<16x32xbf16>, vector<16x32xbf16>, vector<16x16xf32> -> vector<16x16xf32>
    %cst_47 = arith.constant 0.176776692 : f32
    %114 = vector.broadcast %cst_47 : f32 to vector<16x16xf32>
    %115 = arith.mulf %113, %114 : vector<16x16xf32>
    %116 = vector.broadcast %12 : vector<1x16xf32> to vector<16x16xf32>
    %117 = arith.addf %115, %116 : vector<16x16xf32>
    %cst_48 = arith.constant dense<0xFF800000> : vector<16xf32>
    %118 = vector.multi_reduction <maximumf>, %117, %cst_48 [1] : vector<16x16xf32> to vector<16xf32>
    %119 = vector.shape_cast %118 : vector<16xf32> to vector<16x1xf32>
    %120 = vector.broadcast %119 : vector<16x1xf32> to vector<16x16xf32>
    %121 = arith.subf %117, %120 : vector<16x16xf32>
    %122 = math.exp %121 : vector<16x16xf32>
    %cst_49 = arith.constant dense<0.000000e+00> : vector<16xf32>
    %123 = vector.multi_reduction <add>, %122, %cst_49 [1] : vector<16x16xf32> to vector<16xf32>
    %124 = vector.shape_cast %123 : vector<16xf32> to vector<16x1xf32>
    %125 = vector.broadcast %124 : vector<16x1xf32> to vector<16x16xf32>
    %126 = arith.divf %122, %125 : vector<16x16xf32>
    %127 = vector.broadcast %8 : vector<16x1xf32> to vector<16x16xf32>
    %128 = arith.mulf %126, %127 : vector<16x16xf32>
    %cst_50 = arith.constant dense<0.000000e+00> : vector<16xf32>
    %129 = vector.multi_reduction <add>, %128, %cst_50 [0] : vector<16x16xf32> to vector<16xf32>
    %130 = vector.shape_cast %129 : vector<16xf32> to vector<1x16xf32>
    %131 = arith.addf %99, %130 : vector<1x16xf32>
    %132 = arith.truncf %126 : vector<16x16xf32> to vector<16x16xbf16>
    %cst_51 = arith.constant dense<0.000000e+00> : vector<16x32xf32>
    %133 = tpu.matmul %132, %112, %cst_51 {dimension_numbers = #tpu.dot_dimension_numbers<[1], [0], [0], [1], [0, 0, 1, 1], [], []>} : vector<16x16xbf16>, vector<16x32xbf16>, vector<16x32xf32> -> vector<16x32xf32>
    %134 = arith.truncf %133 : vector<16x32xf32> to vector<16x32xbf16>
    %c0_52 = arith.constant 0 : index
    %c64 = arith.constant 64 : index
    %c0_53 = arith.constant 0 : index
    %135 = vector.load %arg8[%c0_52, %c64, %c0_53] : memref<1x128x128xbf16, #tpu.memory_space<vmem>>, vector<1x32x128xbf16>
    %136 = vector.shape_cast %135 : vector<1x32x128xbf16> to vector<32x128xbf16>
    %cst_54 = arith.constant dense<0.000000e+00> : vector<16x128xf32>
    %137 = tpu.matmul %134, %136, %cst_54 {dimension_numbers = #tpu.dot_dimension_numbers<[1], [0], [0], [1], [0, 0, 1, 1], [], []>} : vector<16x32xbf16>, vector<32x128xbf16>, vector<16x128xf32> -> vector<16x128xf32>
    %138 = arith.addf %106, %137 : vector<16x128xf32>
    %139 = vector.extract_strided_slice %40 {offsets = [0, 96], sizes = [16, 32], strides = [1, 1]} : vector<16x384xf32> to vector<16x32xf32>
    %140 = arith.truncf %139 : vector<16x32xf32> to vector<16x32xbf16>
    %141 = vector.extract_strided_slice %40 {offsets = [0, 224], sizes = [16, 32], strides = [1, 1]} : vector<16x384xf32> to vector<16x32xf32>
    %142 = arith.truncf %141 : vector<16x32xf32> to vector<16x32xbf16>
    %143 = vector.extract_strided_slice %40 {offsets = [0, 352], sizes = [16, 32], strides = [1, 1]} : vector<16x384xf32> to vector<16x32xf32>
    %144 = arith.truncf %143 : vector<16x32xf32> to vector<16x32xbf16>
    %cst_55 = arith.constant dense<0.000000e+00> : vector<16x16xf32>
    %145 = tpu.matmul %140, %142, %cst_55 {dimension_numbers = #tpu.dot_dimension_numbers<[1], [1], [0], [0], [0, 0, 1, 0], [], []>} : vector<16x32xbf16>, vector<16x32xbf16>, vector<16x16xf32> -> vector<16x16xf32>
    %cst_56 = arith.constant 0.176776692 : f32
    %146 = vector.broadcast %cst_56 : f32 to vector<16x16xf32>
    %147 = arith.mulf %145, %146 : vector<16x16xf32>
    %148 = vector.broadcast %12 : vector<1x16xf32> to vector<16x16xf32>
    %149 = arith.addf %147, %148 : vector<16x16xf32>
    %cst_57 = arith.constant dense<0xFF800000> : vector<16xf32>
    %150 = vector.multi_reduction <maximumf>, %149, %cst_57 [1] : vector<16x16xf32> to vector<16xf32>
    %151 = vector.shape_cast %150 : vector<16xf32> to vector<16x1xf32>
    %152 = vector.broadcast %151 : vector<16x1xf32> to vector<16x16xf32>
    %153 = arith.subf %149, %152 : vector<16x16xf32>
    %154 = math.exp %153 : vector<16x16xf32>
    %cst_58 = arith.constant dense<0.000000e+00> : vector<16xf32>
    %155 = vector.multi_reduction <add>, %154, %cst_58 [1] : vector<16x16xf32> to vector<16xf32>
    %156 = vector.shape_cast %155 : vector<16xf32> to vector<16x1xf32>
    %157 = vector.broadcast %156 : vector<16x1xf32> to vector<16x16xf32>
    %158 = arith.divf %154, %157 : vector<16x16xf32>
    %159 = vector.broadcast %8 : vector<16x1xf32> to vector<16x16xf32>
    %160 = arith.mulf %158, %159 : vector<16x16xf32>
    %cst_59 = arith.constant dense<0.000000e+00> : vector<16xf32>
    %161 = vector.multi_reduction <add>, %160, %cst_59 [0] : vector<16x16xf32> to vector<16xf32>
    %162 = vector.shape_cast %161 : vector<16xf32> to vector<1x16xf32>
    %163 = arith.addf %131, %162 : vector<1x16xf32>
    %164 = arith.truncf %158 : vector<16x16xf32> to vector<16x16xbf16>
    %cst_60 = arith.constant dense<0.000000e+00> : vector<16x32xf32>
    %165 = tpu.matmul %164, %144, %cst_60 {dimension_numbers = #tpu.dot_dimension_numbers<[1], [0], [0], [1], [0, 0, 1, 1], [], []>} : vector<16x16xbf16>, vector<16x32xbf16>, vector<16x32xf32> -> vector<16x32xf32>
    %166 = arith.truncf %165 : vector<16x32xf32> to vector<16x32xbf16>
    %c0_61 = arith.constant 0 : index
    %c96 = arith.constant 96 : index
    %c0_62 = arith.constant 0 : index
    %167 = vector.load %arg8[%c0_61, %c96, %c0_62] : memref<1x128x128xbf16, #tpu.memory_space<vmem>>, vector<1x32x128xbf16>
    %168 = vector.shape_cast %167 : vector<1x32x128xbf16> to vector<32x128xbf16>
    %cst_63 = arith.constant dense<0.000000e+00> : vector<16x128xf32>
    %169 = tpu.matmul %166, %168, %cst_63 {dimension_numbers = #tpu.dot_dimension_numbers<[1], [0], [0], [1], [0, 0, 1, 1], [], []>} : vector<16x32xbf16>, vector<32x128xbf16>, vector<16x128xf32> -> vector<16x128xf32>
    %170 = arith.addf %138, %169 : vector<16x128xf32>
    %171 = arith.addf %4, %170 : vector<16x128xf32>
    %c0_64 = arith.constant 0 : index
    %c0_65 = arith.constant 0 : index
    %c0_66 = arith.constant 0 : index
    %172 = vector.load %arg9[%c0_64, %c0_65, %c0_66] : memref<1x1x128xf32, #tpu.memory_space<vmem>>, vector<1x1x128xf32>
    %173 = vector.shape_cast %172 : vector<1x1x128xf32> to vector<1x128xf32>
    %174 = vector.broadcast %173 : vector<1x128xf32> to vector<16x128xf32>
    %175 = arith.addf %171, %174 : vector<16x128xf32>
    %c0_67 = arith.constant 0 : index
    %c0_68 = arith.constant 0 : index
    %c0_69 = arith.constant 0 : index
    %176 = vector.load %arg10[%c0_67, %c0_68, %c0_69] : memref<1x1x128xf32, #tpu.memory_space<vmem>>, vector<1x1x128xf32>
    %177 = vector.shape_cast %176 : vector<1x1x128xf32> to vector<1x128xf32>
    %c0_70 = arith.constant 0 : index
    %c0_71 = arith.constant 0 : index
    %c0_72 = arith.constant 0 : index
    %178 = vector.load %arg11[%c0_70, %c0_71, %c0_72] : memref<1x1x128xf32, #tpu.memory_space<vmem>>, vector<1x1x128xf32>
    %179 = vector.shape_cast %178 : vector<1x1x128xf32> to vector<1x128xf32>
    %cst_73 = arith.constant dense<0.000000e+00> : vector<16xf32>
    %180 = vector.multi_reduction <add>, %175, %cst_73 [1] : vector<16x128xf32> to vector<16xf32>
    %181 = vector.shape_cast %180 : vector<16xf32> to vector<16x1xf32>
    %cst_74 = arith.constant 1.280000e+02 : f32
    %182 = vector.broadcast %cst_74 : f32 to vector<16x1xf32>
    %183 = arith.divf %181, %182 : vector<16x1xf32>
    %184 = vector.broadcast %183 : vector<16x1xf32> to vector<16x128xf32>
    %185 = arith.subf %175, %184 : vector<16x128xf32>
    %186 = arith.mulf %185, %185 : vector<16x128xf32>
    %cst_75 = arith.constant dense<0.000000e+00> : vector<16xf32>
    %187 = vector.multi_reduction <add>, %186, %cst_75 [1] : vector<16x128xf32> to vector<16xf32>
    %188 = vector.shape_cast %187 : vector<16xf32> to vector<16x1xf32>
    %cst_76 = arith.constant 1.280000e+02 : f32
    %189 = vector.broadcast %cst_76 : f32 to vector<16x1xf32>
    %190 = arith.divf %188, %189 : vector<16x1xf32>
    %cst_77 = arith.constant 9.99999997E-7 : f32
    %191 = vector.broadcast %cst_77 : f32 to vector<16x1xf32>
    %192 = arith.addf %190, %191 : vector<16x1xf32>
    %193 = math.rsqrt %192 : vector<16x1xf32>
    %194 = vector.broadcast %193 : vector<16x1xf32> to vector<16x128xf32>
    %195 = arith.mulf %185, %194 : vector<16x128xf32>
    %196 = vector.broadcast %177 : vector<1x128xf32> to vector<16x128xf32>
    %197 = arith.mulf %195, %196 : vector<16x128xf32>
    %198 = vector.broadcast %179 : vector<1x128xf32> to vector<16x128xf32>
    %199 = arith.addf %197, %198 : vector<16x128xf32>
    %200 = arith.truncf %199 : vector<16x128xf32> to vector<16x128xbf16>
    %c0_78 = arith.constant 0 : index
    %c0_79 = arith.constant 0 : index
    %c0_80 = arith.constant 0 : index
    %201 = vector.load %arg12[%c0_78, %c0_79, %c0_80] : memref<1x128x384xbf16, #tpu.memory_space<vmem>>, vector<1x128x384xbf16>
    %202 = vector.shape_cast %201 : vector<1x128x384xbf16> to vector<128x384xbf16>
    %cst_81 = arith.constant dense<0.000000e+00> : vector<16x384xf32>
    %203 = tpu.matmul %200, %202, %cst_81 {dimension_numbers = #tpu.dot_dimension_numbers<[1], [0], [0], [1], [0, 0, 1, 1], [], []>} : vector<16x128xbf16>, vector<128x384xbf16>, vector<16x384xf32> -> vector<16x384xf32>
    %c0_82 = arith.constant 0 : index
    %c0_83 = arith.constant 0 : index
    %c0_84 = arith.constant 0 : index
    %204 = vector.load %arg13[%c0_82, %c0_83, %c0_84] : memref<1x1x384xf32, #tpu.memory_space<vmem>>, vector<1x1x384xf32>
    %205 = vector.shape_cast %204 : vector<1x1x384xf32> to vector<1x384xf32>
    %206 = vector.broadcast %205 : vector<1x384xf32> to vector<16x384xf32>
    %207 = arith.addf %203, %206 : vector<16x384xf32>
    %208 = arith.mulf %207, %207 : vector<16x384xf32>
    %209 = arith.mulf %207, %208 : vector<16x384xf32>
    %cst_85 = arith.constant 4.471500e-02 : f32
    %210 = vector.broadcast %cst_85 : f32 to vector<16x384xf32>
    %211 = arith.mulf %210, %209 : vector<16x384xf32>
    %212 = arith.addf %207, %211 : vector<16x384xf32>
    %cst_86 = arith.constant 0.797884583 : f32
    %213 = vector.broadcast %cst_86 : f32 to vector<16x384xf32>
    %214 = arith.mulf %213, %212 : vector<16x384xf32>
    %215 = math.tanh %214 : vector<16x384xf32>
    %cst_87 = arith.constant 1.000000e+00 : f32
    %216 = vector.broadcast %cst_87 : f32 to vector<16x384xf32>
    %217 = arith.addf %216, %215 : vector<16x384xf32>
    %cst_88 = arith.constant 5.000000e-01 : f32
    %218 = vector.broadcast %cst_88 : f32 to vector<16x384xf32>
    %219 = arith.mulf %218, %217 : vector<16x384xf32>
    %220 = arith.mulf %207, %219 : vector<16x384xf32>
    %221 = arith.truncf %220 : vector<16x384xf32> to vector<16x384xbf16>
    %c0_89 = arith.constant 0 : index
    %c0_90 = arith.constant 0 : index
    %c0_91 = arith.constant 0 : index
    %222 = vector.load %arg14[%c0_89, %c0_90, %c0_91] : memref<1x384x128xbf16, #tpu.memory_space<vmem>>, vector<1x384x128xbf16>
    %223 = vector.shape_cast %222 : vector<1x384x128xbf16> to vector<384x128xbf16>
    %cst_92 = arith.constant dense<0.000000e+00> : vector<16x128xf32>
    %224 = tpu.matmul %221, %223, %cst_92 {dimension_numbers = #tpu.dot_dimension_numbers<[1], [0], [0], [1], [0, 0, 1, 1], [], []>} : vector<16x384xbf16>, vector<384x128xbf16>, vector<16x128xf32> -> vector<16x128xf32>
    %c0_93 = arith.constant 0 : index
    %c0_94 = arith.constant 0 : index
    %c0_95 = arith.constant 0 : index
    %225 = vector.load %arg15[%c0_93, %c0_94, %c0_95] : memref<1x1x128xf32, #tpu.memory_space<vmem>>, vector<1x1x128xf32>
    %226 = vector.shape_cast %225 : vector<1x1x128xf32> to vector<1x128xf32>
    %227 = vector.broadcast %226 : vector<1x128xf32> to vector<16x128xf32>
    %228 = arith.addf %224, %227 : vector<16x128xf32>
    %229 = arith.addf %175, %228 : vector<16x128xf32>
    %c0_96 = arith.constant 0 : index
    %c0_97 = arith.constant 0 : index
    %c0_98 = arith.constant 0 : index
    %230 = vector.load %arg16[%c0_96, %c0_97, %c0_98] : memref<1x16x128xf32, #tpu.memory_space<vmem>>, vector<1x16x128xf32>
    %231 = vector.shape_cast %230 : vector<1x16x128xf32> to vector<16x128xf32>
    %232 = vector.shape_cast %229 : vector<16x128xf32> to vector<1x16x128xf32>
    tpu.vector_store %arg16[%c0_96, %c0_97, %c0_98], %232 {strides = array<i32>} : memref<1x16x128xf32, #tpu.memory_space<vmem>>, vector<1x16x128xf32>,
    %c0_99 = arith.constant 0 : index
    %c0_100 = arith.constant 0 : index
    %c0_101 = arith.constant 0 : index
    %233 = vector.load %arg17[%c0_99, %c0_100, %c0_101] : memref<1x1x16xf32, #tpu.memory_space<vmem>>, vector<1x1x16xf32>
    %234 = vector.shape_cast %233 : vector<1x1x16xf32> to vector<1x16xf32>
    %235 = vector.shape_cast %163 : vector<1x16xf32> to vector<1x1x16xf32>
    tpu.vector_store %arg17[%c0_99, %c0_100, %c0_101], %235 {strides = array<i32>} : memref<1x1x16xf32, #tpu.memory_space<vmem>>, vector<1x1x16xf32>,
    return
  }
  func.func @transform_0(%arg0: i32, %arg1: i32) -> (i32, i32, i32) {
    %c0_i32 = arith.constant 0 : i32
    %c0_i32_0 = arith.constant 0 : i32
    %c0_i32_1 = arith.constant 0 : i32
    return %arg0, %c0_i32, %c0_i32_0 : i32, i32, i32
  }
  func.func @transform_1(%arg0: i32, %arg1: i32) -> (i32, i32, i32) {
    %c0_i32 = arith.constant 0 : i32
    %c0_i32_0 = arith.constant 0 : i32
    %c0_i32_1 = arith.constant 0 : i32
    return %arg0, %c0_i32, %c0_i32_0 : i32, i32, i32
  }
  func.func @transform_2(%arg0: i32, %arg1: i32) -> (i32, i32, i32) {
    %c0_i32 = arith.constant 0 : i32
    %c0_i32_0 = arith.constant 0 : i32
    %c0_i32_1 = arith.constant 0 : i32
    return %arg0, %c0_i32, %c0_i32_0 : i32, i32, i32
  }
  func.func @transform_3(%arg0: i32, %arg1: i32) -> (i32, i32, i32) {
    %c0_i32 = arith.constant 0 : i32
    %c0_i32_0 = arith.constant 0 : i32
    %c0_i32_1 = arith.constant 0 : i32
    return %arg1, %c0_i32, %c0_i32_0 : i32, i32, i32
  }
  func.func @transform_4(%arg0: i32, %arg1: i32) -> (i32, i32, i32) {
    %c0_i32 = arith.constant 0 : i32
    %c0_i32_0 = arith.constant 0 : i32
    %c0_i32_1 = arith.constant 0 : i32
    return %arg1, %c0_i32, %c0_i32_0 : i32, i32, i32
  }
  func.func @transform_5(%arg0: i32, %arg1: i32) -> (i32, i32, i32) {
    %c0_i32 = arith.constant 0 : i32
    %c0_i32_0 = arith.constant 0 : i32
    %c0_i32_1 = arith.constant 0 : i32
    return %arg1, %c0_i32, %c0_i32_0 : i32, i32, i32
  }
  func.func @transform_6(%arg0: i32, %arg1: i32) -> (i32, i32, i32) {
    %c0_i32 = arith.constant 0 : i32
    %c0_i32_0 = arith.constant 0 : i32
    %c0_i32_1 = arith.constant 0 : i32
    return %arg1, %c0_i32, %c0_i32_0 : i32, i32, i32
  }
  func.func @transform_7(%arg0: i32, %arg1: i32) -> (i32, i32, i32) {
    %c0_i32 = arith.constant 0 : i32
    %c0_i32_0 = arith.constant 0 : i32
    %c0_i32_1 = arith.constant 0 : i32
    return %arg1, %c0_i32, %c0_i32_0 : i32, i32, i32
  }
  func.func @transform_8(%arg0: i32, %arg1: i32) -> (i32, i32, i32) {
    %c0_i32 = arith.constant 0 : i32
    %c0_i32_0 = arith.constant 0 : i32
    %c0_i32_1 = arith.constant 0 : i32
    return %arg1, %c0_i32, %c0_i32_0 : i32, i32, i32
  }
  func.func @transform_9(%arg0: i32, %arg1: i32) -> (i32, i32, i32) {
    %c0_i32 = arith.constant 0 : i32
    %c0_i32_0 = arith.constant 0 : i32
    %c0_i32_1 = arith.constant 0 : i32
    return %arg1, %c0_i32, %c0_i32_0 : i32, i32, i32
  }
  func.func @transform_10(%arg0: i32, %arg1: i32) -> (i32, i32, i32) {
    %c0_i32 = arith.constant 0 : i32
    %c0_i32_0 = arith.constant 0 : i32
    %c0_i32_1 = arith.constant 0 : i32
    return %arg1, %c0_i32, %c0_i32_0 : i32, i32, i32
  }
  func.func @transform_11(%arg0: i32, %arg1: i32) -> (i32, i32, i32) {
    %c0_i32 = arith.constant 0 : i32
    %c0_i32_0 = arith.constant 0 : i32
    %c0_i32_1 = arith.constant 0 : i32
    return %arg1, %c0_i32, %c0_i32_0 : i32, i32, i32
  }
  func.func @transform_12(%arg0: i32, %arg1: i32) -> (i32, i32, i32) {
    %c0_i32 = arith.constant 0 : i32
    %c0_i32_0 = arith.constant 0 : i32
    %c0_i32_1 = arith.constant 0 : i32
    return %arg1, %c0_i32, %c0_i32_0 : i32, i32, i32
  }
  func.func @transform_13(%arg0: i32, %arg1: i32) -> (i32, i32, i32) {
    %c0_i32 = arith.constant 0 : i32
    %c0_i32_0 = arith.constant 0 : i32
    %c0_i32_1 = arith.constant 0 : i32
    return %arg1, %c0_i32, %c0_i32_0 : i32, i32, i32
  }
  func.func @transform_14(%arg0: i32, %arg1: i32) -> (i32, i32, i32) {
    %c0_i32 = arith.constant 0 : i32
    %c0_i32_0 = arith.constant 0 : i32
    %c0_i32_1 = arith.constant 0 : i32
    return %arg0, %c0_i32, %c0_i32_0 : i32, i32, i32
  }
  func.func @transform_15(%arg0: i32, %arg1: i32) -> (i32, i32, i32) {
    %c0_i32 = arith.constant 0 : i32
    %c0_i32_0 = arith.constant 0 : i32
    %c0_i32_1 = arith.constant 0 : i32
    return %arg0, %c0_i32, %c0_i32_0 : i32, i32, i32
  }
}

module attributes {stable_mosaic.version = 11 : i64} {
  func.func @_block_stack_kernel(%arg0: i32, %arg1: i32, %arg2: memref<1x16x128xf32, #tpu.memory_space<vmem>>, %arg3: memref<1x1x16xf32, #tpu.memory_space<vmem>>, %arg4: memref<1x16x1xf32, #tpu.memory_space<vmem>>, %arg5: memref<1x1x128xf32, #tpu.memory_space<vmem>>, %arg6: memref<1x1x128xf32, #tpu.memory_space<vmem>>, %arg7: memref<1x128x384xbf16, #tpu.memory_space<vmem>>, %arg8: memref<1x128x128xbf16, #tpu.memory_space<vmem>>, %arg9: memref<1x1x128xf32, #tpu.memory_space<vmem>>, %arg10: memref<1x1x128xf32, #tpu.memory_space<vmem>>, %arg11: memref<1x1x128xf32, #tpu.memory_space<vmem>>, %arg12: memref<1x128x384xbf16, #tpu.memory_space<vmem>>, %arg13: memref<1x1x384xf32, #tpu.memory_space<vmem>>, %arg14: memref<1x384x128xbf16, #tpu.memory_space<vmem>>, %arg15: memref<1x1x128xf32, #tpu.memory_space<vmem>>, %arg16: memref<1x16x128xf32, #tpu.memory_space<vmem>>, %arg17: memref<1x1x16xf32, #tpu.memory_space<vmem>>) attributes {dimension_semantics = [#tpu.dimension_semantics<parallel>, #tpu.dimension_semantics<arbitrary>], iteration_bounds = array<i64: 2, 1>, scalar_prefetch = 0 : i64, scratch_operands = 0 : i64, tpu.core_type = #tpu.core_type<tc>, window_params = [{transform_indices = @transform_0, window_bounds = array<i64: 1, 16, 128>}, {transform_indices = @transform_1, window_bounds = array<i64: 1, 1, 16>}, {transform_indices = @transform_2, window_bounds = array<i64: 1, 16, 1>}, {transform_indices = @transform_3, window_bounds = array<i64: 1, 1, 128>}, {transform_indices = @transform_4, window_bounds = array<i64: 1, 1, 128>}, {transform_indices = @transform_5, window_bounds = array<i64: 1, 128, 384>}, {transform_indices = @transform_6, window_bounds = array<i64: 1, 128, 128>}, {transform_indices = @transform_7, window_bounds = array<i64: 1, 1, 128>}, {transform_indices = @transform_8, window_bounds = array<i64: 1, 1, 128>}, {transform_indices = @transform_9, window_bounds = array<i64: 1, 1, 128>}, {transform_indices = @transform_10, window_bounds = array<i64: 1, 128, 384>}, {transform_indices = @transform_11, window_bounds = array<i64: 1, 1, 384>}, {transform_indices = @transform_12, window_bounds = array<i64: 1, 384, 128>}, {transform_indices = @transform_13, window_bounds = array<i64: 1, 1, 128>}, {transform_indices = @transform_14, window_bounds = array<i64: 1, 16, 128>}, {transform_indices = @transform_15, window_bounds = array<i64: 1, 1, 16>}]} {
    %c0_i32 = arith.constant 0 : i32
    %0 = arith.cmpi eq, %arg1, %c0_i32 : i32
    %1 = arith.extui %0 : i1 to i32
    %c0_i32_0 = arith.constant 0 : i32
    %2 = arith.cmpi ne, %1, %c0_i32_0 : i32
    scf.if %2 {
      %c0_102 = arith.constant 0 : index
      %c0_103 = arith.constant 0 : index
      %c0_104 = arith.constant 0 : index
      %236 = vector.load %arg2[%c0_102, %c0_103, %c0_104] : memref<1x16x128xf32, #tpu.memory_space<vmem>>, vector<1x16x128xf32>
      %237 = vector.shape_cast %236 : vector<1x16x128xf32> to vector<16x128xf32>
      %c0_105 = arith.constant 0 : index
      %c0_106 = arith.constant 0 : index
      %c0_107 = arith.constant 0 : index
      %238 = vector.load %arg16[%c0_105, %c0_106, %c0_107] : memref<1x16x128xf32, #tpu.memory_space<vmem>>, vector<1x16x128xf32>
      %239 = vector.shape_cast %238 : vector<1x16x128xf32> to vector<16x128xf32>
      %240 = vector.shape_cast %237 : vector<16x128xf32> to vector<1x16x128xf32>
      tpu.vector_store %arg16[%c0_105, %c0_106, %c0_107], %240 {strides = array<i32>} : memref<1x16x128xf32, #tpu.memory_space<vmem>>, vector<1x16x128xf32>,
    } else {
    }
    %c0 = arith.constant 0 : index
    %c0_1 = arith.constant 0 : index
    %c0_2 = arith.constant 0 : index
    %3 = vector.load %arg16[%c0, %c0_1, %c0_2] : memref<1x16x128xf32, #tpu.memory_space<vmem>>, vector<1x16x128xf32>
    %4 = vector.shape_cast %3 : vector<1x16x128xf32> to vector<16x128xf32>
    %c0_3 = arith.constant 0 : index
    %c0_4 = arith.constant 0 : index
    %c0_5 = arith.constant 0 : index
    %5 = vector.load %arg3[%c0_3, %c0_4, %c0_5] : memref<1x1x16xf32, #tpu.memory_space<vmem>>, vector<1x1x16xf32>
    %6 = vector.shape_cast %5 : vector<1x1x16xf32> to vector<1x16xf32>
    %c0_6 = arith.constant 0 : index
    %c0_7 = arith.constant 0 : index
    %c0_8 = arith.constant 0 : index
    %7 = vector.load %arg4[%c0_6, %c0_7, %c0_8] : memref<1x16x1xf32, #tpu.memory_space<vmem>>, vector<1x16x1xf32>
    %8 = vector.shape_cast %7 : vector<1x16x1xf32> to vector<16x1xf32>
    %cst = arith.constant 1.000000e+00 : f32
    %9 = vector.broadcast %cst : f32 to vector<1x16xf32>
    %10 = arith.subf %6, %9 : vector<1x16xf32>
    %cst_9 = arith.constant 1.000000e+09 : f32
    %11 = vector.broadcast %cst_9 : f32 to vector<1x16xf32>
    %12 = arith.mulf %10, %11 : vector<1x16xf32>
    %c0_10 = arith.constant 0 : index
    %c0_11 = arith.constant 0 : index
    %c0_12 = arith.constant 0 : index
    %13 = vector.load %arg5[%c0_10, %c0_11, %c0_12] : memref<1x1x128xf32, #tpu.memory_space<vmem>>, vector<1x1x128xf32>
    %14 = vector.shape_cast %13 : vector<1x1x128xf32> to vector<1x128xf32>
    %c0_13 = arith.constant 0 : index
    %c0_14 = arith.constant 0 : index
    %c0_15 = arith.constant 0 : index
    %15 = vector.load %arg6[%c0_13, %c0_14, %c0_15] : memref<1x1x128xf32, #tpu.memory_space<vmem>>, vector<1x1x128xf32>
    %16 = vector.shape_cast %15 : vector<1x1x128xf32> to vector<1x128xf32>
    %cst_16 = arith.constant dense<0.000000e+00> : vector<16xf32>
    %17 = vector.multi_reduction <add>, %4, %cst_16 [1] : vector<16x128xf32> to vector<16xf32>
    %18 = vector.shape_cast %17 : vector<16xf32> to vector<16x1xf32>
    %cst_17 = arith.constant 1.280000e+02 : f32
    %19 = vector.broadcast %cst_17 : f32 to vector<16x1xf32>
    %20 = arith.divf %18, %19 : vector<16x1xf32>
    %21 = vector.broadcast %20 : vector<16x1xf32> to vector<16x128xf32>
    %22 = arith.subf %4, %21 : vector<16x128xf32>
    %23 = arith.mulf %22, %22 : vector<16x128xf32>
    %cst_18 = arith.constant dense<0.000000e+00> : vector<16xf32>
    %24 = vector.multi_reduction <add>, %23, %cst_18 [1] : vector<16x128xf32> to vector<16xf32>
    %25 = vector.shape_cast %24 : vector<16xf32> to vector<16x1xf32>
    %cst_19 = arith.constant 1.280000e+02 : f32
    %26 = vector.broadcast %cst_19 : f32 to vector<16x1xf32>
    %27 = arith.divf %25, %26 : vector<16x1xf32>
    %cst_20 = arith.constant 9.99999997E-7 : f32
    %28 = vector.broadcast %cst_20 : f32 to vector<16x1xf32>
    %29 = arith.addf %27, %28 : vector<16x1xf32>
    %30 = math.rsqrt %29 : vector<16x1xf32>
    %31 = vector.broadcast %30 : vector<16x1xf32> to vector<16x128xf32>
    %32 = arith.mulf %22, %31 : vector<16x128xf32>
    %33 = vector.broadcast %14 : vector<1x128xf32> to vector<16x128xf32>
    %34 = arith.mulf %32, %33 : vector<16x128xf32>
    %35 = vector.broadcast %16 : vector<1x128xf32> to vector<16x128xf32>
    %36 = arith.addf %34, %35 : vector<16x128xf32>
    %37 = arith.truncf %36 : vector<16x128xf32> to vector<16x128xbf16>
    %c0_21 = arith.constant 0 : index
    %c0_22 = arith.constant 0 : index
    %c0_23 = arith.constant 0 : index
    %38 = vector.load %arg7[%c0_21, %c0_22, %c0_23] : memref<1x128x384xbf16, #tpu.memory_space<vmem>>, vector<1x128x384xbf16>
    %39 = vector.shape_cast %38 : vector<1x128x384xbf16> to vector<128x384xbf16>
    %cst_24 = arith.constant dense<0.000000e+00> : vector<16x384xf32>
    %40 = tpu.matmul %37, %39, %cst_24 {dimension_numbers = #tpu.dot_dimension_numbers<[1], [0], [0], [1], [0, 0, 1, 1], [], []>} : vector<16x128xbf16>, vector<128x384xbf16>, vector<16x384xf32> -> vector<16x384xf32>
    %cst_25 = arith.constant 0.000000e+00 : f32
    %41 = vector.broadcast %cst_25 : f32 to vector<16x128xf32>
    %cst_26 = arith.constant 0.000000e+00 : f32
    %42 = vector.broadcast %cst_26 : f32 to vector<1x16xf32>
    %43 = vector.extract_strided_slice %40 {offsets = [0, 0], sizes = [16, 32], strides = [1, 1]} : vector<16x384xf32> to vector<16x32xf32>
    %44 = arith.truncf %43 : vector<16x32xf32> to vector<16x32xbf16>
    %45 = vector.extract_strided_slice %40 {offsets = [0, 128], sizes = [16, 32], strides = [1, 1]} : vector<16x384xf32> to vector<16x32xf32>
    %46 = arith.truncf %45 : vector<16x32xf32> to vector<16x32xbf16>
    %47 = vector.extract_strided_slice %40 {offsets = [0, 256], sizes = [16, 32], strides = [1, 1]} : vector<16x384xf32> to vector<16x32xf32>
    %48 = arith.truncf %47 : vector<16x32xf32> to vector<16x32xbf16>
    %cst_27 = arith.constant dense<0.000000e+00> : vector<16x16xf32>
    %49 = tpu.matmul %44, %46, %cst_27 {dimension_numbers = #tpu.dot_dimension_numbers<[1], [1], [0], [0], [0, 0, 1, 0], [], []>} : vector<16x32xbf16>, vector<16x32xbf16>, vector<16x16xf32> -> vector<16x16xf32>
    %cst_28 = arith.constant 0.176776692 : f32
    %50 = vector.broadcast %cst_28 : f32 to vector<16x16xf32>
    %51 = arith.mulf %49, %50 : vector<16x16xf32>
    %52 = vector.broadcast %12 : vector<1x16xf32> to vector<16x16xf32>
    %53 = arith.addf %51, %52 : vector<16x16xf32>
    %cst_29 = arith.constant dense<0xFF800000> : vector<16xf32>
    %54 = vector.multi_reduction <maximumf>, %53, %cst_29 [1] : vector<16x16xf32> to vector<16xf32>
    %55 = vector.shape_cast %54 : vector<16xf32> to vector<16x1xf32>
    %56 = vector.broadcast %55 : vector<16x1xf32> to vector<16x16xf32>
    %57 = arith.subf %53, %56 : vector<16x16xf32>
    %58 = math.exp %57 : vector<16x16xf32>
    %cst_30 = arith.constant dense<0.000000e+00> : vector<16xf32>
    %59 = vector.multi_reduction <add>, %58, %cst_30 [1] : vector<16x16xf32> to vector<16xf32>
    %60 = vector.shape_cast %59 : vector<16xf32> to vector<16x1xf32>
    %61 = vector.broadcast %60 : vector<16x1xf32> to vector<16x16xf32>
    %62 = arith.divf %58, %61 : vector<16x16xf32>
    %63 = vector.broadcast %8 : vector<16x1xf32> to vector<16x16xf32>
    %64 = arith.mulf %62, %63 : vector<16x16xf32>
    %cst_31 = arith.constant dense<0.000000e+00> : vector<16xf32>
    %65 = vector.multi_reduction <add>, %64, %cst_31 [0] : vector<16x16xf32> to vector<16xf32>
    %66 = vector.shape_cast %65 : vector<16xf32> to vector<1x16xf32>
    %67 = arith.addf %42, %66 : vector<1x16xf32>
    %68 = arith.truncf %62 : vector<16x16xf32> to vector<16x16xbf16>
    %cst_32 = arith.constant dense<0.000000e+00> : vector<16x32xf32>
    %69 = tpu.matmul %68, %48, %cst_32 {dimension_numbers = #tpu.dot_dimension_numbers<[1], [0], [0], [1], [0, 0, 1, 1], [], []>} : vector<16x16xbf16>, vector<16x32xbf16>, vector<16x32xf32> -> vector<16x32xf32>
    %70 = arith.truncf %69 : vector<16x32xf32> to vector<16x32xbf16>
    %c0_33 = arith.constant 0 : index
    %c0_34 = arith.constant 0 : index
    %c0_35 = arith.constant 0 : index
    %71 = vector.load %arg8[%c0_33, %c0_34, %c0_35] : memref<1x128x128xbf16, #tpu.memory_space<vmem>>, vector<1x32x128xbf16>
    %72 = vector.shape_cast %71 : vector<1x32x128xbf16> to vector<32x128xbf16>
    %cst_36 = arith.constant dense<0.000000e+00> : vector<16x128xf32>
    %73 = tpu.matmul %70, %72, %cst_36 {dimension_numbers = #tpu.dot_dimension_numbers<[1], [0], [0], [1], [0, 0, 1, 1], [], []>} : vector<16x32xbf16>, vector<32x128xbf16>, vector<16x128xf32> -> vector<16x128xf32>
    %74 = arith.addf %41, %73 : vector<16x128xf32>
    %75 = vector.extract_strided_slice %40 {offsets = [0, 32], sizes = [16, 32], strides = [1, 1]} : vector<16x384xf32> to vector<16x32xf32>
    %76 = arith.truncf %75 : vector<16x32xf32> to vector<16x32xbf16>
    %77 = vector.extract_strided_slice %40 {offsets = [0, 160], sizes = [16, 32], strides = [1, 1]} : vector<16x384xf32> to vector<16x32xf32>
    %78 = arith.truncf %77 : vector<16x32xf32> to vector<16x32xbf16>
    %79 = vector.extract_strided_slice %40 {offsets = [0, 288], sizes = [16, 32], strides = [1, 1]} : vector<16x384xf32> to vector<16x32xf32>
    %80 = arith.truncf %79 : vector<16x32xf32> to vector<16x32xbf16>
    %cst_37 = arith.constant dense<0.000000e+00> : vector<16x16xf32>
    %81 = tpu.matmul %76, %78, %cst_37 {dimension_numbers = #tpu.dot_dimension_numbers<[1], [1], [0], [0], [0, 0, 1, 0], [], []>} : vector<16x32xbf16>, vector<16x32xbf16>, vector<16x16xf32> -> vector<16x16xf32>
    %cst_38 = arith.constant 0.176776692 : f32
    %82 = vector.broadcast %cst_38 : f32 to vector<16x16xf32>
    %83 = arith.mulf %81, %82 : vector<16x16xf32>
    %84 = vector.broadcast %12 : vector<1x16xf32> to vector<16x16xf32>
    %85 = arith.addf %83, %84 : vector<16x16xf32>
    %cst_39 = arith.constant dense<0xFF800000> : vector<16xf32>
    %86 = vector.multi_reduction <maximumf>, %85, %cst_39 [1] : vector<16x16xf32> to vector<16xf32>
    %87 = vector.shape_cast %86 : vector<16xf32> to vector<16x1xf32>
    %88 = vector.broadcast %87 : vector<16x1xf32> to vector<16x16xf32>
    %89 = arith.subf %85, %88 : vector<16x16xf32>
    %90 = math.exp %89 : vector<16x16xf32>
    %cst_40 = arith.constant dense<0.000000e+00> : vector<16xf32>
    %91 = vector.multi_reduction <add>, %90, %cst_40 [1] : vector<16x16xf32> to vector<16xf32>
    %92 = vector.shape_cast %91 : vector<16xf32> to vector<16x1xf32>
    %93 = vector.broadcast %92 : vector<16x1xf32> to vector<16x16xf32>
    %94 = arith.divf %90, %93 : vector<16x16xf32>
    %95 = vector.broadcast %8 : vector<16x1xf32> to vector<16x16xf32>
    %96 = arith.mulf %94, %95 : vector<16x16xf32>
    %cst_41 = arith.constant dense<0.000000e+00> : vector<16xf32>
    %97 = vector.multi_reduction <add>, %96, %cst_41 [0] : vector<16x16xf32> to vector<16xf32>
    %98 = vector.shape_cast %97 : vector<16xf32> to vector<1x16xf32>
    %99 = arith.addf %67, %98 : vector<1x16xf32>
    %100 = arith.truncf %94 : vector<16x16xf32> to vector<16x16xbf16>
    %cst_42 = arith.constant dense<0.000000e+00> : vector<16x32xf32>
    %101 = tpu.matmul %100, %80, %cst_42 {dimension_numbers = #tpu.dot_dimension_numbers<[1], [0], [0], [1], [0, 0, 1, 1], [], []>} : vector<16x16xbf16>, vector<16x32xbf16>, vector<16x32xf32> -> vector<16x32xf32>
    %102 = arith.truncf %101 : vector<16x32xf32> to vector<16x32xbf16>
    %c0_43 = arith.constant 0 : index
    %c32 = arith.constant 32 : index
    %c0_44 = arith.constant 0 : index
    %103 = vector.load %arg8[%c0_43, %c32, %c0_44] : memref<1x128x128xbf16, #tpu.memory_space<vmem>>, vector<1x32x128xbf16>
    %104 = vector.shape_cast %103 : vector<1x32x128xbf16> to vector<32x128xbf16>
    %cst_45 = arith.constant dense<0.000000e+00> : vector<16x128xf32>
    %105 = tpu.matmul %102, %104, %cst_45 {dimension_numbers = #tpu.dot_dimension_numbers<[1], [0], [0], [1], [0, 0, 1, 1], [], []>} : vector<16x32xbf16>, vector<32x128xbf16>, vector<16x128xf32> -> vector<16x128xf32>
    %106 = arith.addf %74, %105 : vector<16x128xf32>
    %107 = vector.extract_strided_slice %40 {offsets = [0, 64], sizes = [16, 32], strides = [1, 1]} : vector<16x384xf32> to vector<16x32xf32>
    %108 = arith.truncf %107 : vector<16x32xf32> to vector<16x32xbf16>
    %109 = vector.extract_strided_slice %40 {offsets = [0, 192], sizes = [16, 32], strides = [1, 1]} : vector<16x384xf32> to vector<16x32xf32>
    %110 = arith.truncf %109 : vector<16x32xf32> to vector<16x32xbf16>
    %111 = vector.extract_strided_slice %40 {offsets = [0, 320], sizes = [16, 32], strides = [1, 1]} : vector<16x384xf32> to vector<16x32xf32>
    %112 = arith.truncf %111 : vector<16x32xf32> to vector<16x32xbf16>
    %cst_46 = arith.constant dense<0.000000e+00> : vector<16x16xf32>
    %113 = tpu.matmul %108, %110, %cst_46 {dimension_numbers = #tpu.dot_dimension_numbers<[1], [1], [0], [0], [0, 0, 1, 0], [], []>} : vector<16x32xbf16>, vector<16x32xbf16>, vector<16x16xf32> -> vector<16x16xf32>
    %cst_47 = arith.constant 0.176776692 : f32
    %114 = vector.broadcast %cst_47 : f32 to vector<16x16xf32>
    %115 = arith.mulf %113, %114 : vector<16x16xf32>
    %116 = vector.broadcast %12 : vector<1x16xf32> to vector<16x16xf32>
    %117 = arith.addf %115, %116 : vector<16x16xf32>
    %cst_48 = arith.constant dense<0xFF800000> : vector<16xf32>
    %118 = vector.multi_reduction <maximumf>, %117, %cst_48 [1] : vector<16x16xf32> to vector<16xf32>
    %119 = vector.shape_cast %118 : vector<16xf32> to vector<16x1xf32>
    %120 = vector.broadcast %119 : vector<16x1xf32> to vector<16x16xf32>
    %121 = arith.subf %117, %120 : vector<16x16xf32>
    %122 = math.exp %121 : vector<16x16xf32>
    %cst_49 = arith.constant dense<0.000000e+00> : vector<16xf32>
    %123 = vector.multi_reduction <add>, %122, %cst_49 [1] : vector<16x16xf32> to vector<16xf32>
    %124 = vector.shape_cast %123 : vector<16xf32> to vector<16x1xf32>
    %125 = vector.broadcast %124 : vector<16x1xf32> to vector<16x16xf32>
    %126 = arith.divf %122, %125 : vector<16x16xf32>
    %127 = vector.broadcast %8 : vector<16x1xf32> to vector<16x16xf32>
    %128 = arith.mulf %126, %127 : vector<16x16xf32>
    %cst_50 = arith.constant dense<0.000000e+00> : vector<16xf32>
    %129 = vector.multi_reduction <add>, %128, %cst_50 [0] : vector<16x16xf32> to vector<16xf32>
    %130 = vector.shape_cast %129 : vector<16xf32> to vector<1x16xf32>
    %131 = arith.addf %99, %130 : vector<1x16xf32>
    %132 = arith.truncf %126 : vector<16x16xf32> to vector<16x16xbf16>
    %cst_51 = arith.constant dense<0.000000e+00> : vector<16x32xf32>
    %133 = tpu.matmul %132, %112, %cst_51 {dimension_numbers = #tpu.dot_dimension_numbers<[1], [0], [0], [1], [0, 0, 1, 1], [], []>} : vector<16x16xbf16>, vector<16x32xbf16>, vector<16x32xf32> -> vector<16x32xf32>
    %134 = arith.truncf %133 : vector<16x32xf32> to vector<16x32xbf16>
    %c0_52 = arith.constant 0 : index
    %c64 = arith.constant 64 : index
    %c0_53 = arith.constant 0 : index
    %135 = vector.load %arg8[%c0_52, %c64, %c0_53] : memref<1x128x128xbf16, #tpu.memory_space<vmem>>, vector<1x32x128xbf16>
    %136 = vector.shape_cast %135 : vector<1x32x128xbf16> to vector<32x128xbf16>
    %cst_54 = arith.constant dense<0.000000e+00> : vector<16x128xf32>
    %137 = tpu.matmul %134, %136, %cst_54 {dimension_numbers = #tpu.dot_dimension_numbers<[1], [0], [0], [1], [0, 0, 1, 1], [], []>} : vector<16x32xbf16>, vector<32x128xbf16>, vector<16x128xf32> -> vector<16x128xf32>
    %138 = arith.addf %106, %137 : vector<16x128xf32>
    %139 = vector.extract_strided_slice %40 {offsets = [0, 96], sizes = [16, 32], strides = [1, 1]} : vector<16x384xf32> to vector<16x32xf32>
    %140 = arith.truncf %139 : vector<16x32xf32> to vector<16x32xbf16>
    %141 = vector.extract_strided_slice %40 {offsets = [0, 224], sizes = [16, 32], strides = [1, 1]} : vector<16x384xf32> to vector<16x32xf32>
    %142 = arith.truncf %141 : vector<16x32xf32> to vector<16x32xbf16>
    %143 = vector.extract_strided_slice %40 {offsets = [0, 352], sizes = [16, 32], strides = [1, 1]} : vector<16x384xf32> to vector<16x32xf32>
    %144 = arith.truncf %143 : vector<16x32xf32> to vector<16x32xbf16>
    %cst_55 = arith.constant dense<0.000000e+00> : vector<16x16xf32>
    %145 = tpu.matmul %140, %142, %cst_55 {dimension_numbers = #tpu.dot_dimension_numbers<[1], [1], [0], [0], [0, 0, 1, 0], [], []>} : vector<16x32xbf16>, vector<16x32xbf16>, vector<16x16xf32> -> vector<16x16xf32>
    %cst_56 = arith.constant 0.176776692 : f32
    %146 = vector.broadcast %cst_56 : f32 to vector<16x16xf32>
    %147 = arith.mulf %145, %146 : vector<16x16xf32>
    %148 = vector.broadcast %12 : vector<1x16xf32> to vector<16x16xf32>
    %149 = arith.addf %147, %148 : vector<16x16xf32>
    %cst_57 = arith.constant dense<0xFF800000> : vector<16xf32>
    %150 = vector.multi_reduction <maximumf>, %149, %cst_57 [1] : vector<16x16xf32> to vector<16xf32>
    %151 = vector.shape_cast %150 : vector<16xf32> to vector<16x1xf32>
    %152 = vector.broadcast %151 : vector<16x1xf32> to vector<16x16xf32>
    %153 = arith.subf %149, %152 : vector<16x16xf32>
    %154 = math.exp %153 : vector<16x16xf32>
    %cst_58 = arith.constant dense<0.000000e+00> : vector<16xf32>
    %155 = vector.multi_reduction <add>, %154, %cst_58 [1] : vector<16x16xf32> to vector<16xf32>
    %156 = vector.shape_cast %155 : vector<16xf32> to vector<16x1xf32>
    %157 = vector.broadcast %156 : vector<16x1xf32> to vector<16x16xf32>
    %158 = arith.divf %154, %157 : vector<16x16xf32>
    %159 = vector.broadcast %8 : vector<16x1xf32> to vector<16x16xf32>
    %160 = arith.mulf %158, %159 : vector<16x16xf32>
    %cst_59 = arith.constant dense<0.000000e+00> : vector<16xf32>
    %161 = vector.multi_reduction <add>, %160, %cst_59 [0] : vector<16x16xf32> to vector<16xf32>
    %162 = vector.shape_cast %161 : vector<16xf32> to vector<1x16xf32>
    %163 = arith.addf %131, %162 : vector<1x16xf32>
    %164 = arith.truncf %158 : vector<16x16xf32> to vector<16x16xbf16>
    %cst_60 = arith.constant dense<0.000000e+00> : vector<16x32xf32>
    %165 = tpu.matmul %164, %144, %cst_60 {dimension_numbers = #tpu.dot_dimension_numbers<[1], [0], [0], [1], [0, 0, 1, 1], [], []>} : vector<16x16xbf16>, vector<16x32xbf16>, vector<16x32xf32> -> vector<16x32xf32>
    %166 = arith.truncf %165 : vector<16x32xf32> to vector<16x32xbf16>
    %c0_61 = arith.constant 0 : index
    %c96 = arith.constant 96 : index
    %c0_62 = arith.constant 0 : index
    %167 = vector.load %arg8[%c0_61, %c96, %c0_62] : memref<1x128x128xbf16, #tpu.memory_space<vmem>>, vector<1x32x128xbf16>
    %168 = vector.shape_cast %167 : vector<1x32x128xbf16> to vector<32x128xbf16>
    %cst_63 = arith.constant dense<0.000000e+00> : vector<16x128xf32>
    %169 = tpu.matmul %166, %168, %cst_63 {dimension_numbers = #tpu.dot_dimension_numbers<[1], [0], [0], [1], [0, 0, 1, 1], [], []>} : vector<16x32xbf16>, vector<32x128xbf16>, vector<16x128xf32> -> vector<16x128xf32>
    %170 = arith.addf %138, %169 : vector<16x128xf32>
    %171 = arith.addf %4, %170 : vector<16x128xf32>
    %c0_64 = arith.constant 0 : index
    %c0_65 = arith.constant 0 : index
    %c0_66 = arith.constant 0 : index
    %172 = vector.load %arg9[%c0_64, %c0_65, %c0_66] : memref<1x1x128xf32, #tpu.memory_space<vmem>>, vector<1x1x128xf32>
    %173 = vector.shape_cast %172 : vector<1x1x128xf32> to vector<1x128xf32>
    %174 = vector.broadcast %173 : vector<1x128xf32> to vector<16x128xf32>
    %175 = arith.addf %171, %174 : vector<16x128xf32>
    %c0_67 = arith.constant 0 : index
    %c0_68 = arith.constant 0 : index
    %c0_69 = arith.constant 0 : index
    %176 = vector.load %arg10[%c0_67, %c0_68, %c0_69] : memref<1x1x128xf32, #tpu.memory_space<vmem>>, vector<1x1x128xf32>
    %177 = vector.shape_cast %176 : vector<1x1x128xf32> to vector<1x128xf32>
    %c0_70 = arith.constant 0 : index
    %c0_71 = arith.constant 0 : index
    %c0_72 = arith.constant 0 : index
    %178 = vector.load %arg11[%c0_70, %c0_71, %c0_72] : memref<1x1x128xf32, #tpu.memory_space<vmem>>, vector<1x1x128xf32>
    %179 = vector.shape_cast %178 : vector<1x1x128xf32> to vector<1x128xf32>
    %cst_73 = arith.constant dense<0.000000e+00> : vector<16xf32>
    %180 = vector.multi_reduction <add>, %175, %cst_73 [1] : vector<16x128xf32> to vector<16xf32>
    %181 = vector.shape_cast %180 : vector<16xf32> to vector<16x1xf32>
    %cst_74 = arith.constant 1.280000e+02 : f32
    %182 = vector.broadcast %cst_74 : f32 to vector<16x1xf32>
    %183 = arith.divf %181, %182 : vector<16x1xf32>
    %184 = vector.broadcast %183 : vector<16x1xf32> to vector<16x128xf32>
    %185 = arith.subf %175, %184 : vector<16x128xf32>
    %186 = arith.mulf %185, %185 : vector<16x128xf32>
    %cst_75 = arith.constant dense<0.000000e+00> : vector<16xf32>
    %187 = vector.multi_reduction <add>, %186, %cst_75 [1] : vector<16x128xf32> to vector<16xf32>
    %188 = vector.shape_cast %187 : vector<16xf32> to vector<16x1xf32>
    %cst_76 = arith.constant 1.280000e+02 : f32
    %189 = vector.broadcast %cst_76 : f32 to vector<16x1xf32>
    %190 = arith.divf %188, %189 : vector<16x1xf32>
    %cst_77 = arith.constant 9.99999997E-7 : f32
    %191 = vector.broadcast %cst_77 : f32 to vector<16x1xf32>
    %192 = arith.addf %190, %191 : vector<16x1xf32>
    %193 = math.rsqrt %192 : vector<16x1xf32>
    %194 = vector.broadcast %193 : vector<16x1xf32> to vector<16x128xf32>
    %195 = arith.mulf %185, %194 : vector<16x128xf32>
    %196 = vector.broadcast %177 : vector<1x128xf32> to vector<16x128xf32>
    %197 = arith.mulf %195, %196 : vector<16x128xf32>
    %198 = vector.broadcast %179 : vector<1x128xf32> to vector<16x128xf32>
    %199 = arith.addf %197, %198 : vector<16x128xf32>
    %200 = arith.truncf %199 : vector<16x128xf32> to vector<16x128xbf16>
    %c0_78 = arith.constant 0 : index
    %c0_79 = arith.constant 0 : index
    %c0_80 = arith.constant 0 : index
    %201 = vector.load %arg12[%c0_78, %c0_79, %c0_80] : memref<1x128x384xbf16, #tpu.memory_space<vmem>>, vector<1x128x384xbf16>
    %202 = vector.shape_cast %201 : vector<1x128x384xbf16> to vector<128x384xbf16>
    %cst_81 = arith.constant dense<0.000000e+00> : vector<16x384xf32>
    %203 = tpu.matmul %200, %202, %cst_81 {dimension_numbers = #tpu.dot_dimension_numbers<[1], [0], [0], [1], [0, 0, 1, 1], [], []>} : vector<16x128xbf16>, vector<128x384xbf16>, vector<16x384xf32> -> vector<16x384xf32>
    %c0_82 = arith.constant 0 : index
    %c0_83 = arith.constant 0 : index
    %c0_84 = arith.constant 0 : index
    %204 = vector.load %arg13[%c0_82, %c0_83, %c0_84] : memref<1x1x384xf32, #tpu.memory_space<vmem>>, vector<1x1x384xf32>
    %205 = vector.shape_cast %204 : vector<1x1x384xf32> to vector<1x384xf32>
    %206 = vector.broadcast %205 : vector<1x384xf32> to vector<16x384xf32>
    %207 = arith.addf %203, %206 : vector<16x384xf32>
    %208 = arith.mulf %207, %207 : vector<16x384xf32>
    %209 = arith.mulf %207, %208 : vector<16x384xf32>
    %cst_85 = arith.constant 4.471500e-02 : f32
    %210 = vector.broadcast %cst_85 : f32 to vector<16x384xf32>
    %211 = arith.mulf %210, %209 : vector<16x384xf32>
    %212 = arith.addf %207, %211 : vector<16x384xf32>
    %cst_86 = arith.constant 0.797884583 : f32
    %213 = vector.broadcast %cst_86 : f32 to vector<16x384xf32>
    %214 = arith.mulf %213, %212 : vector<16x384xf32>
    %215 = math.tanh %214 : vector<16x384xf32>
    %cst_87 = arith.constant 1.000000e+00 : f32
    %216 = vector.broadcast %cst_87 : f32 to vector<16x384xf32>
    %217 = arith.addf %216, %215 : vector<16x384xf32>
    %cst_88 = arith.constant 5.000000e-01 : f32
    %218 = vector.broadcast %cst_88 : f32 to vector<16x384xf32>
    %219 = arith.mulf %218, %217 : vector<16x384xf32>
    %220 = arith.mulf %207, %219 : vector<16x384xf32>
    %221 = arith.truncf %220 : vector<16x384xf32> to vector<16x384xbf16>
    %c0_89 = arith.constant 0 : index
    %c0_90 = arith.constant 0 : index
    %c0_91 = arith.constant 0 : index
    %222 = vector.load %arg14[%c0_89, %c0_90, %c0_91] : memref<1x384x128xbf16, #tpu.memory_space<vmem>>, vector<1x384x128xbf16>
    %223 = vector.shape_cast %222 : vector<1x384x128xbf16> to vector<384x128xbf16>
    %cst_92 = arith.constant dense<0.000000e+00> : vector<16x128xf32>
    %224 = tpu.matmul %221, %223, %cst_92 {dimension_numbers = #tpu.dot_dimension_numbers<[1], [0], [0], [1], [0, 0, 1, 1], [], []>} : vector<16x384xbf16>, vector<384x128xbf16>, vector<16x128xf32> -> vector<16x128xf32>
    %c0_93 = arith.constant 0 : index
    %c0_94 = arith.constant 0 : index
    %c0_95 = arith.constant 0 : index
    %225 = vector.load %arg15[%c0_93, %c0_94, %c0_95] : memref<1x1x128xf32, #tpu.memory_space<vmem>>, vector<1x1x128xf32>
    %226 = vector.shape_cast %225 : vector<1x1x128xf32> to vector<1x128xf32>
    %227 = vector.broadcast %226 : vector<1x128xf32> to vector<16x128xf32>
    %228 = arith.addf %224, %227 : vector<16x128xf32>
    %229 = arith.addf %175, %228 : vector<16x128xf32>
    %c0_96 = arith.constant 0 : index
    %c0_97 = arith.constant 0 : index
    %c0_98 = arith.constant 0 : index
    %230 = vector.load %arg16[%c0_96, %c0_97, %c0_98] : memref<1x16x128xf32, #tpu.memory_space<vmem>>, vector<1x16x128xf32>
    %231 = vector.shape_cast %230 : vector<1x16x128xf32> to vector<16x128xf32>
    %232 = vector.shape_cast %229 : vector<16x128xf32> to vector<1x16x128xf32>
    tpu.vector_store %arg16[%c0_96, %c0_97, %c0_98], %232 {strides = array<i32>} : memref<1x16x128xf32, #tpu.memory_space<vmem>>, vector<1x16x128xf32>,
    %c0_99 = arith.constant 0 : index
    %c0_100 = arith.constant 0 : index
    %c0_101 = arith.constant 0 : index
    %233 = vector.load %arg17[%c0_99, %c0_100, %c0_101] : memref<1x1x16xf32, #tpu.memory_space<vmem>>, vector<1x1x16xf32>
    %234 = vector.shape_cast %233 : vector<1x1x16xf32> to vector<1x16xf32>
    %235 = vector.shape_cast %163 : vector<1x16xf32> to vector<1x1x16xf32>
    tpu.vector_store %arg17[%c0_99, %c0_100, %c0_101], %235 {strides = array<i32>} : memref<1x1x16xf32, #tpu.memory_space<vmem>>, vector<1x1x16xf32>,
    return
  }
  func.func @transform_0(%arg0: i32, %arg1: i32) -> (i32, i32, i32) {
    %c0_i32 = arith.constant 0 : i32
    %c0_i32_0 = arith.constant 0 : i32
    %c0_i32_1 = arith.constant 0 : i32
    return %arg0, %c0_i32, %c0_i32_0 : i32, i32, i32
  }
  func.func @transform_1(%arg0: i32, %arg1: i32) -> (i32, i32, i32) {
    %c0_i32 = arith.constant 0 : i32
    %c0_i32_0 = arith.constant 0 : i32
    %c0_i32_1 = arith.constant 0 : i32
    return %arg0, %c0_i32, %c0_i32_0 : i32, i32, i32
  }
  func.func @transform_2(%arg0: i32, %arg1: i32) -> (i32, i32, i32) {
    %c0_i32 = arith.constant 0 : i32
    %c0_i32_0 = arith.constant 0 : i32
    %c0_i32_1 = arith.constant 0 : i32
    return %arg0, %c0_i32, %c0_i32_0 : i32, i32, i32
  }
  func.func @transform_3(%arg0: i32, %arg1: i32) -> (i32, i32, i32) {
    %c0_i32 = arith.constant 0 : i32
    %c0_i32_0 = arith.constant 0 : i32
    %c0_i32_1 = arith.constant 0 : i32
    return %arg1, %c0_i32, %c0_i32_0 : i32, i32, i32
  }
  func.func @transform_4(%arg0: i32, %arg1: i32) -> (i32, i32, i32) {
    %c0_i32 = arith.constant 0 : i32
    %c0_i32_0 = arith.constant 0 : i32
    %c0_i32_1 = arith.constant 0 : i32
    return %arg1, %c0_i32, %c0_i32_0 : i32, i32, i32
  }
  func.func @transform_5(%arg0: i32, %arg1: i32) -> (i32, i32, i32) {
    %c0_i32 = arith.constant 0 : i32
    %c0_i32_0 = arith.constant 0 : i32
    %c0_i32_1 = arith.constant 0 : i32
    return %arg1, %c0_i32, %c0_i32_0 : i32, i32, i32
  }
  func.func @transform_6(%arg0: i32, %arg1: i32) -> (i32, i32, i32) {
    %c0_i32 = arith.constant 0 : i32
    %c0_i32_0 = arith.constant 0 : i32
    %c0_i32_1 = arith.constant 0 : i32
    return %arg1, %c0_i32, %c0_i32_0 : i32, i32, i32
  }
  func.func @transform_7(%arg0: i32, %arg1: i32) -> (i32, i32, i32) {
    %c0_i32 = arith.constant 0 : i32
    %c0_i32_0 = arith.constant 0 : i32
    %c0_i32_1 = arith.constant 0 : i32
    return %arg1, %c0_i32, %c0_i32_0 : i32, i32, i32
  }
  func.func @transform_8(%arg0: i32, %arg1: i32) -> (i32, i32, i32) {
    %c0_i32 = arith.constant 0 : i32
    %c0_i32_0 = arith.constant 0 : i32
    %c0_i32_1 = arith.constant 0 : i32
    return %arg1, %c0_i32, %c0_i32_0 : i32, i32, i32
  }
  func.func @transform_9(%arg0: i32, %arg1: i32) -> (i32, i32, i32) {
    %c0_i32 = arith.constant 0 : i32
    %c0_i32_0 = arith.constant 0 : i32
    %c0_i32_1 = arith.constant 0 : i32
    return %arg1, %c0_i32, %c0_i32_0 : i32, i32, i32
  }
  func.func @transform_10(%arg0: i32, %arg1: i32) -> (i32, i32, i32) {
    %c0_i32 = arith.constant 0 : i32
    %c0_i32_0 = arith.constant 0 : i32
    %c0_i32_1 = arith.constant 0 : i32
    return %arg1, %c0_i32, %c0_i32_0 : i32, i32, i32
  }
  func.func @transform_11(%arg0: i32, %arg1: i32) -> (i32, i32, i32) {
    %c0_i32 = arith.constant 0 : i32
    %c0_i32_0 = arith.constant 0 : i32
    %c0_i32_1 = arith.constant 0 : i32
    return %arg1, %c0_i32, %c0_i32_0 : i32, i32, i32
  }
  func.func @transform_12(%arg0: i32, %arg1: i32) -> (i32, i32, i32) {
    %c0_i32 = arith.constant 0 : i32
    %c0_i32_0 = arith.constant 0 : i32
    %c0_i32_1 = arith.constant 0 : i32
    return %arg1, %c0_i32, %c0_i32_0 : i32, i32, i32
  }
  func.func @transform_13(%arg0: i32, %arg1: i32) -> (i32, i32, i32) {
    %c0_i32 = arith.constant 0 : i32
    %c0_i32_0 = arith.constant 0 : i32
    %c0_i32_1 = arith.constant 0 : i32
    return %arg1, %c0_i32, %c0_i32_0 : i32, i32, i32
  }
  func.func @transform_14(%arg0: i32, %arg1: i32) -> (i32, i32, i32) {
    %c0_i32 = arith.constant 0 : i32
    %c0_i32_0 = arith.constant 0 : i32
    %c0_i32_1 = arith.constant 0 : i32
    return %arg0, %c0_i32, %c0_i32_0 : i32, i32, i32
  }
  func.func @transform_15(%arg0: i32, %arg1: i32) -> (i32, i32, i32) {
    %c0_i32 = arith.constant 0 : i32
    %c0_i32_0 = arith.constant 0 : i32
    %c0_i32_1 = arith.constant 0 : i32
    return %arg0, %c0_i32, %c0_i32_0 : i32, i32, i32
  }
}

module attributes {stable_mosaic.version = 11 : i64} {
  func.func @_block_stack_kernel(%arg0: i32, %arg1: i32, %arg2: memref<1x16x128xf32, #tpu.memory_space<vmem>>, %arg3: memref<1x1x16xf32, #tpu.memory_space<vmem>>, %arg4: memref<1x16x1xf32, #tpu.memory_space<vmem>>, %arg5: memref<1x1x128xf32, #tpu.memory_space<vmem>>, %arg6: memref<1x1x128xf32, #tpu.memory_space<vmem>>, %arg7: memref<1x128x384xbf16, #tpu.memory_space<vmem>>, %arg8: memref<1x128x128xbf16, #tpu.memory_space<vmem>>, %arg9: memref<1x1x128xf32, #tpu.memory_space<vmem>>, %arg10: memref<1x1x128xf32, #tpu.memory_space<vmem>>, %arg11: memref<1x1x128xf32, #tpu.memory_space<vmem>>, %arg12: memref<1x128x384xbf16, #tpu.memory_space<vmem>>, %arg13: memref<1x1x384xf32, #tpu.memory_space<vmem>>, %arg14: memref<1x384x128xbf16, #tpu.memory_space<vmem>>, %arg15: memref<1x1x128xf32, #tpu.memory_space<vmem>>, %arg16: memref<1x16x128xf32, #tpu.memory_space<vmem>>, %arg17: memref<1x1x16xf32, #tpu.memory_space<vmem>>) attributes {dimension_semantics = [#tpu.dimension_semantics<parallel>, #tpu.dimension_semantics<arbitrary>], iteration_bounds = array<i64: 2, 1>, scalar_prefetch = 0 : i64, scratch_operands = 0 : i64, tpu.core_type = #tpu.core_type<tc>, window_params = [{transform_indices = @transform_0, window_bounds = array<i64: 1, 16, 128>}, {transform_indices = @transform_1, window_bounds = array<i64: 1, 1, 16>}, {transform_indices = @transform_2, window_bounds = array<i64: 1, 16, 1>}, {transform_indices = @transform_3, window_bounds = array<i64: 1, 1, 128>}, {transform_indices = @transform_4, window_bounds = array<i64: 1, 1, 128>}, {transform_indices = @transform_5, window_bounds = array<i64: 1, 128, 384>}, {transform_indices = @transform_6, window_bounds = array<i64: 1, 128, 128>}, {transform_indices = @transform_7, window_bounds = array<i64: 1, 1, 128>}, {transform_indices = @transform_8, window_bounds = array<i64: 1, 1, 128>}, {transform_indices = @transform_9, window_bounds = array<i64: 1, 1, 128>}, {transform_indices = @transform_10, window_bounds = array<i64: 1, 128, 384>}, {transform_indices = @transform_11, window_bounds = array<i64: 1, 1, 384>}, {transform_indices = @transform_12, window_bounds = array<i64: 1, 384, 128>}, {transform_indices = @transform_13, window_bounds = array<i64: 1, 1, 128>}, {transform_indices = @transform_14, window_bounds = array<i64: 1, 16, 128>}, {transform_indices = @transform_15, window_bounds = array<i64: 1, 1, 16>}]} {
    %c0_i32 = arith.constant 0 : i32
    %0 = arith.cmpi eq, %arg1, %c0_i32 : i32
    %1 = arith.extui %0 : i1 to i32
    %c0_i32_0 = arith.constant 0 : i32
    %2 = arith.cmpi ne, %1, %c0_i32_0 : i32
    scf.if %2 {
      %c0_102 = arith.constant 0 : index
      %c0_103 = arith.constant 0 : index
      %c0_104 = arith.constant 0 : index
      %236 = vector.load %arg2[%c0_102, %c0_103, %c0_104] : memref<1x16x128xf32, #tpu.memory_space<vmem>>, vector<1x16x128xf32>
      %237 = vector.shape_cast %236 : vector<1x16x128xf32> to vector<16x128xf32>
      %c0_105 = arith.constant 0 : index
      %c0_106 = arith.constant 0 : index
      %c0_107 = arith.constant 0 : index
      %238 = vector.load %arg16[%c0_105, %c0_106, %c0_107] : memref<1x16x128xf32, #tpu.memory_space<vmem>>, vector<1x16x128xf32>
      %239 = vector.shape_cast %238 : vector<1x16x128xf32> to vector<16x128xf32>
      %240 = vector.shape_cast %237 : vector<16x128xf32> to vector<1x16x128xf32>
      tpu.vector_store %arg16[%c0_105, %c0_106, %c0_107], %240 {strides = array<i32>} : memref<1x16x128xf32, #tpu.memory_space<vmem>>, vector<1x16x128xf32>,
    } else {
    }
    %c0 = arith.constant 0 : index
    %c0_1 = arith.constant 0 : index
    %c0_2 = arith.constant 0 : index
    %3 = vector.load %arg16[%c0, %c0_1, %c0_2] : memref<1x16x128xf32, #tpu.memory_space<vmem>>, vector<1x16x128xf32>
    %4 = vector.shape_cast %3 : vector<1x16x128xf32> to vector<16x128xf32>
    %c0_3 = arith.constant 0 : index
    %c0_4 = arith.constant 0 : index
    %c0_5 = arith.constant 0 : index
    %5 = vector.load %arg3[%c0_3, %c0_4, %c0_5] : memref<1x1x16xf32, #tpu.memory_space<vmem>>, vector<1x1x16xf32>
    %6 = vector.shape_cast %5 : vector<1x1x16xf32> to vector<1x16xf32>
    %c0_6 = arith.constant 0 : index
    %c0_7 = arith.constant 0 : index
    %c0_8 = arith.constant 0 : index
    %7 = vector.load %arg4[%c0_6, %c0_7, %c0_8] : memref<1x16x1xf32, #tpu.memory_space<vmem>>, vector<1x16x1xf32>
    %8 = vector.shape_cast %7 : vector<1x16x1xf32> to vector<16x1xf32>
    %cst = arith.constant 1.000000e+00 : f32
    %9 = vector.broadcast %cst : f32 to vector<1x16xf32>
    %10 = arith.subf %6, %9 : vector<1x16xf32>
    %cst_9 = arith.constant 1.000000e+09 : f32
    %11 = vector.broadcast %cst_9 : f32 to vector<1x16xf32>
    %12 = arith.mulf %10, %11 : vector<1x16xf32>
    %c0_10 = arith.constant 0 : index
    %c0_11 = arith.constant 0 : index
    %c0_12 = arith.constant 0 : index
    %13 = vector.load %arg5[%c0_10, %c0_11, %c0_12] : memref<1x1x128xf32, #tpu.memory_space<vmem>>, vector<1x1x128xf32>
    %14 = vector.shape_cast %13 : vector<1x1x128xf32> to vector<1x128xf32>
    %c0_13 = arith.constant 0 : index
    %c0_14 = arith.constant 0 : index
    %c0_15 = arith.constant 0 : index
    %15 = vector.load %arg6[%c0_13, %c0_14, %c0_15] : memref<1x1x128xf32, #tpu.memory_space<vmem>>, vector<1x1x128xf32>
    %16 = vector.shape_cast %15 : vector<1x1x128xf32> to vector<1x128xf32>
    %cst_16 = arith.constant dense<0.000000e+00> : vector<16xf32>
    %17 = vector.multi_reduction <add>, %4, %cst_16 [1] : vector<16x128xf32> to vector<16xf32>
    %18 = vector.shape_cast %17 : vector<16xf32> to vector<16x1xf32>
    %cst_17 = arith.constant 1.280000e+02 : f32
    %19 = vector.broadcast %cst_17 : f32 to vector<16x1xf32>
    %20 = arith.divf %18, %19 : vector<16x1xf32>
    %21 = vector.broadcast %20 : vector<16x1xf32> to vector<16x128xf32>
    %22 = arith.subf %4, %21 : vector<16x128xf32>
    %23 = arith.mulf %22, %22 : vector<16x128xf32>
    %cst_18 = arith.constant dense<0.000000e+00> : vector<16xf32>
    %24 = vector.multi_reduction <add>, %23, %cst_18 [1] : vector<16x128xf32> to vector<16xf32>
    %25 = vector.shape_cast %24 : vector<16xf32> to vector<16x1xf32>
    %cst_19 = arith.constant 1.280000e+02 : f32
    %26 = vector.broadcast %cst_19 : f32 to vector<16x1xf32>
    %27 = arith.divf %25, %26 : vector<16x1xf32>
    %cst_20 = arith.constant 9.99999997E-7 : f32
    %28 = vector.broadcast %cst_20 : f32 to vector<16x1xf32>
    %29 = arith.addf %27, %28 : vector<16x1xf32>
    %30 = math.rsqrt %29 : vector<16x1xf32>
    %31 = vector.broadcast %30 : vector<16x1xf32> to vector<16x128xf32>
    %32 = arith.mulf %22, %31 : vector<16x128xf32>
    %33 = vector.broadcast %14 : vector<1x128xf32> to vector<16x128xf32>
    %34 = arith.mulf %32, %33 : vector<16x128xf32>
    %35 = vector.broadcast %16 : vector<1x128xf32> to vector<16x128xf32>
    %36 = arith.addf %34, %35 : vector<16x128xf32>
    %37 = arith.truncf %36 : vector<16x128xf32> to vector<16x128xbf16>
    %c0_21 = arith.constant 0 : index
    %c0_22 = arith.constant 0 : index
    %c0_23 = arith.constant 0 : index
    %38 = vector.load %arg7[%c0_21, %c0_22, %c0_23] : memref<1x128x384xbf16, #tpu.memory_space<vmem>>, vector<1x128x384xbf16>
    %39 = vector.shape_cast %38 : vector<1x128x384xbf16> to vector<128x384xbf16>
    %cst_24 = arith.constant dense<0.000000e+00> : vector<16x384xf32>
    %40 = tpu.matmul %37, %39, %cst_24 {dimension_numbers = #tpu.dot_dimension_numbers<[1], [0], [0], [1], [0, 0, 1, 1], [], []>} : vector<16x128xbf16>, vector<128x384xbf16>, vector<16x384xf32> -> vector<16x384xf32>
    %cst_25 = arith.constant 0.000000e+00 : f32
    %41 = vector.broadcast %cst_25 : f32 to vector<16x128xf32>
    %cst_26 = arith.constant 0.000000e+00 : f32
    %42 = vector.broadcast %cst_26 : f32 to vector<1x16xf32>
    %43 = vector.extract_strided_slice %40 {offsets = [0, 0], sizes = [16, 32], strides = [1, 1]} : vector<16x384xf32> to vector<16x32xf32>
    %44 = arith.truncf %43 : vector<16x32xf32> to vector<16x32xbf16>
    %45 = vector.extract_strided_slice %40 {offsets = [0, 128], sizes = [16, 32], strides = [1, 1]} : vector<16x384xf32> to vector<16x32xf32>
    %46 = arith.truncf %45 : vector<16x32xf32> to vector<16x32xbf16>
    %47 = vector.extract_strided_slice %40 {offsets = [0, 256], sizes = [16, 32], strides = [1, 1]} : vector<16x384xf32> to vector<16x32xf32>
    %48 = arith.truncf %47 : vector<16x32xf32> to vector<16x32xbf16>
    %cst_27 = arith.constant dense<0.000000e+00> : vector<16x16xf32>
    %49 = tpu.matmul %44, %46, %cst_27 {dimension_numbers = #tpu.dot_dimension_numbers<[1], [1], [0], [0], [0, 0, 1, 0], [], []>} : vector<16x32xbf16>, vector<16x32xbf16>, vector<16x16xf32> -> vector<16x16xf32>
    %cst_28 = arith.constant 0.176776692 : f32
    %50 = vector.broadcast %cst_28 : f32 to vector<16x16xf32>
    %51 = arith.mulf %49, %50 : vector<16x16xf32>
    %52 = vector.broadcast %12 : vector<1x16xf32> to vector<16x16xf32>
    %53 = arith.addf %51, %52 : vector<16x16xf32>
    %cst_29 = arith.constant dense<0xFF800000> : vector<16xf32>
    %54 = vector.multi_reduction <maximumf>, %53, %cst_29 [1] : vector<16x16xf32> to vector<16xf32>
    %55 = vector.shape_cast %54 : vector<16xf32> to vector<16x1xf32>
    %56 = vector.broadcast %55 : vector<16x1xf32> to vector<16x16xf32>
    %57 = arith.subf %53, %56 : vector<16x16xf32>
    %58 = math.exp %57 : vector<16x16xf32>
    %cst_30 = arith.constant dense<0.000000e+00> : vector<16xf32>
    %59 = vector.multi_reduction <add>, %58, %cst_30 [1] : vector<16x16xf32> to vector<16xf32>
    %60 = vector.shape_cast %59 : vector<16xf32> to vector<16x1xf32>
    %61 = vector.broadcast %60 : vector<16x1xf32> to vector<16x16xf32>
    %62 = arith.divf %58, %61 : vector<16x16xf32>
    %63 = vector.broadcast %8 : vector<16x1xf32> to vector<16x16xf32>
    %64 = arith.mulf %62, %63 : vector<16x16xf32>
    %cst_31 = arith.constant dense<0.000000e+00> : vector<16xf32>
    %65 = vector.multi_reduction <add>, %64, %cst_31 [0] : vector<16x16xf32> to vector<16xf32>
    %66 = vector.shape_cast %65 : vector<16xf32> to vector<1x16xf32>
    %67 = arith.addf %42, %66 : vector<1x16xf32>
    %68 = arith.truncf %62 : vector<16x16xf32> to vector<16x16xbf16>
    %cst_32 = arith.constant dense<0.000000e+00> : vector<16x32xf32>
    %69 = tpu.matmul %68, %48, %cst_32 {dimension_numbers = #tpu.dot_dimension_numbers<[1], [0], [0], [1], [0, 0, 1, 1], [], []>} : vector<16x16xbf16>, vector<16x32xbf16>, vector<16x32xf32> -> vector<16x32xf32>
    %70 = arith.truncf %69 : vector<16x32xf32> to vector<16x32xbf16>
    %c0_33 = arith.constant 0 : index
    %c0_34 = arith.constant 0 : index
    %c0_35 = arith.constant 0 : index
    %71 = vector.load %arg8[%c0_33, %c0_34, %c0_35] : memref<1x128x128xbf16, #tpu.memory_space<vmem>>, vector<1x32x128xbf16>
    %72 = vector.shape_cast %71 : vector<1x32x128xbf16> to vector<32x128xbf16>
    %cst_36 = arith.constant dense<0.000000e+00> : vector<16x128xf32>
    %73 = tpu.matmul %70, %72, %cst_36 {dimension_numbers = #tpu.dot_dimension_numbers<[1], [0], [0], [1], [0, 0, 1, 1], [], []>} : vector<16x32xbf16>, vector<32x128xbf16>, vector<16x128xf32> -> vector<16x128xf32>
    %74 = arith.addf %41, %73 : vector<16x128xf32>
    %75 = vector.extract_strided_slice %40 {offsets = [0, 32], sizes = [16, 32], strides = [1, 1]} : vector<16x384xf32> to vector<16x32xf32>
    %76 = arith.truncf %75 : vector<16x32xf32> to vector<16x32xbf16>
    %77 = vector.extract_strided_slice %40 {offsets = [0, 160], sizes = [16, 32], strides = [1, 1]} : vector<16x384xf32> to vector<16x32xf32>
    %78 = arith.truncf %77 : vector<16x32xf32> to vector<16x32xbf16>
    %79 = vector.extract_strided_slice %40 {offsets = [0, 288], sizes = [16, 32], strides = [1, 1]} : vector<16x384xf32> to vector<16x32xf32>
    %80 = arith.truncf %79 : vector<16x32xf32> to vector<16x32xbf16>
    %cst_37 = arith.constant dense<0.000000e+00> : vector<16x16xf32>
    %81 = tpu.matmul %76, %78, %cst_37 {dimension_numbers = #tpu.dot_dimension_numbers<[1], [1], [0], [0], [0, 0, 1, 0], [], []>} : vector<16x32xbf16>, vector<16x32xbf16>, vector<16x16xf32> -> vector<16x16xf32>
    %cst_38 = arith.constant 0.176776692 : f32
    %82 = vector.broadcast %cst_38 : f32 to vector<16x16xf32>
    %83 = arith.mulf %81, %82 : vector<16x16xf32>
    %84 = vector.broadcast %12 : vector<1x16xf32> to vector<16x16xf32>
    %85 = arith.addf %83, %84 : vector<16x16xf32>
    %cst_39 = arith.constant dense<0xFF800000> : vector<16xf32>
    %86 = vector.multi_reduction <maximumf>, %85, %cst_39 [1] : vector<16x16xf32> to vector<16xf32>
    %87 = vector.shape_cast %86 : vector<16xf32> to vector<16x1xf32>
    %88 = vector.broadcast %87 : vector<16x1xf32> to vector<16x16xf32>
    %89 = arith.subf %85, %88 : vector<16x16xf32>
    %90 = math.exp %89 : vector<16x16xf32>
    %cst_40 = arith.constant dense<0.000000e+00> : vector<16xf32>
    %91 = vector.multi_reduction <add>, %90, %cst_40 [1] : vector<16x16xf32> to vector<16xf32>
    %92 = vector.shape_cast %91 : vector<16xf32> to vector<16x1xf32>
    %93 = vector.broadcast %92 : vector<16x1xf32> to vector<16x16xf32>
    %94 = arith.divf %90, %93 : vector<16x16xf32>
    %95 = vector.broadcast %8 : vector<16x1xf32> to vector<16x16xf32>
    %96 = arith.mulf %94, %95 : vector<16x16xf32>
    %cst_41 = arith.constant dense<0.000000e+00> : vector<16xf32>
    %97 = vector.multi_reduction <add>, %96, %cst_41 [0] : vector<16x16xf32> to vector<16xf32>
    %98 = vector.shape_cast %97 : vector<16xf32> to vector<1x16xf32>
    %99 = arith.addf %67, %98 : vector<1x16xf32>
    %100 = arith.truncf %94 : vector<16x16xf32> to vector<16x16xbf16>
    %cst_42 = arith.constant dense<0.000000e+00> : vector<16x32xf32>
    %101 = tpu.matmul %100, %80, %cst_42 {dimension_numbers = #tpu.dot_dimension_numbers<[1], [0], [0], [1], [0, 0, 1, 1], [], []>} : vector<16x16xbf16>, vector<16x32xbf16>, vector<16x32xf32> -> vector<16x32xf32>
    %102 = arith.truncf %101 : vector<16x32xf32> to vector<16x32xbf16>
    %c0_43 = arith.constant 0 : index
    %c32 = arith.constant 32 : index
    %c0_44 = arith.constant 0 : index
    %103 = vector.load %arg8[%c0_43, %c32, %c0_44] : memref<1x128x128xbf16, #tpu.memory_space<vmem>>, vector<1x32x128xbf16>
    %104 = vector.shape_cast %103 : vector<1x32x128xbf16> to vector<32x128xbf16>
    %cst_45 = arith.constant dense<0.000000e+00> : vector<16x128xf32>
    %105 = tpu.matmul %102, %104, %cst_45 {dimension_numbers = #tpu.dot_dimension_numbers<[1], [0], [0], [1], [0, 0, 1, 1], [], []>} : vector<16x32xbf16>, vector<32x128xbf16>, vector<16x128xf32> -> vector<16x128xf32>
    %106 = arith.addf %74, %105 : vector<16x128xf32>
    %107 = vector.extract_strided_slice %40 {offsets = [0, 64], sizes = [16, 32], strides = [1, 1]} : vector<16x384xf32> to vector<16x32xf32>
    %108 = arith.truncf %107 : vector<16x32xf32> to vector<16x32xbf16>
    %109 = vector.extract_strided_slice %40 {offsets = [0, 192], sizes = [16, 32], strides = [1, 1]} : vector<16x384xf32> to vector<16x32xf32>
    %110 = arith.truncf %109 : vector<16x32xf32> to vector<16x32xbf16>
    %111 = vector.extract_strided_slice %40 {offsets = [0, 320], sizes = [16, 32], strides = [1, 1]} : vector<16x384xf32> to vector<16x32xf32>
    %112 = arith.truncf %111 : vector<16x32xf32> to vector<16x32xbf16>
    %cst_46 = arith.constant dense<0.000000e+00> : vector<16x16xf32>
    %113 = tpu.matmul %108, %110, %cst_46 {dimension_numbers = #tpu.dot_dimension_numbers<[1], [1], [0], [0], [0, 0, 1, 0], [], []>} : vector<16x32xbf16>, vector<16x32xbf16>, vector<16x16xf32> -> vector<16x16xf32>
    %cst_47 = arith.constant 0.176776692 : f32
    %114 = vector.broadcast %cst_47 : f32 to vector<16x16xf32>
    %115 = arith.mulf %113, %114 : vector<16x16xf32>
    %116 = vector.broadcast %12 : vector<1x16xf32> to vector<16x16xf32>
    %117 = arith.addf %115, %116 : vector<16x16xf32>
    %cst_48 = arith.constant dense<0xFF800000> : vector<16xf32>
    %118 = vector.multi_reduction <maximumf>, %117, %cst_48 [1] : vector<16x16xf32> to vector<16xf32>
    %119 = vector.shape_cast %118 : vector<16xf32> to vector<16x1xf32>
    %120 = vector.broadcast %119 : vector<16x1xf32> to vector<16x16xf32>
    %121 = arith.subf %117, %120 : vector<16x16xf32>
    %122 = math.exp %121 : vector<16x16xf32>
    %cst_49 = arith.constant dense<0.000000e+00> : vector<16xf32>
    %123 = vector.multi_reduction <add>, %122, %cst_49 [1] : vector<16x16xf32> to vector<16xf32>
    %124 = vector.shape_cast %123 : vector<16xf32> to vector<16x1xf32>
    %125 = vector.broadcast %124 : vector<16x1xf32> to vector<16x16xf32>
    %126 = arith.divf %122, %125 : vector<16x16xf32>
    %127 = vector.broadcast %8 : vector<16x1xf32> to vector<16x16xf32>
    %128 = arith.mulf %126, %127 : vector<16x16xf32>
    %cst_50 = arith.constant dense<0.000000e+00> : vector<16xf32>
    %129 = vector.multi_reduction <add>, %128, %cst_50 [0] : vector<16x16xf32> to vector<16xf32>
    %130 = vector.shape_cast %129 : vector<16xf32> to vector<1x16xf32>
    %131 = arith.addf %99, %130 : vector<1x16xf32>
    %132 = arith.truncf %126 : vector<16x16xf32> to vector<16x16xbf16>
    %cst_51 = arith.constant dense<0.000000e+00> : vector<16x32xf32>
    %133 = tpu.matmul %132, %112, %cst_51 {dimension_numbers = #tpu.dot_dimension_numbers<[1], [0], [0], [1], [0, 0, 1, 1], [], []>} : vector<16x16xbf16>, vector<16x32xbf16>, vector<16x32xf32> -> vector<16x32xf32>
    %134 = arith.truncf %133 : vector<16x32xf32> to vector<16x32xbf16>
    %c0_52 = arith.constant 0 : index
    %c64 = arith.constant 64 : index
    %c0_53 = arith.constant 0 : index
    %135 = vector.load %arg8[%c0_52, %c64, %c0_53] : memref<1x128x128xbf16, #tpu.memory_space<vmem>>, vector<1x32x128xbf16>
    %136 = vector.shape_cast %135 : vector<1x32x128xbf16> to vector<32x128xbf16>
    %cst_54 = arith.constant dense<0.000000e+00> : vector<16x128xf32>
    %137 = tpu.matmul %134, %136, %cst_54 {dimension_numbers = #tpu.dot_dimension_numbers<[1], [0], [0], [1], [0, 0, 1, 1], [], []>} : vector<16x32xbf16>, vector<32x128xbf16>, vector<16x128xf32> -> vector<16x128xf32>
    %138 = arith.addf %106, %137 : vector<16x128xf32>
    %139 = vector.extract_strided_slice %40 {offsets = [0, 96], sizes = [16, 32], strides = [1, 1]} : vector<16x384xf32> to vector<16x32xf32>
    %140 = arith.truncf %139 : vector<16x32xf32> to vector<16x32xbf16>
    %141 = vector.extract_strided_slice %40 {offsets = [0, 224], sizes = [16, 32], strides = [1, 1]} : vector<16x384xf32> to vector<16x32xf32>
    %142 = arith.truncf %141 : vector<16x32xf32> to vector<16x32xbf16>
    %143 = vector.extract_strided_slice %40 {offsets = [0, 352], sizes = [16, 32], strides = [1, 1]} : vector<16x384xf32> to vector<16x32xf32>
    %144 = arith.truncf %143 : vector<16x32xf32> to vector<16x32xbf16>
    %cst_55 = arith.constant dense<0.000000e+00> : vector<16x16xf32>
    %145 = tpu.matmul %140, %142, %cst_55 {dimension_numbers = #tpu.dot_dimension_numbers<[1], [1], [0], [0], [0, 0, 1, 0], [], []>} : vector<16x32xbf16>, vector<16x32xbf16>, vector<16x16xf32> -> vector<16x16xf32>
    %cst_56 = arith.constant 0.176776692 : f32
    %146 = vector.broadcast %cst_56 : f32 to vector<16x16xf32>
    %147 = arith.mulf %145, %146 : vector<16x16xf32>
    %148 = vector.broadcast %12 : vector<1x16xf32> to vector<16x16xf32>
    %149 = arith.addf %147, %148 : vector<16x16xf32>
    %cst_57 = arith.constant dense<0xFF800000> : vector<16xf32>
    %150 = vector.multi_reduction <maximumf>, %149, %cst_57 [1] : vector<16x16xf32> to vector<16xf32>
    %151 = vector.shape_cast %150 : vector<16xf32> to vector<16x1xf32>
    %152 = vector.broadcast %151 : vector<16x1xf32> to vector<16x16xf32>
    %153 = arith.subf %149, %152 : vector<16x16xf32>
    %154 = math.exp %153 : vector<16x16xf32>
    %cst_58 = arith.constant dense<0.000000e+00> : vector<16xf32>
    %155 = vector.multi_reduction <add>, %154, %cst_58 [1] : vector<16x16xf32> to vector<16xf32>
    %156 = vector.shape_cast %155 : vector<16xf32> to vector<16x1xf32>
    %157 = vector.broadcast %156 : vector<16x1xf32> to vector<16x16xf32>
    %158 = arith.divf %154, %157 : vector<16x16xf32>
    %159 = vector.broadcast %8 : vector<16x1xf32> to vector<16x16xf32>
    %160 = arith.mulf %158, %159 : vector<16x16xf32>
    %cst_59 = arith.constant dense<0.000000e+00> : vector<16xf32>
    %161 = vector.multi_reduction <add>, %160, %cst_59 [0] : vector<16x16xf32> to vector<16xf32>
    %162 = vector.shape_cast %161 : vector<16xf32> to vector<1x16xf32>
    %163 = arith.addf %131, %162 : vector<1x16xf32>
    %164 = arith.truncf %158 : vector<16x16xf32> to vector<16x16xbf16>
    %cst_60 = arith.constant dense<0.000000e+00> : vector<16x32xf32>
    %165 = tpu.matmul %164, %144, %cst_60 {dimension_numbers = #tpu.dot_dimension_numbers<[1], [0], [0], [1], [0, 0, 1, 1], [], []>} : vector<16x16xbf16>, vector<16x32xbf16>, vector<16x32xf32> -> vector<16x32xf32>
    %166 = arith.truncf %165 : vector<16x32xf32> to vector<16x32xbf16>
    %c0_61 = arith.constant 0 : index
    %c96 = arith.constant 96 : index
    %c0_62 = arith.constant 0 : index
    %167 = vector.load %arg8[%c0_61, %c96, %c0_62] : memref<1x128x128xbf16, #tpu.memory_space<vmem>>, vector<1x32x128xbf16>
    %168 = vector.shape_cast %167 : vector<1x32x128xbf16> to vector<32x128xbf16>
    %cst_63 = arith.constant dense<0.000000e+00> : vector<16x128xf32>
    %169 = tpu.matmul %166, %168, %cst_63 {dimension_numbers = #tpu.dot_dimension_numbers<[1], [0], [0], [1], [0, 0, 1, 1], [], []>} : vector<16x32xbf16>, vector<32x128xbf16>, vector<16x128xf32> -> vector<16x128xf32>
    %170 = arith.addf %138, %169 : vector<16x128xf32>
    %171 = arith.addf %4, %170 : vector<16x128xf32>
    %c0_64 = arith.constant 0 : index
    %c0_65 = arith.constant 0 : index
    %c0_66 = arith.constant 0 : index
    %172 = vector.load %arg9[%c0_64, %c0_65, %c0_66] : memref<1x1x128xf32, #tpu.memory_space<vmem>>, vector<1x1x128xf32>
    %173 = vector.shape_cast %172 : vector<1x1x128xf32> to vector<1x128xf32>
    %174 = vector.broadcast %173 : vector<1x128xf32> to vector<16x128xf32>
    %175 = arith.addf %171, %174 : vector<16x128xf32>
    %c0_67 = arith.constant 0 : index
    %c0_68 = arith.constant 0 : index
    %c0_69 = arith.constant 0 : index
    %176 = vector.load %arg10[%c0_67, %c0_68, %c0_69] : memref<1x1x128xf32, #tpu.memory_space<vmem>>, vector<1x1x128xf32>
    %177 = vector.shape_cast %176 : vector<1x1x128xf32> to vector<1x128xf32>
    %c0_70 = arith.constant 0 : index
    %c0_71 = arith.constant 0 : index
    %c0_72 = arith.constant 0 : index
    %178 = vector.load %arg11[%c0_70, %c0_71, %c0_72] : memref<1x1x128xf32, #tpu.memory_space<vmem>>, vector<1x1x128xf32>
    %179 = vector.shape_cast %178 : vector<1x1x128xf32> to vector<1x128xf32>
    %cst_73 = arith.constant dense<0.000000e+00> : vector<16xf32>
    %180 = vector.multi_reduction <add>, %175, %cst_73 [1] : vector<16x128xf32> to vector<16xf32>
    %181 = vector.shape_cast %180 : vector<16xf32> to vector<16x1xf32>
    %cst_74 = arith.constant 1.280000e+02 : f32
    %182 = vector.broadcast %cst_74 : f32 to vector<16x1xf32>
    %183 = arith.divf %181, %182 : vector<16x1xf32>
    %184 = vector.broadcast %183 : vector<16x1xf32> to vector<16x128xf32>
    %185 = arith.subf %175, %184 : vector<16x128xf32>
    %186 = arith.mulf %185, %185 : vector<16x128xf32>
    %cst_75 = arith.constant dense<0.000000e+00> : vector<16xf32>
    %187 = vector.multi_reduction <add>, %186, %cst_75 [1] : vector<16x128xf32> to vector<16xf32>
    %188 = vector.shape_cast %187 : vector<16xf32> to vector<16x1xf32>
    %cst_76 = arith.constant 1.280000e+02 : f32
    %189 = vector.broadcast %cst_76 : f32 to vector<16x1xf32>
    %190 = arith.divf %188, %189 : vector<16x1xf32>
    %cst_77 = arith.constant 9.99999997E-7 : f32
    %191 = vector.broadcast %cst_77 : f32 to vector<16x1xf32>
    %192 = arith.addf %190, %191 : vector<16x1xf32>
    %193 = math.rsqrt %192 : vector<16x1xf32>
    %194 = vector.broadcast %193 : vector<16x1xf32> to vector<16x128xf32>
    %195 = arith.mulf %185, %194 : vector<16x128xf32>
    %196 = vector.broadcast %177 : vector<1x128xf32> to vector<16x128xf32>
    %197 = arith.mulf %195, %196 : vector<16x128xf32>
    %198 = vector.broadcast %179 : vector<1x128xf32> to vector<16x128xf32>
    %199 = arith.addf %197, %198 : vector<16x128xf32>
    %200 = arith.truncf %199 : vector<16x128xf32> to vector<16x128xbf16>
    %c0_78 = arith.constant 0 : index
    %c0_79 = arith.constant 0 : index
    %c0_80 = arith.constant 0 : index
    %201 = vector.load %arg12[%c0_78, %c0_79, %c0_80] : memref<1x128x384xbf16, #tpu.memory_space<vmem>>, vector<1x128x384xbf16>
    %202 = vector.shape_cast %201 : vector<1x128x384xbf16> to vector<128x384xbf16>
    %cst_81 = arith.constant dense<0.000000e+00> : vector<16x384xf32>
    %203 = tpu.matmul %200, %202, %cst_81 {dimension_numbers = #tpu.dot_dimension_numbers<[1], [0], [0], [1], [0, 0, 1, 1], [], []>} : vector<16x128xbf16>, vector<128x384xbf16>, vector<16x384xf32> -> vector<16x384xf32>
    %c0_82 = arith.constant 0 : index
    %c0_83 = arith.constant 0 : index
    %c0_84 = arith.constant 0 : index
    %204 = vector.load %arg13[%c0_82, %c0_83, %c0_84] : memref<1x1x384xf32, #tpu.memory_space<vmem>>, vector<1x1x384xf32>
    %205 = vector.shape_cast %204 : vector<1x1x384xf32> to vector<1x384xf32>
    %206 = vector.broadcast %205 : vector<1x384xf32> to vector<16x384xf32>
    %207 = arith.addf %203, %206 : vector<16x384xf32>
    %208 = arith.mulf %207, %207 : vector<16x384xf32>
    %209 = arith.mulf %207, %208 : vector<16x384xf32>
    %cst_85 = arith.constant 4.471500e-02 : f32
    %210 = vector.broadcast %cst_85 : f32 to vector<16x384xf32>
    %211 = arith.mulf %210, %209 : vector<16x384xf32>
    %212 = arith.addf %207, %211 : vector<16x384xf32>
    %cst_86 = arith.constant 0.797884583 : f32
    %213 = vector.broadcast %cst_86 : f32 to vector<16x384xf32>
    %214 = arith.mulf %213, %212 : vector<16x384xf32>
    %215 = math.tanh %214 : vector<16x384xf32>
    %cst_87 = arith.constant 1.000000e+00 : f32
    %216 = vector.broadcast %cst_87 : f32 to vector<16x384xf32>
    %217 = arith.addf %216, %215 : vector<16x384xf32>
    %cst_88 = arith.constant 5.000000e-01 : f32
    %218 = vector.broadcast %cst_88 : f32 to vector<16x384xf32>
    %219 = arith.mulf %218, %217 : vector<16x384xf32>
    %220 = arith.mulf %207, %219 : vector<16x384xf32>
    %221 = arith.truncf %220 : vector<16x384xf32> to vector<16x384xbf16>
    %c0_89 = arith.constant 0 : index
    %c0_90 = arith.constant 0 : index
    %c0_91 = arith.constant 0 : index
    %222 = vector.load %arg14[%c0_89, %c0_90, %c0_91] : memref<1x384x128xbf16, #tpu.memory_space<vmem>>, vector<1x384x128xbf16>
    %223 = vector.shape_cast %222 : vector<1x384x128xbf16> to vector<384x128xbf16>
    %cst_92 = arith.constant dense<0.000000e+00> : vector<16x128xf32>
    %224 = tpu.matmul %221, %223, %cst_92 {dimension_numbers = #tpu.dot_dimension_numbers<[1], [0], [0], [1], [0, 0, 1, 1], [], []>} : vector<16x384xbf16>, vector<384x128xbf16>, vector<16x128xf32> -> vector<16x128xf32>
    %c0_93 = arith.constant 0 : index
    %c0_94 = arith.constant 0 : index
    %c0_95 = arith.constant 0 : index
    %225 = vector.load %arg15[%c0_93, %c0_94, %c0_95] : memref<1x1x128xf32, #tpu.memory_space<vmem>>, vector<1x1x128xf32>
    %226 = vector.shape_cast %225 : vector<1x1x128xf32> to vector<1x128xf32>
    %227 = vector.broadcast %226 : vector<1x128xf32> to vector<16x128xf32>
    %228 = arith.addf %224, %227 : vector<16x128xf32>
    %229 = arith.addf %175, %228 : vector<16x128xf32>
    %c0_96 = arith.constant 0 : index
    %c0_97 = arith.constant 0 : index
    %c0_98 = arith.constant 0 : index
    %230 = vector.load %arg16[%c0_96, %c0_97, %c0_98] : memref<1x16x128xf32, #tpu.memory_space<vmem>>, vector<1x16x128xf32>
    %231 = vector.shape_cast %230 : vector<1x16x128xf32> to vector<16x128xf32>
    %232 = vector.shape_cast %229 : vector<16x128xf32> to vector<1x16x128xf32>
    tpu.vector_store %arg16[%c0_96, %c0_97, %c0_98], %232 {strides = array<i32>} : memref<1x16x128xf32, #tpu.memory_space<vmem>>, vector<1x16x128xf32>,
    %c0_99 = arith.constant 0 : index
    %c0_100 = arith.constant 0 : index
    %c0_101 = arith.constant 0 : index
    %233 = vector.load %arg17[%c0_99, %c0_100, %c0_101] : memref<1x1x16xf32, #tpu.memory_space<vmem>>, vector<1x1x16xf32>
    %234 = vector.shape_cast %233 : vector<1x1x16xf32> to vector<1x16xf32>
    %235 = vector.shape_cast %163 : vector<1x16xf32> to vector<1x1x16xf32>
    tpu.vector_store %arg17[%c0_99, %c0_100, %c0_101], %235 {strides = array<i32>} : memref<1x1x16xf32, #tpu.memory_space<vmem>>, vector<1x1x16xf32>,
    return
  }
  func.func @transform_0(%arg0: i32, %arg1: i32) -> (i32, i32, i32) {
    %c0_i32 = arith.constant 0 : i32
    %c0_i32_0 = arith.constant 0 : i32
    %c0_i32_1 = arith.constant 0 : i32
    return %arg0, %c0_i32, %c0_i32_0 : i32, i32, i32
  }
  func.func @transform_1(%arg0: i32, %arg1: i32) -> (i32, i32, i32) {
    %c0_i32 = arith.constant 0 : i32
    %c0_i32_0 = arith.constant 0 : i32
    %c0_i32_1 = arith.constant 0 : i32
    return %arg0, %c0_i32, %c0_i32_0 : i32, i32, i32
  }
  func.func @transform_2(%arg0: i32, %arg1: i32) -> (i32, i32, i32) {
    %c0_i32 = arith.constant 0 : i32
    %c0_i32_0 = arith.constant 0 : i32
    %c0_i32_1 = arith.constant 0 : i32
    return %arg0, %c0_i32, %c0_i32_0 : i32, i32, i32
  }
  func.func @transform_3(%arg0: i32, %arg1: i32) -> (i32, i32, i32) {
    %c0_i32 = arith.constant 0 : i32
    %c0_i32_0 = arith.constant 0 : i32
    %c0_i32_1 = arith.constant 0 : i32
    return %arg1, %c0_i32, %c0_i32_0 : i32, i32, i32
  }
  func.func @transform_4(%arg0: i32, %arg1: i32) -> (i32, i32, i32) {
    %c0_i32 = arith.constant 0 : i32
    %c0_i32_0 = arith.constant 0 : i32
    %c0_i32_1 = arith.constant 0 : i32
    return %arg1, %c0_i32, %c0_i32_0 : i32, i32, i32
  }
  func.func @transform_5(%arg0: i32, %arg1: i32) -> (i32, i32, i32) {
    %c0_i32 = arith.constant 0 : i32
    %c0_i32_0 = arith.constant 0 : i32
    %c0_i32_1 = arith.constant 0 : i32
    return %arg1, %c0_i32, %c0_i32_0 : i32, i32, i32
  }
  func.func @transform_6(%arg0: i32, %arg1: i32) -> (i32, i32, i32) {
    %c0_i32 = arith.constant 0 : i32
    %c0_i32_0 = arith.constant 0 : i32
    %c0_i32_1 = arith.constant 0 : i32
    return %arg1, %c0_i32, %c0_i32_0 : i32, i32, i32
  }
  func.func @transform_7(%arg0: i32, %arg1: i32) -> (i32, i32, i32) {
    %c0_i32 = arith.constant 0 : i32
    %c0_i32_0 = arith.constant 0 : i32
    %c0_i32_1 = arith.constant 0 : i32
    return %arg1, %c0_i32, %c0_i32_0 : i32, i32, i32
  }
  func.func @transform_8(%arg0: i32, %arg1: i32) -> (i32, i32, i32) {
    %c0_i32 = arith.constant 0 : i32
    %c0_i32_0 = arith.constant 0 : i32
    %c0_i32_1 = arith.constant 0 : i32
    return %arg1, %c0_i32, %c0_i32_0 : i32, i32, i32
  }
  func.func @transform_9(%arg0: i32, %arg1: i32) -> (i32, i32, i32) {
    %c0_i32 = arith.constant 0 : i32
    %c0_i32_0 = arith.constant 0 : i32
    %c0_i32_1 = arith.constant 0 : i32
    return %arg1, %c0_i32, %c0_i32_0 : i32, i32, i32
  }
  func.func @transform_10(%arg0: i32, %arg1: i32) -> (i32, i32, i32) {
    %c0_i32 = arith.constant 0 : i32
    %c0_i32_0 = arith.constant 0 : i32
    %c0_i32_1 = arith.constant 0 : i32
    return %arg1, %c0_i32, %c0_i32_0 : i32, i32, i32
  }
  func.func @transform_11(%arg0: i32, %arg1: i32) -> (i32, i32, i32) {
    %c0_i32 = arith.constant 0 : i32
    %c0_i32_0 = arith.constant 0 : i32
    %c0_i32_1 = arith.constant 0 : i32
    return %arg1, %c0_i32, %c0_i32_0 : i32, i32, i32
  }
  func.func @transform_12(%arg0: i32, %arg1: i32) -> (i32, i32, i32) {
    %c0_i32 = arith.constant 0 : i32
    %c0_i32_0 = arith.constant 0 : i32
    %c0_i32_1 = arith.constant 0 : i32
    return %arg1, %c0_i32, %c0_i32_0 : i32, i32, i32
  }
  func.func @transform_13(%arg0: i32, %arg1: i32) -> (i32, i32, i32) {
    %c0_i32 = arith.constant 0 : i32
    %c0_i32_0 = arith.constant 0 : i32
    %c0_i32_1 = arith.constant 0 : i32
    return %arg1, %c0_i32, %c0_i32_0 : i32, i32, i32
  }
  func.func @transform_14(%arg0: i32, %arg1: i32) -> (i32, i32, i32) {
    %c0_i32 = arith.constant 0 : i32
    %c0_i32_0 = arith.constant 0 : i32
    %c0_i32_1 = arith.constant 0 : i32
    return %arg0, %c0_i32, %c0_i32_0 : i32, i32, i32
  }
  func.func @transform_15(%arg0: i32, %arg1: i32) -> (i32, i32, i32) {
    %c0_i32 = arith.constant 0 : i32
    %c0_i32_0 = arith.constant 0 : i32
    %c0_i32_1 = arith.constant 0 : i32
    return %arg0, %c0_i32, %c0_i32_0 : i32, i32, i32
  }
}

module attributes {stable_mosaic.version = 11 : i64} {
  func.func @_head_kernel(%arg0: i32, %arg1: memref<2x128xf32, #tpu.memory_space<vmem>>, %arg2: memref<1x128xf32, #tpu.memory_space<vmem>>, %arg3: memref<1x128xf32, #tpu.memory_space<vmem>>, %arg4: memref<128x7xbf16, #tpu.memory_space<vmem>>, %arg5: memref<1x7xf32, #tpu.memory_space<vmem>>, %arg6: memref<2x7xf32, #tpu.memory_space<vmem>>) attributes {dimension_semantics = [#tpu.dimension_semantics<arbitrary>], iteration_bounds = array<i64: 1>, scalar_prefetch = 0 : i64, scratch_operands = 0 : i64, tpu.core_type = #tpu.core_type<tc>, window_params = [{pipeline_mode = #tpu.pipeline_mode<synchronous>, transform_indices = @transform_0, window_bounds = array<i64: 2, 128>}, {pipeline_mode = #tpu.pipeline_mode<synchronous>, transform_indices = @transform_1, window_bounds = array<i64: 1, 128>}, {pipeline_mode = #tpu.pipeline_mode<synchronous>, transform_indices = @transform_2, window_bounds = array<i64: 1, 128>}, {pipeline_mode = #tpu.pipeline_mode<synchronous>, transform_indices = @transform_3, window_bounds = array<i64: 128, 7>}, {pipeline_mode = #tpu.pipeline_mode<synchronous>, transform_indices = @transform_4, window_bounds = array<i64: 1, 7>}, {pipeline_mode = #tpu.pipeline_mode<synchronous>, transform_indices = @transform_5, window_bounds = array<i64: 2, 7>}]} {
    %c0 = arith.constant 0 : index
    %c0_0 = arith.constant 0 : index
    %0 = vector.load %arg1[%c0, %c0_0] : memref<2x128xf32, #tpu.memory_space<vmem>>, vector<2x128xf32>
    %c0_1 = arith.constant 0 : index
    %c0_2 = arith.constant 0 : index
    %1 = vector.load %arg2[%c0_1, %c0_2] : memref<1x128xf32, #tpu.memory_space<vmem>>, vector<1x128xf32>
    %c0_3 = arith.constant 0 : index
    %c0_4 = arith.constant 0 : index
    %2 = vector.load %arg3[%c0_3, %c0_4] : memref<1x128xf32, #tpu.memory_space<vmem>>, vector<1x128xf32>
    %cst = arith.constant dense<0.000000e+00> : vector<2xf32>
    %3 = vector.multi_reduction <add>, %0, %cst [1] : vector<2x128xf32> to vector<2xf32>
    %4 = vector.shape_cast %3 : vector<2xf32> to vector<2x1xf32>
    %cst_5 = arith.constant 1.280000e+02 : f32
    %5 = vector.broadcast %cst_5 : f32 to vector<2x1xf32>
    %6 = arith.divf %4, %5 : vector<2x1xf32>
    %7 = vector.broadcast %6 : vector<2x1xf32> to vector<2x128xf32>
    %8 = arith.subf %0, %7 : vector<2x128xf32>
    %9 = arith.mulf %8, %8 : vector<2x128xf32>
    %cst_6 = arith.constant dense<0.000000e+00> : vector<2xf32>
    %10 = vector.multi_reduction <add>, %9, %cst_6 [1] : vector<2x128xf32> to vector<2xf32>
    %11 = vector.shape_cast %10 : vector<2xf32> to vector<2x1xf32>
    %cst_7 = arith.constant 1.280000e+02 : f32
    %12 = vector.broadcast %cst_7 : f32 to vector<2x1xf32>
    %13 = arith.divf %11, %12 : vector<2x1xf32>
    %cst_8 = arith.constant 9.99999997E-7 : f32
    %14 = vector.broadcast %cst_8 : f32 to vector<2x1xf32>
    %15 = arith.addf %13, %14 : vector<2x1xf32>
    %16 = math.rsqrt %15 : vector<2x1xf32>
    %17 = vector.broadcast %16 : vector<2x1xf32> to vector<2x128xf32>
    %18 = arith.mulf %8, %17 : vector<2x128xf32>
    %19 = vector.broadcast %1 : vector<1x128xf32> to vector<2x128xf32>
    %20 = arith.mulf %18, %19 : vector<2x128xf32>
    %21 = vector.broadcast %2 : vector<1x128xf32> to vector<2x128xf32>
    %22 = arith.addf %20, %21 : vector<2x128xf32>
    %23 = arith.truncf %22 : vector<2x128xf32> to vector<2x128xbf16>
    %c0_9 = arith.constant 0 : index
    %c0_10 = arith.constant 0 : index
    %24 = vector.load %arg4[%c0_9, %c0_10] : memref<128x7xbf16, #tpu.memory_space<vmem>>, vector<128x7xbf16>
    %cst_11 = arith.constant dense<0.000000e+00> : vector<2x7xf32>
    %25 = tpu.matmul %23, %24, %cst_11 {dimension_numbers = #tpu.dot_dimension_numbers<[1], [0], [0], [1], [0, 0, 1, 1], [], []>} : vector<2x128xbf16>, vector<128x7xbf16>, vector<2x7xf32> -> vector<2x7xf32>
    %c0_12 = arith.constant 0 : index
    %c0_13 = arith.constant 0 : index
    %26 = vector.load %arg5[%c0_12, %c0_13] : memref<1x7xf32, #tpu.memory_space<vmem>>, vector<1x7xf32>
    %27 = vector.broadcast %26 : vector<1x7xf32> to vector<2x7xf32>
    %28 = arith.addf %25, %27 : vector<2x7xf32>
    %c0_14 = arith.constant 0 : index
    %c0_15 = arith.constant 0 : index
    %29 = vector.load %arg6[%c0_14, %c0_15] : memref<2x7xf32, #tpu.memory_space<vmem>>, vector<2x7xf32>
    tpu.vector_store %arg6[%c0_14, %c0_15], %28 {strides = array<i32>} : memref<2x7xf32, #tpu.memory_space<vmem>>, vector<2x7xf32>,
    return
  }
  func.func @transform_0(%arg0: i32) -> (i32, i32) {
    %c0_i32 = arith.constant 0 : i32
    %c0_i32_0 = arith.constant 0 : i32
    %c0_i32_1 = arith.constant 0 : i32
    return %c0_i32, %c0_i32_0 : i32, i32
  }
  func.func @transform_1(%arg0: i32) -> (i32, i32) {
    %c0_i32 = arith.constant 0 : i32
    %c0_i32_0 = arith.constant 0 : i32
    %c0_i32_1 = arith.constant 0 : i32
    return %c0_i32, %c0_i32_0 : i32, i32
  }
  func.func @transform_2(%arg0: i32) -> (i32, i32) {
    %c0_i32 = arith.constant 0 : i32
    %c0_i32_0 = arith.constant 0 : i32
    %c0_i32_1 = arith.constant 0 : i32
    return %c0_i32, %c0_i32_0 : i32, i32
  }
  func.func @transform_3(%arg0: i32) -> (i32, i32) {
    %c0_i32 = arith.constant 0 : i32
    %c0_i32_0 = arith.constant 0 : i32
    %c0_i32_1 = arith.constant 0 : i32
    return %c0_i32, %c0_i32_0 : i32, i32
  }
  func.func @transform_4(%arg0: i32) -> (i32, i32) {
    %c0_i32 = arith.constant 0 : i32
    %c0_i32_0 = arith.constant 0 : i32
    %c0_i32_1 = arith.constant 0 : i32
    return %c0_i32, %c0_i32_0 : i32, i32
  }
  func.func @transform_5(%arg0: i32) -> (i32, i32) {
    %c0_i32 = arith.constant 0 : i32
    %c0_i32_0 = arith.constant 0 : i32
    %c0_i32_1 = arith.constant 0 : i32
    return %c0_i32, %c0_i32_0 : i32, i32
  }
}

</mosaic_0001>

<bundles_post_ra>
// kernel: apvit_forward.9
= control target key start
LH: loop header
LB: loop body
LE: loop exit
PB: predicated region body
PF: predicated region fallthrough
CT: control target
= control target key end

     0   :  { %s583_s12 = smov 0   ;;  %s655_s0 = inlined_call_operand.vmem [shape: bf16[512,27], index: 0, kind: input, shape index: {}]   ;;  %s656_s1 = inlined_call_operand.vmem [shape: bf16[27,64], index: 1, kind: input, shape index: {}]   ;;  %s657_s2 = inlined_call_operand.vmem [shape: f32[1,64], index: 2, kind: input, shape index: {}]   ;;  %s658_s3 = inlined_call_operand.vmem [shape: f32[512,64], index: 3, kind: output, shape index: {}]  }
   0x1 LB: > { %s471_s13 = sadd.s32 4294967295, %s560_s12   ;;  %p475_p0 = scmp.ge.s32.totalorder %s560_s12, 1  ;;  %s560_s12 = sphi %s583_s12, %s13_s12  }
   0x2   : > { %p138_p1 = scmp.lt.s32.totalorder %s560_s12, 5 }
   0x4   : > { %p139_p2 = pnand %p475_p0, %p138_p1 }
   0x5   : > { %s476_s16 = sshll.u32 (!%p139_p2), %s471_s13, 4 }
   0x6   : > { %142 = sbr.rel (%p139_p2) target bundleno = 236 (0xec), region = 32  ;;  %p163_p3 = scmp.lt.s32.totalorder (!%p139_p2), %s476_s16, 63 }
   0xb   : > { %v544_v0 = vld [vmem:[%s656_s1 + $0x8] sm:$0x3f]   ;;  %vm278_vm0 = vcmask 1044480   ;;  %vm279_vm1 = vcmask 1045504   ;;  %v562_v1 = vmov 65535   ;;  %v545_v5 = vld [vmem:[%s656_s1] sm:$0xff]  }
   0xc   : > { %v280_v2 = vsel %vm278_vm0, 4294967295, %v562_v1  ;;  %s660_s16 = smov (!%p163_p3, %s476_s16), 63  ;;  %vm253_vm2 = vcmask 220160   ;;  %v480_v14 = vld [vmem:[%s657_s2] ss:$0 sm:$0xff]  ;;  %vm398_vm3 = vcmask 523264  }
   0xd   : > { %v281_v3 = vsel %vm279_vm1, %v280_v2, 0  ;;  %s477_s19 = sshll.u32 %s660_s16, 2  ;;  %s479_s25 = sshll.u32 %s660_s16, 3 }
   0xe   : > { %v283_v4 = vand.u32 %v544_v0, %v281_v3  ;;  %s166_s22 = scalar_lea.vmem %s655_s0, %s477_s19  ;;  %s618_s28 = scalar_lea.vmem %s658_s3, %s479_s25 }
   0xf   : > { %v546_v6 = vld [vmem:[%s166_s22] sm:$0xff]   ;;  %v548_v8 = vld [vmem:[%s166_s22 + $0x8] sm:$0xff]   ;;  %v550_v10 = vld [vmem:[%s166_s22 + $0x10] sm:$0xff]  }
  0x10   : > { %511 = vmatprep.subr.bf16.mxu0 %v283_v4  ;;  %531 = vmatprep.subr.bf16.mxu1 %v283_v4  ;;  %v547_v7 = vld [vmem:[%s166_s22 + $0x20] sm:$0xff]   ;;  %v549_v9 = vld [vmem:[%s166_s22 + $0x28] sm:$0xff]   ;;  %v551_v11 = vld [vmem:[%s166_s22 + $0x30] sm:$0xff]  }
  0x11   : > { %512 = vmatpush3.bf16.msra.mxu0 %v283_v4  ;;  %533 = vmatpush3.bf16.msra.mxu1 %v283_v4  ;;  %v552_v12 = vld [vmem:[%s166_s22 + $0x18] sm:$0xff]  }
  0x12   : > { %513 = vmatprep.subr.bf16.mxu0 %v545_v5  ;;  %532 = vmatprep.subr.bf16.mxu1 %v545_v5  ;;  %v553_v13 = vld [vmem:[%s166_s22 + $0x38] sm:$0xff]  }
  0x13   : > { %515 = vmatprep.mubr.msk.bf16.mxu0 %vm253_vm2, %v546_v6  ;;  %523 = vmatprep.mubr.msk.bf16.mxu1 %vm253_vm2, %v547_v7 }
  0x15   : > { %514 = vmatpush3.bf16.msra.mxu0 %v545_v5  ;;  %534 = vmatpush3.bf16.msra.mxu1 %v545_v5 }
  0x18   : > { %516 = vmatmul.mubr.msk.bf16.vlgmr.msra.gmra.mxu0 %vm253_vm2, %v548_v8  ;;  %524 = vmatmul.mubr.msk.bf16.vlgmr.msra.gmra.mxu1 %vm253_vm2, %v549_v9 }
  0x19   : > { %519 = vmatprep.mubr.msk.bf16.mxu0 %vm253_vm2, %v550_v10  ;;  %527 = vmatprep.mubr.msk.bf16.mxu1 %vm253_vm2, %v551_v11 }
  0x20   : > { %520 = vmatmul.mubr.msk.bf16.gmra.mxu0 %vm253_vm2, %v552_v12  ;;  %528 = vmatmul.mubr.msk.bf16.gmra.mxu1 %vm253_vm2, %v553_v13 }
  0xd8   : > { %v517_v15 = vpop.f32.mrf.mxu0  ;;  %v525_v16 = vpop.f32.mrf.mxu1 }
  0xd9   : > { %v328_v17 = vadd.f32 %v517_v15, %v480_v14  ;;  %v360_v18 = vadd.f32 %v525_v16, %v480_v14 }
  0xda   : > { %v319_v19 = vpop.f32.mrf.mxu0  ;;  %v351_v20 = vpop.f32.mrf.mxu1 }
  0xdb   : > { %v384_v21 = vmax.f32 %v328_v17, 0.0  ;;  %v392_v22 = vmax.f32 %v360_v18, 0.0  ;;  %v320_v23 = vadd.f32 %v480_v14, %v319_v19  ;;  %v352_v24 = vadd.f32 %v480_v14, %v351_v20 }
  0xdc   : > { %v518_v25 = vpop.f32.mrf.mxu0  ;;  %v526_v26 = vpop.f32.mrf.mxu1 }
  0xdd   : > { %401 = vst.msk [vmem:[%s618_s28 + $0x10] sm:$0xff] %vm398_vm3, %v384_v21  ;;  %409 = vst.msk [vmem:[%s618_s28 + $0x50] sm:$0xff] %vm398_vm3, %v392_v22  ;;  %v382_v27 = vmax.f32 %v320_v23, 0.0  ;;  %v390_v28 = vmax.f32 %v352_v24, 0.0  ;;  %v331_v29 = vadd.f32 %v518_v25, %v480_v14  ;;  %v363_v30 = vadd.f32 %v526_v26, %v480_v14 }
  0xde   : > { %v322_v31 = vpop.f32.mrf.mxu0  ;;  %v354_v32 = vpop.f32.mrf.mxu1 }
  0xdf   : > { %399 = vst.msk [vmem:[%s618_s28] sm:$0xff] %vm398_vm3, %v382_v27  ;;  %407 = vst.msk [vmem:[%s618_s28 + $0x40] sm:$0xff] %vm398_vm3, %v390_v28  ;;  %v385_v33 = vmax.f32 %v331_v29, 0.0  ;;  %v393_v34 = vmax.f32 %v363_v30, 0.0  ;;  %v323_v35 = vadd.f32 %v480_v14, %v322_v31  ;;  %v355_v36 = vadd.f32 %v480_v14, %v354_v32 }
  0xe0   : > { %v521_v37 = vpop.f32.mrf.mxu0  ;;  %v529_v38 = vpop.f32.mrf.mxu1 }
  0xe1   : > { %402 = vst.msk [vmem:[%s618_s28 + $0x18] sm:$0xff] %vm398_vm3, %v385_v33  ;;  %410 = vst.msk [vmem:[%s618_s28 + $0x58] sm:$0xff] %vm398_vm3, %v393_v34  ;;  %v383_v39 = vmax.f32 %v323_v35, 0.0  ;;  %v391_v40 = vmax.f32 %v355_v36, 0.0  ;;  %v344_v41 = vadd.f32 %v521_v37, %v480_v14  ;;  %v376_v42 = vadd.f32 %v529_v38, %v480_v14 }
  0xe2   : > { %v335_v43 = vpop.f32.mrf.mxu0  ;;  %v367_v44 = vpop.f32.mrf.mxu1 }
  0xe3   : > { %400 = vst.msk [vmem:[%s618_s28 + $0x8] sm:$0xff] %vm398_vm3, %v383_v39  ;;  %408 = vst.msk [vmem:[%s618_s28 + $0x48] sm:$0xff] %vm398_vm3, %v391_v40  ;;  %v388_v45 = vmax.f32 %v344_v41, 0.0  ;;  %v396_v46 = vmax.f32 %v376_v42, 0.0  ;;  %v336_v47 = vadd.f32 %v480_v14, %v335_v43  ;;  %v368_v48 = vadd.f32 %v480_v14, %v367_v44 }
  0xe4   : > { %v522_v49 = vpop.f32.mrf.mxu0  ;;  %v530_v50 = vpop.f32.mrf.mxu1 }
  0xe5   : > { %405 = vst.msk [vmem:[%s618_s28 + $0x30] sm:$0xff] %vm398_vm3, %v388_v45  ;;  %413 = vst.msk [vmem:[%s618_s28 + $0x70] sm:$0xff] %vm398_vm3, %v396_v46  ;;  %v386_v51 = vmax.f32 %v336_v47, 0.0  ;;  %v394_v52 = vmax.f32 %v368_v48, 0.0  ;;  %v347_v53 = vadd.f32 %v522_v49, %v480_v14  ;;  %v379_v54 = vadd.f32 %v530_v50, %v480_v14 }
  0xe6   : > { %v338_v55 = vpop.f32.mrf.mxu0  ;;  %v370_v56 = vpop.f32.mrf.mxu1 }
  0xe7   : > { %403 = vst.msk [vmem:[%s618_s28 + $0x20] sm:$0xff] %vm398_vm3, %v386_v51  ;;  %411 = vst.msk [vmem:[%s618_s28 + $0x60] sm:$0xff] %vm398_vm3, %v394_v52  ;;  %v389_v57 = vmax.f32 %v347_v53, 0.0  ;;  %v397_v58 = vmax.f32 %v379_v54, 0.0  ;;  %v339_v59 = vadd.f32 %v480_v14, %v338_v55  ;;  %v371_v60 = vadd.f32 %v480_v14, %v370_v56 }
  0xe9   : > { %406 = vst.msk [vmem:[%s618_s28 + $0x38] sm:$0xff] %vm398_vm3, %v389_v57  ;;  %414 = vst.msk [vmem:[%s618_s28 + $0x78] sm:$0xff] %vm398_vm3, %v397_v58  ;;  %v387_v61 = vmax.f32 %v339_v59, 0.0  ;;  %v395_v62 = vmax.f32 %v371_v60, 0.0 }
  0xeb   : > { %404 = vst.msk [vmem:[%s618_s28 + $0x28] sm:$0xff] %vm398_vm3, %v387_v61  ;;  %412 = vst.msk [vmem:[%s618_s28 + $0x68] sm:$0xff] %vm398_vm3, %v395_v62 }
  0xec PF: > { %s13_s12 = sadd.s32 1, %s560_s12  }
  0xed   : > { %p10_p4 = scmp.ge.s32.totalorder %s13_s12, 6  }
  0xef   :  { %12 = sbr.rel (!%p10_p4) target bundleno = 1 (0x1), region = 62 }

// kernel: apvit_forward.10
= control target key start
LH: loop header
LB: loop body
LE: loop exit
PB: predicated region body
PF: predicated region fallthrough
CT: control target
= control target key end

     0   :  { %vm558_vm0 = vcmask 523264   ;;  %s1677_s1 = inlined_call_operand.vmem [shape: bf16[576,128], index: 1, kind: input, shape index: {}]   ;;  %s1678_s0 = inlined_call_operand.vmem [shape: bf16[128,576], index: 0, kind: input, shape index: {}]   ;;  %s1679_s2 = inlined_call_operand.vmem [shape: f32[1,128], index: 2, kind: input, shape index: {}]   ;;  %s1680_s3 = inlined_call_operand.vmem [shape: f32[128,128], index: 3, kind: output, shape index: {}]  }
   0x1   :  { %v1167_v0 = vld [vmem:[%s1677_s1 + $0x78] sm:$0xff]   ;;  %v1171_v4 = vld [vmem:[%s1677_s1 + $0x70] sm:$0xff]   ;;  %v1175_v8 = vld [vmem:[%s1677_s1 + $0x68] sm:$0xff]  }
   0x2   :  { %v1168_v1 = vld [vmem:[%s1677_s1 + $0xf8] sm:$0xff]   ;;  %995 = vmatprep.subr.bf16.mxu0 %v1167_v0  ;;  %v1172_v5 = vld [vmem:[%s1677_s1 + $0xf0] sm:$0xff]   ;;  %v1176_v9 = vld [vmem:[%s1677_s1 + $0xe8] sm:$0xff]  }
   0x3   :  { %v1169_v2 = vld [vmem:[%s1677_s1 + $0x38] sm:$0xff]   ;;  %1059 = vmatprep.subr.bf16.mxu1 %v1168_v1  ;;  %v1173_v6 = vld [vmem:[%s1677_s1 + $0x30] sm:$0xff]   ;;  %v1177_v10 = vld [vmem:[%s1677_s1 + $0x28] sm:$0xff]  }
   0x4   :  { %v1170_v3 = vld [vmem:[%s1677_s1 + $0xb8] sm:$0xff]   ;;  %996 = vmatpush3.bf16.msra.mxu0 %v1169_v2  ;;  %v1174_v7 = vld [vmem:[%s1677_s1 + $0xb0] sm:$0xff]   ;;  %v1178_v11 = vld [vmem:[%s1677_s1 + $0xa8] sm:$0xff]  }
   0x5   :  { %1060 = vmatpush3.bf16.msra.mxu1 %v1170_v3  ;;  %997 = vmatprep.subr.bf16.mxu0 %v1171_v4  ;;  %v1179_v12 = vld [vmem:[%s1677_s1 + $0x60] sm:$0xff]   ;;  %v1183_v16 = vld [vmem:[%s1677_s1 + $0x58] sm:$0xff]   ;;  %v1187_v20 = vld [vmem:[%s1677_s1 + $0x50] sm:$0xff]  }
   0x6   :  { %1061 = vmatprep.subr.bf16.mxu1 %v1172_v5  ;;  %v1180_v13 = vld [vmem:[%s1677_s1 + $0xe0] sm:$0xff]   ;;  %v1184_v17 = vld [vmem:[%s1677_s1 + $0xd8] sm:$0xff]   ;;  %v1188_v21 = vld [vmem:[%s1677_s1 + $0xd0] sm:$0xff]  }
   0x7   :  { %v1181_v14 = vld [vmem:[%s1677_s1 + $0x20] sm:$0xff]   ;;  %v1185_v18 = vld [vmem:[%s1677_s1 + $0x18] sm:$0xff]   ;;  %v1189_v22 = vld [vmem:[%s1677_s1 + $0x10] sm:$0xff]  }
   0x8   :  { %998 = vmatpush3.bf16.msra.mxu0 %v1173_v6  ;;  %v1182_v15 = vld [vmem:[%s1677_s1 + $0xa0] sm:$0xff]   ;;  %v1186_v19 = vld [vmem:[%s1677_s1 + $0x98] sm:$0xff]   ;;  %v1190_v23 = vld [vmem:[%s1677_s1 + $0x90] sm:$0xff]  }
   0x9   :  { %1062 = vmatpush3.bf16.msra.mxu1 %v1174_v7  ;;  %999 = vmatprep.subr.bf16.mxu0 %v1175_v8  ;;  %v1191_v24 = vld [vmem:[%s1677_s1 + $0x48] sm:$0xff]   ;;  %v1195_v28 = vld [vmem:[%s1677_s1 + $0x40] sm:$0xff]   ;;  %v1205_v36 = vld [vmem:[%s1677_s1 + $0x118] sm:$0xff]  }
   0xa   :  { %1063 = vmatprep.subr.bf16.mxu1 %v1176_v9  ;;  %v1192_v25 = vld [vmem:[%s1677_s1 + $0xc8] sm:$0xff]   ;;  %v1196_v29 = vld [vmem:[%s1677_s1 + $0xc0] sm:$0xff]   ;;  %v1218_v42 = vld [vmem:[%s1677_s1 + $0x110] sm:$0xff]  }
   0xb   :  { %v1193_v26 = vld [vmem:[%s1677_s1 + $0x8] sm:$0xff]   ;;  %v1197_v30 = vld [vmem:[%s1677_s1] sm:$0xff]   ;;  %v1214_v43 = vld [vmem:[%s1678_s0 + $0x5c] ss:$20 sps:$4 sm:$0xff]  }
   0xc   :  { %1000 = vmatpush3.bf16.msra.mxu0 %v1177_v10  ;;  %v1194_v27 = vld [vmem:[%s1677_s1 + $0x88] sm:$0xff]   ;;  %v1198_v31 = vld [vmem:[%s1677_s1 + $0x80] sm:$0xff]   ;;  %v1219_v47 = vld [vmem:[%s1678_s0 + $0x7c] ss:$20 sps:$4 sm:$0xff]  }
   0xd   :  { %1064 = vmatpush3.bf16.msra.mxu1 %v1178_v11  ;;  %1001 = vmatprep.subr.bf16.mxu0 %v1179_v12  ;;  %v1199_v32 = vld [vmem:[%s1678_s0] ss:$20 sps:$4 sm:$0xff]   ;;  %v1201_v33 = vld [vmem:[%s1678_s0 + $0x4] ss:$20 sps:$4 sm:$0xff]   ;;  %v1202_v34 = vld [vmem:[%s1678_s0 + $0x8] ss:$20 sps:$4 sm:$0xff]  }
   0xe   :  { %1065 = vmatprep.subr.bf16.mxu1 %v1180_v13  ;;  %v1204_v35 = vld [vmem:[%s1678_s0 + $0xc] ss:$20 sps:$4 sm:$0xff]   ;;  %615 = vmatprep.mubr.bf16.mxu0 %v1201_v33  ;;  %v1208_v38 = vld [vmem:[%s1678_s0 + $0x34] ss:$20 sps:$4 sm:$0xff]   ;;  %v1211_v40 = vld [vmem:[%s1678_s0 + $0x30] ss:$20 sps:$4 sm:$0xff]  }
   0xf   :  { %712 = vmatprep.mubr.bf16.mxu1 %v1204_v35  ;;  %v1206_v37 = vld [vmem:[%s1678_s0 + $0x2c] ss:$20 sps:$4 sm:$0xff]   ;;  %v1210_v39 = vld [vmem:[%s1678_s0 + $0x28] ss:$20 sps:$4 sm:$0xff]   ;;  %v1216_v44 = vld [vmem:[%s1678_s0 + $0x50] ss:$20 sps:$4 sm:$0xff]  }
  0x10   :  { %1002 = vmatpush3.bf16.msra.mxu0 %v1181_v14  ;;  %v1212_v41 = vld [vmem:[%s1678_s0 + $0x54] ss:$20 sps:$4 sm:$0xff]   ;;  %v1217_v45 = vld [vmem:[%s1678_s0 + $0x58] ss:$20 sps:$4 sm:$0xff]   ;;  %v1244_v49 = vld [vmem:[%s1677_s1 + $0x100] sm:$0xff]  }
  0x11   :  { %1066 = vmatpush3.bf16.msra.mxu1 %v1182_v15  ;;  %1003 = vmatprep.subr.bf16.mxu0 %v1183_v16  ;;  %v1231_v46 = vld [vmem:[%s1677_s1 + $0x108] sm:$0xff]   ;;  %v1221_v48 = vld [vmem:[%s1678_s0 + $0x84] ss:$20 sps:$4 sm:$0xff]   ;;  %v1224_v51 = vld [vmem:[%s1678_s0 + $0x80] ss:$20 sps:$4 sm:$0xff]  }
  0x12   :  { %1067 = vmatprep.subr.bf16.mxu1 %v1184_v17  ;;  %v1223_v50 = vld [vmem:[%s1678_s0 + $0x78] ss:$20 sps:$4 sm:$0xff]   ;;  %v1229_v54 = vld [vmem:[%s1678_s0 + $0xa0] ss:$20 sps:$4 sm:$0xff]   ;;  %v1230_v55 = vld [vmem:[%s1678_s0 + $0xa8] ss:$20 sps:$4 sm:$0xff]  }
  0x13   :  { %v1225_v52 = vld [vmem:[%s1678_s0 + $0xa4] ss:$20 sps:$4 sm:$0xff]   ;;  %v1227_v53 = vld [vmem:[%s1678_s0 + $0xac] ss:$20 sps:$4 sm:$0xff]   ;;  %v1234_v57 = vld [vmem:[%s1678_s0 + $0xd4] ss:$20 sps:$4 sm:$0xff]  }
  0x14   :  { %1004 = vmatpush3.bf16.msra.mxu0 %v1185_v18  ;;  %v1232_v56 = vld [vmem:[%s1678_s0 + $0xcc] ss:$20 sps:$4 sm:$0xff]   ;;  %v1236_v58 = vld [vmem:[%s1678_s0 + $0xc8] ss:$20 sps:$4 sm:$0xff]   ;;  %v1237_v59 = vld [vmem:[%s1678_s0 + $0xd0] ss:$20 sps:$4 sm:$0xff]  }
  0x15   :  { %1068 = vmatpush3.bf16.msra.mxu1 %v1186_v19  ;;  %1005 = vmatprep.subr.bf16.mxu0 %v1187_v20  ;;  %v1238_v60 = vld [vmem:[%s1678_s0 + $0xf4] ss:$20 sps:$4 sm:$0xff]   ;;  %v1240_v61 = vld [vmem:[%s1678_s0 + $0xfc] ss:$20 sps:$4 sm:$0xff]   ;;  %v1243_v63 = vld [vmem:[%s1678_s0 + $0xf8] ss:$20 sps:$4 sm:$0xff]  }
  0x16   :  { %1069 = vmatprep.subr.bf16.mxu1 %v1188_v21  ;;  %v1242_v62 = vld [vmem:[%s1678_s0 + $0xf0] ss:$20 sps:$4 sm:$0xff]   ;;  %v1249_v2 = vld [vmem:[%s1678_s0 + $0x118] ss:$20 sps:$4 sm:$0xff]   ;;  %v1250_v3 = vld [vmem:[%s1678_s0 + $0x120] ss:$20 sps:$4 sm:$0xff]  }
  0x17   :  { %v1245_v0 = vld [vmem:[%s1678_s0 + $0x11c] ss:$20 sps:$4 sm:$0xff]   ;;  %v1247_v1 = vld [vmem:[%s1678_s0 + $0x124] ss:$20 sps:$4 sm:$0xff]   ;;  %v1255_v8 = vld [vmem:[%s1678_s0 + $0x60] ss:$20 sps:$4 sm:$0xff]  }
  0x18   :  { %1006 = vmatpush3.bf16.msra.mxu0 %v1189_v22  ;;  %v1251_v4 = vld [vmem:[%s1678_s0 + $0x10] ss:$20 sps:$4 sm:$0xff]   ;;  %v1253_v6 = vld [vmem:[%s1678_s0 + $0x38] ss:$20 sps:$4 sm:$0xff]   ;;  %v1256_v9 = vld [vmem:[%s1678_s0 + $0x100] ss:$20 sps:$4 sm:$0xff]  }
  0x19   :  { %1070 = vmatpush3.bf16.msra.mxu1 %v1190_v23  ;;  %1007 = vmatprep.subr.bf16.mxu0 %v1191_v24  ;;  %v1252_v5 = vld [vmem:[%s1678_s0 + $0xb0] ss:$20 sps:$4 sm:$0xff]   ;;  %v1254_v7 = vld [vmem:[%s1678_s0 + $0xd8] ss:$20 sps:$4 sm:$0xff]   ;;  %v1257_v10 = vld [vmem:[%s1678_s0 + $0x88] ss:$20 sps:$4 sm:$0xff]  }
  0x1a   :  { %1071 = vmatprep.subr.bf16.mxu1 %v1192_v25  ;;  %v1258_v11 = vld [vmem:[%s1678_s0 + $0x128] ss:$20 sps:$4 sm:$0xff]  }
  0x1c   :  { %1008 = vmatpush3.bf16.msra.mxu0 %v1193_v26 }
  0x1d   :  { %1072 = vmatpush3.bf16.msra.mxu1 %v1194_v27  ;;  %1009 = vmatprep.subr.bf16.mxu0 %v1195_v28 }
  0x1e   :  { %1073 = vmatprep.subr.bf16.mxu1 %v1196_v29 }
  0x20   :  { %1010 = vmatpush3.bf16.msra.mxu0 %v1197_v30 }
  0x21   :  { %1074 = vmatpush3.bf16.msra.mxu1 %v1198_v31  ;;  %1135 = vmatprep.subr.bf16.mxu0 %v1205_v36 }
  0x22   :  { %1159 = vmatprep.subr.bf16.mxu1 %v1205_v36 }
  0x23   :  { %616 = vmatmul.mubr.bf16.vlgmr.msra.gmra.mxu0 %v1199_v32 }
  0x24   :  { %713 = vmatmul.mubr.bf16.vlgmr.msra.gmra.mxu1 %v1202_v34  ;;  %1136 = vmatpush3.bf16.msra.mxu0 %v1205_v36 }
  0x25   :  { %1163 = vmatpush3.bf16.msra.mxu1 %v1205_v36  ;;  %623 = vmatprep.mubr.bf16.mxu0 %v1206_v37 }
  0x26   :  { %720 = vmatprep.mubr.bf16.mxu1 %v1208_v38  ;;  %1137 = vmatprep.subr.bf16.mxu0 %v1218_v42 }
  0x27   :  { %1160 = vmatprep.subr.bf16.mxu1 %v1218_v42 }
  0x28   :  { %1138 = vmatpush3.bf16.msra.mxu0 %v1218_v42 }
  0x29   :  { %1164 = vmatpush3.bf16.msra.mxu1 %v1218_v42  ;;  %1139 = vmatprep.subr.bf16.mxu0 %v1231_v46 }
  0x2a   :  { %1161 = vmatprep.subr.bf16.mxu1 %v1231_v46 }
  0x2b   :  { %624 = vmatmul.mubr.bf16.gmra.mxu0 %v1210_v39 }
  0x2c   :  { %721 = vmatmul.mubr.bf16.gmra.mxu1 %v1211_v40  ;;  %631 = vmatprep.mubr.bf16.mxu0 %v1212_v41 }
  0x2d   :  { %728 = vmatprep.mubr.bf16.mxu1 %v1214_v43  ;;  %1140 = vmatpush3.bf16.msra.mxu0 %v1231_v46 }
  0x2e   :  { %1165 = vmatpush3.bf16.msra.mxu1 %v1231_v46  ;;  %1141 = vmatprep.subr.bf16.mxu0 %v1244_v49 }
  0x2f   :  { %1162 = vmatprep.subr.bf16.mxu1 %v1244_v49 }
  0x31   :  { %1142 = vmatpush3.bf16.msra.mxu0 %v1244_v49 }
  0x32   :  { %1166 = vmatpush3.bf16.msra.mxu1 %v1244_v49 }
  0x33   :  { %632 = vmatmul.mubr.bf16.gmra.mxu0 %v1216_v44 }
  0x34   :  { %729 = vmatmul.mubr.bf16.gmra.mxu1 %v1217_v45  ;;  %639 = vmatprep.mubr.bf16.mxu0 %v1219_v47 }
  0x35   :  { %736 = vmatprep.mubr.bf16.mxu1 %v1221_v48 }
  0x3b   :  { %640 = vmatmul.mubr.bf16.gmra.mxu0 %v1223_v50 }
  0x3c   :  { %737 = vmatmul.mubr.bf16.gmra.mxu1 %v1224_v51  ;;  %647 = vmatprep.mubr.bf16.mxu0 %v1225_v52 }
  0x3d   :  { %744 = vmatprep.mubr.bf16.mxu1 %v1227_v53 }
  0x43   :  { %648 = vmatmul.mubr.bf16.gmra.mxu0 %v1229_v54 }
  0x44   :  { %745 = vmatmul.mubr.bf16.gmra.mxu1 %v1230_v55  ;;  %655 = vmatprep.mubr.bf16.mxu0 %v1232_v56 }
  0x45   :  { %752 = vmatprep.mubr.bf16.mxu1 %v1234_v57 }
  0x4b   :  { %656 = vmatmul.mubr.bf16.gmra.mxu0 %v1236_v58 }
  0x4c   :  { %753 = vmatmul.mubr.bf16.gmra.mxu1 %v1237_v59  ;;  %663 = vmatprep.mubr.bf16.mxu0 %v1238_v60 }
  0x4d   :  { %760 = vmatprep.mubr.bf16.mxu1 %v1240_v61 }
  0x53   :  { %664 = vmatmul.mubr.bf16.gmra.mxu0 %v1242_v62 }
  0x54   :  { %761 = vmatmul.mubr.bf16.gmra.mxu1 %v1243_v63  ;;  %671 = vmatprep.mubr.bf16.mxu0 %v1245_v0 }
  0x55   :  { %768 = vmatprep.mubr.bf16.mxu1 %v1247_v1 }
  0x5b   :  { %672 = vmatmul.mubr.bf16.gmra.mxu0 %v1249_v2  ;;  %v1566_v2 = vld [vmem:[%s1679_s2] ss:$0 sm:$0xff] }
  0x5c   :  { %769 = vmatmul.mubr.bf16.gmra.mxu1 %v1250_v3  ;;  %1143 = vmatprep.mubr.msk.bf16.mxu0 %vm558_vm0, %v1251_v4 }
  0x5d   :  { %1151 = vmatprep.mubr.msk.bf16.mxu1 %vm558_vm0, %v1252_v5 }
  0x63   :  { %1144 = vmatmul.mubr.msk.bf16.vlgmr.msra.gmra.mxu0 %vm558_vm0, %v1253_v6 }
  0x64   :  { %1152 = vmatmul.mubr.msk.bf16.vlgmr.msra.gmra.mxu1 %vm558_vm0, %v1254_v7  ;;  %1147 = vmatprep.mubr.msk.bf16.mxu0 %vm558_vm0, %v1255_v8 }
  0x65   :  { %1155 = vmatprep.mubr.msk.bf16.mxu1 %vm558_vm0, %v1256_v9 }
  0x6b   :  { %1148 = vmatmul.mubr.msk.bf16.gmra.mxu0 %vm558_vm0, %v1257_v10 }
  0x6c   :  { %1156 = vmatmul.mubr.msk.bf16.gmra.mxu1 %vm558_vm0, %v1258_v11 }
  0xe3   :  { %v1011_v12 = vpop.f32.mrf.mxu0 }
  0xe4   :  { %v1515_v13 = vpop.f32.mrf.mxu1 }
  0xe5   :  { %v1012_v14 = vpop.f32.mrf.mxu0 }
  0xe6   :  { %v1517_v15 = vpop.f32.mrf.mxu1  ;;  %v1013_v0 = vadd.f32 %v1012_v14, %v1011_v12 }
  0xe7   :  { %v1014_v16 = vpop.f32.mrf.mxu0  ;;  %v1077_v14 = vadd.f32 %v1517_v15, %v1515_v13 }
  0xe8   :  { %v1519_v17 = vpop.f32.mrf.mxu1  ;;  %v618_v10 = vadd.f32 %v1013_v0, %v1566_v2 }
  0xe9   :  { %v1015_v18 = vpop.f32.mrf.mxu0 }
  0xea   :  { %v1079_v19 = vpop.f32.mrf.mxu1  ;;  %v1016_v3 = vadd.f32 %v1015_v18, %v1014_v16 }
  0xeb   :  { %v1017_v20 = vpop.f32.mrf.mxu0  ;;  %v1080_v16 = vadd.f32 %v1079_v19, %v1519_v17 }
  0xec   :  { %v1521_v21 = vpop.f32.mrf.mxu1 }
  0xed   :  { %v1018_v22 = vpop.f32.mrf.mxu0 }
  0xee   :  { %v1523_v23 = vpop.f32.mrf.mxu1  ;;  %v1019_v5 = vadd.f32 %v1018_v22, %v1017_v20 }
  0xef   :  { %v1020_v24 = vpop.f32.mrf.mxu0  ;;  %v1083_v13 = vadd.f32 %v1523_v23, %v1521_v21 }
  0xf0   :  { %v1525_v25 = vpop.f32.mrf.mxu1  ;;  %v626_v18 = vadd.f32 %v1019_v5, %v1566_v2 }
  0xf1   :  { %v1021_v26 = vpop.f32.mrf.mxu0 }
  0xf2   :  { %v1527_v27 = vpop.f32.mrf.mxu1  ;;  %v1022_v7 = vadd.f32 %v1021_v26, %v1020_v24  ;;  %v723_v23 = vadd.f32 %v1083_v13, %v626_v18 }
  0xf3   :  { %v1023_v28 = vpop.f32.mrf.mxu0  ;;  %v1086_v17 = vadd.f32 %v1527_v27, %v1525_v25 }
  0xf4   :  { %v1529_v29 = vpop.f32.mrf.mxu1  ;;  %v629_v26 = vadd.f32 %v1022_v7, %v1566_v2 }
  0xf5   :  { %v1024_v30 = vpop.f32.mrf.mxu0 }
  0xf6   :  { %v1531_v31 = vpop.f32.mrf.mxu1  ;;  %v1025_v8 = vadd.f32 %v1024_v30, %v1023_v28  ;;  %v726_v27 = vadd.f32 %v1086_v17, %v629_v26 }
  0xf7   :  { %v1026_v32 = vpop.f32.mrf.mxu0  ;;  %v1089_v19 = vadd.f32 %v1531_v31, %v1529_v29 }
  0xf8   :  { %v1533_v33 = vpop.f32.mrf.mxu1  ;;  %v634_v28 = vadd.f32 %v1025_v8, %v1566_v2 }
  0xf9   :  { %1681 = vst [vmem:[#allocation2_spill] sm:$0xff] %v1533_v33  ;;  %v1027_v34 = vpop.f32.mrf.mxu0 }
  0xfa   :  { %v1535_v35 = vpop.f32.mrf.mxu1  ;;  %v1028_v30 = vadd.f32 %v1027_v34, %v1026_v32  ;;  %v1599_v5 = vadd.f32 %v1089_v19, %v634_v28 }
  0xfb   :  { %1682 = vst [vmem:[#allocation3_spill] sm:$0xff] %v1535_v35  ;;  %v1029_v36 = vpop.f32.mrf.mxu0  ;;  %v621_v35 = vadd.f32 %v1016_v3, %v1566_v2  ;;  %v715_v3 = vadd.f32 %v1077_v14, %v618_v10 }
  0xfc   :  { %v1537_v37 = vpop.f32.mrf.mxu1 }
  0xfd   :  { %v1030_v38 = vpop.f32.mrf.mxu0 }
  0xfe   :  { %v1539_v39 = vpop.f32.mrf.mxu1  ;;  %v1031_v20 = vadd.f32 %v1030_v38, %v1029_v36 }
  0xff   :  { %v1541_v40 = vpop.f32.mrf.mxu0  ;;  %v1095_v29 = vadd.f32 %v1539_v39, %v1537_v37 }
 0x100   :  { %v1543_v41 = vpop.f32.mrf.mxu1  ;;  %v642_v32 = vadd.f32 %v1031_v20, %v1566_v2 }
 0x101   :  { %v1545_v42 = vpop.f32.mrf.mxu0 }
 0x102   :  { %v1547_v43 = vpop.f32.mrf.mxu1  ;;  %v739_v20 = vadd.f32 %v1095_v29, %v642_v32 }
 0x103   :  { %v1035_v44 = vpop.f32.mrf.mxu0 }
 0x104   :  { %v1549_v45 = vpop.f32.mrf.mxu1 }
 0x105   :  { %v1036_v46 = vpop.f32.mrf.mxu0 }
 0x106   :  { %v1551_v47 = vpop.f32.mrf.mxu1  ;;  %v1037_v22 = vadd.f32 %v1036_v46, %v1035_v44  ;;  %v718_v44 = vadd.f32 %v1080_v16, %v621_v35 }
 0x107   :  { %v1038_v48 = vpop.f32.mrf.mxu0  ;;  %v1101_v31 = vadd.f32 %v1551_v47, %v1549_v45 }
 0x108   :  { %v1553_v49 = vpop.f32.mrf.mxu1  ;;  %v650_v34 = vadd.f32 %v1037_v22, %v1566_v2 }
 0x109   :  { %v1039_v50 = vpop.f32.mrf.mxu0 }
 0x10a   :  { %v1555_v51 = vpop.f32.mrf.mxu1  ;;  %v1040_v36 = vadd.f32 %v1039_v50, %v1038_v48  ;;  %v747_v18 = vadd.f32 %v1101_v31, %v650_v34 }
 0x10b   :  { %v1041_v52 = vpop.f32.mrf.mxu0  ;;  %v1104_v37 = vadd.f32 %v1555_v51, %v1553_v49 }
 0x10c   :  { %v1105_v53 = vpop.f32.mrf.mxu1 }
 0x10d   :  { %v1042_v54 = vpop.f32.mrf.mxu0 }
 0x10e   :  { %v1106_v55 = vpop.f32.mrf.mxu1  ;;  %v1043_v11 = vadd.f32 %v1042_v54, %v1041_v52 }
 0x10f   :  { %v1044_v56 = vpop.f32.mrf.mxu0  ;;  %v1107_v46 = vadd.f32 %v1106_v55, %v1105_v53  ;;  %v653_v53 = vadd.f32 %v1040_v36, %v1566_v2 }
 0x110   :  { %v1108_v57 = vpop.f32.mrf.mxu1  ;;  %v658_v15 = vadd.f32 %v1043_v11, %v1566_v2  ;;  %v1034_v11 = vadd.f32 %v1545_v42, %v1541_v40 }
 0x111   :  { %v1045_v58 = vpop.f32.mrf.mxu0  ;;  %v750_v49 = vadd.f32 %v1104_v37, %v653_v53 }
 0x112   :  { %v1109_v59 = vpop.f32.mrf.mxu1  ;;  %v1046_v52 = vadd.f32 %v1045_v58, %v1044_v56  ;;  %v1596_v56 = vadd.f32 %v1028_v30, %v1566_v2  ;;  %v755_v50 = vadd.f32 %v1107_v46, %v658_v15  ;;  %v645_v15 = vadd.f32 %v1034_v11, %v1566_v2 }
 0x113   :  { %v1047_v60 = vpop.f32.mrf.mxu0  ;;  %v1110_v55 = vadd.f32 %v1109_v59, %v1108_v57 }
 0x114   :  { %v1557_v61 = vpop.f32.mrf.mxu1  ;;  %v661_v58 = vadd.f32 %v1046_v52, %v1566_v2 }
 0x115   :  { %v1048_v62 = vpop.f32.mrf.mxu0 }
 0x116   :  { %v1559_v63 = vpop.f32.mrf.mxu1  ;;  %v1049_v7 = vadd.f32 %v1048_v62, %v1047_v60 }
 0x117   :  { %v1561_v1 = vpop.f32.mrf.mxu0 }
 0x118   :  { %v1568_v4 = vpop.f32.mrf.mxu1 }
 0x119   :  { %v1570_v6 = vpop.f32.mrf.mxu0 }
 0x11a   :  { %v1572_v9 = vpop.f32.mrf.mxu1  ;;  %v1052_v51 = vadd.f32 %v1570_v6, %v1561_v1 }
 0x11b   :  { %v1053_v12 = vpop.f32.mrf.mxu0 }
 0x11c   :  { %v1578_v33 = vpop.f32.mrf.mxu1  ;;  %v669_v46 = vadd.f32 %v1052_v51, %v1566_v2 }
 0x11d   :  { %v1054_v24 = vpop.f32.mrf.mxu0 }
 0x11e   :  { %v1118_v54 = vpop.f32.mrf.mxu1  ;;  %v1055_v35 = vadd.f32 %v1054_v24, %v1053_v12  ;;  %v758_v12 = vadd.f32 %v1110_v55, %v661_v58  ;;  %v666_v24 = vadd.f32 %v1049_v7, %v1566_v2 }
 0x11f   :  { %v1056_v0 = vpop.f32.mrf.mxu0  ;;  %v1119_v28 = vadd.f32 %v1118_v54, %v1578_v33 }
 0x120   :  { %v1591_v38 = vpop.f32.mrf.mxu1  ;;  %v674_v22 = vadd.f32 %v1055_v35, %v1566_v2 }
 0x121   :  { %v1057_v21 = vpop.f32.mrf.mxu0 }
 0x122   :  { %v1121_v25 = vpop.f32.mrf.mxu1  ;;  %v1058_v57 = vadd.f32 %v1057_v21, %v1056_v0  ;;  %v1113_v0 = vadd.f32 %v1559_v63, %v1557_v61  ;;  %v771_v36 = vadd.f32 %v1119_v28, %v674_v22  ;;  %v1098_v61 = vadd.f32 %v1547_v43, %v1543_v41  ;;  %v1683_v41 = vld [vmem:[#allocation2_spill] sm:$0xff]  ;;  %v1684_v43 = vld [vmem:[#allocation3_spill] sm:$0xff] }
 0x123   :  { %v1145_v48 = vpop.f32.mrf.mxu0  ;;  %v1122_v21 = vadd.f32 %v1121_v25, %v1591_v38  ;;  %v1092_v29 = vadd.f32 %v1684_v43, %v1683_v41  ;;  %v1116_v38 = vadd.f32 %v1572_v9, %v1568_v4 }
 0x124   :  { %v820_v8 = vadd.f32 %v1145_v48, %v723_v23  ;;  %v1153_v10 = vpop.f32.mrf.mxu1  ;;  %v677_v33 = vadd.f32 %v1058_v57, %v1566_v2  ;;  %v763_v34 = vadd.f32 %v1113_v0, %v666_v24  ;;  %v742_v48 = vadd.f32 %v1098_v61, %v645_v15 }
 0x125   :  { %v852_v14 = vadd.f32 %v1153_v10, %v755_v50  ;;  %v811_v16 = vpop.f32.mrf.mxu0  ;;  %v734_v10 = vadd.f32 %v1092_v29, %v1596_v56 }
 0x126   :  { %v876_v39 = vmax.f32 %v820_v8, 0.0  ;;  %v812_v45 = vadd.f32 %v811_v16, %v715_v3  ;;  %v843_v47 = vpop.f32.mrf.mxu1  ;;  %v774_v55 = vadd.f32 %v1122_v21, %v677_v33 }
 0x127   :  { %v884_v59 = vmax.f32 %v852_v14, 0.0  ;;  %v844_v60 = vadd.f32 %v843_v47, %v747_v18  ;;  %v1146_v62 = vpop.f32.mrf.mxu0  ;;  %v766_v14 = vadd.f32 %v1116_v38, %v669_v46 }
 0x128   :  { %892 = vst [vmem:[%s1680_s3 + $0x10] sm:$0xff] %v876_v39  ;;  %v874_v40 = vmax.f32 %v812_v45, 0.0  ;;  %v823_v42 = vadd.f32 %v1146_v62, %v726_v27  ;;  %v1154_v26 = vpop.f32.mrf.mxu1 }
 0x129   :  { %900 = vst [vmem:[%s1680_s3 + $0x50] sm:$0xff] %v884_v59  ;;  %v882_v30 = vmax.f32 %v844_v60, 0.0  ;;  %v855_v52 = vadd.f32 %v1154_v26, %v758_v12  ;;  %v814_v13 = vpop.f32.mrf.mxu0 }
 0x12a   :  { %890 = vst [vmem:[%s1680_s3] sm:$0xff] %v874_v40  ;;  %v877_v3 = vmax.f32 %v823_v42, 0.0  ;;  %v815_v1 = vadd.f32 %v814_v13, %v718_v44  ;;  %v846_v6 = vpop.f32.mrf.mxu1 }
 0x12b   :  { %898 = vst [vmem:[%s1680_s3 + $0x40] sm:$0xff] %v882_v30  ;;  %v885_v54 = vmax.f32 %v855_v52, 0.0  ;;  %v847_v17 = vadd.f32 %v846_v6, %v750_v49  ;;  %v1149_v19 = vpop.f32.mrf.mxu0 }
 0x12c   :  { %893 = vst [vmem:[%s1680_s3 + $0x18] sm:$0xff] %v877_v3  ;;  %v875_v63 = vmax.f32 %v815_v1, 0.0  ;;  %v836_v44 = vadd.f32 %v1149_v19, %v739_v20  ;;  %v1157_v32 = vpop.f32.mrf.mxu1 }
 0x12d   :  { %901 = vst [vmem:[%s1680_s3 + $0x58] sm:$0xff] %v885_v54  ;;  %v883_v23 = vmax.f32 %v847_v17, 0.0  ;;  %v868_v58 = vadd.f32 %v1157_v32, %v771_v36  ;;  %v827_v27 = vpop.f32.mrf.mxu0 }
 0x12e   :  { %891 = vst [vmem:[%s1680_s3 + $0x8] sm:$0xff] %v875_v63  ;;  %v880_v31 = vmax.f32 %v836_v44, 0.0  ;;  %v828_v35 = vadd.f32 %v827_v27, %v1599_v5  ;;  %v859_v2 = vpop.f32.mrf.mxu1 }
 0x12f   :  { %899 = vst [vmem:[%s1680_s3 + $0x48] sm:$0xff] %v883_v23  ;;  %v888_v25 = vmax.f32 %v868_v58, 0.0  ;;  %v860_v50 = vadd.f32 %v859_v2, %v763_v34  ;;  %v1150_v53 = vpop.f32.mrf.mxu0 }
 0x130   :  { %896 = vst [vmem:[%s1680_s3 + $0x30] sm:$0xff] %v880_v31  ;;  %v878_v7 = vmax.f32 %v828_v35, 0.0  ;;  %v839_v8 = vadd.f32 %v1150_v53, %v742_v48  ;;  %v1158_v5 = vpop.f32.mrf.mxu1 }
 0x131   :  { %904 = vst [vmem:[%s1680_s3 + $0x70] sm:$0xff] %v888_v25  ;;  %v886_v4 = vmax.f32 %v860_v50, 0.0  ;;  %v871_v9 = vadd.f32 %v1158_v5, %v774_v55  ;;  %v830_v11 = vpop.f32.mrf.mxu0 }
 0x132   :  { %894 = vst [vmem:[%s1680_s3 + $0x20] sm:$0xff] %v878_v7  ;;  %v881_v16 = vmax.f32 %v839_v8, 0.0  ;;  %v831_v18 = vadd.f32 %v830_v11, %v734_v10  ;;  %v862_v20 = vpop.f32.mrf.mxu1 }
 0x133   :  { %902 = vst [vmem:[%s1680_s3 + $0x60] sm:$0xff] %v886_v4  ;;  %v889_v56 = vmax.f32 %v871_v9, 0.0  ;;  %v863_v37 = vadd.f32 %v862_v20, %v766_v14 }
 0x134   :  { %897 = vst [vmem:[%s1680_s3 + $0x38] sm:$0xff] %v881_v16  ;;  %v879_v39 = vmax.f32 %v831_v18, 0.0 }
 0x135   :  { %905 = vst [vmem:[%s1680_s3 + $0x78] sm:$0xff] %v889_v56  ;;  %v887_v45 = vmax.f32 %v863_v37, 0.0 }
 0x136   :  { %895 = vst [vmem:[%s1680_s3 + $0x28] sm:$0xff] %v879_v39 }
 0x137   :  { %903 = vst [vmem:[%s1680_s3 + $0x68] sm:$0xff] %v887_v45 }

// kernel: apvit_forward.11
= control target key start
LH: loop header
LB: loop body
LE: loop exit
PB: predicated region body
PF: predicated region fallthrough
CT: control target
= control target key end

     0   :  { %vm977_vm0 = vcmask 7168   ;;  %s1643_s1 = inlined_call_operand.vmem [shape: bf16[1152,128], index: 1, kind: input, shape index: {}]   ;;  %s1644_s0 = inlined_call_operand.vmem [shape: bf16[32,1152], index: 0, kind: input, shape index: {}]   ;;  %s1645_s2 = inlined_call_operand.vmem [shape: f32[1,128], index: 2, kind: input, shape index: {}]   ;;  %s1646_s3 = inlined_call_operand.vmem [shape: f32[32,128], index: 3, kind: output, shape index: {0}]   ;;  %s1647_s4 = inlined_call_operand.vmem [shape: f32[32,1], index: 4, kind: output, shape index: {1}]  }
   0x1   :  { %v1223_v0 = vld [vmem:[%s1643_s1 + $0x78] sm:$0xff]   ;;  %v1227_v4 = vld [vmem:[%s1643_s1 + $0x70] sm:$0xff]   ;;  %v1231_v8 = vld [vmem:[%s1643_s1 + $0x68] sm:$0xff]  }
   0x2   :  { %v1224_v1 = vld [vmem:[%s1643_s1 + $0x38] sm:$0xff]   ;;  %1081 = vmatprep.subr.bf16.mxu0 %v1223_v0  ;;  %v1228_v5 = vld [vmem:[%s1643_s1 + $0x30] sm:$0xff]   ;;  %v1232_v9 = vld [vmem:[%s1643_s1 + $0x28] sm:$0xff]  }
   0x3   :  { %v1225_v2 = vld [vmem:[%s1643_s1 + $0xf8] sm:$0xff]   ;;  %1082 = vmatpush3.bf16.msra.mxu0 %v1224_v1  ;;  %v1229_v6 = vld [vmem:[%s1643_s1 + $0xf0] sm:$0xff]   ;;  %v1233_v10 = vld [vmem:[%s1643_s1 + $0xe8] sm:$0xff]  }
   0x4   :  { %v1226_v3 = vld [vmem:[%s1643_s1 + $0xb8] sm:$0xff]   ;;  %1109 = vmatprep.subr.bf16.mxu1 %v1225_v2  ;;  %1083 = vmatprep.subr.bf16.mxu0 %v1227_v4  ;;  %v1230_v7 = vld [vmem:[%s1643_s1 + $0xb0] sm:$0xff]   ;;  %v1234_v11 = vld [vmem:[%s1643_s1 + $0xa8] sm:$0xff]  }
   0x5   :  { %1110 = vmatpush3.bf16.msra.mxu1 %v1226_v3  ;;  %v1235_v12 = vld [vmem:[%s1643_s1 + $0x60] sm:$0xff]   ;;  %v1239_v16 = vld [vmem:[%s1643_s1 + $0x58] sm:$0xff]   ;;  %v1243_v20 = vld [vmem:[%s1643_s1 + $0x50] sm:$0xff]  }
   0x6   :  { %1111 = vmatprep.subr.bf16.mxu1 %v1229_v6  ;;  %v1236_v13 = vld [vmem:[%s1643_s1 + $0x20] sm:$0xff]   ;;  %v1240_v17 = vld [vmem:[%s1643_s1 + $0x18] sm:$0xff]   ;;  %v1244_v21 = vld [vmem:[%s1643_s1 + $0x10] sm:$0xff]  }
   0x7   :  { %1084 = vmatpush3.bf16.msra.mxu0 %v1228_v5  ;;  %v1237_v14 = vld [vmem:[%s1643_s1 + $0xe0] sm:$0xff]   ;;  %v1241_v18 = vld [vmem:[%s1643_s1 + $0xd8] sm:$0xff]   ;;  %v1245_v22 = vld [vmem:[%s1643_s1 + $0xd0] sm:$0xff]  }
   0x8   :  { %1085 = vmatprep.subr.bf16.mxu0 %v1231_v8  ;;  %v1238_v15 = vld [vmem:[%s1643_s1 + $0xa0] sm:$0xff]   ;;  %v1242_v19 = vld [vmem:[%s1643_s1 + $0x98] sm:$0xff]   ;;  %v1246_v23 = vld [vmem:[%s1643_s1 + $0x90] sm:$0xff]  }
   0x9   :  { %1112 = vmatpush3.bf16.msra.mxu1 %v1230_v7  ;;  %v1247_v24 = vld [vmem:[%s1643_s1 + $0x48] sm:$0xff]   ;;  %v1251_v28 = vld [vmem:[%s1643_s1 + $0x40] sm:$0xff]   ;;  %v1258_v34 = vld [vmem:[%s1643_s1 + $0x178] sm:$0xff]  }
   0xa   :  { %1113 = vmatprep.subr.bf16.mxu1 %v1233_v10  ;;  %v1248_v25 = vld [vmem:[%s1643_s1 + $0x8] sm:$0xff]   ;;  %v1252_v29 = vld [vmem:[%s1643_s1] sm:$0xff]   ;;  %v1262_v37 = vld [vmem:[%s1643_s1 + $0x138] sm:$0xff]  }
   0xb   :  { %1086 = vmatpush3.bf16.msra.mxu0 %v1232_v9  ;;  %v1249_v26 = vld [vmem:[%s1643_s1 + $0xc8] sm:$0xff]   ;;  %v1253_v30 = vld [vmem:[%s1643_s1 + $0xc0] sm:$0xff]   ;;  %v1263_v38 = vld [vmem:[%s1643_s1 + $0x1f8] sm:$0xff]  }
   0xc   :  { %1087 = vmatprep.subr.bf16.mxu0 %v1235_v12  ;;  %v1250_v27 = vld [vmem:[%s1643_s1 + $0x88] sm:$0xff]   ;;  %v1254_v31 = vld [vmem:[%s1644_s0] ss:$36 sps:$4 sm:$0xff]   ;;  %v1264_v39 = vld [vmem:[%s1643_s1 + $0x1b8] sm:$0xff]  }
   0xd   :  { %1114 = vmatpush3.bf16.msra.mxu1 %v1234_v11  ;;  %v1256_v32 = vld [vmem:[%s1644_s0 + $0x4] ss:$36 sps:$4 sm:$0xff]   ;;  %v1261_v36 = vld [vmem:[%s1644_s0 + $0xc] ss:$36 sps:$4 sm:$0xff]   ;;  %v1277_v52 = vld [vmem:[%s1643_s1 + $0x158] sm:$0xff]  }
   0xe   :  { %1115 = vmatprep.subr.bf16.mxu1 %v1237_v14  ;;  %v1257_v33 = vld [vmem:[%s1643_s1 + $0x80] sm:$0xff]   ;;  %744 = vmatprep.mubr.bf16.mxu0 %v1256_v32  ;;  %v1259_v35 = vld [vmem:[%s1644_s0 + $0x8] ss:$36 sps:$4 sm:$0xff]   ;;  %v1265_v40 = vld [vmem:[%s1643_s1 + $0x170] sm:$0xff]  }
   0xf   :  { %1088 = vmatpush3.bf16.msra.mxu0 %v1236_v13  ;;  %793 = vmatprep.mubr.bf16.mxu1 %v1261_v36  ;;  %v1266_v41 = vld [vmem:[%s1643_s1 + $0x130] sm:$0xff]   ;;  %v1269_v44 = vld [vmem:[%s1643_s1 + $0x168] sm:$0xff]   ;;  %v1273_v48 = vld [vmem:[%s1643_s1 + $0x160] sm:$0xff]  }
  0x10   :  { %1089 = vmatprep.subr.bf16.mxu0 %v1239_v16  ;;  %v1267_v42 = vld [vmem:[%s1643_s1 + $0x1f0] sm:$0xff]   ;;  %v1270_v45 = vld [vmem:[%s1643_s1 + $0x128] sm:$0xff]   ;;  %v1274_v49 = vld [vmem:[%s1643_s1 + $0x120] sm:$0xff]  }
  0x11   :  { %1116 = vmatpush3.bf16.msra.mxu1 %v1238_v15  ;;  %v1268_v43 = vld [vmem:[%s1643_s1 + $0x1b0] sm:$0xff]   ;;  %v1271_v46 = vld [vmem:[%s1643_s1 + $0x1e8] sm:$0xff]   ;;  %v1275_v50 = vld [vmem:[%s1643_s1 + $0x1e0] sm:$0xff]  }
  0x12   :  { %1117 = vmatprep.subr.bf16.mxu1 %v1241_v18  ;;  %v1272_v47 = vld [vmem:[%s1643_s1 + $0x1a8] sm:$0xff]   ;;  %v1276_v51 = vld [vmem:[%s1643_s1 + $0x1a0] sm:$0xff]   ;;  %v1278_v53 = vld [vmem:[%s1643_s1 + $0x118] sm:$0xff]  }
  0x13   :  { %1090 = vmatpush3.bf16.msra.mxu0 %v1240_v17  ;;  %v1279_v54 = vld [vmem:[%s1644_s0 + $0x4c] ss:$36 sps:$4 sm:$0xff]   ;;  %v1281_v55 = vld [vmem:[%s1643_s1 + $0x1d8] sm:$0xff]   ;;  %v1295_v4 = vld [vmem:[%s1643_s1 + $0x140] sm:$0xff]  }
  0x14   :  { %1091 = vmatprep.subr.bf16.mxu0 %v1243_v20  ;;  %v1282_v56 = vld [vmem:[%s1644_s0 + $0x48] ss:$36 sps:$4 sm:$0xff]   ;;  %v1283_v57 = vld [vmem:[%s1643_s1 + $0x198] sm:$0xff]   ;;  %v1286_v59 = vld [vmem:[%s1643_s1 + $0x150] sm:$0xff]  }
  0x15   :  { %1118 = vmatpush3.bf16.msra.mxu1 %v1242_v19  ;;  %v1284_v58 = vld [vmem:[%s1644_s0 + $0x54] ss:$36 sps:$4 sm:$0xff]   ;;  %v1291_v0 = vld [vmem:[%s1643_s1 + $0x148] sm:$0xff]   ;;  %v1296_v5 = vld [vmem:[%s1643_s1 + $0x100] sm:$0xff]  }
  0x16   :  { %1119 = vmatprep.subr.bf16.mxu1 %v1245_v22  ;;  %v1287_v60 = vld [vmem:[%s1644_s0 + $0x50] ss:$36 sps:$4 sm:$0xff]   ;;  %v1292_v1 = vld [vmem:[%s1643_s1 + $0x108] sm:$0xff]   ;;  %v1297_v6 = vld [vmem:[%s1643_s1 + $0x1c0] sm:$0xff]  }
  0x17   :  { %1092 = vmatpush3.bf16.msra.mxu0 %v1244_v21  ;;  %v1288_v61 = vld [vmem:[%s1643_s1 + $0x110] sm:$0xff]   ;;  %v1293_v2 = vld [vmem:[%s1643_s1 + $0x1c8] sm:$0xff]   ;;  %v1301_v9 = vld [vmem:[%s1643_s1 + $0x180] sm:$0xff]  }
  0x18   :  { %1093 = vmatprep.subr.bf16.mxu0 %v1247_v24  ;;  %v1289_v62 = vld [vmem:[%s1643_s1 + $0x1d0] sm:$0xff]   ;;  %v1294_v3 = vld [vmem:[%s1643_s1 + $0x188] sm:$0xff]   ;;  %v1302_v10 = vld [vmem:[%s1643_s1 + $0x238] sm:$0xff]  }
  0x19   :  { %1120 = vmatpush3.bf16.msra.mxu1 %v1246_v23  ;;  %v1290_v63 = vld [vmem:[%s1643_s1 + $0x190] sm:$0xff]   ;;  %v1303_v11 = vld [vmem:[%s1644_s0 + $0x18] ss:$36 sps:$4 sm:$0xff]   ;;  %v1310_v16 = vld [vmem:[%s1643_s1 + $0x228] sm:$0xff]  }
  0x1a   :  { %1121 = vmatprep.subr.bf16.mxu1 %v1249_v26  ;;  %v1298_v7 = vld [vmem:[%s1644_s0 + $0x10] ss:$36 sps:$4 sm:$0xff]   ;;  %v1305_v12 = vld [vmem:[%s1644_s0 + $0x1c] ss:$36 sps:$4 sm:$0xff]   ;;  %v1311_v17 = vld [vmem:[%s1644_s0 + $0x64] ss:$36 sps:$4 sm:$0xff]  }
  0x1b   :  { %1094 = vmatpush3.bf16.msra.mxu0 %v1248_v25  ;;  %v1300_v8 = vld [vmem:[%s1644_s0 + $0x14] ss:$36 sps:$4 sm:$0xff]   ;;  %v1307_v14 = vld [vmem:[%s1644_s0 + $0x5c] ss:$36 sps:$4 sm:$0xff]   ;;  %v1317_v23 = vld [vmem:[%s1643_s1 + $0x208] sm:$0xff]  }
  0x1c   :  { %1095 = vmatprep.subr.bf16.mxu0 %v1251_v28  ;;  %v1306_v13 = vld [vmem:[%s1643_s1 + $0x230] sm:$0xff]   ;;  %v1309_v15 = vld [vmem:[%s1644_s0 + $0x58] ss:$36 sps:$4 sm:$0xff]   ;;  %v1313_v18 = vld [vmem:[%s1644_s0 + $0x60] ss:$36 sps:$4 sm:$0xff]  }
  0x1d   :  { %1122 = vmatpush3.bf16.msra.mxu1 %v1250_v27  ;;  %v1314_v19 = vld [vmem:[%s1643_s1 + $0x220] sm:$0xff]   ;;  %v1315_v20 = vld [vmem:[%s1643_s1 + $0x218] sm:$0xff]   ;;  %v1316_v22 = vld [vmem:[%s1643_s1 + $0x210] sm:$0xff]  }
  0x1e   :  { %1123 = vmatprep.subr.bf16.mxu1 %v1253_v30  ;;  %v1319_v21 = vld [vmem:[%s1644_s0 + $0x20] ss:$36 sps:$4 sm:$0xff]   ;;  %v1320_v25 = vld [vmem:[%s1644_s0 + $0x68] ss:$36 sps:$4 sm:$0xff]  }
  0x1f   :  { %1096 = vmatpush3.bf16.msra.mxu0 %v1252_v29  ;;  %v1318_v24 = vld [vmem:[%s1643_s1 + $0x200] sm:$0xff]  }
  0x20   :  { %1137 = vmatprep.subr.bf16.mxu0 %v1258_v34 }
  0x21   :  { %1124 = vmatpush3.bf16.msra.mxu1 %v1257_v33 }
  0x22   :  { %745 = vmatmul.mubr.bf16.vlgmr.msra.gmra.mxu0 %v1254_v31  ;;  %1165 = vmatprep.subr.bf16.mxu1 %v1263_v38 }
  0x23   :  { %1138 = vmatpush3.bf16.msra.mxu0 %v1262_v37  ;;  %752 = vmatprep.mubr.bf16.mxu0 %v1279_v54 }
  0x24   :  { %794 = vmatmul.mubr.bf16.vlgmr.msra.gmra.mxu1 %v1259_v35  ;;  %1139 = vmatprep.subr.bf16.mxu0 %v1265_v40 }
  0x25   :  { %1166 = vmatpush3.bf16.msra.mxu1 %v1264_v39  ;;  %801 = vmatprep.mubr.bf16.mxu1 %v1284_v58 }
  0x26   :  { %1167 = vmatprep.subr.bf16.mxu1 %v1267_v42 }
  0x27   :  { %1140 = vmatpush3.bf16.msra.mxu0 %v1266_v41 }
  0x28   :  { %1141 = vmatprep.subr.bf16.mxu0 %v1269_v44 }
  0x29   :  { %1168 = vmatpush3.bf16.msra.mxu1 %v1268_v43 }
  0x2a   :  { %1169 = vmatprep.subr.bf16.mxu1 %v1271_v46  ;;  %753 = vmatmul.mubr.bf16.gmra.mxu0 %v1282_v56 }
  0x2b   :  { %1142 = vmatpush3.bf16.msra.mxu0 %v1270_v45  ;;  %842 = vmatprep.mubr.bf16.mxu0 %v1300_v8 }
  0x2c   :  { %1143 = vmatprep.subr.bf16.mxu0 %v1273_v48  ;;  %802 = vmatmul.mubr.bf16.gmra.mxu1 %v1287_v60 }
  0x2d   :  { %1170 = vmatpush3.bf16.msra.mxu1 %v1272_v47  ;;  %891 = vmatprep.mubr.bf16.mxu1 %v1305_v12 }
  0x2e   :  { %1171 = vmatprep.subr.bf16.mxu1 %v1275_v50 }
  0x2f   :  { %1144 = vmatpush3.bf16.msra.mxu0 %v1274_v49 }
  0x30   :  { %1145 = vmatprep.subr.bf16.mxu0 %v1277_v52 }
  0x31   :  { %1172 = vmatpush3.bf16.msra.mxu1 %v1276_v51 }
  0x32   :  { %1173 = vmatprep.subr.bf16.mxu1 %v1281_v55  ;;  %v990_v55 = vld [vmem:[%s1645_s2] ss:$0 sm:$0xff] }
  0x33   :  { %1146 = vmatpush3.bf16.msra.mxu0 %v1278_v53 }
  0x34   :  { %1147 = vmatprep.subr.bf16.mxu0 %v1286_v59 }
  0x35   :  { %1174 = vmatpush3.bf16.msra.mxu1 %v1283_v57 }
  0x36   :  { %1175 = vmatprep.subr.bf16.mxu1 %v1289_v62 }
  0x37   :  { %1148 = vmatpush3.bf16.msra.mxu0 %v1288_v61 }
  0x38   :  { %1149 = vmatprep.subr.bf16.mxu0 %v1291_v0 }
  0x39   :  { %1176 = vmatpush3.bf16.msra.mxu1 %v1290_v63 }
  0x3a   :  { %1177 = vmatprep.subr.bf16.mxu1 %v1293_v2 }
  0x3b   :  { %1150 = vmatpush3.bf16.msra.mxu0 %v1292_v1 }
  0x3c   :  { %1151 = vmatprep.subr.bf16.mxu0 %v1295_v4 }
  0x3d   :  { %1178 = vmatpush3.bf16.msra.mxu1 %v1294_v3 }
  0x3e   :  { %1179 = vmatprep.subr.bf16.mxu1 %v1297_v6 }
  0x3f   :  { %1152 = vmatpush3.bf16.msra.mxu0 %v1296_v5 }
  0x40   :  { %1203 = vmatprep.subr.bf16.mxu0 %v1302_v10 }
  0x41   :  { %1180 = vmatpush3.bf16.msra.mxu1 %v1301_v9 }
  0x42   :  { %843 = vmatmul.mubr.bf16.vlgmr.msra.gmra.mxu0 %v1298_v7 }
  0x43   :  { %1204 = vmatpush3.bf16.msra.mxu0 %v1302_v10  ;;  %850 = vmatprep.mubr.bf16.mxu0 %v1307_v14 }
  0x44   :  { %892 = vmatmul.mubr.bf16.vlgmr.msra.gmra.mxu1 %v1303_v11  ;;  %1205 = vmatprep.subr.bf16.mxu0 %v1306_v13 }
  0x45   :  { %899 = vmatprep.mubr.bf16.mxu1 %v1311_v17 }
  0x47   :  { %1206 = vmatpush3.bf16.msra.mxu0 %v1306_v13 }
  0x48   :  { %1207 = vmatprep.subr.bf16.mxu0 %v1310_v16 }
  0x4a   :  { %851 = vmatmul.mubr.bf16.gmra.mxu0 %v1309_v15 }
  0x4b   :  { %1208 = vmatpush3.bf16.msra.mxu0 %v1310_v16  ;;  %1219 = vmatprep.mubr.bf16.mxu0 %v1319_v21 }
  0x4c   :  { %900 = vmatmul.mubr.bf16.gmra.mxu1 %v1313_v18  ;;  %1209 = vmatprep.subr.bf16.mxu0 %v1314_v19 }
  0x4f   :  { %1210 = vmatpush3.bf16.msra.mxu0 %v1314_v19 }
  0x50   :  { %1211 = vmatprep.subr.bf16.mxu0 %v1315_v20 }
  0x53   :  { %1212 = vmatpush3.bf16.msra.mxu0 %v1315_v20 }
  0x54   :  { %1213 = vmatprep.subr.bf16.mxu0 %v1316_v22 }
  0x57   :  { %1214 = vmatpush3.bf16.msra.mxu0 %v1316_v22 }
  0x58   :  { %1215 = vmatprep.subr.bf16.mxu0 %v1317_v23 }
  0x5b   :  { %1216 = vmatpush3.bf16.msra.mxu0 %v1317_v23 }
  0x5c   :  { %1217 = vmatprep.subr.bf16.mxu0 %v1318_v24 }
  0x5f   :  { %1218 = vmatpush3.bf16.msra.mxu0 %v1318_v24 }
  0x62   :  { %1220 = vmatmul.mubr.bf16.vlgmr.msra.gmra.mxu0 %v1320_v25 }
  0xe2   :  { %v1097_v26 = vpop.f32.mrf.mxu0 }
  0xe4   :  { %v1125_v27 = vpop.f32.mrf.mxu1  ;;  %v1098_v28 = vpop.f32.mrf.mxu0 }
  0xe5   :  { %v1099_v54 = vadd.f32 %v1098_v28, %v1097_v26 }
  0xe6   :  { %v1126_v29 = vpop.f32.mrf.mxu1  ;;  %v1100_v30 = vpop.f32.mrf.mxu0 }
  0xe7   :  { %v747_v61 = vadd.f32 %v1099_v54, %v990_v55  ;;  %v1127_v62 = vadd.f32 %v1126_v29, %v1125_v27 }
  0xe8   :  { %v1128_v31 = vpop.f32.mrf.mxu1  ;;  %v1101_v32 = vpop.f32.mrf.mxu0 }
  0xe9   :  { %v1102_v63 = vadd.f32 %v1101_v32, %v1100_v30  ;;  %v796_v7 = vadd.f32 %v1127_v62, %v747_v61 }
  0xea   :  { %v1103_v33 = vpop.f32.mrf.mxu0  ;;  %v1129_v34 = vpop.f32.mrf.mxu1 }
  0xeb   :  { %v750_v8 = vadd.f32 %v1102_v63, %v990_v55  ;;  %v1130_v9 = vadd.f32 %v1129_v34, %v1128_v31 }
  0xec   :  { %v1131_v35 = vpop.f32.mrf.mxu1  ;;  %v1104_v36 = vpop.f32.mrf.mxu0 }
  0xed   :  { %v1105_v53 = vadd.f32 %v1104_v36, %v1103_v33  ;;  %v799_v18 = vadd.f32 %v1130_v9, %v750_v8 }
  0xee   :  { %v1132_v37 = vpop.f32.mrf.mxu1  ;;  %v1106_v38 = vpop.f32.mrf.mxu0 }
  0xef   :  { %v755_v58 = vadd.f32 %v1105_v53, %v990_v55  ;;  %v1133_v59 = vadd.f32 %v1132_v37, %v1131_v35 }
  0xf0   :  { %v1134_v39 = vpop.f32.mrf.mxu1  ;;  %v1107_v40 = vpop.f32.mrf.mxu0 }
  0xf1   :  { %v1108_v60 = vadd.f32 %v1107_v40, %v1106_v38  ;;  %v804_v3 = vadd.f32 %v1133_v59, %v755_v58 }
  0xf2   :  { %v1135_v42 = vpop.f32.mrf.mxu1 }
  0xf3   :  { %v758_v4 = vadd.f32 %v1108_v60, %v990_v55  ;;  %v1136_v5 = vadd.f32 %v1135_v42, %v1134_v39 }
  0xf5   :  { %v807_v14 = vadd.f32 %v1136_v5, %v758_v4 }
 0x102   :  { %v1153_v41 = vpop.f32.mrf.mxu0 }
 0x104   :  { %v1154_v43 = vpop.f32.mrf.mxu0  ;;  %v1181_v44 = vpop.f32.mrf.mxu1 }
 0x105   :  { %v1155_v6 = vadd.f32 %v1154_v43, %v1153_v41 }
 0x106   :  { %v1156_v45 = vpop.f32.mrf.mxu0  ;;  %v1182_v46 = vpop.f32.mrf.mxu1 }
 0x107   :  { %v845_v15 = vadd.f32 %v1155_v6, %v796_v7  ;;  %v1183_v16 = vadd.f32 %v1182_v46, %v1181_v44 }
 0x108   :  { %v1157_v47 = vpop.f32.mrf.mxu0  ;;  %v1184_v48 = vpop.f32.mrf.mxu1 }
 0x109   :  { %v1158_v17 = vadd.f32 %v1157_v47, %v1156_v45  ;;  %v894_v26 = vadd.f32 %v1183_v16, %v845_v15 }
 0x10a   :  { %v1159_v49 = vpop.f32.mrf.mxu0  ;;  %v1185_v50 = vpop.f32.mrf.mxu1 }
 0x10b   :  { %v848_v23 = vadd.f32 %v1158_v17, %v799_v18  ;;  %v1186_v24 = vadd.f32 %v1185_v50, %v1184_v48 }
 0x10c   :  { %v1160_v51 = vpop.f32.mrf.mxu0  ;;  %v1187_v52 = vpop.f32.mrf.mxu1 }
 0x10d   :  { %v1161_v0 = vadd.f32 %v1160_v51, %v1159_v49  ;;  %v897_v34 = vadd.f32 %v1186_v24, %v848_v23 }
 0x10e   :  { %v1162_v56 = vpop.f32.mrf.mxu0  ;;  %v1188_v57 = vpop.f32.mrf.mxu1 }
 0x10f   :  { %v853_v10 = vadd.f32 %v1161_v0, %v804_v3  ;;  %v1189_v11 = vadd.f32 %v1188_v57, %v1187_v52 }
 0x110   :  { %v1163_v1 = vpop.f32.mrf.mxu0  ;;  %v1190_v2 = vpop.f32.mrf.mxu1 }
 0x111   :  { %v1164_v12 = vadd.f32 %v1163_v1, %v1162_v56  ;;  %v902_v21 = vadd.f32 %v1189_v11, %v853_v10 }
 0x112   :  { %v1191_v13 = vpop.f32.mrf.mxu1 }
 0x113   :  { %v856_v19 = vadd.f32 %v1164_v12, %v807_v14  ;;  %v1192_v20 = vadd.f32 %v1191_v13, %v1190_v2 }
 0x115   :  { %v905_v30 = vadd.f32 %v1192_v20, %v856_v19 }
 0x122   :  { %v1221_v22 = vpop.f32.mrf.mxu0 }
 0x123   :  { %v951_v25 = vadd.f32 %v1221_v22, %v902_v21 }
 0x124   :  { %v942_v27 = vpop.f32.mrf.mxu0 }
 0x125   :  { %v959_v28 = vmax.f32 %v951_v25, 0.0  ;;  %v943_v29 = vadd.f32 %v942_v27, %v894_v26 }
 0x126   :  { %v1222_v31 = vpop.f32.mrf.mxu0 }
 0x127   :  { %963 = vst [vmem:[%s1646_s3 + $0x10] sm:$0xff] %v959_v28  ;;  %v957_v32 = vmax.f32 %v943_v29, 0.0  ;;  %v954_v33 = vadd.f32 %v1222_v31, %v905_v30  ;;  %v967_v35 = vand.u32 2147483647, %v959_v28 }
 0x128   :  { %v945_v36 = vpop.f32.mrf.mxu0 }
 0x129   :  { %961 = vst [vmem:[%s1646_s3] sm:$0xff] %v957_v32  ;;  %v960_v37 = vmax.f32 %v954_v33, 0.0  ;;  %v946_v38 = vadd.f32 %v945_v36, %v897_v34  ;;  %973 = vadd.xlane.f32.xlu1 %v967_v35  ;;  %v965_v39 = vand.u32 2147483647, %v957_v32 }
 0x12b   :  { %964 = vst [vmem:[%s1646_s3 + $0x18] sm:$0xff] %v960_v37  ;;  %v958_v40 = vmax.f32 %v946_v38, 0.0  ;;  %969 = vadd.xlane.f32.xlu0 %v965_v39  ;;  %v968_v41 = vand.u32 2147483647, %v960_v37 }
 0x12d   :  { %962 = vst [vmem:[%s1646_s3 + $0x8] sm:$0xff] %v958_v40  ;;  %975 = vadd.xlane.f32.xlu1 %v968_v41  ;;  %v966_v42 = vand.u32 2147483647, %v958_v40 }
 0x12f   :  { %971 = vadd.xlane.f32.xlu0 %v966_v42 }
 0x1b2   :  { %v974_v43 = vpop.xlane.xlu1 %973 }
 0x1b3   :  { %980 = vst.msk [vmem:[%s1647_s4 + $0x10] sm:$0xff] %vm977_vm0, %v974_v43 }
 0x1b4   :  { %v970_v44 = vpop.xlane.xlu0 %969 }
 0x1b5   :  { %978 = vst.msk [vmem:[%s1647_s4] sm:$0xff] %vm977_vm0, %v970_v44 }
 0x1b6   :  { %v976_v45 = vpop.xlane.xlu1 %975 }
 0x1b7   :  { %981 = vst.msk [vmem:[%s1647_s4 + $0x18] sm:$0xff] %vm977_vm0, %v976_v45 }
 0x1b8   :  { %v972_v46 = vpop.xlane.xlu0 %971 }
 0x1b9   :  { %979 = vst.msk [vmem:[%s1647_s4 + $0x8] sm:$0xff] %vm977_vm0, %v972_v46 }

// kernel: apvit_forward.12
= control target key start
LH: loop header
LB: loop body
LE: loop exit
PB: predicated region body
PF: predicated region fallthrough
CT: control target
= control target key end

     0   :  { %s556_s18 = smov 0   ;;  %s616_s0 = inlined_call_operand.vmem [shape: bf16[2,12,128], index: 0, kind: input, shape index: {}]   ;;  %s617_s1 = inlined_call_operand.vmem [shape: f32[2,12,128], index: 1, kind: input, shape index: {}]   ;;  %s618_s2 = inlined_call_operand.vmem [shape: f32[1,128], index: 2, kind: input, shape index: {}]   ;;  %s619_s3 = inlined_call_operand.vmem [shape: bf16[128,128], index: 3, kind: input, shape index: {}]   ;;  %s620_s4 = inlined_call_operand.vmem [shape: f32[1,128], index: 4, kind: input, shape index: {}]   ;;  %s621_s5 = inlined_call_operand.vmem [shape: f32[2,16,128], index: 5, kind: output, shape index: {}]  }
   0x1 LB: > { %s442_s19 = sadd.s32 4294967295, %s522_s18   ;;  %p446_p0 = scmp.ge.s32.totalorder %s522_s18, 1  ;;  %s522_s18 = sphi %s556_s18, %s15_s18  }
   0x2   : > { %p197_p1 = scmp.lt.s32.totalorder %s522_s18, 3 }
   0x4   : > { %p198_p2 = pnand %p446_p0, %p197_p1 }
   0x5   : > { %p230_p3 = scmp.lt.s32.totalorder (!%p198_p2), %s442_s19, 1 }
   0x6   : > { %201 = sbr.rel (%p198_p2) target bundleno = 246 (0xf6), region = 40 }
   0xb   : > { %v507_v0 = vld [vmem:[%s619_s3 + $0x38] sm:$0xff]   ;;  %v524_v1 = vmov 0.0   ;;  %v508_v2 = vld [vmem:[%s619_s3 + $0x30] sm:$0xff]   ;;  %vm525_vm0 = vmmov 0   ;;  %s623_s19 = smov (!%p230_p3, %s442_s19), 1  ;;  %v509_v3 = vld [vmem:[%s619_s3 + $0x28] sm:$0xff]  }
   0xc   : > { %477 = vmatprep.subr.bf16.mxu0 %v524_v1  ;;  %493 = vmatprep.mubr.msk.bf16.mxu0 %vm525_vm0, %v524_v1  ;;  %s465_s26 = sshll.u32 %s623_s19, 3  ;;  %s466_s30 = sshll.u32 %s623_s19, 4  ;;  %v510_v4 = vld [vmem:[%s619_s3 + $0x20] sm:$0xff]   ;;  %v511_v5 = vld [vmem:[%s619_s3 + $0x18] sm:$0xff]   ;;  %v512_v6 = vld [vmem:[%s619_s3 + $0x10] sm:$0xff]  }
   0xd   : > { %478 = vmatpush3.bf16.msra.mxu0 %v507_v0  ;;  %s234_s29 = scalar_lea.vmem %s616_s0, %s465_s26  ;;  %s583_s8 = scalar_lea.vmem %s621_s5, %s466_s30  ;;  %v513_v7 = vld [vmem:[%s619_s3 + $0x8] sm:$0xff]   ;;  %v514_v8 = vld [vmem:[%s619_s3] sm:$0xff]  }
   0xe   : > { %479 = vmatprep.subr.bf16.mxu0 %v524_v1  ;;  %374 = vst [vmem:[%s583_s8 + $0xd] sm:$0x7] %v524_v1  ;;  %v515_v9 = vld [vmem:[%s234_s29] sm:$0x3f]   ;;  %s239_s24 = scalar_lea.vmem %s617_s1, %s466_s30 }
   0xf   : > { %v370_v10 = vld [vmem:[%s618_s2] sm:$0x1]  ;;  %v367_v18 = vld [vmem:[%s239_s24 + $0x8] sm:$0xf] }
  0x10   : > { %371 = vst [vmem:[%s583_s8] sm:$0x1] %v370_v10  ;;  %v453_v11 = vld [vmem:[%s620_s4] ss:$0 sm:$0xff] }
  0x11   : > { %480 = vmatpush3.bf16.msra.mxu0 %v508_v2  ;;  %v366_v13 = vld [vmem:[%s239_s24] sm:$0xff] }
  0x12   : > { %481 = vmatprep.subr.bf16.mxu0 %v524_v1 }
  0x15   : > { %482 = vmatpush3.bf16.msra.mxu0 %v509_v3 }
  0x16   : > { %483 = vmatprep.subr.bf16.mxu0 %v524_v1 }
  0x19   : > { %484 = vmatpush3.bf16.msra.mxu0 %v510_v4 }
  0x1a   : > { %485 = vmatprep.subr.bf16.mxu0 %v524_v1 }
  0x1d   : > { %486 = vmatpush3.bf16.msra.mxu0 %v511_v5 }
  0x1e   : > { %487 = vmatprep.subr.bf16.mxu0 %v524_v1 }
  0x21   : > { %488 = vmatpush3.bf16.msra.mxu0 %v512_v6 }
  0x22   : > { %489 = vmatprep.subr.bf16.mxu0 %v524_v1 }
  0x25   : > { %490 = vmatpush3.bf16.msra.mxu0 %v513_v7 }
  0x26   : > { %491 = vmatprep.subr.bf16.mxu0 %v524_v1 }
  0x29   : > { %492 = vmatpush3.bf16.msra.mxu0 %v514_v8 }
  0x2c   : > { %494 = vmatmul.mubr.bf16.vlgmr.msra.gmra.mxu0 %v515_v9 }
  0xec   : > { %v359_v12 = vpop.f32.mrf.mxu0 }
  0xed   : > { %v360_v14 = vadd.f32 %v453_v11, %v359_v12 }
  0xee   : > { %v495_v15 = vpop.f32.mrf.mxu0 }
  0xef   : > { %v368_v16 = vadd.f32 %v366_v13, %v360_v14 }
  0xf0   : > { %v362_v17 = vpop.f32.mrf.mxu0 }
  0xf1   : > { %372 = vst [vmem:[%s583_s8 + $0x1] sm:$0xff] %v368_v16  ;;  %v363_v19 = vadd.f32 %v453_v11, %v362_v17 }
  0xf2   : > { %v496_v20 = vpop.f32.mrf.mxu0 }
  0xf3   : > { %v369_v21 = vadd.f32 %v367_v18, %v363_v19 }
  0xf5   : > { %373 = vst [vmem:[%s583_s8 + $0x9] sm:$0xf] %v369_v21 }
  0xf6 PF: > { %s15_s18 = sadd.s32 1, %s522_s18  }
  0xf7   : > { %p12_p4 = scmp.ge.s32.totalorder %s15_s18, 4  }
  0xf9   :  { %14 = sbr.rel (!%p12_p4) target bundleno = 1 (0x1), region = 73 }

// kernel: apvit_forward.13
= control target key start
LH: loop header
LB: loop body
LE: loop exit
PB: predicated region body
PF: predicated region fallthrough
CT: control target
= control target key end

     0   :  { %s3394_s18 = smov 0   ;;  %s3396_s19 = smov 0   ;;  %s3908_s0 = inlined_call_operand.vmem [shape: f32[2,16,128], index: 0, kind: input, shape index: {}]   ;;  %s3909_s1 = inlined_call_operand.vmem [shape: f32[2,1,16], index: 1, kind: input, shape index: {}]   ;;  %s3910_s2 = inlined_call_operand.vmem [shape: f32[2,16,1], index: 2, kind: input, shape index: {}]   ;;  %s3911_s3 = inlined_call_operand.vmem [shape: f32[5,1,128], index: 3, kind: input, shape index: {}]   ;;  %s3912_s4 = inlined_call_operand.vmem [shape: f32[5,1,128], index: 4, kind: input, shape index: {}]   ;;  %s3913_s5 = inlined_call_operand.vmem [shape: bf16[5,128,384], index: 5, kind: input, shape index: {}]   ;;  %s3914_s6 = inlined_call_operand.vmem [shape: bf16[5,128,128], index: 6, kind: input, shape index: {}]   ;;  %s3915_s7 = inlined_call_operand.vmem [shape: f32[5,1,128], index: 7, kind: input, shape index: {}]   ;;  %s3916_s8 = inlined_call_operand.vmem [shape: f32[5,1,128], index: 8, kind: input, shape index: {}]   ;;  %s3917_s9 = inlined_call_operand.vmem [shape: f32[5,1,128], index: 9, kind: input, shape index: {}]   ;;  %s3918_s10 = inlined_call_operand.vmem [shape: bf16[5,128,384], index: 10, kind: input, shape index: {}]   ;;  %s3919_s11 = inlined_call_operand.vmem [shape: f32[5,1,384], index: 11, kind: input, shape index: {}]   ;;  %s3920_s12 = inlined_call_operand.vmem [shape: bf16[5,384,128], index: 12, kind: input, shape index: {}]   ;;  %s3921_s13 = inlined_call_operand.vmem [shape: f32[5,1,128], index: 13, kind: input, shape index: {}]   ;;  %s3922_s14 = inlined_call_operand.vmem [shape: f32[2,16,128], index: 14, kind: output, shape index: {0}]   ;;  %s3923_s15 = inlined_call_operand.vmem [shape: f32[2,1,16], index: 15, kind: output, shape index: {1}]  }
   0x1   :  { %3929 = sst [smem:[#allocation9_spill]] %s3908_s0  ;;  %s3398_s20 = smov 0  }
   0x2   :  { %3930 = sst [smem:[#allocation10_spill]] %s3909_s1  ;;  %s3400_s21 = smov 0  }
   0x3   :  { %3931 = sst [smem:[#allocation11_spill]] %s3910_s2  ;;  %s3402_s22 = smov 0  }
   0x4   :  { %3932 = sst [smem:[#allocation12_spill]] %s3913_s5 }
   0x5   :  { %3933 = sst [smem:[#allocation13_spill]] %s3914_s6 }
   0x6   :  { %3934 = sst [smem:[#allocation14_spill]] %s3916_s8 }
   0x7   :  { %3935 = sst [smem:[#allocation15_spill]] %s3917_s9 }
   0x8   :  { %3936 = sst [smem:[#allocation16_spill]] %s3918_s10 }
   0x9   :  { %3937 = sst [smem:[#allocation17_spill]] %s3919_s11 }
   0xa   :  { %3938 = sst [smem:[#allocation18_spill]] %s3922_s14 }
   0xb   :  { %3939 = sst [smem:[#allocation19_spill]] %s3923_s15 }
   0xc LB: > { %3940 = sst [smem:[#allocation2_spill]] %s3290_s18  ;;  %s35_s23 = sadd.s32 1, %s3298_s20  ;;  %s3306_s22 = sphi %s3402_s22, %s26_s22   ;;  %s3302_s21 = sphi %s3400_s21, %s3974_s21   ;;  %s3298_s20 = sphi %s3398_s20, %s3973_s20   ;;  %s3294_s19 = sphi %s3396_s19, %s3972_s19   ;;  %s3290_s18 = sphi %s3394_s18, %s3971_s18  }
   0xd   : > { %3941 = sst [smem:[#allocation3_spill]] %s3298_s20  ;;  %s38_s24 = sadd.s32 1, %s3302_s21 }
   0xe   : > { %3942 = sst [smem:[#allocation4_spill]] %s3302_s21  ;;  %p36_p0 = scmp.ge.s32.totalorder %s35_s23, 5 }
   0xf   : > { %3943 = sst [smem:[#allocation5_spill]] %s3306_s22  ;;  %p2733_p1 = scmp.ge.s32.totalorder %s3306_s22, 1 }
  0x10   : > { %p567_p2 = scmp.lt.s32.totalorder %s3306_s22, 11  ;;  %s3976_s23 = smov (%p36_p0, %s35_s23), 0 }
  0x11   : > { %3944 = sst [smem:[#allocation6_spill]] %s3976_s23  ;;  %s3978_s24 = smov (!%p36_p0, %s38_s24), %s3302_s21 }
  0x12   : > { %p568_p3 = pnand %p2733_p1, %p567_p2  ;;  %p40_p4 = scmp.ge.s32.totalorder %s3978_s24, 2 }
  0x14   : > { %s3980_s24 = smov (%p40_p4, %s3978_s24), 0  ;;  %571 = sbr.rel (%p568_p3) target bundleno = 3609 (0xe19), region = 76 }
  0x15   : > { %3945 = sst [smem:[#allocation7_spill]] %s3980_s24 }
  0x19   : > { %p668_p5 = scmp.lt.s32.totalorder %s3294_s19, 1  ;;  %p681_p6 = scmp.lt.s32.totalorder %s3290_s18, 4 }
  0x1a   : > { %s3947_s0 = sld [smem:[#allocation9_spill]] }
  0x1b   : > { %s3982_s19 = smov (!%p668_p5, %s3294_s19), 1  ;;  %s3948_s2 = sld [smem:[#allocation11_spill]] }
  0x1c   : > { %s3430_s25 = scalar_select %p681_p6, %s3290_s18, 4 }
  0x1d   : > { %s2847_s26 = sshll.u32 %s3982_s19, 4  ;;  %s3950_s6 = sld [smem:[#allocation13_spill]] }
  0x1e   : > { %s3068_s28 = smul.u32 192, %s3430_s25  ;;  %s2849_s29 = sshll.u32 %s3430_s25, 6 }
  0x1f   : > { %s3951_s5 = sld [smem:[#allocation12_spill]]  ;;  %s3069_s16 = smul.u32 3, %s3430_s25 }
  0x20   : > { %s672_s17 = scalar_lea.vmem %s3947_s0, %s2847_s26  ;;  %s3954_s10 = sld [smem:[#allocation16_spill]] }
  0x21   : > { %s3443_s21 = scalar_lea.vmem %s3948_s2, %s2847_s26  ;;  %s3486_s0 = scalar_lea.vmem %s3920_s12, %s3068_s28 }
  0x22   : > { %3949 = sst [smem:[#allocation8_spill]] %s3443_s21  ;;  %s722_s18 = scalar_lea.vmem %s3921_s13, %s3430_s25 }
  0x23   : > { %s3458_s30 = scalar_lea.vmem %s3950_s6, %s2849_s29  ;;  %s3955_s6 = sld [smem:[#allocation18_spill]] }
  0x24   : > { %s3956_s1 = sld [smem:[#allocation17_spill]] }
  0x25   : > { %s3467_s20 = scalar_lea.vmem %s3951_s5, %s3068_s28  ;;  %s3957_s8 = sld [smem:[#allocation19_spill]] }
  0x26   : > { %s3480_s29 = scalar_lea.vmem %s3954_s10, %s3068_s28  ;;  %s3958_s28 = sld [smem:[#allocation2_spill]] }
  0x29   : > { %s3495_s27 = scalar_lea.vmem %s3955_s6, %s2847_s26 }
  0x2a   : > { %s3500_s14 = scalar_lea.vmem %s3956_s1, %s3069_s16 }
  0x2b   : > { %s730_s24 = scalar_lea.vmem %s3957_s8, %s3982_s19 }
  0x2c   : > { %p2745_p7 = scmp.ne.s32.totalorder %s3958_s28, 0 }
  0x2e   : > { %735 = sbr.rel (%p2745_p7) target bundleno = 53 (0x35), region = 80 }
  0x33   : > { %v736_v0 = vld [vmem:[%s672_s17] sm:$0xff]  ;;  %v737_v1 = vld [vmem:[%s672_s17 + $0x8] sm:$0xff] }
  0x34   : > { %738 = vst [vmem:[%s3495_s27] sm:$0xff] %v736_v0  ;;  %739 = vst [vmem:[%s3495_s27 + $0x8] sm:$0xff] %v737_v1 }
  0x35 PF: > { %v3118_v4 = vld [vmem:[%s3467_s20 + $0xac] ss:$12 sps:$4 sm:$0xff]   ;;  %v3120_v5 = vld [vmem:[%s3467_s20 + $0xa8] ss:$12 sps:$4 sm:$0xff]   ;;  %v3308_v6 = vmov 0.0   ;;  %v3309_v29 = vmov 0   ;;  %s3959_s8 = scalar_lea.vmem %s3911_s3, %s3430_s25  ;;  %s3960_s21 = scalar_lea.vmem %s3912_s4, %s3430_s25 }
  0x36   : > { %2928 = vmatprep.subr.bf16.mxu1 %v3308_v6  ;;  %v3121_v7 = vld [vmem:[%s3467_s20 + $0xb0] ss:$12 sps:$4 sm:$0xff]   ;;  %949 = vmatprep.subr.bf16.mxu0 %v3118_v4  ;;  %v3122_v16 = vld [vmem:[%s3467_s20 + $0x94] ss:$12 sps:$4 sm:$0xff]   ;;  %v3125_v18 = vld [vmem:[%s3467_s20 + $0x98] ss:$12 sps:$4 sm:$0xff]   ;;  %s3964_s1 = scalar_lea.vmem %s3915_s7, %s3430_s25 }
  0x37   : > { %950 = vmatpush1.bf16.msra.mxu0 %v3120_v5  ;;  %2929 = vmatpush3.bf16.msra.mxu1 %v3121_v7  ;;  %v3124_v17 = vld [vmem:[%s3467_s20 + $0x90] ss:$12 sps:$4 sm:$0xff]   ;;  %v3128_v20 = vld [vmem:[%s3467_s20 + $0x78] ss:$12 sps:$4 sm:$0xff]   ;;  %v3129_v21 = vld [vmem:[%s3467_s20 + $0x80] ss:$12 sps:$4 sm:$0xff]   ;;  %v1087_v7 = vlaneseq }
  0x38   : > { %2930 = vmatprep.subr.bf16.mxu1 %v3308_v6  ;;  %951 = vmatprep.subr.bf16.mxu0 %v3122_v16  ;;  %v3126_v19 = vld [vmem:[%s3467_s20 + $0x7c] ss:$12 sps:$4 sm:$0xff]   ;;  %v3130_v22 = vld [vmem:[%s3467_s20 + $0x64] ss:$12 sps:$4 sm:$0xff]   ;;  %v3132_v23 = vld [vmem:[%s3467_s20 + $0x60] ss:$12 sps:$4 sm:$0xff]  }
  0x39   : > { %v3133_v24 = vld [vmem:[%s3467_s20 + $0x68] ss:$12 sps:$4 sm:$0xff]   ;;  %v3134_v25 = vld [vmem:[%s3467_s20 + $0x4c] ss:$12 sps:$4 sm:$0xff]   ;;  %v3137_v27 = vld [vmem:[%s3467_s20 + $0x50] ss:$12 sps:$4 sm:$0xff]   ;;  %981 = vmatprep.mubr.bf16.mxu0 %v3309_v29  ;;  %3117 = vset.pattern.permute.xlu0 %v3309_v29 }
  0x3a   : > { %v3136_v26 = vld [vmem:[%s3467_s20 + $0x48] ss:$12 sps:$4 sm:$0xff]   ;;  %vm3310_vm0 = vmmov 0   ;;  %v3140_v30 = vld [vmem:[%s3467_s20 + $0x30] ss:$12 sps:$4 sm:$0xff]   ;;  %3116 = vset.pattern.permute.xlu1 %v3309_v29  ;;  %vm1036_vm1 = vcmask 261120  }
  0x3b   : > { %v740_v2 = vld [vmem:[%s3495_s27] sm:$0xff]  ;;  %v741_v3 = vld [vmem:[%s3495_s27 + $0x8] sm:$0xff]  ;;  %952 = vmatpush1.bf16.msra.mxu0 %v3124_v17  ;;  %2931 = vmatpush3.bf16.msra.mxu1 %v3125_v18  ;;  %s3311_s26 = smov 96   ;;  %s3961_s11 = sld [smem:[#allocation10_spill]]  ;;  %vm1094_vm2 = vcmask 130048   ;;  %vm2501_vm3 = vcmask 122880  }
  0x3c   : > { %749 = vadd.xlane.f32.xlu0 %v740_v2  ;;  %2932 = vmatprep.subr.bf16.mxu1 %v3308_v6  ;;  %v3138_v28 = vld [vmem:[%s3467_s20 + $0x34] ss:$12 sps:$4 sm:$0xff]   ;;  %v3141_v31 = vld [vmem:[%s3467_s20 + $0x38] ss:$12 sps:$4 sm:$0xff]   ;;  %v3142_v32 = vld [vmem:[%s3467_s20 + $0x1c] ss:$12 sps:$4 sm:$0xff]  }
  0x3d   : > { %953 = vmatprep.subr.bf16.mxu0 %v3126_v19  ;;  %2944 = vmatprep.mubr.msk.bf16.mxu1 %vm3310_vm0, %v3308_v6  ;;  %v3144_v33 = vld [vmem:[%s3467_s20 + $0x18] ss:$12 sps:$4 sm:$0xff]   ;;  %v3145_v34 = vld [vmem:[%s3467_s20 + $0x20] ss:$12 sps:$4 sm:$0xff]   ;;  %v3149_v37 = vld [vmem:[%s3467_s20 + $0x8] ss:$12 sps:$4 sm:$0xff]  }
  0x3e   : > { %v3146_v35 = vld [vmem:[%s3467_s20 + $0x4] ss:$12 sps:$4 sm:$0xff]   ;;  %v3148_v36 = vld [vmem:[%s3467_s20] ss:$12 sps:$4 sm:$0xff]   ;;  %s3312_s23 = smov 64   ;;  %s3313_s2 = smov 32  }
  0x3f   : > { %954 = vmatpush1.bf16.msra.mxu0 %v3128_v20  ;;  %2933 = vmatpush3.bf16.msra.mxu1 %v3129_v21  ;;  %v2747_v46 = vld [vmem:[%s3959_s8] ss:$0 sm:$0xff]  ;;  %s3963_s22 = sld [smem:[#allocation8_spill]] }
  0x40   : > { %751 = vadd.xlane.f32.xlu0 %v741_v3  ;;  %2934 = vmatprep.subr.bf16.mxu1 %v3308_v6  ;;  %v2748_v50 = vld [vmem:[%s3960_s21] ss:$0 sm:$0xff]  ;;  %s3965_s5 = sld [smem:[#allocation14_spill]] }
  0x41   : > { %955 = vmatprep.subr.bf16.mxu0 %v3130_v22  ;;  %s3962_s16 = scalar_lea.vmem %s3961_s11, %s3982_s19  ;;  %s3967_s10 = sld [smem:[#allocation15_spill]] }
  0x43   : > { %956 = vmatpush1.bf16.msra.mxu0 %v3132_v23  ;;  %2935 = vmatpush3.bf16.msra.mxu1 %v3133_v24 }
  0x44   : > { %957 = vmatprep.subr.bf16.mxu0 %v3134_v25  ;;  %2936 = vmatprep.subr.bf16.mxu1 %v3308_v6 }
  0x46   : > { %s3966_s6 = scalar_lea.vmem %s3965_s5, %s3430_s25 }
  0x47   : > { %958 = vmatpush1.bf16.msra.mxu0 %v3136_v26  ;;  %2937 = vmatpush3.bf16.msra.mxu1 %v3137_v27  ;;  %s3968_s21 = scalar_lea.vmem %s3967_s10, %s3430_s25 }
  0x48   : > { %959 = vmatprep.subr.bf16.mxu0 %v3138_v28  ;;  %2938 = vmatprep.subr.bf16.mxu1 %v3308_v6 }
  0x4b   : > { %960 = vmatpush1.bf16.msra.mxu0 %v3140_v30  ;;  %2939 = vmatpush3.bf16.msra.mxu1 %v3141_v31 }
  0x4c   : > { %961 = vmatprep.subr.bf16.mxu0 %v3142_v32  ;;  %2940 = vmatprep.subr.bf16.mxu1 %v3308_v6 }
  0x4f   : > { %962 = vmatpush1.bf16.msra.mxu0 %v3144_v33  ;;  %2941 = vmatpush3.bf16.msra.mxu1 %v3145_v34 }
  0x50   : > { %963 = vmatprep.subr.bf16.mxu0 %v3146_v35  ;;  %2942 = vmatprep.subr.bf16.mxu1 %v3308_v6 }
  0x53   : > { %964 = vmatpush1.bf16.msra.mxu0 %v3148_v36  ;;  %2943 = vmatpush3.bf16.msra.mxu1 %v3149_v37 }
  0x54   : > { %2954 = vmatprep.subr.bf16.mxu1 %v3308_v6  ;;  %2948 = vmatprep.subr.bf16.mxu0 %v3308_v6 }
  0xc5   : > { %v750_v8 = vpop.xlane.xlu0 %749 }
  0xc6   : > { %v754_v9 = vmul.f32 0.0078125, %v750_v8  ;;  %v742_v8 = vld [vmem:[%s3962_s16] sm:$0x1] }
  0xc8   : > { %v3516_v10 = vsub.f32 %v740_v2, %v754_v9  ;;  %v2746_v9 = vadd.f32 -1.0, %v742_v8 }
  0xc9   : > { %v752_v11 = vpop.xlane.xlu0 %751 }
  0xca   : > { %v755_v12 = vmul.f32 0.0078125, %v752_v11  ;;  %v758_v13 = vmul.f32 %v3516_v10, %v3516_v10  ;;  %v746_v11 = vmul.f32 1e+09, %v2746_v9 }
  0xcc   : > { %v3520_v14 = vsub.f32 %v741_v3, %v755_v12  ;;  %760 = vadd.xlane.f32.xlu1 %v758_v13 }
  0xce   : > { %v759_v15 = vmul.f32 %v3520_v14, %v3520_v14 }
  0xd0   : > { %762 = vadd.xlane.f32.xlu1 %v759_v15 }
 0x155   : > { %v761_v38 = vpop.xlane.xlu1 %760 }
 0x156   : > { %v764_v39 = vmul.f32 0.0078125, %v761_v38 }
 0x158   : > { %v766_v40 = vadd.f32 1e-06, %v764_v39 }
 0x159   : > { %v763_v41 = vpop.xlane.xlu1 %762 }
 0x15a   : > { %3214 = vrsqrt.f32 %v766_v40  ;;  %v765_v42 = vmul.f32 0.0078125, %v763_v41 }
 0x15c   : > { %v767_v43 = vadd.f32 1e-06, %v765_v42 }
 0x15e   : > { %3216 = vrsqrt.f32 %v767_v43 }
 0x167   : > { %v3215_v44 = vpop.eup %3214 }
 0x168   : > { %v770_v45 = vmul.f32 %v3215_v44, %v3516_v10  ;;  %v3603_v10 = vshrl.u32 %v1087_v7, 7 }
 0x16a   : > { %v778_v49 = vmul.f32 %v2747_v46, %v770_v45  ;;  %v1089_v12 = vsub.s32 0, %v3603_v10 }
 0x16b   : > { %v3217_v47 = vpop.eup %3216 }
 0x16c   : > { %v771_v48 = vmul.f32 %v3217_v47, %v3520_v14  ;;  %v786_v52 = vadd.f32 %v2748_v50, %v778_v49  ;;  %v3608_v13 = vrot.slane %v746_v11, %v1089_v12  ;;  %v3150_v11 = vld [vmem:[%s3458_s30 + $0x8] sm:$0xff]  }
 0x16e   : > { %v779_v51 = vmul.f32 %v2747_v46, %v771_v48 }
 0x170   : > { %v787_v53 = vadd.f32 %v2748_v50, %v779_v51 }
 0x172   : > { %v788_v54 = vpack.c.bf16 %v787_v53, %v786_v52 }
 0x174   : > { %982 = vmatmul.mubr.bf16.vlgmr.msra.gmra.mxu0 %v788_v54  ;;  %2945 = vmatmul.mubr.bf16.vlgmr.msra.gmra.mxu1 %v788_v54 }
 0x175   : > { %2950 = vmatprep.mubr.msk.bf16.mxu0 %vm3310_vm0, %v3308_v6  ;;  %2956 = vmatprep.mubr.msk.bf16.mxu1 %vm3310_vm0, %v3308_v6 }
 0x234   : > { %v983_v55 = vpop.f32.mrf.mxu0  ;;  %v1026_v56 = vpop.f32.mrf.mxu1 }
 0x236   : > { %v985_v57 = vpop.f32.mrf.mxu0  ;;  %v2946_v58 = vpop.f32.mrf.mxu1 }
 0x238   : > { %v987_v59 = vpop.f32.mrf.mxu0  ;;  %v1029_v60 = vpop.f32.mrf.mxu1 }
 0x239   : > { %v3574_v61 = vpack.c.bf16 %v987_v59, %v983_v55  ;;  %v3576_v62 = vpack.c.bf16 %v1029_v60, %v1026_v56 }
 0x23a   : > { %v989_v63 = vpop.f32.mrf.mxu0  ;;  %v2947_v0 = vpop.f32.mrf.mxu1 }
 0x23b   : > { %v3578_v1 = vpack.c.bf16 %v989_v63, %v985_v57  ;;  %2955 = vmatpush3.bf16.msra.mxu1 %v3576_v62  ;;  %1190 = vrot.lane.b32.xlu1 %v3574_v61, %s3311_s26  ;;  %v3152_v0 = vld [vmem:[%s3458_s30 + $0x18] sm:$0xff]  }
 0x23c   : > { %2966 = vmatprep.subr.bf16.mxu1 %v3308_v6 }
 0x23d   : > { %1193 = vrot.lane.b32.xlu0 %v3578_v1, %s3311_s26  ;;  %v1041_v2 = vsel %vm1036_vm1, %v3578_v1, 0 }
 0x23e   : > { %2949 = vmatpush3.bf16.xpose.msra.mxu0 %v1041_v2 }
 0x23f   : > { %2960 = vmatprep.subr.bf16.mxu0 %v3308_v6 }
 0x245   : > { %2951 = vmatmul.mubr.msk.bf16.vlgmr.msra.gmra.mxu0 %vm1036_vm1, %v3574_v61 }
 0x246   : > { %2962 = vmatprep.mubr.msk.bf16.mxu0 %vm3310_vm0, %v3308_v6 }
 0x2ad   : > { %v1191_v5 = vpop.permute.xlu1 %1190 }
 0x2af   : > { %v1194_v3 = vpop.permute.xlu0 %1193 }
 0x2b0   : > { %v1199_v4 = vsel %vm1036_vm1, %v1194_v3, 0 }
 0x2b1   : > { %2961 = vmatpush3.bf16.xpose.msra.mxu0 %v1199_v4 }
 0x2b2   : > { %2972 = vmatprep.subr.bf16.mxu0 %v3308_v6 }
 0x2b8   : > { %2963 = vmatmul.mubr.msk.bf16.vlgmr.msra.gmra.mxu0 %vm1036_vm1, %v1191_v5 }
 0x2b9   : > { %2976 = vmatprep.mubr.msk.bf16.mxu0 %vm3310_vm0, %v3308_v6  ;;  %2973 = vmatpush3.bf16.msra.mxu0 %v3152_v0 }
 0x2ba   : > { %2974 = vmatprep.subr.bf16.mxu0 %v3308_v6 }
 0x305   : > { %v1077_v14 = vpop.f32.mrf.mxu0 }
 0x306   : > { %v1084_v15 = vmul.f32 0.17677669, %v1077_v14 }
 0x307   : > { %v2952_v16 = vpop.f32.mrf.mxu0 }
 0x308   : > { %v1092_v17 = vadd.f32 %v3608_v13, %v1084_v15  ;;  %v3151_v15 = vld [vmem:[%s3458_s30] sm:$0xff]   ;;  %v3153_v16 = vld [vmem:[%s3458_s30 + $0x10] sm:$0xff]  }
 0x309   : > { %v1080_v18 = vpop.f32.mrf.mxu0  ;;  %2975 = vmatpush3.bf16.msra.mxu0 %v3153_v16  ;;  %v3155_v16 = vld [vmem:[%s3458_s30 + $0x20] sm:$0xff]  }
 0x30a   : > { %v1085_v19 = vmul.f32 0.17677669, %v1080_v18  ;;  %v1095_v20 = vsel %vm1094_vm2, %v1092_v17, -inf  ;;  %2988 = vmatprep.subr.bf16.mxu0 %v3308_v6 }
 0x30b   : > { %1096 = vmax.xlane.f32.xlu1 %v1095_v20  ;;  %v2953_v21 = vpop.f32.mrf.mxu0 }
 0x30c   : > { %v1093_v22 = vadd.f32 %v3608_v13, %v1085_v19 }
 0x30e   : > { %v1098_v23 = vsel %vm1094_vm2, %v1093_v22, -inf }
 0x30f   : > { %1099 = vmax.xlane.f32.xlu0 %v1098_v23 }
 0x378   : > { %v1235_v24 = vpop.f32.mrf.mxu0 }
 0x379   : > { %v1242_v25 = vmul.f32 0.17677669, %v1235_v24 }
 0x37a   : > { %v2964_v26 = vpop.f32.mrf.mxu0 }
 0x37b   : > { %v1244_v27 = vadd.f32 %v1242_v25, %v3608_v13 }
 0x37c   : > { %v1238_v28 = vpop.f32.mrf.mxu0 }
 0x37d   : > { %v1243_v30 = vmul.f32 0.17677669, %v1238_v28  ;;  %v1246_v31 = vsel %vm1094_vm2, %v1244_v27, -inf }
 0x37e   : > { %1247 = vmax.xlane.f32.xlu0 %v1246_v31  ;;  %v2965_v32 = vpop.f32.mrf.mxu0 }
 0x37f   : > { %v1245_v33 = vadd.f32 %v1243_v30, %v3608_v13 }
 0x381   : > { %v1249_v34 = vsel %vm1094_vm2, %v1245_v33, -inf }
 0x382   : > { %1250 = vmax.xlane.f32.xlu1 %v1249_v34 }
 0x394   : > { %v1097_v35 = vpop.xlane.xlu1 %1096 }
 0x395   : > { %v1101_v36 = vsub.f32 %v1092_v17, %v1097_v35 }
 0x397   : > { %v1103_v37 = vmul.f32 1.442695, %v1101_v36 }
 0x398   : > { %v1100_v38 = vpop.xlane.xlu0 %1099 }
 0x399   : > { %3218 = vpow2.f32 %v1103_v37  ;;  %v1102_v39 = vsub.f32 %v1093_v22, %v1100_v38 }
 0x39b   : > { %v1105_v40 = vmul.f32 1.442695, %v1102_v39 }
 0x39d   : > { %3220 = vpow2.f32 %v1105_v40 }
 0x3a6   : > { %v3219_v41 = vpop.eup %3218 }
 0x3a7   : > { %v1107_v42 = vsel %vm1094_vm2, %v3219_v41, 0.0 }
 0x3a8   : > { %1108 = vadd.xlane.f32.xlu0 %v1107_v42 }
 0x3aa   : > { %v3221_v43 = vpop.eup %3220 }
 0x3ab   : > { %v1110_v44 = vsel %vm1094_vm2, %v3221_v43, 0.0 }
 0x3ac   : > { %1111 = vadd.xlane.f32.xlu1 %v1110_v44 }
 0x407   : > { %v1248_v45 = vpop.xlane.xlu0 %1247 }
 0x408   : > { %v1252_v46 = vsub.f32 %v1244_v27, %v1248_v45 }
 0x40a   : > { %v1254_v47 = vmul.f32 1.442695, %v1252_v46 }
 0x40b   : > { %v1251_v48 = vpop.xlane.xlu1 %1250 }
 0x40c   : > { %3222 = vpow2.f32 %v1254_v47  ;;  %v1253_v49 = vsub.f32 %v1245_v33, %v1251_v48 }
 0x40e   : > { %v1256_v50 = vmul.f32 1.442695, %v1253_v49 }
 0x410   : > { %3224 = vpow2.f32 %v1256_v50 }
 0x419   : > { %v3223_v51 = vpop.eup %3222 }
 0x41a   : > { %v1258_v52 = vsel %vm1094_vm2, %v3223_v51, 0.0 }
 0x41b   : > { %1259 = vadd.xlane.f32.xlu0 %v1258_v52 }
 0x41d   : > { %v3225_v53 = vpop.eup %3224 }
 0x41e   : > { %v1261_v54 = vsel %vm1094_vm2, %v3225_v53, 0.0 }
 0x41f   : > { %1262 = vadd.xlane.f32.xlu1 %v1261_v54 }
 0x430   : > { %1448 = vrot.lane.b32.xlu1 %v3578_v1, %s3312_s23 }
 0x431   : > { %1282 = vrot.lane.b32.xlu0 %v3576_v62, %s3311_s26  ;;  %v1109_v55 = vpop.xlane.xlu0 %1108 }
 0x432   : > { %3226 = vrcp.f32 %v1109_v55 }
 0x434   : > { %1446 = vrot.lane.b32.xlu1 %v3574_v61, %s3312_s23 }
 0x435   : > { %v1112_v56 = vpop.xlane.xlu1 %1111 }
 0x436   : > { %3228 = vrcp.f32 %v1112_v56 }
 0x43f   : > { %v3227_v57 = vpop.eup %3226 }
 0x440   : > { %v3628_v59 = vmul.f32 %v3227_v57, %v3219_v41 }
 0x443   : > { %v3229_v58 = vpop.eup %3228 }
 0x444   : > { %v3630_v60 = vmul.f32 %v3229_v58, %v3221_v43 }
 0x446   : > { %v1139_v63 = vpack.c.bf16 %v3630_v60, %v3628_v59 }
 0x448   : > { %2957 = vmatmul.mubr.msk.bf16.vlgmr.msra.gmra.mxu1 %vm1094_vm2, %v1139_v63 }
 0x449   : > { %2968 = vmatprep.mubr.msk.bf16.mxu1 %vm3310_vm0, %v3308_v6 }
 0x4a4   : > { %v1260_v2 = vpop.xlane.xlu0 %1259 }
 0x4a5   : > { %3230 = vrcp.f32 %v1260_v2 }
 0x4a8   : > { %v1283_v3 = vpop.permute.xlu0 %1282  ;;  %v1263_v4 = vpop.xlane.xlu1 %1262 }
 0x4a9   : > { %3232 = vrcp.f32 %v1263_v4  ;;  %2967 = vmatpush3.bf16.msra.mxu1 %v1283_v3 }
 0x4aa   : > { %2980 = vmatprep.subr.bf16.mxu1 %v3308_v6 }
 0x4ac   : > { %v1449_v24 = vpop.permute.xlu1 %1448 }
 0x4ad   : > { %v1454_v28 = vsel %vm1036_vm1, %v1449_v24, 0 }
 0x4b0   : > { %v1447_v30 = vpop.permute.xlu1 %1446 }
 0x4b2   : > { %v3231_v5 = vpop.eup %3230 }
 0x4b3   : > { %v3640_v8 = vmul.f32 %v3231_v5, %v3223_v51 }
 0x4b6   : > { %v3233_v7 = vpop.eup %3232 }
 0x4b7   : > { %v3642_v9 = vmul.f32 %v3233_v7, %v3225_v53 }
 0x4b9   : > { %v1280_v14 = vpack.c.bf16 %v3642_v9, %v3640_v8 }
 0x4bb   : > { %2969 = vmatmul.mubr.msk.bf16.vlgmr.msra.gmra.mxu1 %vm1094_vm2, %v1280_v14 }
 0x4bc   : > { %2981 = vmatpush3.bf16.msra.mxu1 %v3150_v11  ;;  %2984 = vmatprep.mubr.msk.bf16.mxu1 %vm3310_vm0, %v3308_v6 }
 0x4bd   : > { %2982 = vmatprep.subr.bf16.mxu1 %v3308_v6 }
 0x4c0   : > { %2983 = vmatpush3.bf16.msra.mxu1 %v3151_v15  ;;  %v3154_v15 = vld [vmem:[%s3458_s30 + $0x28] sm:$0xff]  }
 0x4c1   : > { %2994 = vmatprep.subr.bf16.mxu1 %v3308_v6 }
 0x508   : > { %v1177_v17 = vpop.f32.mrf.mxu1 }
 0x50a   : > { %v2958_v18 = vpop.f32.mrf.mxu1 }
 0x50c   : > { %v1180_v19 = vpop.f32.mrf.mxu1 }
 0x50d   : > { %v1184_v20 = vpack.c.bf16 %v1180_v19, %v1177_v17 }
 0x50e   : > { %v2959_v21 = vpop.f32.mrf.mxu1 }
 0x50f   : > { %2985 = vmatmul.mubr.msk.bf16.vlgmr.msra.gmra.mxu1 %vm1036_vm1, %v1184_v20 }
 0x510   : > { %2996 = vmatprep.mubr.msk.bf16.mxu1 %vm3310_vm0, %v3308_v6 }
 0x57b   : > { %v1322_v22 = vpop.f32.mrf.mxu1 }
 0x57d   : > { %v2970_v23 = vpop.f32.mrf.mxu1 }
 0x57f   : > { %v1325_v25 = vpop.f32.mrf.mxu1 }
 0x580   : > { %v1329_v26 = vpack.c.bf16 %v1325_v25, %v1322_v22 }
 0x581   : > { %v2971_v27 = vpop.f32.mrf.mxu1 }
 0x582   : > { %2977 = vmatmul.mubr.msk.bf16.vlgmr.msra.gmra.mxu0 %vm1036_vm1, %v1329_v26 }
 0x583   : > { %2989 = vmatpush3.bf16.xpose.msra.mxu0 %v1454_v28  ;;  %2990 = vmatprep.mubr.msk.bf16.mxu0 %vm3310_vm0, %v3308_v6 }
 0x584   : > { %3000 = vmatprep.subr.bf16.mxu0 %v3308_v6 }
 0x58a   : > { %2991 = vmatmul.mubr.msk.bf16.vlgmr.msra.gmra.mxu0 %vm1036_vm1, %v1447_v30 }
 0x58b   : > { %3004 = vmatprep.mubr.msk.bf16.mxu0 %vm3310_vm0, %v3308_v6  ;;  %3001 = vmatpush3.bf16.msra.mxu0 %v3154_v15  ;;  %v3266_v15 = vld [vmem:[%s3495_s27] sm:$0xff] }
 0x58c   : > { %3002 = vmatprep.subr.bf16.mxu0 %v3308_v6 }
 0x58f   : > { %3003 = vmatpush3.bf16.msra.mxu0 %v3155_v16 }
 0x590   : > { %3014 = vmatprep.subr.bf16.mxu0 %v3308_v6 }
 0x5cf   : > { %v3666_v31 = vpop.f32.mrf.mxu1 }
 0x5d1   : > { %v2986_v32 = vpop.f32.mrf.mxu1 }
 0x5d3   : > { %v3668_v33 = vpop.f32.mrf.mxu1 }
 0x5d5   : > { %v2987_v34 = vpop.f32.mrf.mxu1 }
 0x642   : > { %v3670_v35 = vpop.f32.mrf.mxu0 }
 0x644   : > { %v2978_v36 = vpop.f32.mrf.mxu0 }
 0x646   : > { %v3672_v37 = vpop.f32.mrf.mxu0 }
 0x648   : > { %v2979_v38 = vpop.f32.mrf.mxu0 }
 0x64a   : > { %v1490_v39 = vpop.f32.mrf.mxu0 }
 0x64b   : > { %v1497_v40 = vmul.f32 0.17677669, %v1490_v39 }
 0x64c   : > { %v2992_v41 = vpop.f32.mrf.mxu0 }
 0x64d   : > { %v1499_v42 = vadd.f32 %v1497_v40, %v3608_v13 }
 0x64e   : > { %v1493_v43 = vpop.f32.mrf.mxu0 }
 0x64f   : > { %v1498_v44 = vmul.f32 0.17677669, %v1493_v43  ;;  %v1501_v45 = vsel %vm1094_vm2, %v1499_v42, -inf }
 0x650   : > { %1502 = vmax.xlane.f32.xlu1 %v1501_v45  ;;  %v2993_v46 = vpop.f32.mrf.mxu0 }
 0x651   : > { %v1500_v47 = vadd.f32 %v1498_v44, %v3608_v13 }
 0x653   : > { %v1504_v48 = vsel %vm1094_vm2, %v1500_v47, -inf }
 0x654   : > { %1505 = vmax.xlane.f32.xlu0 %v1504_v48 }
 0x661   : > { %1536 = vrot.lane.b32.xlu1 %v3576_v62, %s3312_s23 }
 0x665   : > { %1646 = vrot.lane.b32.xlu1 %v3574_v61, %s3313_s2 }
 0x6d9   : > { %v1503_v49 = vpop.xlane.xlu1 %1502 }
 0x6da   : > { %v1507_v50 = vsub.f32 %v1499_v42, %v1503_v49 }
 0x6dc   : > { %v1509_v51 = vmul.f32 1.442695, %v1507_v50 }
 0x6dd   : > { %v1537_v52 = vpop.permute.xlu1 %1536  ;;  %v1506_v53 = vpop.xlane.xlu0 %1505 }
 0x6de   : > { %3234 = vpow2.f32 %v1509_v51  ;;  %v1508_v54 = vsub.f32 %v1500_v47, %v1506_v53  ;;  %2995 = vmatpush3.bf16.msra.mxu1 %v1537_v52  ;;  %v1440_v47 = vadd.f32 %v3666_v31, %v3670_v35  ;;  %v1443_v51 = vadd.f32 %v3668_v33, %v3672_v37  ;;  %v3156_v37 = vld [vmem:[%s3458_s30 + $0x38] sm:$0xff]  }
 0x6df   : > { %3008 = vmatprep.subr.bf16.mxu1 %v3308_v6 }
 0x6e0   : > { %v1511_v55 = vmul.f32 1.442695, %v1508_v54 }
 0x6e2   : > { %3236 = vpow2.f32 %v1511_v55 }
 0x6eb   : > { %v3235_v56 = vpop.eup %3234 }
 0x6ec   : > { %v1513_v57 = vsel %vm1094_vm2, %v3235_v56, 0.0 }
 0x6ed   : > { %1514 = vadd.xlane.f32.xlu0 %v1513_v57 }
 0x6ef   : > { %v3237_v58 = vpop.eup %3236 }
 0x6f0   : > { %v1516_v63 = vsel %vm1094_vm2, %v3237_v58, 0.0 }
 0x6f1   : > { %1517 = vadd.xlane.f32.xlu0 %v1516_v63  ;;  %v3157_v63 = vld [vmem:[%s3458_s30 + $0x30] sm:$0xff]  }
 0x707   : > { %1648 = vrot.lane.b32.xlu0 %v3578_v1, %s3313_s2  ;;  %v1647_v1 = vpop.permute.xlu1 %1646 }
 0x776   : > { %v1515_v61 = vpop.xlane.xlu0 %1514 }
 0x777   : > { %3238 = vrcp.f32 %v1515_v61 }
 0x77a   : > { %v1518_v0 = vpop.xlane.xlu0 %1517 }
 0x77b   : > { %3240 = vrcp.f32 %v1518_v0 }
 0x77e   : > { %v1649_v7 = vpop.permute.xlu0 %1648 }
 0x77f   : > { %v1654_v14 = vsel %vm1036_vm1, %v1649_v7, 0 }
 0x784   : > { %v3239_v2 = vpop.eup %3238 }
 0x785   : > { %v3687_v4 = vmul.f32 %v3239_v2, %v3235_v56 }
 0x788   : > { %v3241_v3 = vpop.eup %3240 }
 0x789   : > { %v3689_v5 = vmul.f32 %v3241_v3, %v3237_v58 }
 0x78b   : > { %v1535_v11 = vpack.c.bf16 %v3689_v5, %v3687_v4 }
 0x78d   : > { %2997 = vmatmul.mubr.msk.bf16.vlgmr.msra.gmra.mxu1 %vm1094_vm2, %v1535_v11 }
 0x78e   : > { %3009 = vmatpush3.bf16.xpose.msra.mxu1 %v1654_v14  ;;  %3010 = vmatprep.mubr.msk.bf16.mxu1 %vm3310_vm0, %v3308_v6 }
 0x78f   : > { %3020 = vmatprep.subr.bf16.mxu1 %v3308_v6 }
 0x795   : > { %3011 = vmatmul.mubr.msk.bf16.vlgmr.msra.gmra.mxu1 %vm1036_vm1, %v1647_v1  ;;  %v2793_v1 = vld [vmem:[%s3964_s1] ss:$0 sm:$0xff] }
 0x796   : > { %3024 = vmatprep.mubr.msk.bf16.mxu1 %vm3310_vm0, %v3308_v6  ;;  %3021 = vmatpush3.bf16.msra.mxu1 %v3156_v37 }
 0x797   : > { %3022 = vmatprep.subr.bf16.mxu1 %v3308_v6 }
 0x79a   : > { %3023 = vmatpush3.bf16.msra.mxu1 %v3157_v63 }
 0x79b   : > { %3028 = vmatprep.subr.bf16.mxu1 %v3308_v6 }
 0x84d   : > { %v1576_v17 = vpop.f32.mrf.mxu1 }
 0x84f   : > { %v2998_v18 = vpop.f32.mrf.mxu1 }
 0x851   : > { %v1579_v19 = vpop.f32.mrf.mxu1 }
 0x852   : > { %v1583_v20 = vpack.c.bf16 %v1579_v19, %v1576_v17 }
 0x853   : > { %v2999_v21 = vpop.f32.mrf.mxu1 }
 0x854   : > { %3005 = vmatmul.mubr.msk.bf16.vlgmr.msra.gmra.mxu0 %vm1036_vm1, %v1583_v20  ;;  %v3267_v21 = vld [vmem:[%s3495_s27 + $0x8] sm:$0xff] }
 0x855   : > { %v1690_v22 = vpop.f32.mrf.mxu1  ;;  %3016 = vmatprep.mubr.msk.bf16.mxu0 %vm3310_vm0, %v3308_v6 }
 0x856   : > { %v1697_v23 = vmul.f32 0.17677669, %v1690_v22 }
 0x857   : > { %v3012_v24 = vpop.f32.mrf.mxu1 }
 0x858   : > { %v1699_v25 = vadd.f32 %v1697_v23, %v3608_v13  ;;  %v3158_v24 = vld [vmem:[%s3480_s29 + $0xa8] ss:$12 sps:$4 sm:$0xff]  }
 0x859   : > { %v1693_v26 = vpop.f32.mrf.mxu1 }
 0x85a   : > { %v1698_v27 = vmul.f32 0.17677669, %v1693_v26  ;;  %v1701_v28 = vsel %vm1094_vm2, %v1699_v25, -inf  ;;  %v3161_v26 = vld [vmem:[%s3480_s29 + $0xb0] ss:$12 sps:$4 sm:$0xff]  }
 0x85b   : > { %1702 = vmax.xlane.f32.xlu1 %v1701_v28  ;;  %v3013_v30 = vpop.f32.mrf.mxu1 }
 0x85c   : > { %v1700_v32 = vadd.f32 %v1698_v27, %v3608_v13  ;;  %v744_v13 = vld [vmem:[%s3963_s22 + $0x8] sm:$0xff] }
 0x85e   : > { %v1704_v34 = vsel %vm1094_vm2, %v1700_v32, -inf }
 0x85f   : > { %1705 = vmax.xlane.f32.xlu0 %v1704_v34 }
 0x8e4   : > { %v1703_v36 = vpop.xlane.xlu1 %1702 }
 0x8e5   : > { %v1707_v38 = vsub.f32 %v1699_v25, %v1703_v36  ;;  %v3160_v25 = vld [vmem:[%s3480_s29 + $0xac] ss:$12 sps:$4 sm:$0xff]  }
 0x8e7   : > { %v1709_v39 = vmul.f32 1.442695, %v1707_v38 }
 0x8e8   : > { %v1706_v40 = vpop.xlane.xlu0 %1705 }
 0x8e9   : > { %3242 = vpow2.f32 %v1709_v39  ;;  %v1708_v41 = vsub.f32 %v1700_v32, %v1706_v40  ;;  %v3164_v40 = vld [vmem:[%s3480_s29 + $0x94] ss:$12 sps:$4 sm:$0xff]  }
 0x8eb   : > { %v1711_v42 = vmul.f32 1.442695, %v1708_v41  ;;  %v3162_v41 = vld [vmem:[%s3480_s29 + $0x90] ss:$12 sps:$4 sm:$0xff]  }
 0x8ed   : > { %3244 = vpow2.f32 %v1711_v42  ;;  %v3165_v42 = vld [vmem:[%s3480_s29 + $0x98] ss:$12 sps:$4 sm:$0xff]  }
 0x8f6   : > { %v3243_v43 = vpop.eup %3242 }
 0x8f7   : > { %v1713_v44 = vsel %vm1094_vm2, %v3243_v43, 0.0 }
 0x8f8   : > { %1714 = vadd.xlane.f32.xlu0 %v1713_v44  ;;  %v3166_v44 = vld [vmem:[%s3480_s29 + $0x78] ss:$12 sps:$4 sm:$0xff]  }
 0x8fa   : > { %v3245_v45 = vpop.eup %3244 }
 0x8fb   : > { %v1716_v46 = vsel %vm1094_vm2, %v3245_v45, 0.0 }
 0x8fc   : > { %1717 = vadd.xlane.f32.xlu1 %v1716_v46  ;;  %v743_v46 = vld [vmem:[%s3963_s22] sm:$0xff] }
 0x90e   : > { %1736 = vrot.lane.b32.xlu0 %v3576_v62, %s3313_s2 }
 0x912   : > { %1124 = vperm.xlu0 %3117, %v744_v13   ;;  %v3172_v13 = vld [vmem:[%s3480_s29 + $0x64] ss:$12 sps:$4 sm:$0xff]  }
 0x914   : > { %v1637_v48 = vpop.f32.mrf.mxu0 }
 0x915   : > { %v1644_v49 = vadd.f32 %v1637_v48, %v1440_v47  ;;  %v3170_v47 = vld [vmem:[%s3480_s29 + $0x60] ss:$12 sps:$4 sm:$0xff]   ;;  %v3173_v48 = vld [vmem:[%s3480_s29 + $0x68] ss:$12 sps:$4 sm:$0xff]  }
 0x916   : > { %v3006_v50 = vpop.f32.mrf.mxu0 }
 0x917   : > { %v3174_v50 = vld [vmem:[%s3480_s29 + $0x48] ss:$12 sps:$4 sm:$0xff]  }
 0x918   : > { %v1640_v52 = vpop.f32.mrf.mxu0 }
 0x919   : > { %v1645_v53 = vadd.f32 %v1640_v52, %v1443_v51  ;;  %v3177_v51 = vld [vmem:[%s3480_s29 + $0x50] ss:$12 sps:$4 sm:$0xff]   ;;  %v3180_v52 = vld [vmem:[%s3480_s29 + $0x34] ss:$12 sps:$4 sm:$0xff]  }
 0x91a   : > { %v3007_v54 = vpop.f32.mrf.mxu0 }
 0x91b   : > { %v3181_v54 = vld [vmem:[%s3480_s29 + $0x38] ss:$12 sps:$4 sm:$0xff]  }
 0x981   : > { %v1715_v55 = vpop.xlane.xlu0 %1714 }
 0x982   : > { %3246 = vrcp.f32 %v1715_v55  ;;  %v3184_v55 = vld [vmem:[%s3480_s29 + $0x1c] ss:$12 sps:$4 sm:$0xff]  }
 0x985   : > { %v1718_v56 = vpop.xlane.xlu1 %1717  ;;  %v1737_v62 = vpop.permute.xlu0 %1736 }
 0x986   : > { %3248 = vrcp.f32 %v1718_v56  ;;  %3015 = vmatpush3.bf16.msra.mxu0 %v1737_v62  ;;  %v3182_v56 = vld [vmem:[%s3480_s29 + $0x18] ss:$12 sps:$4 sm:$0xff]   ;;  %v3185_v62 = vld [vmem:[%s3480_s29 + $0x20] ss:$12 sps:$4 sm:$0xff]  }
 0x987   : > { %2075 = vmatprep.subr.bf16.mxu0 %v3160_v25 }
 0x98f   : > { %v3247_v57 = vpop.eup %3246 }
 0x990   : > { %v3721_v31 = vmul.f32 %v3247_v57, %v3243_v43  ;;  %v3168_v43 = vld [vmem:[%s3480_s29 + $0x7c] ss:$12 sps:$4 sm:$0xff]   ;;  %v3188_v57 = vld [vmem:[%s3480_s29 + $0x4] ss:$12 sps:$4 sm:$0xff]  }
 0x993   : > { %v3249_v58 = vpop.eup %3248 }
 0x994   : > { %v3723_v35 = vmul.f32 %v3249_v58, %v3245_v45  ;;  %v3169_v45 = vld [vmem:[%s3480_s29 + $0x80] ss:$12 sps:$4 sm:$0xff]  }
 0x995   : > { %v3186_v58 = vld [vmem:[%s3480_s29] ss:$12 sps:$4 sm:$0xff]  }
 0x996   : > { %v1735_v33 = vpack.c.bf16 %v3723_v35, %v3721_v31 }
 0x998   : > { %3017 = vmatmul.mubr.msk.bf16.vlgmr.msra.gmra.mxu0 %vm1094_vm2, %v1735_v33  ;;  %v3189_v33 = vld [vmem:[%s3480_s29 + $0x8] ss:$12 sps:$4 sm:$0xff]  }
 0x999   : > { %2107 = vmatprep.mubr.bf16.mxu0 %v3309_v29  ;;  %2076 = vmatpush1.bf16.msra.mxu0 %v3158_v24 }
 0x99a   : > { %2077 = vmatprep.subr.bf16.mxu0 %v3164_v40 }
 0x99d   : > { %2078 = vmatpush1.bf16.msra.mxu0 %v3162_v41 }
 0x99e   : > { %2079 = vmatprep.subr.bf16.mxu0 %v3168_v43 }
 0x9a1   : > { %2080 = vmatpush1.bf16.msra.mxu0 %v3166_v44 }
 0x9a2   : > { %2081 = vmatprep.subr.bf16.mxu0 %v3172_v13 }
 0x9a5   : > { %2082 = vmatpush1.bf16.msra.mxu0 %v3170_v47 }
 0xa58   : > { %v1776_v61 = vpop.f32.mrf.mxu0 }
 0xa5a   : > { %v3018_v0 = vpop.f32.mrf.mxu0 }
 0xa5c   : > { %v1779_v2 = vpop.f32.mrf.mxu0 }
 0xa5d   : > { %v1783_v3 = vpack.c.bf16 %v1779_v2, %v1776_v61  ;;  %v1125_v61 = vpop.permute.xlu0 %1124 }
 0xa5e   : > { %v3019_v7 = vpop.f32.mrf.mxu0 }
 0xa5f   : > { %3025 = vmatmul.mubr.msk.bf16.vlgmr.msra.gmra.mxu1 %vm1036_vm1, %v1783_v3  ;;  %v1128_v7 = vmul.f32 %v1125_v61, %v3630_v60 }
 0xa60   : > { %3044 = vmatprep.mubr.msk.bf16.mxu1 %vm3310_vm0, %v3308_v6  ;;  %3029 = vmatpush3.bf16.msra.mxu1 %v3161_v26 }
 0xa61   : > { %3030 = vmatprep.subr.bf16.mxu1 %v3308_v6 }
 0xa64   : > { %3031 = vmatpush3.bf16.msra.mxu1 %v3165_v42 }
 0xa65   : > { %3032 = vmatprep.subr.bf16.mxu1 %v3308_v6 }
 0xa68   : > { %3033 = vmatpush3.bf16.msra.mxu1 %v3169_v45 }
 0xa69   : > { %3034 = vmatprep.subr.bf16.mxu1 %v3308_v6 }
 0xa6c   : > { %3035 = vmatpush3.bf16.msra.mxu1 %v3173_v48 }
 0xa6d   : > { %3036 = vmatprep.subr.bf16.mxu1 %v3308_v6 }
 0xa70   : > { %3037 = vmatpush3.bf16.msra.mxu1 %v3177_v51 }
 0xa71   : > { %3038 = vmatprep.subr.bf16.mxu1 %v3308_v6 }
 0xa74   : > { %3039 = vmatpush3.bf16.msra.mxu1 %v3181_v54 }
 0xa75   : > { %3040 = vmatprep.subr.bf16.mxu1 %v3308_v6 }
 0xa78   : > { %3041 = vmatpush3.bf16.msra.mxu1 %v3185_v62 }
 0xa79   : > { %3042 = vmatprep.subr.bf16.mxu1 %v3308_v6 }
 0xa7c   : > { %3043 = vmatpush3.bf16.msra.mxu1 %v3189_v33 }
 0xa7d   : > { %3048 = vmatprep.subr.bf16.mxu1 %v3308_v6 }
 0xb1f   : > { %v1837_v29 = vpop.f32.mrf.mxu1 }
 0xb20   : > { %v1844_v11 = vadd.f32 %v1837_v29, %v1644_v49  ;;  %v3176_v49 = vld [vmem:[%s3480_s29 + $0x4c] ss:$12 sps:$4 sm:$0xff]   ;;  %v1269_v29 = vmul.f32 %v3642_v9, %v1125_v61 }
 0xb21   : > { %v3026_v14 = vpop.f32.mrf.mxu1  ;;  %2083 = vmatprep.subr.bf16.mxu0 %v3176_v49  ;;  %v2794_v49 = vld [vmem:[%s3966_s6] ss:$0 sm:$0xff] }
 0xb22   : > { %v1846_v16 = vadd.f32 %v3266_v15, %v1844_v11  ;;  %2084 = vmatpush1.bf16.msra.mxu0 %v3174_v50  ;;  %v1524_v11 = vmul.f32 %v3689_v5, %v1125_v61  ;;  %v1724_v14 = vmul.f32 %v3723_v35, %v1125_v61 }
 0xb23   : > { %v1840_v17 = vpop.f32.mrf.mxu1  ;;  %2085 = vmatprep.subr.bf16.mxu0 %v3180_v52 }
 0xb24   : > { %v1845_v18 = vadd.f32 %v1840_v17, %v1645_v53  ;;  %v3742_v19 = vadd.f32 %v2793_v1, %v1846_v16  ;;  %v3178_v53 = vld [vmem:[%s3480_s29 + $0x30] ss:$12 sps:$4 sm:$0xff]   ;;  %v1526_v60 = vsel %vm1094_vm2, %v1524_v11, 0.0  ;;  %v1726_v5 = vsel %vm1094_vm2, %v1724_v14, 0.0 }
 0xb25   : > { %v3027_v20 = vpop.f32.mrf.mxu1  ;;  %v3191_v11 = vld [vmem:[%s3486_s0 + $0x78] sm:$0xff]  }
 0xb26   : > { %v1847_v22 = vadd.f32 %v3267_v21, %v1845_v18  ;;  %1859 = vadd.xlane.f32.xlu1 %v3742_v19  ;;  %2086 = vmatpush1.bf16.msra.mxu0 %v3178_v53  ;;  %v1130_v20 = vsel %vm1094_vm2, %v1128_v7, 0.0  ;;  %v1271_v21 = vsel %vm1094_vm2, %v1269_v29, 0.0  ;;  %v3190_v29 = vld [vmem:[%s3486_s0 + $0xb8] sm:$0xff]  }
 0xb27   : > { %2087 = vmatprep.subr.bf16.mxu0 %v3184_v55  ;;  %v3192_v14 = vld [vmem:[%s3486_s0 + $0x38] sm:$0xff]  }
 0xb28   : > { %v3746_v23 = vadd.f32 %v2793_v1, %v1847_v22 }
 0xb2a   : > { %1861 = vadd.xlane.f32.xlu1 %v3746_v23  ;;  %2088 = vmatpush1.bf16.msra.mxu0 %v3182_v56 }
 0xb2b   : > { %2089 = vmatprep.subr.bf16.mxu0 %v3188_v57 }
 0xb2e   : > { %2090 = vmatpush1.bf16.msra.mxu0 %v3186_v58  ;;  %v2795_v58 = vld [vmem:[%s3968_s21] ss:$0 sm:$0xff] }
 0xb2f   : > { %2897 = vmatprep.subr.bf16.mxu0 %v3191_v11 }
 0xbaf   : > { %v1860_v27 = vpop.xlane.xlu1 %1859 }
 0xbb0   : > { %v1863_v28 = vmul.f32 0.0078125, %v1860_v27 }
 0xbb2   : > { %v3754_v30 = vsub.f32 %v3742_v19, %v1863_v28 }
 0xbb3   : > { %v1862_v32 = vpop.xlane.xlu1 %1861 }
 0xbb4   : > { %v1864_v34 = vmul.f32 0.0078125, %v1862_v32  ;;  %v1867_v36 = vmul.f32 %v3754_v30, %v3754_v30 }
 0xbb6   : > { %v3759_v38 = vsub.f32 %v3746_v23, %v1864_v34  ;;  %1869 = vadd.xlane.f32.xlu1 %v1867_v36 }
 0xbb8   : > { %v1868_v39 = vmul.f32 %v3759_v38, %v3759_v38 }
 0xbba   : > { %1871 = vadd.xlane.f32.xlu1 %v1868_v39 }
 0xbcb   : > { %1119 = vperm.xlu1 %3116, %v743_v46  }
 0xc3f   : > { %v1870_v37 = vpop.xlane.xlu1 %1869 }
 0xc40   : > { %v1873_v63 = vmul.f32 0.0078125, %v1870_v37 }
 0xc42   : > { %v1875_v0 = vadd.f32 1e-06, %v1873_v63 }
 0xc43   : > { %v1872_v2 = vpop.xlane.xlu1 %1871 }
 0xc44   : > { %3250 = vrsqrt.f32 %v1875_v0  ;;  %v1874_v3 = vmul.f32 0.0078125, %v1872_v2 }
 0xc46   : > { %v1876_v1 = vadd.f32 1e-06, %v1874_v3 }
 0xc47   : > { %v1120_v15 = vpop.permute.xlu1 %1119 }
 0xc48   : > { %3252 = vrsqrt.f32 %v1876_v1  ;;  %v1127_v16 = vmul.f32 %v1120_v15, %v3628_v59  ;;  %v1268_v17 = vmul.f32 %v3640_v8, %v1120_v15  ;;  %v1523_v18 = vmul.f32 %v3687_v4, %v1120_v15  ;;  %v3193_v1 = vld [vmem:[%s3486_s0 + $0xb0] sm:$0xff]  }
 0xc49   : > { %v1723_v9 = vmul.f32 %v3721_v31, %v1120_v15  ;;  %v3194_v15 = vld [vmem:[%s3486_s0 + $0x70] sm:$0xff]  }
 0xc4a   : > { %v1129_v35 = vsel %vm1094_vm2, %v1127_v16, 0.0  ;;  %v1270_v22 = vsel %vm1094_vm2, %v1268_v17, 0.0  ;;  %v1525_v59 = vsel %vm1094_vm2, %v1523_v18, 0.0  ;;  %v3195_v16 = vld [vmem:[%s3486_s0 + $0x30] sm:$0xff]   ;;  %v3196_v17 = vld [vmem:[%s3486_s0 + $0xa8] sm:$0xff]  }
 0xc4b   : > { %v1131_v24 = vadd.f32 %v1130_v20, %v1129_v35  ;;  %v1272_v8 = vadd.f32 %v1271_v21, %v1270_v22  ;;  %v1527_v25 = vadd.f32 %v1526_v60, %v1525_v59  ;;  %v1725_v4 = vsel %vm1094_vm2, %v1723_v9, 0.0  ;;  %v3197_v18 = vld [vmem:[%s3486_s0 + $0x68] sm:$0xff]   ;;  %v3199_v21 = vld [vmem:[%s3486_s0 + $0xa0] sm:$0xff]   ;;  %v3203_v35 = vld [vmem:[%s3486_s0 + $0x58] sm:$0xff]  }
 0xc4c   : > { %v1727_v26 = vadd.f32 %v1726_v5, %v1725_v4  ;;  %v3198_v20 = vld [vmem:[%s3486_s0 + $0x28] sm:$0xff]   ;;  %v3200_v60 = vld [vmem:[%s3486_s0 + $0x60] sm:$0xff]   ;;  %v3202_v5 = vld [vmem:[%s3486_s0 + $0x98] sm:$0xff]  }
 0xc4d   : > { %v1132_v27 = vrot.slane %v1131_v24, 4  ;;  %v1273_v28 = vrot.slane %v1272_v8, 4  ;;  %v1528_v32 = vrot.slane %v1527_v25, 4  ;;  %v3201_v9 = vld [vmem:[%s3486_s0 + $0x20] sm:$0xff]   ;;  %v3204_v22 = vld [vmem:[%s3486_s0 + $0x18] sm:$0xff]   ;;  %v3205_v59 = vld [vmem:[%s3486_s0 + $0x90] sm:$0xff]  }
 0xc4e   : > { %v1728_v34 = vrot.slane %v1727_v26, 4  ;;  %v3209_v4 = vld [vmem:[%s3486_s0 + $0x48] sm:$0xff]  }
 0xc4f   : > { %v1133_v31 = vadd.f32 %v1132_v27, %v1131_v24  ;;  %v1274_v36 = vadd.f32 %v1273_v28, %v1272_v8  ;;  %v1529_v39 = vadd.f32 %v1528_v32, %v1527_v25  ;;  %v3206_v24 = vld [vmem:[%s3486_s0 + $0x50] sm:$0xff]   ;;  %v3208_v25 = vld [vmem:[%s3486_s0 + $0x88] sm:$0xff]   ;;  %v3211_v27 = vld [vmem:[%s3486_s0 + $0x80] sm:$0xff]  }
 0xc50   : > { %v1729_v40 = vadd.f32 %v1728_v34, %v1727_v26  ;;  %v3207_v8 = vld [vmem:[%s3486_s0 + $0x10] sm:$0xff]   ;;  %v3210_v26 = vld [vmem:[%s3486_s0 + $0x8] sm:$0xff]   ;;  %v3212_v28 = vld [vmem:[%s3486_s0 + $0x40] sm:$0xff]   ;;  %v1942_v34 = vsub.s32 2, %v3603_v10 }
 0xc51   : > { %v3251_v41 = vpop.eup %3250  ;;  %v1134_v42 = vrot.slane %v1133_v31, 2  ;;  %v1275_v43 = vrot.slane %v1274_v36, 2  ;;  %v1530_v44 = vrot.slane %v1529_v39, 2  ;;  %v3213_v32 = vld [vmem:[%s3486_s0] sm:$0xff]  }
 0xc52   : > { %v1730_v45 = vrot.slane %v1729_v40, 2  ;;  %v1879_v46 = vmul.f32 %v3251_v41, %v3754_v30 }
 0xc53   : > { %v1135_v13 = vadd.f32 %v1134_v42, %v1133_v31  ;;  %v1276_v47 = vadd.f32 %v1275_v43, %v1274_v36  ;;  %v1531_v48 = vadd.f32 %v1530_v44, %v1529_v39  ;;  %v1930_v31 = vld [vmem:[%s3500_s14] sm:$0x7]  ;;  %v1938_v36 = vsub.s32 1, %v3603_v10 }
 0xc54   : > { %v1731_v50 = vadd.f32 %v1730_v45, %v1729_v40  ;;  %v1887_v56 = vmul.f32 %v2794_v49, %v1879_v46  ;;  %v1935_v39 = vrot.slane %v1930_v31, %v1089_v12  ;;  %v1943_v40 = vrot.slane %v1930_v31, %v1942_v34 }
 0xc55   : > { %v3253_v51 = vpop.eup %3252  ;;  %v1136_v52 = vrot.slane %v1135_v13, 1  ;;  %v1277_v53 = vrot.slane %v1276_v47, 1  ;;  %v1532_v54 = vrot.slane %v1531_v48, 1  ;;  %v1939_v41 = vrot.slane %v1930_v31, %v1938_v36 }
 0xc56   : > { %v1880_v55 = vmul.f32 %v3253_v51, %v3759_v38  ;;  %v1732_v30 = vrot.slane %v1731_v50, 1  ;;  %v1895_v61 = vadd.f32 %v2795_v58, %v1887_v56 }
 0xc57   : > { %v1137_v62 = vadd.f32 %v1136_v52, %v1135_v13  ;;  %v1278_v57 = vadd.f32 %v1277_v53, %v1276_v47  ;;  %v1533_v63 = vadd.f32 %v1532_v54, %v1531_v48 }
 0xc58   : > { %v1888_v33 = vmul.f32 %v2794_v49, %v1880_v55  ;;  %v1733_v2 = vadd.f32 %v1732_v30, %v1731_v50 }
 0xc59   : > { %v1279_v37 = vadd.f32 %v1278_v57, %v1137_v62 }
 0xc5a   : > { %v1896_v0 = vadd.f32 %v2795_v58, %v1888_v33 }
 0xc5b   : > { %v1534_v38 = vadd.f32 %v1533_v63, %v1279_v37 }
 0xc5c   : > { %v1897_v3 = vpack.c.bf16 %v1896_v0, %v1895_v61 }
 0xc5d   : > { %v1734_v7 = vadd.f32 %v1733_v2, %v1534_v38 }
 0xc5e   : > { %2108 = vmatmul.mubr.bf16.vlgmr.msra.gmra.mxu0 %v1897_v3  ;;  %3045 = vmatmul.mubr.bf16.vlgmr.msra.gmra.mxu1 %v1897_v3 }
 0xc5f   : > { %2502 = vst.msk [vmem:[%s730_s24] sm:$0x1] %vm2501_vm3, %v1734_v7  ;;  %3064 = vmatprep.mubr.msk.bf16.mxu1 %vm3310_vm0, %v3308_v6  ;;  %3049 = vmatpush3.bf16.msra.mxu1 %v3190_v29 }
 0xc60   : > { %3050 = vmatprep.subr.bf16.mxu1 %v3308_v6  ;;  %2898 = vmatpush3.bf16.msra.mxu0 %v3192_v14 }
 0xc61   : > { %2899 = vmatprep.subr.bf16.mxu0 %v3194_v15 }
 0xc63   : > { %3051 = vmatpush3.bf16.msra.mxu1 %v3193_v1 }
 0xc64   : > { %3052 = vmatprep.subr.bf16.mxu1 %v3308_v6  ;;  %2900 = vmatpush3.bf16.msra.mxu0 %v3195_v16 }
 0xc65   : > { %2901 = vmatprep.subr.bf16.mxu0 %v3197_v18 }
 0xc67   : > { %3053 = vmatpush3.bf16.msra.mxu1 %v3196_v17 }
 0xc68   : > { %3054 = vmatprep.subr.bf16.mxu1 %v3308_v6  ;;  %2902 = vmatpush3.bf16.msra.mxu0 %v3198_v20 }
 0xc69   : > { %2903 = vmatprep.subr.bf16.mxu0 %v3200_v60 }
 0xc6b   : > { %3055 = vmatpush3.bf16.msra.mxu1 %v3199_v21 }
 0xc6c   : > { %3056 = vmatprep.subr.bf16.mxu1 %v3308_v6  ;;  %2904 = vmatpush3.bf16.msra.mxu0 %v3201_v9 }
 0xc6d   : > { %2905 = vmatprep.subr.bf16.mxu0 %v3203_v35 }
 0xc6f   : > { %3057 = vmatpush3.bf16.msra.mxu1 %v3202_v5 }
 0xc70   : > { %3058 = vmatprep.subr.bf16.mxu1 %v3308_v6  ;;  %2906 = vmatpush3.bf16.msra.mxu0 %v3204_v22 }
 0xc71   : > { %2907 = vmatprep.subr.bf16.mxu0 %v3206_v24 }
 0xc73   : > { %3059 = vmatpush3.bf16.msra.mxu1 %v3205_v59 }
 0xc74   : > { %3060 = vmatprep.subr.bf16.mxu1 %v3308_v6  ;;  %2908 = vmatpush3.bf16.msra.mxu0 %v3207_v8 }
 0xc75   : > { %2909 = vmatprep.subr.bf16.mxu0 %v3209_v4 }
 0xc77   : > { %3061 = vmatpush3.bf16.msra.mxu1 %v3208_v25 }
 0xc78   : > { %3062 = vmatprep.subr.bf16.mxu1 %v3308_v6  ;;  %2910 = vmatpush3.bf16.msra.mxu0 %v3210_v26 }
 0xc79   : > { %2911 = vmatprep.subr.bf16.mxu0 %v3212_v28 }
 0xc7b   : > { %3063 = vmatpush3.bf16.msra.mxu1 %v3211_v27 }
 0xc7c   : > { %2912 = vmatpush3.bf16.msra.mxu0 %v3213_v32 }
 0xd1e   : > { %v2109_v42 = vpop.f32.mrf.mxu0  ;;  %v2152_v6 = vpop.f32.mrf.mxu1 }
 0xd1f   : > { %v3863_v43 = vadd.f32 %v2109_v42, %v1935_v39  ;;  %v3865_v44 = vadd.f32 %v2152_v6, %v1943_v40 }
 0xd20   : > { %v2111_v45 = vpop.f32.mrf.mxu0  ;;  %v3046_v46 = vpop.f32.mrf.mxu1 }
 0xd21   : > { %v2159_v13 = vmul.f32 %v3863_v43, %v3863_v43  ;;  %v2161_v47 = vmul.f32 %v3865_v44, %v3865_v44  ;;  %v3871_v48 = vadd.f32 %v2111_v45, %v1939_v41 }
 0xd22   : > { %v2113_v10 = vpop.f32.mrf.mxu0  ;;  %v2155_v12 = vpop.f32.mrf.mxu1 }
 0xd23   : > { %v2165_v49 = vmul.f32 %v2159_v13, %v3863_v43  ;;  %v2167_v50 = vmul.f32 %v2161_v47, %v3865_v44  ;;  %v2160_v51 = vmul.f32 %v3871_v48, %v3871_v48  ;;  %v2114_v52 = vadd.f32 %v2113_v10, %v1935_v39 }
 0xd24   : > { %v2156_v53 = vadd.f32 %v2155_v12, %v1943_v40  ;;  %v2115_v54 = vpop.f32.mrf.mxu0  ;;  %v3047_v55 = vpop.f32.mrf.mxu1 }
 0xd25   : > { %v2171_v56 = vmul.f32 0.044715, %v2165_v49  ;;  %v2173_v62 = vmul.f32 0.044715, %v2167_v50  ;;  %v2166_v57 = vmul.f32 %v2160_v51, %v3871_v48  ;;  %v2162_v30 = vmul.f32 %v2114_v52, %v2114_v52 }
 0xd26   : > { %v2164_v58 = vmul.f32 %v2156_v53, %v2156_v53  ;;  %v2116_v33 = vadd.f32 %v2115_v54, %v1939_v41 }
 0xd27   : > { %v2177_v37 = vadd.f32 %v2171_v56, %v3863_v43  ;;  %v2179_v63 = vadd.f32 %v2173_v62, %v3865_v44  ;;  %v2172_v61 = vmul.f32 0.044715, %v2166_v57  ;;  %v2168_v0 = vmul.f32 %v2162_v30, %v2114_v52 }
 0xd28   : > { %v2170_v38 = vmul.f32 %v2164_v58, %v2156_v53  ;;  %v2163_v2 = vmul.f32 %v2116_v33, %v2116_v33 }
 0xd29   : > { %v2183_v3 = vmul.f32 0.7978846, %v2177_v37  ;;  %v2185_v7 = vmul.f32 0.7978846, %v2179_v63  ;;  %v2178_v29 = vadd.f32 %v2172_v61, %v3871_v48  ;;  %v2174_v11 = vmul.f32 0.044715, %v2168_v0 }
 0xd2a   : > { %v2176_v14 = vmul.f32 0.044715, %v2170_v38  ;;  %v2169_v1 = vmul.f32 %v2163_v2, %v2116_v33 }
 0xd2b   : > { %3254 = vtanh.f32 %v2183_v3  ;;  %v2184_v15 = vmul.f32 0.7978846, %v2178_v29  ;;  %v2180_v16 = vadd.f32 %v2174_v11, %v2114_v52 }
 0xd2c   : > { %3256 = vtanh.f32 %v2185_v7  ;;  %v2182_v17 = vadd.f32 %v2176_v14, %v2156_v53  ;;  %v2175_v18 = vmul.f32 0.044715, %v2169_v1 }
 0xd2d   : > { %3258 = vtanh.f32 %v2184_v15  ;;  %v2186_v20 = vmul.f32 0.7978846, %v2180_v16 }
 0xd2e   : > { %v2188_v21 = vmul.f32 0.7978846, %v2182_v17  ;;  %v2181_v60 = vadd.f32 %v2175_v18, %v2116_v33 }
 0xd2f   : > { %3260 = vtanh.f32 %v2186_v20 }
 0xd30   : > { %3262 = vtanh.f32 %v2188_v21  ;;  %v2187_v9 = vmul.f32 0.7978846, %v2181_v60 }
 0xd32   : > { %3264 = vtanh.f32 %v2187_v9 }
 0xd38   : > { %v3255_v5 = vpop.eup %3254 }
 0xd39   : > { %v3257_v35 = vpop.eup %3256  ;;  %v2195_v4 = vadd.f32 1.0, %v3255_v5 }
 0xd3a   : > { %v3259_v22 = vpop.eup %3258  ;;  %v2197_v59 = vadd.f32 1.0, %v3257_v35 }
 0xd3b   : > { %v2196_v8 = vadd.f32 1.0, %v3259_v22  ;;  %v2201_v40 = vmul.f32 0.5, %v2195_v4 }
 0xd3c   : > { %v3261_v24 = vpop.eup %3260  ;;  %v2203_v27 = vmul.f32 0.5, %v2197_v59 }
 0xd3d   : > { %v3263_v25 = vpop.eup %3262  ;;  %v2198_v26 = vadd.f32 1.0, %v3261_v24  ;;  %v2202_v39 = vmul.f32 0.5, %v2196_v8  ;;  %v2207_v10 = vmul.f32 %v2201_v40, %v3863_v43 }
 0xd3e   : > { %v2200_v28 = vadd.f32 1.0, %v3263_v25  ;;  %v2209_v41 = vmul.f32 %v2203_v27, %v3865_v44 }
 0xd3f   : > { %v3265_v32 = vpop.eup %3264  ;;  %v2204_v34 = vmul.f32 0.5, %v2198_v26  ;;  %v2208_v13 = vmul.f32 %v2202_v39, %v3871_v48 }
 0xd40   : > { %v2206_v31 = vmul.f32 0.5, %v2200_v28  ;;  %v2199_v36 = vadd.f32 1.0, %v3265_v32 }
 0xd41   : > { %v2210_v45 = vmul.f32 %v2204_v34, %v2114_v52  ;;  %v2820_v52 = vld [vmem:[%s722_s18] ss:$0 sm:$0xff] }
 0xd42   : > { %v2212_v42 = vmul.f32 %v2206_v31, %v2156_v53  ;;  %v2205_v6 = vmul.f32 0.5, %v2199_v36 }
 0xd43   : > { %v2213_v49 = vpack.c.bf16 %v2210_v45, %v2207_v10 }
 0xd44   : > { %v2215_v46 = vpack.c.bf16 %v2212_v42, %v2209_v41  ;;  %v2211_v47 = vmul.f32 %v2205_v6, %v2116_v33 }
 0xd46   : > { %3065 = vmatmul.mubr.bf16.vlgmr.msra.gmra.mxu1 %v2215_v46  ;;  %v2214_v12 = vpack.c.bf16 %v2211_v47, %v2208_v13 }
 0xd48   : > { %2447 = vmatprep.mubr.bf16.mxu0 %v2214_v12 }
 0xd49   : > { %2448 = vmatmul.mubr.bf16.vlgmr.msra.gmra.mxu0 %v2213_v49 }
 0xe06   : > { %v2490_v50 = vpop.f32.mrf.mxu1 }
 0xe08   : > { %v3066_v51 = vpop.f32.mrf.mxu1 }
 0xe09   : > { %v2913_v54 = vpop.f32.mrf.mxu0 }
 0xe0a   : > { %v2493_v44 = vpop.f32.mrf.mxu1 }
 0xe0b   : > { %v2914_v48 = vpop.f32.mrf.mxu0 }
 0xe0c   : > { %v2915_v53 = vadd.f32 %v2914_v48, %v2913_v54  ;;  %v3067_v55 = vpop.f32.mrf.mxu1 }
 0xe0d   : > { %v2916_v43 = vpop.f32.mrf.mxu0 }
 0xe0e   : > { %v2450_v56 = vadd.f32 %v2915_v53, %v2820_v52 }
 0xe0f   : > { %v2917_v62 = vpop.f32.mrf.mxu0 }
 0xe10   : > { %v2491_v57 = vadd.f32 %v2490_v50, %v2450_v56  ;;  %v2918_v30 = vadd.f32 %v2917_v62, %v2916_v43 }
 0xe12   : > { %v2497_v58 = vadd.f32 %v2491_v57, %v3742_v19  ;;  %v2453_v33 = vadd.f32 %v2918_v30, %v2820_v52 }
 0xe14   : > { %2499 = vst [vmem:[%s3495_s27] sm:$0xff] %v2497_v58  ;;  %v2494_v37 = vadd.f32 %v2493_v44, %v2453_v33 }
 0xe16   : > { %v2498_v63 = vadd.f32 %v2494_v37, %v3746_v23 }
 0xe18   : > { %2500 = vst [vmem:[%s3495_s27 + $0x8] sm:$0xff] %v2498_v63 }
 0xe19 PF: > { %s3970_s14 = sld [smem:[#allocation5_spill]] }
 0xe1a   : > { %s3971_s18 = sld [smem:[#allocation3_spill]] }
 0xe1b   : > { %s3972_s19 = sld [smem:[#allocation4_spill]] }
 0xe1c   : > { %s3973_s20 = sld [smem:[#allocation6_spill]] }
 0xe1d   : > { %s3974_s21 = sld [smem:[#allocation7_spill]] }
 0xe1f   : > { %s26_s22 = sadd.s32 1, %s3970_s14  }
 0xe20   : > { %p23_p8 = scmp.ge.s32.totalorder %s26_s22, 12  }
 0xe22   :  { %25 = sbr.rel (!%p23_p8) target bundleno = 12 (0xc), region = 161 }

// kernel: apvit_forward.14
= control target key start
LH: loop header
LB: loop body
LE: loop exit
PB: predicated region body
PF: predicated region fallthrough
CT: control target
= control target key end

     0   :  { %s3393_s18 = smov 0   ;;  %s3395_s19 = smov 0   ;;  %s3975_s0 = inlined_call_operand.vmem [shape: f32[2,16,128], index: 0, kind: input, shape index: {}]   ;;  %s3976_s1 = inlined_call_operand.vmem [shape: f32[2,1,16], index: 1, kind: input, shape index: {}]   ;;  %s3977_s2 = inlined_call_operand.vmem [shape: f32[2,16,1], index: 2, kind: input, shape index: {}]   ;;  %s3978_s3 = inlined_call_operand.vmem [shape: f32[1,1,128], index: 3, kind: input, shape index: {}]   ;;  %s3979_s4 = inlined_call_operand.vmem [shape: f32[1,1,128], index: 4, kind: input, shape index: {}]   ;;  %s3980_s5 = inlined_call_operand.vmem [shape: bf16[1,128,384], index: 5, kind: input, shape index: {}]   ;;  %s3981_s6 = inlined_call_operand.vmem [shape: bf16[1,128,128], index: 6, kind: input, shape index: {}]   ;;  %s3982_s7 = inlined_call_operand.vmem [shape: f32[1,1,128], index: 7, kind: input, shape index: {}]   ;;  %s3983_s8 = inlined_call_operand.vmem [shape: f32[1,1,128], index: 8, kind: input, shape index: {}]   ;;  %s3984_s9 = inlined_call_operand.vmem [shape: f32[1,1,128], index: 9, kind: input, shape index: {}]   ;;  %s3985_s10 = inlined_call_operand.vmem [shape: bf16[1,128,384], index: 10, kind: input, shape index: {}]   ;;  %s3986_s11 = inlined_call_operand.vmem [shape: f32[1,1,384], index: 11, kind: input, shape index: {}]   ;;  %s3987_s12 = inlined_call_operand.vmem [shape: bf16[1,384,128], index: 12, kind: input, shape index: {}]   ;;  %s3988_s13 = inlined_call_operand.vmem [shape: f32[1,1,128], index: 13, kind: input, shape index: {}]   ;;  %s3989_s14 = inlined_call_operand.vmem [shape: f32[2,16,128], index: 14, kind: output, shape index: {0}]   ;;  %s3990_s15 = inlined_call_operand.vmem [shape: f32[2,1,16], index: 15, kind: output, shape index: {1}]  }
   0x1   :  { %s3397_s20 = smov 0  }
   0x2 LB: > { %s38_s21 = sadd.s32 1, %s3301_s19  ;;  %p2775_p0 = scmp.ge.s32.totalorder %s3305_s20, 1  ;;  %s3305_s20 = sphi %s3397_s20, %s26_s20   ;;  %s3301_s19 = sphi %s3395_s19, %s3992_s19   ;;  %s3297_s18 = sphi %s3393_s18, %s3991_s18  }
   0x3   : > { %p40_p1 = scmp.ge.s32.totalorder %s38_s21, 2  ;;  %p567_p2 = scmp.lt.s32.totalorder %s3305_s20, 3 }
   0x5   : > { %s3994_s21 = smov (%p40_p1, %s38_s21), 0  ;;  %p568_p3 = pnand %p2775_p0, %p567_p2 }
   0x6   : > { %p668_p4 = scmp.lt.s32.totalorder (!%p568_p3), %s3297_s18, 1  ;;  %s3310_s28 = smov (!%p568_p3), 96  }
   0x7   : > { %571 = sbr.rel (%p568_p3) target bundleno = 3565 (0xded), region = 76  ;;  %s3311_s17 = smov (!%p568_p3), 64  }
   0xc   : > { %s3996_s18 = smov (!%p668_p4, %s3297_s18), 1  ;;  %v3135_v2 = vld [vmem:[%s3980_s5 + $0xac] ss:$12 sps:$4 sm:$0xff]   ;;  %v3137_v3 = vld [vmem:[%s3980_s5 + $0xa8] ss:$12 sps:$4 sm:$0xff]   ;;  %v3307_v4 = vmov 0.0  }
   0xd   : > { %s3414_s22 = sshll.u32 %s3996_s18, 4  ;;  %2963 = vmatprep.subr.bf16.mxu1 %v3307_v4  ;;  %v3138_v5 = vld [vmem:[%s3980_s5 + $0xb0] ss:$12 sps:$4 sm:$0xff]   ;;  %949 = vmatprep.subr.bf16.mxu0 %v3135_v2  ;;  %v3139_v14 = vld [vmem:[%s3980_s5 + $0x94] ss:$12 sps:$4 sm:$0xff]   ;;  %v3308_v27 = vmov 0   ;;  %s675_s16 = scalar_lea.vmem %s3976_s1, %s3996_s18 }
   0xe   : > { %s672_s25 = scalar_lea.vmem %s3975_s0, %s3414_s22  ;;  %950 = vmatpush1.bf16.msra.mxu0 %v3137_v3  ;;  %2964 = vmatpush3.bf16.msra.mxu1 %v3138_v5  ;;  %v3141_v15 = vld [vmem:[%s3980_s5 + $0x90] ss:$12 sps:$4 sm:$0xff]   ;;  %v3142_v16 = vld [vmem:[%s3980_s5 + $0x98] ss:$12 sps:$4 sm:$0xff]   ;;  %v3146_v19 = vld [vmem:[%s3980_s5 + $0x80] ss:$12 sps:$4 sm:$0xff]  }
   0xf   : > { %v3420_v0 = vld [vmem:[%s672_s25] sm:$0xff]  ;;  %v3422_v1 = vld [vmem:[%s672_s25 + $0x8] sm:$0xff]  ;;  %2965 = vmatprep.subr.bf16.mxu1 %v3307_v4  ;;  %951 = vmatprep.subr.bf16.mxu0 %v3139_v14  ;;  %v3154_v25 = vld [vmem:[%s3980_s5 + $0x50] ss:$12 sps:$4 sm:$0xff]   ;;  %vm3309_vm0 = vmmov 0   ;;  %vm1036_vm1 = vcmask 261120  }
  0x10   : > { %749 = vadd.xlane.f32.xlu0 %v3420_v0  ;;  %v3143_v17 = vld [vmem:[%s3980_s5 + $0x7c] ss:$12 sps:$4 sm:$0xff]   ;;  %v3145_v18 = vld [vmem:[%s3980_s5 + $0x78] ss:$12 sps:$4 sm:$0xff]   ;;  %v3149_v21 = vld [vmem:[%s3980_s5 + $0x60] ss:$12 sps:$4 sm:$0xff]   ;;  %981 = vmatprep.mubr.bf16.mxu0 %v3308_v27 }
  0x11   : > { %v3147_v20 = vld [vmem:[%s3980_s5 + $0x64] ss:$12 sps:$4 sm:$0xff]   ;;  %v3150_v22 = vld [vmem:[%s3980_s5 + $0x68] ss:$12 sps:$4 sm:$0xff]   ;;  %v3151_v23 = vld [vmem:[%s3980_s5 + $0x4c] ss:$12 sps:$4 sm:$0xff]   ;;  %2979 = vmatprep.mubr.msk.bf16.mxu1 %vm3309_vm0, %v3307_v4  ;;  %3134 = vset.pattern.permute.xlu0 %v3308_v27 }
  0x12   : > { %952 = vmatpush1.bf16.msra.mxu0 %v3141_v15  ;;  %2966 = vmatpush3.bf16.msra.mxu1 %v3142_v16  ;;  %v3153_v24 = vld [vmem:[%s3980_s5 + $0x48] ss:$12 sps:$4 sm:$0xff]   ;;  %v3157_v28 = vld [vmem:[%s3980_s5 + $0x30] ss:$12 sps:$4 sm:$0xff]   ;;  %v3158_v29 = vld [vmem:[%s3980_s5 + $0x38] ss:$12 sps:$4 sm:$0xff]  }
  0x13   : > { %2967 = vmatprep.subr.bf16.mxu1 %v3307_v4  ;;  %953 = vmatprep.subr.bf16.mxu0 %v3143_v17  ;;  %v3155_v26 = vld [vmem:[%s3980_s5 + $0x34] ss:$12 sps:$4 sm:$0xff]   ;;  %v3159_v30 = vld [vmem:[%s3980_s5 + $0x1c] ss:$12 sps:$4 sm:$0xff]   ;;  %v3161_v31 = vld [vmem:[%s3980_s5 + $0x18] ss:$12 sps:$4 sm:$0xff]  }
  0x14   : > { %751 = vadd.xlane.f32.xlu0 %v3422_v1  ;;  %3133 = vset.pattern.permute.xlu1 %v3308_v27  ;;  %v3162_v32 = vld [vmem:[%s3980_s5 + $0x20] ss:$12 sps:$4 sm:$0xff]   ;;  %v3163_v33 = vld [vmem:[%s3980_s5 + $0x4] ss:$12 sps:$4 sm:$0xff]   ;;  %v3166_v35 = vld [vmem:[%s3980_s5 + $0x8] ss:$12 sps:$4 sm:$0xff]  }
  0x15   : > { %v3165_v34 = vld [vmem:[%s3980_s5] ss:$12 sps:$4 sm:$0xff]   ;;  %vm1094_vm2 = vcmask 130048   ;;  %vm2501_vm3 = vcmask 122880  }
  0x16   : > { %954 = vmatpush1.bf16.msra.mxu0 %v3145_v18  ;;  %2968 = vmatpush3.bf16.msra.mxu1 %v3146_v19  ;;  %v2783_v44 = vld [vmem:[%s3978_s3] ss:$0 sm:$0xff] }
  0x17   : > { %2969 = vmatprep.subr.bf16.mxu1 %v3307_v4  ;;  %955 = vmatprep.subr.bf16.mxu0 %v3147_v20  ;;  %v2784_v48 = vld [vmem:[%s3979_s4] ss:$0 sm:$0xff] }
  0x1a   : > { %956 = vmatpush1.bf16.msra.mxu0 %v3149_v21  ;;  %2970 = vmatpush3.bf16.msra.mxu1 %v3150_v22 }
  0x1b   : > { %957 = vmatprep.subr.bf16.mxu0 %v3151_v23  ;;  %2971 = vmatprep.subr.bf16.mxu1 %v3307_v4 }
  0x1e   : > { %958 = vmatpush1.bf16.msra.mxu0 %v3153_v24  ;;  %2972 = vmatpush3.bf16.msra.mxu1 %v3154_v25 }
  0x1f   : > { %959 = vmatprep.subr.bf16.mxu0 %v3155_v26  ;;  %2973 = vmatprep.subr.bf16.mxu1 %v3307_v4 }
  0x22   : > { %960 = vmatpush1.bf16.msra.mxu0 %v3157_v28  ;;  %2974 = vmatpush3.bf16.msra.mxu1 %v3158_v29 }
  0x23   : > { %961 = vmatprep.subr.bf16.mxu0 %v3159_v30  ;;  %2975 = vmatprep.subr.bf16.mxu1 %v3307_v4 }
  0x26   : > { %962 = vmatpush1.bf16.msra.mxu0 %v3161_v31  ;;  %2976 = vmatpush3.bf16.msra.mxu1 %v3162_v32 }
  0x27   : > { %963 = vmatprep.subr.bf16.mxu0 %v3163_v33  ;;  %2977 = vmatprep.subr.bf16.mxu1 %v3307_v4 }
  0x2a   : > { %964 = vmatpush1.bf16.msra.mxu0 %v3165_v34  ;;  %2978 = vmatpush3.bf16.msra.mxu1 %v3166_v35 }
  0x2b   : > { %2989 = vmatprep.subr.bf16.mxu1 %v3307_v4  ;;  %2983 = vmatprep.subr.bf16.mxu0 %v3307_v4 }
  0x99   : > { %v750_v6 = vpop.xlane.xlu0 %749 }
  0x9a   : > { %v754_v7 = vmul.f32 0.0078125, %v750_v6 }
  0x9c   : > { %v3438_v8 = vsub.f32 %v3420_v0, %v754_v7  ;;  %v1087_v7 = vlaneseq }
  0x9d   : > { %v752_v9 = vpop.xlane.xlu0 %751 }
  0x9e   : > { %v755_v10 = vmul.f32 0.0078125, %v752_v9  ;;  %v758_v11 = vmul.f32 %v3438_v8, %v3438_v8 }
  0xa0   : > { %v3443_v12 = vsub.f32 %v3422_v1, %v755_v10  ;;  %760 = vadd.xlane.f32.xlu1 %v758_v11  ;;  %v3563_v10 = vshrl.u32 %v1087_v7, 7 }
  0xa2   : > { %v759_v13 = vmul.f32 %v3443_v12, %v3443_v12 }
  0xa4   : > { %762 = vadd.xlane.f32.xlu1 %v759_v13 }
 0x129   : > { %v761_v36 = vpop.xlane.xlu1 %760 }
 0x12a   : > { %v764_v37 = vmul.f32 0.0078125, %v761_v36 }
 0x12c   : > { %v766_v38 = vadd.f32 1e-06, %v764_v37 }
 0x12d   : > { %v763_v39 = vpop.xlane.xlu1 %762 }
 0x12e   : > { %3231 = vrsqrt.f32 %v766_v38  ;;  %v765_v40 = vmul.f32 0.0078125, %v763_v39 }
 0x130   : > { %v767_v41 = vadd.f32 1e-06, %v765_v40 }
 0x132   : > { %3233 = vrsqrt.f32 %v767_v41 }
 0x13b   : > { %v3232_v42 = vpop.eup %3231 }
 0x13c   : > { %v770_v43 = vmul.f32 %v3232_v42, %v3438_v8  ;;  %v742_v8 = vld [vmem:[%s675_s16] sm:$0x1]  ;;  %s3312_s16 = smov 32  }
 0x13d   : > { %v2782_v9 = vadd.f32 -1.0, %v742_v8 }
 0x13e   : > { %v778_v47 = vmul.f32 %v2783_v44, %v770_v43 }
 0x13f   : > { %v3234_v45 = vpop.eup %3233  ;;  %v746_v11 = vmul.f32 1e+09, %v2782_v9 }
 0x140   : > { %v771_v46 = vmul.f32 %v3234_v45, %v3443_v12  ;;  %v786_v50 = vadd.f32 %v2784_v48, %v778_v47  ;;  %v1089_v12 = vsub.s32 0, %v3563_v10 }
 0x142   : > { %v779_v49 = vmul.f32 %v2783_v44, %v771_v46  ;;  %v3568_v13 = vrot.slane %v746_v11, %v1089_v12 }
 0x144   : > { %v787_v51 = vadd.f32 %v2784_v48, %v779_v49 }
 0x146   : > { %v788_v52 = vpack.c.bf16 %v787_v51, %v786_v50 }
 0x148   : > { %982 = vmatmul.mubr.bf16.vlgmr.msra.gmra.mxu0 %v788_v52  ;;  %2980 = vmatmul.mubr.bf16.vlgmr.msra.gmra.mxu1 %v788_v52 }
 0x149   : > { %2985 = vmatprep.mubr.msk.bf16.mxu0 %vm3309_vm0, %v3307_v4  ;;  %2991 = vmatprep.mubr.msk.bf16.mxu1 %vm3309_vm0, %v3307_v4 }
 0x208   : > { %v983_v53 = vpop.f32.mrf.mxu0  ;;  %v1026_v54 = vpop.f32.mrf.mxu1 }
 0x20a   : > { %v985_v55 = vpop.f32.mrf.mxu0  ;;  %v2981_v56 = vpop.f32.mrf.mxu1 }
 0x20c   : > { %v987_v57 = vpop.f32.mrf.mxu0  ;;  %v1029_v58 = vpop.f32.mrf.mxu1 }
 0x20d   : > { %v3535_v59 = vpack.c.bf16 %v987_v57, %v983_v53  ;;  %v3537_v60 = vpack.c.bf16 %v1029_v58, %v1026_v54 }
 0x20e   : > { %v989_v61 = vpop.f32.mrf.mxu0  ;;  %v2982_v62 = vpop.f32.mrf.mxu1 }
 0x20f   : > { %v3539_v63 = vpack.c.bf16 %v989_v61, %v985_v55  ;;  %2990 = vmatpush3.bf16.msra.mxu1 %v3537_v60  ;;  %1190 = vrot.lane.b32.xlu1 %v3535_v59, %s3310_s28 }
 0x210   : > { %3001 = vmatprep.subr.bf16.mxu1 %v3307_v4 }
 0x211   : > { %1193 = vrot.lane.b32.xlu0 %v3539_v63, %s3310_s28  ;;  %v1041_v2 = vsel %vm1036_vm1, %v3539_v63, 0 }
 0x212   : > { %2984 = vmatpush3.bf16.xpose.msra.mxu0 %v1041_v2 }
 0x213   : > { %2995 = vmatprep.subr.bf16.mxu0 %v3307_v4 }
 0x219   : > { %2986 = vmatmul.mubr.msk.bf16.vlgmr.msra.gmra.mxu0 %vm1036_vm1, %v3535_v59 }
 0x21a   : > { %2997 = vmatprep.mubr.msk.bf16.mxu0 %vm3309_vm0, %v3307_v4 }
 0x281   : > { %v1191_v6 = vpop.permute.xlu1 %1190 }
 0x283   : > { %v1194_v3 = vpop.permute.xlu0 %1193 }
 0x284   : > { %v1199_v5 = vsel %vm1036_vm1, %v1194_v3, 0  ;;  %v3169_v3 = vld [vmem:[%s3981_s6 + $0x18] sm:$0xff]  }
 0x285   : > { %2996 = vmatpush3.bf16.xpose.msra.mxu0 %v1199_v5 }
 0x286   : > { %3007 = vmatprep.subr.bf16.mxu0 %v3307_v4 }
 0x28c   : > { %2998 = vmatmul.mubr.msk.bf16.vlgmr.msra.gmra.mxu0 %vm1036_vm1, %v1191_v6 }
 0x28d   : > { %3011 = vmatprep.mubr.msk.bf16.mxu0 %vm3309_vm0, %v3307_v4  ;;  %3008 = vmatpush3.bf16.msra.mxu0 %v3169_v3 }
 0x28e   : > { %3009 = vmatprep.subr.bf16.mxu0 %v3307_v4 }
 0x2d9   : > { %v1077_v14 = vpop.f32.mrf.mxu0 }
 0x2da   : > { %v1084_v15 = vmul.f32 0.17677669, %v1077_v14 }
 0x2db   : > { %v2987_v16 = vpop.f32.mrf.mxu0 }
 0x2dc   : > { %v1092_v17 = vadd.f32 %v3568_v13, %v1084_v15  ;;  %v3167_v15 = vld [vmem:[%s3981_s6 + $0x8] sm:$0xff]  }
 0x2dd   : > { %v1080_v18 = vpop.f32.mrf.mxu0 }
 0x2de   : > { %v1085_v19 = vmul.f32 0.17677669, %v1080_v18  ;;  %v1095_v20 = vsel %vm1094_vm2, %v1092_v17, -inf  ;;  %v3170_v18 = vld [vmem:[%s3981_s6 + $0x10] sm:$0xff]  }
 0x2df   : > { %1096 = vmax.xlane.f32.xlu1 %v1095_v20  ;;  %v2988_v21 = vpop.f32.mrf.mxu0  ;;  %3010 = vmatpush3.bf16.msra.mxu0 %v3170_v18 }
 0x2e0   : > { %v1093_v22 = vadd.f32 %v3568_v13, %v1085_v19  ;;  %3023 = vmatprep.subr.bf16.mxu0 %v3307_v4 }
 0x2e2   : > { %v1098_v23 = vsel %vm1094_vm2, %v1093_v22, -inf }
 0x2e3   : > { %1099 = vmax.xlane.f32.xlu0 %v1098_v23 }
 0x34c   : > { %v1235_v24 = vpop.f32.mrf.mxu0 }
 0x34d   : > { %v1242_v25 = vmul.f32 0.17677669, %v1235_v24 }
 0x34e   : > { %v2999_v26 = vpop.f32.mrf.mxu0 }
 0x34f   : > { %v1244_v28 = vadd.f32 %v1242_v25, %v3568_v13 }
 0x350   : > { %v1238_v29 = vpop.f32.mrf.mxu0 }
 0x351   : > { %v1243_v30 = vmul.f32 0.17677669, %v1238_v29  ;;  %v1246_v31 = vsel %vm1094_vm2, %v1244_v28, -inf }
 0x352   : > { %1247 = vmax.xlane.f32.xlu0 %v1246_v31  ;;  %v3000_v32 = vpop.f32.mrf.mxu0 }
 0x353   : > { %v1245_v33 = vadd.f32 %v1243_v30, %v3568_v13 }
 0x355   : > { %v1249_v34 = vsel %vm1094_vm2, %v1245_v33, -inf }
 0x356   : > { %1250 = vmax.xlane.f32.xlu1 %v1249_v34 }
 0x368   : > { %v1097_v35 = vpop.xlane.xlu1 %1096 }
 0x369   : > { %v1101_v36 = vsub.f32 %v1092_v17, %v1097_v35  ;;  %v3168_v17 = vld [vmem:[%s3981_s6] sm:$0xff]  }
 0x36b   : > { %v1103_v37 = vmul.f32 1.442695, %v1101_v36 }
 0x36c   : > { %v1100_v38 = vpop.xlane.xlu0 %1099 }
 0x36d   : > { %3235 = vpow2.f32 %v1103_v37  ;;  %v1102_v39 = vsub.f32 %v1093_v22, %v1100_v38 }
 0x36f   : > { %v1105_v40 = vmul.f32 1.442695, %v1102_v39 }
 0x371   : > { %3237 = vpow2.f32 %v1105_v40 }
 0x37a   : > { %v3236_v41 = vpop.eup %3235 }
 0x37b   : > { %v1107_v42 = vsel %vm1094_vm2, %v3236_v41, 0.0 }
 0x37c   : > { %1108 = vadd.xlane.f32.xlu0 %v1107_v42 }
 0x37e   : > { %v3238_v43 = vpop.eup %3237 }
 0x37f   : > { %v1110_v44 = vsel %vm1094_vm2, %v3238_v43, 0.0 }
 0x380   : > { %1111 = vadd.xlane.f32.xlu1 %v1110_v44 }
 0x3db   : > { %v1248_v45 = vpop.xlane.xlu0 %1247 }
 0x3dc   : > { %v1252_v46 = vsub.f32 %v1244_v28, %v1248_v45 }
 0x3de   : > { %v1254_v47 = vmul.f32 1.442695, %v1252_v46 }
 0x3df   : > { %v1251_v48 = vpop.xlane.xlu1 %1250 }
 0x3e0   : > { %3239 = vpow2.f32 %v1254_v47  ;;  %v1253_v49 = vsub.f32 %v1245_v33, %v1251_v48 }
 0x3e2   : > { %v1256_v50 = vmul.f32 1.442695, %v1253_v49 }
 0x3e4   : > { %3241 = vpow2.f32 %v1256_v50 }
 0x3ed   : > { %v3240_v51 = vpop.eup %3239 }
 0x3ee   : > { %v1258_v52 = vsel %vm1094_vm2, %v3240_v51, 0.0 }
 0x3ef   : > { %1259 = vadd.xlane.f32.xlu0 %v1258_v52 }
 0x3f1   : > { %v3242_v53 = vpop.eup %3241 }
 0x3f2   : > { %v1261_v54 = vsel %vm1094_vm2, %v3242_v53, 0.0 }
 0x3f3   : > { %1262 = vadd.xlane.f32.xlu1 %v1261_v54 }
 0x404   : > { %1448 = vrot.lane.b32.xlu1 %v3539_v63, %s3311_s17 }
 0x405   : > { %1282 = vrot.lane.b32.xlu0 %v3537_v60, %s3310_s28  ;;  %v1109_v55 = vpop.xlane.xlu0 %1108  ;;  %s3690_s28 = scalar_lea.vmem %s3977_s2, %s3414_s22 }
 0x406   : > { %3243 = vrcp.f32 %v1109_v55 }
 0x408   : > { %1446 = vrot.lane.b32.xlu1 %v3535_v59, %s3311_s17 }
 0x409   : > { %v1112_v56 = vpop.xlane.xlu1 %1111 }
 0x40a   : > { %3245 = vrcp.f32 %v1112_v56 }
 0x413   : > { %v3244_v57 = vpop.eup %3243 }
 0x414   : > { %v3588_v61 = vmul.f32 %v3244_v57, %v3236_v41 }
 0x417   : > { %v3246_v58 = vpop.eup %3245 }
 0x418   : > { %v3590_v62 = vmul.f32 %v3246_v58, %v3238_v43 }
 0x41a   : > { %v1139_v2 = vpack.c.bf16 %v3590_v62, %v3588_v61 }
 0x41c   : > { %2992 = vmatmul.mubr.msk.bf16.vlgmr.msra.gmra.mxu1 %vm1094_vm2, %v1139_v2 }
 0x41d   : > { %3003 = vmatprep.mubr.msk.bf16.mxu1 %vm3309_vm0, %v3307_v4 }
 0x478   : > { %v1260_v5 = vpop.xlane.xlu0 %1259 }
 0x479   : > { %3247 = vrcp.f32 %v1260_v5 }
 0x47c   : > { %v1283_v6 = vpop.permute.xlu0 %1282  ;;  %v1263_v7 = vpop.xlane.xlu1 %1262 }
 0x47d   : > { %3249 = vrcp.f32 %v1263_v7  ;;  %3002 = vmatpush3.bf16.msra.mxu1 %v1283_v6 }
 0x47e   : > { %3015 = vmatprep.subr.bf16.mxu1 %v3307_v4 }
 0x480   : > { %v1449_v26 = vpop.permute.xlu1 %1448 }
 0x481   : > { %v1454_v31 = vsel %vm1036_vm1, %v1449_v26, 0 }
 0x484   : > { %v1447_v32 = vpop.permute.xlu1 %1446 }
 0x486   : > { %v3248_v8 = vpop.eup %3247 }
 0x487   : > { %v3602_v11 = vmul.f32 %v3248_v8, %v3240_v51 }
 0x48a   : > { %v3250_v9 = vpop.eup %3249 }
 0x48b   : > { %v3604_v14 = vmul.f32 %v3250_v9, %v3242_v53 }
 0x48d   : > { %v1280_v16 = vpack.c.bf16 %v3604_v14, %v3602_v11 }
 0x48f   : > { %3004 = vmatmul.mubr.msk.bf16.vlgmr.msra.gmra.mxu1 %vm1094_vm2, %v1280_v16 }
 0x490   : > { %3016 = vmatpush3.bf16.msra.mxu1 %v3167_v15  ;;  %3019 = vmatprep.mubr.msk.bf16.mxu1 %vm3309_vm0, %v3307_v4 }
 0x491   : > { %3017 = vmatprep.subr.bf16.mxu1 %v3307_v4 }
 0x494   : > { %3018 = vmatpush3.bf16.msra.mxu1 %v3168_v17 }
 0x495   : > { %3029 = vmatprep.subr.bf16.mxu1 %v3307_v4 }
 0x4dc   : > { %v1177_v19 = vpop.f32.mrf.mxu1 }
 0x4de   : > { %v2993_v20 = vpop.f32.mrf.mxu1 }
 0x4df   : > { %v3172_v20 = vld [vmem:[%s3981_s6 + $0x20] sm:$0xff]  }
 0x4e0   : > { %v1180_v21 = vpop.f32.mrf.mxu1 }
 0x4e1   : > { %v1184_v22 = vpack.c.bf16 %v1180_v21, %v1177_v19  ;;  %v3171_v19 = vld [vmem:[%s3981_s6 + $0x28] sm:$0xff]  }
 0x4e2   : > { %v2994_v23 = vpop.f32.mrf.mxu1 }
 0x4e3   : > { %3020 = vmatmul.mubr.msk.bf16.vlgmr.msra.gmra.mxu1 %vm1036_vm1, %v1184_v22 }
 0x4e4   : > { %3031 = vmatprep.mubr.msk.bf16.mxu1 %vm3309_vm0, %v3307_v4 }
 0x54f   : > { %v1322_v24 = vpop.f32.mrf.mxu1 }
 0x551   : > { %v3005_v25 = vpop.f32.mrf.mxu1 }
 0x553   : > { %v1325_v28 = vpop.f32.mrf.mxu1 }
 0x554   : > { %v1329_v29 = vpack.c.bf16 %v1325_v28, %v1322_v24 }
 0x555   : > { %v3006_v30 = vpop.f32.mrf.mxu1 }
 0x556   : > { %3012 = vmatmul.mubr.msk.bf16.vlgmr.msra.gmra.mxu0 %vm1036_vm1, %v1329_v29 }
 0x557   : > { %3024 = vmatpush3.bf16.xpose.msra.mxu0 %v1454_v31  ;;  %3025 = vmatprep.mubr.msk.bf16.mxu0 %vm3309_vm0, %v3307_v4 }
 0x558   : > { %3035 = vmatprep.subr.bf16.mxu0 %v3307_v4 }
 0x55e   : > { %3026 = vmatmul.mubr.msk.bf16.vlgmr.msra.gmra.mxu0 %vm1036_vm1, %v1447_v32 }
 0x55f   : > { %3039 = vmatprep.mubr.msk.bf16.mxu0 %vm3309_vm0, %v3307_v4  ;;  %3036 = vmatpush3.bf16.msra.mxu0 %v3171_v19 }
 0x560   : > { %3037 = vmatprep.subr.bf16.mxu0 %v3307_v4 }
 0x563   : > { %3038 = vmatpush3.bf16.msra.mxu0 %v3172_v20  ;;  %v2829_v20 = vld [vmem:[%s3982_s7] ss:$0 sm:$0xff] }
 0x564   : > { %3049 = vmatprep.subr.bf16.mxu0 %v3307_v4 }
 0x5a3   : > { %v3634_v33 = vpop.f32.mrf.mxu1 }
 0x5a5   : > { %v3021_v34 = vpop.f32.mrf.mxu1 }
 0x5a7   : > { %v3636_v35 = vpop.f32.mrf.mxu1 }
 0x5a9   : > { %v3022_v36 = vpop.f32.mrf.mxu1 }
 0x616   : > { %v3638_v37 = vpop.f32.mrf.mxu0 }
 0x618   : > { %v3013_v38 = vpop.f32.mrf.mxu0 }
 0x61a   : > { %v3640_v39 = vpop.f32.mrf.mxu0 }
 0x61c   : > { %v3014_v40 = vpop.f32.mrf.mxu0 }
 0x61e   : > { %v1490_v41 = vpop.f32.mrf.mxu0 }
 0x61f   : > { %v1497_v42 = vmul.f32 0.17677669, %v1490_v41 }
 0x620   : > { %v3027_v43 = vpop.f32.mrf.mxu0 }
 0x621   : > { %v1499_v44 = vadd.f32 %v1497_v42, %v3568_v13 }
 0x622   : > { %v1493_v45 = vpop.f32.mrf.mxu0 }
 0x623   : > { %v1498_v46 = vmul.f32 0.17677669, %v1493_v45  ;;  %v1501_v47 = vsel %vm1094_vm2, %v1499_v44, -inf }
 0x624   : > { %1502 = vmax.xlane.f32.xlu1 %v1501_v47  ;;  %v3028_v48 = vpop.f32.mrf.mxu0 }
 0x625   : > { %v1500_v49 = vadd.f32 %v1498_v46, %v3568_v13 }
 0x627   : > { %v1504_v50 = vsel %vm1094_vm2, %v1500_v49, -inf }
 0x628   : > { %1505 = vmax.xlane.f32.xlu0 %v1504_v50 }
 0x635   : > { %1536 = vrot.lane.b32.xlu1 %v3537_v60, %s3311_s17 }
 0x639   : > { %1646 = vrot.lane.b32.xlu1 %v3535_v59, %s3312_s16 }
 0x6ad   : > { %v1503_v51 = vpop.xlane.xlu1 %1502 }
 0x6ae   : > { %v1507_v52 = vsub.f32 %v1499_v44, %v1503_v51  ;;  %v1440_v51 = vadd.f32 %v3634_v33, %v3638_v37 }
 0x6b0   : > { %v1509_v53 = vmul.f32 1.442695, %v1507_v52 }
 0x6b1   : > { %v1537_v54 = vpop.permute.xlu1 %1536  ;;  %v1506_v55 = vpop.xlane.xlu0 %1505 }
 0x6b2   : > { %3251 = vpow2.f32 %v1509_v53  ;;  %v1508_v56 = vsub.f32 %v1500_v49, %v1506_v55  ;;  %3030 = vmatpush3.bf16.msra.mxu1 %v1537_v54  ;;  %v1443_v55 = vadd.f32 %v3636_v35, %v3640_v39  ;;  %v3173_v35 = vld [vmem:[%s3981_s6 + $0x38] sm:$0xff]   ;;  %v3174_v39 = vld [vmem:[%s3981_s6 + $0x30] sm:$0xff]  }
 0x6b3   : > { %3043 = vmatprep.subr.bf16.mxu1 %v3307_v4 }
 0x6b4   : > { %v1511_v57 = vmul.f32 1.442695, %v1508_v56 }
 0x6b6   : > { %3253 = vpow2.f32 %v1511_v57 }
 0x6bf   : > { %v3252_v58 = vpop.eup %3251 }
 0x6c0   : > { %v1513_v2 = vsel %vm1094_vm2, %v3252_v58, 0.0 }
 0x6c1   : > { %1514 = vadd.xlane.f32.xlu0 %v1513_v2 }
 0x6c3   : > { %v3254_v3 = vpop.eup %3253 }
 0x6c4   : > { %v1516_v5 = vsel %vm1094_vm2, %v3254_v3, 0.0 }
 0x6c5   : > { %1517 = vadd.xlane.f32.xlu0 %v1516_v5 }
 0x6db   : > { %1648 = vrot.lane.b32.xlu0 %v3539_v63, %s3312_s16  ;;  %v1647_v63 = vpop.permute.xlu1 %1646 }
 0x74a   : > { %v1515_v59 = vpop.xlane.xlu0 %1514 }
 0x74b   : > { %3255 = vrcp.f32 %v1515_v59 }
 0x74e   : > { %v1518_v6 = vpop.xlane.xlu0 %1517 }
 0x74f   : > { %3257 = vrcp.f32 %v1518_v6 }
 0x752   : > { %v1649_v16 = vpop.permute.xlu0 %1648 }
 0x753   : > { %v1654_v18 = vsel %vm1036_vm1, %v1649_v16, 0 }
 0x758   : > { %v3256_v7 = vpop.eup %3255 }
 0x759   : > { %v3655_v9 = vmul.f32 %v3256_v7, %v3252_v58 }
 0x75c   : > { %v3258_v8 = vpop.eup %3257 }
 0x75d   : > { %v3657_v15 = vmul.f32 %v3258_v8, %v3254_v3 }
 0x75f   : > { %v1535_v17 = vpack.c.bf16 %v3657_v15, %v3655_v9 }
 0x761   : > { %3032 = vmatmul.mubr.msk.bf16.vlgmr.msra.gmra.mxu1 %vm1094_vm2, %v1535_v17 }
 0x762   : > { %3044 = vmatpush3.bf16.xpose.msra.mxu1 %v1654_v18  ;;  %3045 = vmatprep.mubr.msk.bf16.mxu1 %vm3309_vm0, %v3307_v4 }
 0x763   : > { %3055 = vmatprep.subr.bf16.mxu1 %v3307_v4 }
 0x769   : > { %3046 = vmatmul.mubr.msk.bf16.vlgmr.msra.gmra.mxu1 %vm1036_vm1, %v1647_v63 }
 0x76a   : > { %3059 = vmatprep.mubr.msk.bf16.mxu1 %vm3309_vm0, %v3307_v4  ;;  %3056 = vmatpush3.bf16.msra.mxu1 %v3173_v35 }
 0x76b   : > { %3057 = vmatprep.subr.bf16.mxu1 %v3307_v4 }
 0x76e   : > { %3058 = vmatpush3.bf16.msra.mxu1 %v3174_v39 }
 0x76f   : > { %3063 = vmatprep.subr.bf16.mxu1 %v3307_v4 }
 0x821   : > { %v1576_v21 = vpop.f32.mrf.mxu1 }
 0x823   : > { %v3033_v22 = vpop.f32.mrf.mxu1 }
 0x825   : > { %v1579_v23 = vpop.f32.mrf.mxu1 }
 0x826   : > { %v1583_v24 = vpack.c.bf16 %v1579_v23, %v1576_v21 }
 0x827   : > { %v3034_v25 = vpop.f32.mrf.mxu1 }
 0x828   : > { %3040 = vmatmul.mubr.msk.bf16.vlgmr.msra.gmra.mxu0 %vm1036_vm1, %v1583_v24 }
 0x829   : > { %v1690_v26 = vpop.f32.mrf.mxu1  ;;  %3051 = vmatprep.mubr.msk.bf16.mxu0 %vm3309_vm0, %v3307_v4 }
 0x82a   : > { %v1697_v28 = vmul.f32 0.17677669, %v1690_v26 }
 0x82b   : > { %v3047_v29 = vpop.f32.mrf.mxu1 }
 0x82c   : > { %v1699_v30 = vadd.f32 %v1697_v28, %v3568_v13  ;;  %v3175_v29 = vld [vmem:[%s3985_s10 + $0xa8] ss:$12 sps:$4 sm:$0xff]  }
 0x82d   : > { %v1693_v31 = vpop.f32.mrf.mxu1 }
 0x82e   : > { %v1698_v32 = vmul.f32 0.17677669, %v1693_v31  ;;  %v1701_v34 = vsel %vm1094_vm2, %v1699_v30, -inf }
 0x82f   : > { %1702 = vmax.xlane.f32.xlu1 %v1701_v34  ;;  %v3048_v36 = vpop.f32.mrf.mxu1 }
 0x830   : > { %v1700_v38 = vadd.f32 %v1698_v32, %v3568_v13  ;;  %v744_v13 = vld [vmem:[%s3690_s28 + $0x8] sm:$0xff] }
 0x832   : > { %v1704_v40 = vsel %vm1094_vm2, %v1700_v38, -inf }
 0x833   : > { %1705 = vmax.xlane.f32.xlu0 %v1704_v40 }
 0x8b8   : > { %v1703_v41 = vpop.xlane.xlu1 %1702 }
 0x8b9   : > { %v1707_v42 = vsub.f32 %v1699_v30, %v1703_v41  ;;  %v3178_v30 = vld [vmem:[%s3985_s10 + $0xb0] ss:$12 sps:$4 sm:$0xff]  }
 0x8bb   : > { %v1709_v43 = vmul.f32 1.442695, %v1707_v42  ;;  %v3181_v42 = vld [vmem:[%s3985_s10 + $0x94] ss:$12 sps:$4 sm:$0xff]  }
 0x8bc   : > { %v1706_v44 = vpop.xlane.xlu0 %1705 }
 0x8bd   : > { %3259 = vpow2.f32 %v1709_v43  ;;  %v1708_v45 = vsub.f32 %v1700_v38, %v1706_v44  ;;  %v3179_v43 = vld [vmem:[%s3985_s10 + $0x90] ss:$12 sps:$4 sm:$0xff]   ;;  %v3182_v44 = vld [vmem:[%s3985_s10 + $0x98] ss:$12 sps:$4 sm:$0xff]  }
 0x8bf   : > { %v1711_v46 = vmul.f32 1.442695, %v1708_v45  ;;  %v3185_v45 = vld [vmem:[%s3985_s10 + $0x7c] ss:$12 sps:$4 sm:$0xff]  }
 0x8c1   : > { %3261 = vpow2.f32 %v1711_v46  ;;  %v3183_v46 = vld [vmem:[%s3985_s10 + $0x78] ss:$12 sps:$4 sm:$0xff]  }
 0x8ca   : > { %v3260_v47 = vpop.eup %3259 }
 0x8cb   : > { %v1713_v48 = vsel %vm1094_vm2, %v3260_v47, 0.0 }
 0x8cc   : > { %1714 = vadd.xlane.f32.xlu0 %v1713_v48  ;;  %v743_v48 = vld [vmem:[%s3690_s28] sm:$0xff]  ;;  %s730_s28 = scalar_lea.vmem %s3990_s15, %s3996_s18 }
 0x8ce   : > { %v3262_v49 = vpop.eup %3261 }
 0x8cf   : > { %v1716_v50 = vsel %vm1094_vm2, %v3262_v49, 0.0 }
 0x8d0   : > { %1717 = vadd.xlane.f32.xlu1 %v1716_v50  ;;  %v3187_v50 = vld [vmem:[%s3985_s10 + $0x60] ss:$12 sps:$4 sm:$0xff]  }
 0x8e2   : > { %1736 = vrot.lane.b32.xlu0 %v3537_v60, %s3312_s16 }
 0x8e6   : > { %1124 = vperm.xlu0 %3134, %v744_v13   ;;  %v3190_v13 = vld [vmem:[%s3985_s10 + $0x68] ss:$12 sps:$4 sm:$0xff]  }
 0x8e8   : > { %v1637_v52 = vpop.f32.mrf.mxu0 }
 0x8e9   : > { %v1644_v53 = vadd.f32 %v1637_v52, %v1440_v51  ;;  %v3193_v51 = vld [vmem:[%s3985_s10 + $0x4c] ss:$12 sps:$4 sm:$0xff]   ;;  %v3191_v52 = vld [vmem:[%s3985_s10 + $0x48] ss:$12 sps:$4 sm:$0xff]  }
 0x8ea   : > { %v3041_v54 = vpop.f32.mrf.mxu0 }
 0x8eb   : > { %v3197_v54 = vld [vmem:[%s3985_s10 + $0x34] ss:$12 sps:$4 sm:$0xff]  }
 0x8ec   : > { %v1640_v56 = vpop.f32.mrf.mxu0 }
 0x8ed   : > { %v1645_v57 = vadd.f32 %v1640_v56, %v1443_v55  ;;  %v3195_v55 = vld [vmem:[%s3985_s10 + $0x30] ss:$12 sps:$4 sm:$0xff]   ;;  %v3198_v56 = vld [vmem:[%s3985_s10 + $0x38] ss:$12 sps:$4 sm:$0xff]  }
 0x8ee   : > { %v3042_v58 = vpop.f32.mrf.mxu0 }
 0x8ef   : > { %v3199_v58 = vld [vmem:[%s3985_s10 + $0x18] ss:$12 sps:$4 sm:$0xff]  }
 0x955   : > { %v1715_v2 = vpop.xlane.xlu0 %1714 }
 0x956   : > { %3263 = vrcp.f32 %v1715_v2  ;;  %v3202_v2 = vld [vmem:[%s3985_s10 + $0x20] ss:$12 sps:$4 sm:$0xff]  }
 0x959   : > { %v1718_v3 = vpop.xlane.xlu1 %1717  ;;  %v1737_v5 = vpop.permute.xlu0 %1736 }
 0x95a   : > { %3265 = vrcp.f32 %v1718_v3  ;;  %3050 = vmatpush3.bf16.msra.mxu0 %v1737_v5  ;;  %v3205_v3 = vld [vmem:[%s3985_s10 + $0x4] ss:$12 sps:$4 sm:$0xff]   ;;  %v3203_v5 = vld [vmem:[%s3985_s10] ss:$12 sps:$4 sm:$0xff]  }
 0x961   : > { %v1125_v35 = vpop.permute.xlu0 %1124 }
 0x963   : > { %v3264_v60 = vpop.eup %3263 }
 0x964   : > { %v3699_v6 = vmul.f32 %v3264_v60, %v3260_v47  ;;  %v3186_v47 = vld [vmem:[%s3985_s10 + $0x80] ss:$12 sps:$4 sm:$0xff]   ;;  %v3206_v60 = vld [vmem:[%s3985_s10 + $0x8] ss:$12 sps:$4 sm:$0xff]  }
 0x967   : > { %v3266_v59 = vpop.eup %3265 }
 0x968   : > { %v3701_v33 = vmul.f32 %v3266_v59, %v3262_v49  ;;  %v3189_v49 = vld [vmem:[%s3985_s10 + $0x64] ss:$12 sps:$4 sm:$0xff]  }
 0x96a   : > { %v1735_v37 = vpack.c.bf16 %v3701_v33, %v3699_v6 }
 0x96c   : > { %3052 = vmatmul.mubr.msk.bf16.vlgmr.msra.gmra.mxu0 %vm1094_vm2, %v1735_v37 }
 0x96d   : > { %2107 = vmatprep.mubr.bf16.mxu0 %v3308_v27 }
 0xa2c   : > { %v1776_v7 = vpop.f32.mrf.mxu0 }
 0xa2e   : > { %v3053_v8 = vpop.f32.mrf.mxu0 }
 0xa30   : > { %v1779_v16 = vpop.f32.mrf.mxu0 }
 0xa31   : > { %v1783_v17 = vpack.c.bf16 %v1779_v16, %v1776_v7  ;;  %v1128_v16 = vmul.f32 %v1125_v35, %v3590_v62 }
 0xa32   : > { %v3054_v18 = vpop.f32.mrf.mxu0 }
 0xa33   : > { %3060 = vmatmul.mubr.msk.bf16.vlgmr.msra.gmra.mxu1 %vm1036_vm1, %v1783_v17  ;;  %v1269_v17 = vmul.f32 %v3604_v14, %v1125_v35  ;;  %v1524_v18 = vmul.f32 %v3657_v15, %v1125_v35 }
 0xa34   : > { %3079 = vmatprep.mubr.msk.bf16.mxu1 %vm3309_vm0, %v3307_v4  ;;  %3064 = vmatpush3.bf16.msra.mxu1 %v3178_v30 }
 0xa35   : > { %3065 = vmatprep.subr.bf16.mxu1 %v3307_v4  ;;  %v1526_v62 = vsel %vm1094_vm2, %v1524_v18, 0.0  ;;  %v3208_v18 = vld [vmem:[%s3987_s12 + $0x78] sm:$0xff]  }
 0xa38   : > { %3066 = vmatpush3.bf16.msra.mxu1 %v3182_v44 }
 0xa39   : > { %3067 = vmatprep.subr.bf16.mxu1 %v3307_v4 }
 0xa3c   : > { %3068 = vmatpush3.bf16.msra.mxu1 %v3186_v47 }
 0xa3d   : > { %3069 = vmatprep.subr.bf16.mxu1 %v3307_v4 }
 0xa40   : > { %3070 = vmatpush3.bf16.msra.mxu1 %v3190_v13 }
 0xa41   : > { %3071 = vmatprep.subr.bf16.mxu1 %v3307_v4 }
 0xaf3   : > { %v1837_v27 = vpop.f32.mrf.mxu1 }
 0xaf4   : > { %v1844_v63 = vadd.f32 %v1837_v27, %v1644_v53  ;;  %v3194_v53 = vld [vmem:[%s3985_s10 + $0x50] ss:$12 sps:$4 sm:$0xff]   ;;  %v1724_v27 = vmul.f32 %v3701_v33, %v1125_v35 }
 0xaf5   : > { %v3061_v19 = vpop.f32.mrf.mxu1  ;;  %3072 = vmatpush3.bf16.msra.mxu1 %v3194_v53 }
 0xaf6   : > { %v1846_v21 = vadd.f32 %v1844_v63, %v3420_v0  ;;  %v3177_v0 = vld [vmem:[%s3985_s10 + $0xac] ss:$12 sps:$4 sm:$0xff]   ;;  %3073 = vmatprep.subr.bf16.mxu1 %v3307_v4  ;;  %v1726_v15 = vsel %vm1094_vm2, %v1724_v27, 0.0 }
 0xaf7   : > { %v1840_v22 = vpop.f32.mrf.mxu1  ;;  %2075 = vmatprep.subr.bf16.mxu0 %v3177_v0  ;;  %v3209_v27 = vld [vmem:[%s3987_s12 + $0x38] sm:$0xff]  }
 0xaf8   : > { %v1845_v23 = vadd.f32 %v1840_v22, %v1645_v57  ;;  %v3722_v24 = vadd.f32 %v2829_v20, %v1846_v21  ;;  %2076 = vmatpush1.bf16.msra.mxu0 %v3175_v29  ;;  %v3201_v57 = vld [vmem:[%s3985_s10 + $0x1c] ss:$12 sps:$4 sm:$0xff]  }
 0xaf9   : > { %v3062_v25 = vpop.f32.mrf.mxu1  ;;  %2077 = vmatprep.subr.bf16.mxu0 %v3181_v42  ;;  %3074 = vmatpush3.bf16.msra.mxu1 %v3198_v56 }
 0xafa   : > { %v1847_v26 = vadd.f32 %v1845_v23, %v3422_v1  ;;  %1859 = vadd.xlane.f32.xlu1 %v3722_v24  ;;  %3075 = vmatprep.subr.bf16.mxu1 %v3307_v4  ;;  %v1130_v23 = vsel %vm1094_vm2, %v1128_v16, 0.0  ;;  %v1271_v25 = vsel %vm1094_vm2, %v1269_v17, 0.0  ;;  %v3207_v17 = vld [vmem:[%s3987_s12 + $0xb8] sm:$0xff]  }
 0xafc   : > { %v3726_v28 = vadd.f32 %v2829_v20, %v1847_v26  ;;  %2078 = vmatpush1.bf16.msra.mxu0 %v3179_v43 }
 0xafd   : > { %2079 = vmatprep.subr.bf16.mxu0 %v3185_v45  ;;  %3076 = vmatpush3.bf16.msra.mxu1 %v3202_v2 }
 0xafe   : > { %1861 = vadd.xlane.f32.xlu1 %v3726_v28  ;;  %3077 = vmatprep.subr.bf16.mxu1 %v3307_v4 }
 0xb00   : > { %2080 = vmatpush1.bf16.msra.mxu0 %v3183_v46 }
 0xb01   : > { %2081 = vmatprep.subr.bf16.mxu0 %v3189_v49  ;;  %3078 = vmatpush3.bf16.msra.mxu1 %v3206_v60 }
 0xb02   : > { %3083 = vmatprep.subr.bf16.mxu1 %v3307_v4 }
 0xb04   : > { %2082 = vmatpush1.bf16.msra.mxu0 %v3187_v50 }
 0xb05   : > { %2083 = vmatprep.subr.bf16.mxu0 %v3193_v51  ;;  %v2830_v51 = vld [vmem:[%s3983_s8] ss:$0 sm:$0xff] }
 0xb08   : > { %2084 = vmatpush1.bf16.msra.mxu0 %v3191_v52 }
 0xb09   : > { %2085 = vmatprep.subr.bf16.mxu0 %v3197_v54 }
 0xb0c   : > { %2086 = vmatpush1.bf16.msra.mxu0 %v3195_v55 }
 0xb0d   : > { %2087 = vmatprep.subr.bf16.mxu0 %v3201_v57 }
 0xb10   : > { %2088 = vmatpush1.bf16.msra.mxu0 %v3199_v58 }
 0xb11   : > { %2089 = vmatprep.subr.bf16.mxu0 %v3205_v3 }
 0xb14   : > { %2090 = vmatpush1.bf16.msra.mxu0 %v3203_v5 }
 0xb15   : > { %2932 = vmatprep.subr.bf16.mxu0 %v3208_v18 }
 0xb83   : > { %v1860_v1 = vpop.xlane.xlu1 %1859 }
 0xb84   : > { %v1863_v31 = vmul.f32 0.0078125, %v1860_v1 }
 0xb86   : > { %v3740_v32 = vsub.f32 %v3722_v24, %v1863_v31 }
 0xb87   : > { %v1862_v34 = vpop.xlane.xlu1 %1861 }
 0xb88   : > { %v1864_v36 = vmul.f32 0.0078125, %v1862_v34  ;;  %v1867_v38 = vmul.f32 %v3740_v32, %v3740_v32 }
 0xb8a   : > { %v3745_v40 = vsub.f32 %v3726_v28, %v1864_v36  ;;  %1869 = vadd.xlane.f32.xlu1 %v1867_v38 }
 0xb8c   : > { %v1868_v41 = vmul.f32 %v3745_v40, %v3745_v40 }
 0xb8e   : > { %1871 = vadd.xlane.f32.xlu1 %v1868_v41 }
 0xb9f   : > { %1119 = vperm.xlu1 %3133, %v743_v48  }
 0xc13   : > { %v1870_v59 = vpop.xlane.xlu1 %1869 }
 0xc14   : > { %v1873_v37 = vmul.f32 0.0078125, %v1870_v59 }
 0xc16   : > { %v1875_v39 = vadd.f32 1e-06, %v1873_v37 }
 0xc17   : > { %v1872_v7 = vpop.xlane.xlu1 %1871 }
 0xc18   : > { %3267 = vrsqrt.f32 %v1875_v39  ;;  %v1874_v8 = vmul.f32 0.0078125, %v1872_v7 }
 0xc1a   : > { %v1876_v63 = vadd.f32 1e-06, %v1874_v8 }
 0xc1b   : > { %v1120_v19 = vpop.permute.xlu1 %1119 }
 0xc1c   : > { %3269 = vrsqrt.f32 %v1876_v63  ;;  %v1127_v20 = vmul.f32 %v1120_v19, %v3588_v61  ;;  %v1268_v21 = vmul.f32 %v3602_v11, %v1120_v19  ;;  %v1523_v22 = vmul.f32 %v3655_v9, %v1120_v19  ;;  %v3210_v63 = vld [vmem:[%s3987_s12 + $0xb0] sm:$0xff]  }
 0xc1d   : > { %v1723_v14 = vmul.f32 %v3699_v6, %v1120_v19  ;;  %v3211_v19 = vld [vmem:[%s3987_s12 + $0x70] sm:$0xff]  }
 0xc1e   : > { %v1129_v33 = vsel %vm1094_vm2, %v1127_v20, 0.0  ;;  %v1270_v26 = vsel %vm1094_vm2, %v1268_v21, 0.0  ;;  %v1525_v61 = vsel %vm1094_vm2, %v1523_v22, 0.0  ;;  %v3212_v20 = vld [vmem:[%s3987_s12 + $0x30] sm:$0xff]   ;;  %v3213_v21 = vld [vmem:[%s3987_s12 + $0xa8] sm:$0xff]  }
 0xc1f   : > { %v1131_v29 = vadd.f32 %v1130_v23, %v1129_v33  ;;  %v1272_v11 = vadd.f32 %v1271_v25, %v1270_v26  ;;  %v1527_v0 = vadd.f32 %v1526_v62, %v1525_v61  ;;  %v1725_v9 = vsel %vm1094_vm2, %v1723_v14, 0.0  ;;  %v3214_v22 = vld [vmem:[%s3987_s12 + $0x68] sm:$0xff]   ;;  %v3216_v25 = vld [vmem:[%s3987_s12 + $0xa0] sm:$0xff]   ;;  %v3220_v33 = vld [vmem:[%s3987_s12 + $0x58] sm:$0xff]  }
 0xc20   : > { %v1727_v30 = vadd.f32 %v1726_v15, %v1725_v9  ;;  %v3215_v23 = vld [vmem:[%s3987_s12 + $0x28] sm:$0xff]   ;;  %v3217_v62 = vld [vmem:[%s3987_s12 + $0x60] sm:$0xff]   ;;  %v3219_v15 = vld [vmem:[%s3987_s12 + $0x98] sm:$0xff]  }
 0xc21   : > { %v1132_v1 = vrot.slane %v1131_v29, 4  ;;  %v1273_v31 = vrot.slane %v1272_v11, 4  ;;  %v1528_v34 = vrot.slane %v1527_v0, 4  ;;  %v3218_v14 = vld [vmem:[%s3987_s12 + $0x20] sm:$0xff]   ;;  %v3221_v26 = vld [vmem:[%s3987_s12 + $0x18] sm:$0xff]   ;;  %v3222_v61 = vld [vmem:[%s3987_s12 + $0x90] sm:$0xff]  }
 0xc22   : > { %v1728_v36 = vrot.slane %v1727_v30, 4  ;;  %v3226_v9 = vld [vmem:[%s3987_s12 + $0x48] sm:$0xff]  }
 0xc23   : > { %v1133_v38 = vadd.f32 %v1132_v1, %v1131_v29  ;;  %v1274_v6 = vadd.f32 %v1273_v31, %v1272_v11  ;;  %v1529_v41 = vadd.f32 %v1528_v34, %v1527_v0  ;;  %v3223_v29 = vld [vmem:[%s3987_s12 + $0x50] sm:$0xff]   ;;  %v3225_v0 = vld [vmem:[%s3987_s12 + $0x88] sm:$0xff]   ;;  %v3228_v1 = vld [vmem:[%s3987_s12 + $0x80] sm:$0xff]  }
 0xc24   : > { %v1729_v42 = vadd.f32 %v1728_v36, %v1727_v30  ;;  %v3224_v11 = vld [vmem:[%s3987_s12 + $0x10] sm:$0xff]   ;;  %v3227_v30 = vld [vmem:[%s3987_s12 + $0x8] sm:$0xff]   ;;  %v3229_v31 = vld [vmem:[%s3987_s12 + $0x40] sm:$0xff]   ;;  %v1942_v36 = vsub.s32 2, %v3563_v10 }
 0xc25   : > { %v3268_v43 = vpop.eup %3267  ;;  %v1134_v44 = vrot.slane %v1133_v38, 2  ;;  %v1275_v45 = vrot.slane %v1274_v6, 2  ;;  %v1530_v46 = vrot.slane %v1529_v41, 2  ;;  %v3230_v34 = vld [vmem:[%s3987_s12] sm:$0xff]  }
 0xc26   : > { %v1730_v47 = vrot.slane %v1729_v42, 2  ;;  %v1879_v48 = vmul.f32 %v3268_v43, %v3740_v32  ;;  %v2831_v32 = vld [vmem:[%s3984_s9] ss:$0 sm:$0xff] }
 0xc27   : > { %v1135_v49 = vadd.f32 %v1134_v44, %v1133_v38  ;;  %v1276_v50 = vadd.f32 %v1275_v45, %v1274_v6  ;;  %v1531_v13 = vadd.f32 %v1530_v46, %v1529_v41  ;;  %v1938_v38 = vsub.s32 1, %v3563_v10 }
 0xc28   : > { %v1731_v52 = vadd.f32 %v1730_v47, %v1729_v42  ;;  %v1887_v58 = vmul.f32 %v2830_v51, %v1879_v48 }
 0xc29   : > { %v3270_v53 = vpop.eup %3269  ;;  %v1136_v54 = vrot.slane %v1135_v49, 1  ;;  %v1277_v55 = vrot.slane %v1276_v50, 1  ;;  %v1532_v56 = vrot.slane %v1531_v13, 1 }
 0xc2a   : > { %v1880_v57 = vmul.f32 %v3270_v53, %v3745_v40  ;;  %v1732_v5 = vrot.slane %v1731_v52, 1  ;;  %v1895_v35 = vadd.f32 %v2831_v32, %v1887_v58 }
 0xc2b   : > { %v1137_v2 = vadd.f32 %v1136_v54, %v1135_v49  ;;  %v1278_v3 = vadd.f32 %v1277_v55, %v1276_v50  ;;  %v1533_v37 = vadd.f32 %v1532_v56, %v1531_v13 }
 0xc2c   : > { %v1888_v60 = vmul.f32 %v2830_v51, %v1880_v57  ;;  %v1733_v8 = vadd.f32 %v1732_v5, %v1731_v52 }
 0xc2d   : > { %v1279_v59 = vadd.f32 %v1278_v3, %v1137_v2 }
 0xc2e   : > { %v1896_v39 = vadd.f32 %v2831_v32, %v1888_v60 }
 0xc2f   : > { %v1534_v7 = vadd.f32 %v1533_v37, %v1279_v59 }
 0xc30   : > { %v1897_v40 = vpack.c.bf16 %v1896_v39, %v1895_v35 }
 0xc31   : > { %v1734_v16 = vadd.f32 %v1733_v8, %v1534_v7 }
 0xc32   : > { %2108 = vmatmul.mubr.bf16.vlgmr.msra.gmra.mxu0 %v1897_v40  ;;  %3080 = vmatmul.mubr.bf16.vlgmr.msra.gmra.mxu1 %v1897_v40 }
 0xc33   : > { %2502 = vst.msk [vmem:[%s730_s28] sm:$0x1] %vm2501_vm3, %v1734_v16  ;;  %3099 = vmatprep.mubr.msk.bf16.mxu1 %vm3309_vm0, %v3307_v4  ;;  %3084 = vmatpush3.bf16.msra.mxu1 %v3207_v17  ;;  %s727_s28 = scalar_lea.vmem %s3989_s14, %s3414_s22 }
 0xc34   : > { %3085 = vmatprep.subr.bf16.mxu1 %v3307_v4  ;;  %2933 = vmatpush3.bf16.msra.mxu0 %v3209_v27 }
 0xc35   : > { %2934 = vmatprep.subr.bf16.mxu0 %v3211_v19 }
 0xc37   : > { %3086 = vmatpush3.bf16.msra.mxu1 %v3210_v63 }
 0xc38   : > { %3087 = vmatprep.subr.bf16.mxu1 %v3307_v4  ;;  %2935 = vmatpush3.bf16.msra.mxu0 %v3212_v20 }
 0xc39   : > { %2936 = vmatprep.subr.bf16.mxu0 %v3214_v22 }
 0xc3b   : > { %3088 = vmatpush3.bf16.msra.mxu1 %v3213_v21 }
 0xc3c   : > { %3089 = vmatprep.subr.bf16.mxu1 %v3307_v4  ;;  %2937 = vmatpush3.bf16.msra.mxu0 %v3215_v23 }
 0xc3d   : > { %2938 = vmatprep.subr.bf16.mxu0 %v3217_v62 }
 0xc3f   : > { %3090 = vmatpush3.bf16.msra.mxu1 %v3216_v25 }
 0xc40   : > { %3091 = vmatprep.subr.bf16.mxu1 %v3307_v4  ;;  %2939 = vmatpush3.bf16.msra.mxu0 %v3218_v14 }
 0xc41   : > { %2940 = vmatprep.subr.bf16.mxu0 %v3220_v33 }
 0xc43   : > { %3092 = vmatpush3.bf16.msra.mxu1 %v3219_v15 }
 0xc44   : > { %3093 = vmatprep.subr.bf16.mxu1 %v3307_v4  ;;  %2941 = vmatpush3.bf16.msra.mxu0 %v3221_v26 }
 0xc45   : > { %2942 = vmatprep.subr.bf16.mxu0 %v3223_v29 }
 0xc47   : > { %3094 = vmatpush3.bf16.msra.mxu1 %v3222_v61 }
 0xc48   : > { %3095 = vmatprep.subr.bf16.mxu1 %v3307_v4  ;;  %2943 = vmatpush3.bf16.msra.mxu0 %v3224_v11 }
 0xc49   : > { %2944 = vmatprep.subr.bf16.mxu0 %v3226_v9 }
 0xc4b   : > { %3096 = vmatpush3.bf16.msra.mxu1 %v3225_v0 }
 0xc4c   : > { %3097 = vmatprep.subr.bf16.mxu1 %v3307_v4  ;;  %2945 = vmatpush3.bf16.msra.mxu0 %v3227_v30  ;;  %v1930_v4 = vld [vmem:[%s3986_s11] sm:$0x7] }
 0xc4d   : > { %2946 = vmatprep.subr.bf16.mxu0 %v3229_v31  ;;  %v1935_v6 = vrot.slane %v1930_v4, %v1089_v12  ;;  %v1943_v41 = vrot.slane %v1930_v4, %v1942_v36  ;;  %v1939_v42 = vrot.slane %v1930_v4, %v1938_v38 }
 0xc4f   : > { %3098 = vmatpush3.bf16.msra.mxu1 %v3228_v1 }
 0xc50   : > { %2947 = vmatpush3.bf16.msra.mxu0 %v3230_v34 }
 0xcf2   : > { %v2109_v43 = vpop.f32.mrf.mxu0  ;;  %v2152_v44 = vpop.f32.mrf.mxu1 }
 0xcf3   : > { %v3936_v45 = vadd.f32 %v2109_v43, %v1935_v6  ;;  %v3938_v46 = vadd.f32 %v2152_v44, %v1943_v41 }
 0xcf4   : > { %v2111_v47 = vpop.f32.mrf.mxu0  ;;  %v3081_v48 = vpop.f32.mrf.mxu1 }
 0xcf5   : > { %v2159_v49 = vmul.f32 %v3936_v45, %v3936_v45  ;;  %v2161_v50 = vmul.f32 %v3938_v46, %v3938_v46  ;;  %v3944_v13 = vadd.f32 %v2111_v47, %v1939_v42 }
 0xcf6   : > { %v2113_v10 = vpop.f32.mrf.mxu0  ;;  %v2155_v12 = vpop.f32.mrf.mxu1 }
 0xcf7   : > { %v2165_v51 = vmul.f32 %v2159_v49, %v3936_v45  ;;  %v2167_v52 = vmul.f32 %v2161_v50, %v3938_v46  ;;  %v2160_v53 = vmul.f32 %v3944_v13, %v3944_v13  ;;  %v2114_v54 = vadd.f32 %v2113_v10, %v1935_v6 }
 0xcf8   : > { %v2156_v55 = vadd.f32 %v2155_v12, %v1943_v41  ;;  %v2115_v56 = vpop.f32.mrf.mxu0  ;;  %v3082_v57 = vpop.f32.mrf.mxu1 }
 0xcf9   : > { %v2171_v58 = vmul.f32 0.044715, %v2165_v51  ;;  %v2173_v2 = vmul.f32 0.044715, %v2167_v52  ;;  %v2166_v3 = vmul.f32 %v2160_v53, %v3944_v13  ;;  %v2162_v5 = vmul.f32 %v2114_v54, %v2114_v54 }
 0xcfa   : > { %v2164_v32 = vmul.f32 %v2156_v55, %v2156_v55  ;;  %v2116_v60 = vadd.f32 %v2115_v56, %v1939_v42 }
 0xcfb   : > { %v2177_v59 = vadd.f32 %v2171_v58, %v3936_v45  ;;  %v2179_v37 = vadd.f32 %v2173_v2, %v3938_v46  ;;  %v2172_v35 = vmul.f32 0.044715, %v2166_v3  ;;  %v2168_v39 = vmul.f32 %v2162_v5, %v2114_v54 }
 0xcfc   : > { %v2170_v7 = vmul.f32 %v2164_v32, %v2156_v55  ;;  %v2163_v8 = vmul.f32 %v2116_v60, %v2116_v60 }
 0xcfd   : > { %v2183_v40 = vmul.f32 0.7978846, %v2177_v59  ;;  %v2185_v16 = vmul.f32 0.7978846, %v2179_v37  ;;  %v2178_v17 = vadd.f32 %v2172_v35, %v3944_v13  ;;  %v2174_v18 = vmul.f32 0.044715, %v2168_v39 }
 0xcfe   : > { %v2176_v27 = vmul.f32 0.044715, %v2170_v7  ;;  %v2169_v63 = vmul.f32 %v2163_v8, %v2116_v60 }
 0xcff   : > { %3271 = vtanh.f32 %v2183_v40  ;;  %v2184_v19 = vmul.f32 0.7978846, %v2178_v17  ;;  %v2180_v20 = vadd.f32 %v2174_v18, %v2114_v54 }
 0xd00   : > { %3273 = vtanh.f32 %v2185_v16  ;;  %v2182_v21 = vadd.f32 %v2176_v27, %v2156_v55  ;;  %v2175_v22 = vmul.f32 0.044715, %v2169_v63 }
 0xd01   : > { %3275 = vtanh.f32 %v2184_v19  ;;  %v2186_v23 = vmul.f32 0.7978846, %v2180_v20 }
 0xd02   : > { %v2188_v25 = vmul.f32 0.7978846, %v2182_v21  ;;  %v2181_v62 = vadd.f32 %v2175_v22, %v2116_v60 }
 0xd03   : > { %3277 = vtanh.f32 %v2186_v23 }
 0xd04   : > { %3279 = vtanh.f32 %v2188_v25  ;;  %v2187_v14 = vmul.f32 0.7978846, %v2181_v62 }
 0xd06   : > { %3281 = vtanh.f32 %v2187_v14 }
 0xd0c   : > { %v3272_v15 = vpop.eup %3271 }
 0xd0d   : > { %v3274_v33 = vpop.eup %3273  ;;  %v2195_v9 = vadd.f32 1.0, %v3272_v15 }
 0xd0e   : > { %v3276_v26 = vpop.eup %3275  ;;  %v2197_v61 = vadd.f32 1.0, %v3274_v33 }
 0xd0f   : > { %v2196_v11 = vadd.f32 1.0, %v3276_v26  ;;  %v2201_v41 = vmul.f32 0.5, %v2195_v9 }
 0xd10   : > { %v3278_v29 = vpop.eup %3277  ;;  %v2203_v1 = vmul.f32 0.5, %v2197_v61 }
 0xd11   : > { %v3280_v0 = vpop.eup %3279  ;;  %v2198_v30 = vadd.f32 1.0, %v3278_v29  ;;  %v2202_v6 = vmul.f32 0.5, %v2196_v11  ;;  %v2207_v10 = vmul.f32 %v2201_v41, %v3936_v45 }
 0xd12   : > { %v2200_v31 = vadd.f32 1.0, %v3280_v0  ;;  %v2209_v42 = vmul.f32 %v2203_v1, %v3938_v46  ;;  %v2856_v46 = vld [vmem:[%s3988_s13] ss:$0 sm:$0xff] }
 0xd13   : > { %v3282_v34 = vpop.eup %3281  ;;  %v2204_v36 = vmul.f32 0.5, %v2198_v30  ;;  %v2208_v49 = vmul.f32 %v2202_v6, %v3944_v13 }
 0xd14   : > { %v2206_v4 = vmul.f32 0.5, %v2200_v31  ;;  %v2199_v38 = vadd.f32 1.0, %v3282_v34 }
 0xd15   : > { %v2210_v47 = vmul.f32 %v2204_v36, %v2114_v54 }
 0xd16   : > { %v2212_v43 = vmul.f32 %v2206_v4, %v2156_v55  ;;  %v2205_v44 = vmul.f32 0.5, %v2199_v38 }
 0xd17   : > { %v2213_v51 = vpack.c.bf16 %v2210_v47, %v2207_v10 }
 0xd18   : > { %v2215_v48 = vpack.c.bf16 %v2212_v43, %v2209_v42  ;;  %v2211_v50 = vmul.f32 %v2205_v44, %v2116_v60 }
 0xd1a   : > { %3100 = vmatmul.mubr.bf16.vlgmr.msra.gmra.mxu1 %v2215_v48  ;;  %v2214_v12 = vpack.c.bf16 %v2211_v50, %v2208_v49 }
 0xd1c   : > { %2447 = vmatprep.mubr.bf16.mxu0 %v2214_v12 }
 0xd1d   : > { %2448 = vmatmul.mubr.bf16.vlgmr.msra.gmra.mxu0 %v2213_v51 }
 0xdda   : > { %v2490_v52 = vpop.f32.mrf.mxu1 }
 0xddc   : > { %v3101_v53 = vpop.f32.mrf.mxu1 }
 0xddd   : > { %v2948_v56 = vpop.f32.mrf.mxu0 }
 0xdde   : > { %v2493_v57 = vpop.f32.mrf.mxu1 }
 0xddf   : > { %v2949_v54 = vpop.f32.mrf.mxu0 }
 0xde0   : > { %v2950_v55 = vadd.f32 %v2949_v54, %v2948_v56  ;;  %v3102_v13 = vpop.f32.mrf.mxu1 }
 0xde1   : > { %v2951_v58 = vpop.f32.mrf.mxu0 }
 0xde2   : > { %v2450_v2 = vadd.f32 %v2950_v55, %v2856_v46 }
 0xde3   : > { %v2952_v45 = vpop.f32.mrf.mxu0 }
 0xde4   : > { %v2491_v3 = vadd.f32 %v2490_v52, %v2450_v2  ;;  %v2953_v5 = vadd.f32 %v2952_v45, %v2951_v58 }
 0xde6   : > { %v2497_v32 = vadd.f32 %v2491_v3, %v3722_v24  ;;  %v2453_v60 = vadd.f32 %v2953_v5, %v2856_v46 }
 0xde8   : > { %2499 = vst [vmem:[%s727_s28] sm:$0xff] %v2497_v32  ;;  %v2494_v59 = vadd.f32 %v2493_v57, %v2453_v60 }
 0xdea   : > { %v2498_v37 = vadd.f32 %v2494_v59, %v3726_v28 }
 0xdec   : > { %2500 = vst [vmem:[%s727_s28 + $0x8] sm:$0xff] %v2498_v37 }
 0xded PF: > { %s26_s20 = sadd.s32 1, %s3305_s20   ;;  %s3991_s18 = smov %s3301_s19 }
 0xdee   : > { %p23_p5 = scmp.ge.s32.totalorder %s26_s20, 4   ;;  %s3992_s19 = smov %s3994_s21 }
 0xdf0   :  { %25 = sbr.rel (!%p23_p5) target bundleno = 2 (0x2), region = 161 }

// kernel: apvit_forward.17
= control target key start
LH: loop header
LB: loop body
LE: loop exit
PB: predicated region body
PF: predicated region fallthrough
CT: control target
= control target key end

     0   :  { %vm25_vm0 = vcmask 1041408   ;;  %s331_s0 = inlined_call_operand.vmem [shape: f32[2,128], index: 0, kind: input, shape index: {}]   ;;  %s332_s1 = inlined_call_operand.vmem [shape: f32[1,128], index: 1, kind: input, shape index: {}]   ;;  %s333_s2 = inlined_call_operand.vmem [shape: f32[1,128], index: 2, kind: input, shape index: {}]   ;;  %s334_s3 = inlined_call_operand.vmem [shape: bf16[128,7], index: 3, kind: input, shape index: {}]   ;;  %s335_s4 = inlined_call_operand.vmem [shape: f32[1,7], index: 4, kind: input, shape index: {}]   ;;  %s336_s5 = inlined_call_operand.hbm [shape: f32[2,7], index: 5, kind: output, shape index: {}]  }
   0x1   :  { %v22_v0 = vld [vmem:[%s331_s0] sm:$0x3] }
   0x2   :  { %v26_v1 = vsel %vm25_vm0, %v22_v0, 0.0 }
   0x3   :  { %27 = vadd.xlane.f32.xlu0 %v26_v1 }
   0x4   :  { %10 = vsyncpa [#allocation3], 0  ;;  %v225_v2 = vld [vmem:[%s334_s3 + $0x38] sm:$0xff]   ;;  %v257_v3 = vmov 0.0   ;;  %v226_v4 = vld [vmem:[%s334_s3 + $0x30] sm:$0xff]   ;;  %vm258_vm1 = vmmov 0  }
   0x5   :  { %202 = vmatprep.subr.bf16.mxu0 %v257_v3  ;;  %v227_v10 = vld [vmem:[%s334_s3 + $0x28] sm:$0xff]   ;;  %v228_v11 = vld [vmem:[%s334_s3 + $0x20] sm:$0xff]   ;;  %218 = vmatprep.mubr.msk.bf16.mxu0 %vm258_vm1, %v257_v3  ;;  %v229_v12 = vld [vmem:[%s334_s3 + $0x18] sm:$0xff]   ;;  %s259_s15 = smov [#allocation2]   ;;  %vm166_vm2 = vcmask 50176  }
   0x6   :  { %203 = vmatpush3.bf16.msra.mxu0 %v225_v2  ;;  %v230_v13 = vld [vmem:[%s334_s3 + $0x10] sm:$0xff]   ;;  %v231_v14 = vld [vmem:[%s334_s3 + $0x8] sm:$0xff]   ;;  %v232_v15 = vld [vmem:[%s334_s3] sm:$0xff]   ;;  %s174_s16 = sshll.u32 %s259_s15, 4  ;;  %s175_s16 = int_to_ptr.vmem [resolvable:$true] %s174_s16 }
   0x7   :  { %204 = vmatprep.subr.bf16.mxu0 %v257_v3  ;;  %v182_v20 = vld [vmem:[%s332_s1] ss:$0 sm:$0xff]  ;;  %s235_s1 = scalar_lea.vmem %s175_s16, 32  ;;  %p240_p1 = scmp.lt.s32.totalorder %s175_s16, %s175_s16 }
   0x8   :  { %v183_v22 = vld [vmem:[%s333_s2] ss:$0 sm:$0xff]  ;;  %p236_p0 = scmp.ne.s32.totalorder %s175_s16, %s235_s1  ;;  %p241_p2 = scmp.lt.s32.totalorder %s235_s1, %s235_s1 }
   0x9   :  { %v184_v26 = vld [vmem:[%s335_s4] ss:$0 sm:$0xff] }
   0xa   :  { %205 = vmatpush3.bf16.msra.mxu0 %v226_v4  ;;  %p242_p3 = por %p241_p2, %p240_p1 }
   0xb   :  { %206 = vmatprep.subr.bf16.mxu0 %v257_v3 }
   0xc   :  { %p243_p4 = pnand %p242_p3, %p236_p0 }
   0xe   :  { %207 = vmatpush3.bf16.msra.mxu0 %v227_v10 }
   0xf   :  { %208 = vmatprep.subr.bf16.mxu0 %v257_v3 }
  0x12   :  { %209 = vmatpush3.bf16.msra.mxu0 %v228_v11 }
  0x13   :  { %210 = vmatprep.subr.bf16.mxu0 %v257_v3 }
  0x16   :  { %211 = vmatpush3.bf16.msra.mxu0 %v229_v12 }
  0x17   :  { %212 = vmatprep.subr.bf16.mxu0 %v257_v3 }
  0x1a   :  { %213 = vmatpush3.bf16.msra.mxu0 %v230_v13 }
  0x1b   :  { %214 = vmatprep.subr.bf16.mxu0 %v257_v3 }
  0x1e   :  { %215 = vmatpush3.bf16.msra.mxu0 %v231_v14 }
  0x1f   :  { %216 = vmatprep.subr.bf16.mxu0 %v257_v3 }
  0x22   :  { %217 = vmatpush3.bf16.msra.mxu0 %v232_v15 }
  0x8c   :  { %v28_v5 = vpop.xlane.xlu0 %27 }
  0x8d   :  { %v30_v6 = vmul.f32 0.0078125, %v28_v5 }
  0x8f   :  { %v31_v7 = vsub.f32 %v22_v0, %v30_v6 }
  0x91   :  { %v32_v8 = vmul.f32 %v31_v7, %v31_v7 }
  0x93   :  { %v33_v9 = vsel %vm25_vm0, %v32_v8, 0.0 }
  0x94   :  { %34 = vadd.xlane.f32.xlu0 %v33_v9 }
 0x11d   :  { %v35_v16 = vpop.xlane.xlu0 %34 }
 0x11e   :  { %v36_v17 = vmul.f32 0.0078125, %v35_v16 }
 0x120   :  { %v37_v18 = vadd.f32 1e-06, %v36_v17 }
 0x122   :  { %233 = vrsqrt.f32 %v37_v18 }
 0x12f   :  { %v234_v19 = vpop.eup %233 }
 0x130   :  { %v39_v21 = vmul.f32 %v234_v19, %v31_v7 }
 0x132   :  { %v46_v23 = vmul.f32 %v182_v20, %v39_v21 }
 0x134   :  { %v53_v24 = vadd.f32 %v183_v22, %v46_v23 }
 0x136   :  { %v54_v25 = vpack.c.bf16 %v53_v24, %v53_v24 }
 0x138   :  { %219 = vmatmul.mubr.bf16.vlgmr.msra.gmra.mxu0 %v54_v25 }
 0x1f8   :  { %v160_v27 = vpop.f32.mrf.mxu0 }
 0x1f9   :  { %v161_v28 = vadd.f32 %v184_v26, %v160_v27 }
 0x1fa   :  { %v220_v29 = vpop.f32.mrf.mxu0 }
 0x1fb   :  { %167 = vst.msk [vmem:[#allocation2] sm:$0x3] %vm166_vm2, %v161_v28 }
 0x1fc   :  { %v163_v30 = vpop.f32.mrf.mxu0 }
 0x1fd   :  { %246 = shalt.err (!%p243_p4)
}
 0x1fe   :  { %177 = dma.vmem_to_hbm [thread:$0]  %s175_s16, 32, %s336_s5, [#allocation3]   ;;  %v221_v31 = vpop.f32.mrf.mxu0 }
 0x1ff   :  { %255 = dma.done.wait [#allocation3], 32  }
 0x200   :  { %256 = vsyncadd [#allocation3], 4294967264 }
 0x201   :  { %181 = vsyncpa [#allocation3], 1 }

// kernel: apvit_forward.16
= control target key start
LH: loop header
LB: loop body
LE: loop exit
PB: predicated region body
PF: predicated region fallthrough
CT: control target
= control target key end

     0   :  { %s4156_s0 = inlined_call_operand.vmem [shape: f32[2,16,128], index: 0, kind: input, shape index: {}]   ;;  %s4157_s1 = inlined_call_operand.vmem [shape: f32[2,1,16], index: 1, kind: input, shape index: {}]   ;;  %s4158_s2 = inlined_call_operand.vmem [shape: f32[2,16,1], index: 2, kind: input, shape index: {}]   ;;  %s4159_s3 = inlined_call_operand.vmem [shape: f32[1,1,128], index: 3, kind: input, shape index: {}]   ;;  %s4160_s4 = inlined_call_operand.vmem [shape: f32[1,1,128], index: 4, kind: input, shape index: {}]   ;;  %s4161_s5 = inlined_call_operand.vmem [shape: bf16[1,128,384], index: 5, kind: input, shape index: {}]   ;;  %s4162_s6 = inlined_call_operand.vmem [shape: bf16[1,128,128], index: 6, kind: input, shape index: {}]   ;;  %s4163_s7 = inlined_call_operand.vmem [shape: f32[1,1,128], index: 7, kind: input, shape index: {}]   ;;  %s4164_s8 = inlined_call_operand.vmem [shape: f32[1,1,128], index: 8, kind: input, shape index: {}]   ;;  %s4165_s9 = inlined_call_operand.vmem [shape: f32[1,1,128], index: 9, kind: input, shape index: {}]   ;;  %s4166_s10 = inlined_call_operand.vmem [shape: bf16[1,128,384], index: 10, kind: input, shape index: {}]   ;;  %s4167_s11 = inlined_call_operand.vmem [shape: f32[1,1,384], index: 11, kind: input, shape index: {}]   ;;  %s4168_s12 = inlined_call_operand.vmem [shape: bf16[1,384,128], index: 12, kind: input, shape index: {}]   ;;  %s4169_s13 = inlined_call_operand.vmem [shape: f32[1,1,128], index: 13, kind: input, shape index: {}]   ;;  %s4170_s14 = inlined_call_operand.vmem [shape: f32[2,16,128], index: 14, kind: output, shape index: {0}]   ;;  %s4171_s15 = inlined_call_operand.hbm [shape: f32[2,1,16], index: 15, kind: output, shape index: {1}]  }
   0x1   :  { %4178 = sst [smem:[#allocation11_spill]] %s4156_s0 }
   0x2   :  { %4179 = sst [smem:[#allocation12_spill]] %s4157_s1 }
   0x3   :  { %21 = vsyncpa [#allocation3], 0 }
   0x4   :  { %23 = vsyncpa [#allocation3 + $0x1], 0  ;;  %s3501_s18 = smov 0   ;;  %s3503_s19 = smov 0  }
   0x5   :  { %s3505_s20 = smov 0   ;;  %s3507_s21 = smov 0  }
   0x6   :  { %s3509_s22 = smov 0   ;;  %s3511_s23 = smov 0  }
   0x7 LB: > { %4180 = sst [smem:[#allocation5_spill]] %s3392_s18  ;;  %s2781_s24 = sadd.s32 4294967295, %s3412_s23   ;;  %s3412_s23 = sphi %s3511_s23, %s29_s23   ;;  %s3408_s22 = sphi %s3509_s22, %s4196_s22   ;;  %s3404_s21 = sphi %s3507_s21, %s4195_s21   ;;  %s3400_s20 = sphi %s3505_s20, %s4194_s20   ;;  %s3396_s19 = sphi %s3503_s19, %s4198_s19   ;;  %s3392_s18 = sphi %s3501_s18, %s4197_s18  }
   0x8   : > { %4181 = sst [smem:[#allocation6_spill]] %s3400_s20  ;;  %s2782_s25 = sadd.s32 4294967294, %s3412_s23  }
   0x9   : > { %4182 = sst [smem:[#allocation7_spill]] %s3408_s22  ;;  %s41_s26 = sadd.s32 1, %s3408_s22 }
   0xa   : > { %s438_s27 = sadd.s32 1, %s3400_s20  ;;  %p43_p0 = scmp.ge.s32.totalorder %s41_s26, 2 }
   0xb   : > { %p448_p1 = scmp.ne.s32.totalorder %s3400_s20, %s3396_s19  ;;  %p449_p2 = scmp.eq.s32.totalorder %s2781_s24, 1 }
   0xc   : > { %p454_p3 = scmp.ne.s32.totalorder %s3396_s19, %s3392_s18  ;;  %s4200_s26 = smov (%p43_p0, %s41_s26), 0 }
   0xd   : > { %4183 = sst [smem:[#allocation8_spill]] %s4200_s26  ;;  %p3541_p4 = por %p449_p2, %p448_p1 }
   0xe   : > { %p455_p5 = scmp.eq.s32.totalorder %s2782_s25, 1  ;;  %s435_s29 = ssub.s32 %s3408_s22, %s4200_s26 }
   0xf   : > { %p2796_p6 = scmp.ge.s32.totalorder %s3412_s23, 1  ;;  %p436_p7 = scmp.eq.s32.totalorder %s435_s29, 0 }
  0x10   : > { %p3548_p8 = por %p455_p5, %p454_p3  ;;  %p570_p9 = scmp.lt.s32.totalorder %s3412_s23, 3 }
  0x11   : > { %s3554_s16 = scalar_select %p436_p7, %s3400_s20, %s438_s27  }
  0x12   : > { %s4185_s30 = scalar_select %p3548_p8, 1, 0 }
  0x13   : > { %4187 = sst [smem:[#allocation10_spill]] %s3554_s16  ;;  %p571_p10 = pnand %p2796_p6, %p570_p9 }
  0x14   : > { %4186 = sst [smem:[#allocation9_spill]] %s4185_s30  ;;  %p672_p11 = scmp.lt.s32.totalorder (!%p571_p10), %s3404_s21, 1 }
  0x15   : > { %574 = sbr.rel (%p571_p10) target bundleno = 3580 (0xdfc), region = 76  ;;  %s4188_s0 = sld [smem:[#allocation11_spill]] (!%p571_p10) }
  0x16   : > { %s3417_s29 = smov (!%p571_p10), 96   ;;  %s4189_s1 = sld [smem:[#allocation12_spill]] (!%p571_p10) }
  0x17   : > { %s3419_s18 = smov (!%p571_p10), 32   ;;  %s3420_s27 = smov (!%p571_p10), [#allocation2]  }
  0x1a   : > { %s3558_s17 = scalar_select %p672_p11, %s3404_s21, 1  ;;  %v3188_v2 = vld [vmem:[%s4161_s5 + $0xac] ss:$12 sps:$4 sm:$0xff]   ;;  %v3190_v3 = vld [vmem:[%s4161_s5 + $0xa8] ss:$12 sps:$4 sm:$0xff]   ;;  %v3414_v4 = vmov 0.0  }
  0x1b   : > { %2985 = vmatprep.subr.bf16.mxu1 %v3414_v4  ;;  %v3191_v5 = vld [vmem:[%s4161_s5 + $0xb0] ss:$12 sps:$4 sm:$0xff]   ;;  %950 = vmatprep.subr.bf16.mxu0 %v3188_v2  ;;  %v3192_v14 = vld [vmem:[%s4161_s5 + $0x94] ss:$12 sps:$4 sm:$0xff]   ;;  %v3195_v16 = vld [vmem:[%s4161_s5 + $0x98] ss:$12 sps:$4 sm:$0xff]  }
  0x1c   : > { %s3561_s24 = sshll.u32 %s3558_s17, 4  ;;  %951 = vmatpush1.bf16.msra.mxu0 %v3190_v3  ;;  %2986 = vmatpush3.bf16.msra.mxu1 %v3191_v5  ;;  %v3194_v15 = vld [vmem:[%s4161_s5 + $0x90] ss:$12 sps:$4 sm:$0xff]   ;;  %v3198_v18 = vld [vmem:[%s4161_s5 + $0x78] ss:$12 sps:$4 sm:$0xff]   ;;  %v3415_v27 = vmov 0   ;;  %s679_s20 = scalar_lea.vmem %s4189_s1, %s3558_s17 }
  0x1d   : > { %s676_s26 = scalar_lea.vmem %s4188_s0, %s3561_s24  ;;  %2987 = vmatprep.subr.bf16.mxu1 %v3414_v4  ;;  %952 = vmatprep.subr.bf16.mxu0 %v3192_v14  ;;  %v3196_v17 = vld [vmem:[%s4161_s5 + $0x7c] ss:$12 sps:$4 sm:$0xff]   ;;  %v3199_v19 = vld [vmem:[%s4161_s5 + $0x80] ss:$12 sps:$4 sm:$0xff]   ;;  %v3200_v20 = vld [vmem:[%s4161_s5 + $0x64] ss:$12 sps:$4 sm:$0xff]   ;;  %s3837_s0 = scalar_lea.vmem %s4158_s2, %s3561_s24 }
  0x1e   : > { %v3567_v0 = vld [vmem:[%s676_s26] sm:$0xff]  ;;  %v3569_v1 = vld [vmem:[%s676_s26 + $0x8] sm:$0xff]  ;;  %v3207_v25 = vld [vmem:[%s4161_s5 + $0x50] ss:$12 sps:$4 sm:$0xff]   ;;  %982 = vmatprep.mubr.bf16.mxu0 %v3415_v27  ;;  %vm3416_vm0 = vmmov 0   ;;  %3187 = vset.pattern.permute.xlu0 %v3415_v27  ;;  %vm1037_vm1 = vcmask 261120  }
  0x1f   : > { %750 = vadd.xlane.f32.xlu0 %v3567_v0  ;;  %v3202_v21 = vld [vmem:[%s4161_s5 + $0x60] ss:$12 sps:$4 sm:$0xff]   ;;  %v3203_v22 = vld [vmem:[%s4161_s5 + $0x68] ss:$12 sps:$4 sm:$0xff]   ;;  %3001 = vmatprep.mubr.msk.bf16.mxu1 %vm3416_vm0, %v3414_v4  ;;  %v3210_v28 = vld [vmem:[%s4161_s5 + $0x30] ss:$12 sps:$4 sm:$0xff]  }
  0x20   : > { %953 = vmatpush1.bf16.msra.mxu0 %v3194_v15  ;;  %2988 = vmatpush3.bf16.msra.mxu1 %v3195_v16  ;;  %v3204_v23 = vld [vmem:[%s4161_s5 + $0x4c] ss:$12 sps:$4 sm:$0xff]   ;;  %v3206_v24 = vld [vmem:[%s4161_s5 + $0x48] ss:$12 sps:$4 sm:$0xff]   ;;  %v3216_v33 = vld [vmem:[%s4161_s5 + $0x4] ss:$12 sps:$4 sm:$0xff]  }
  0x21   : > { %2989 = vmatprep.subr.bf16.mxu1 %v3414_v4  ;;  %954 = vmatprep.subr.bf16.mxu0 %v3196_v17  ;;  %v3208_v26 = vld [vmem:[%s4161_s5 + $0x34] ss:$12 sps:$4 sm:$0xff]   ;;  %v3211_v29 = vld [vmem:[%s4161_s5 + $0x38] ss:$12 sps:$4 sm:$0xff]   ;;  %v3212_v30 = vld [vmem:[%s4161_s5 + $0x1c] ss:$12 sps:$4 sm:$0xff]  }
  0x22   : > { %3186 = vset.pattern.permute.xlu1 %v3415_v27  ;;  %v3214_v31 = vld [vmem:[%s4161_s5 + $0x18] ss:$12 sps:$4 sm:$0xff]   ;;  %v3215_v32 = vld [vmem:[%s4161_s5 + $0x20] ss:$12 sps:$4 sm:$0xff]   ;;  %v3219_v35 = vld [vmem:[%s4161_s5 + $0x8] ss:$12 sps:$4 sm:$0xff]  }
  0x23   : > { %752 = vadd.xlane.f32.xlu0 %v3569_v1  ;;  %v3218_v34 = vld [vmem:[%s4161_s5] ss:$12 sps:$4 sm:$0xff]   ;;  %vm1095_vm2 = vcmask 130048   ;;  %s3418_s17 = smov 64   ;;  %vm2502_vm3 = vcmask 122880  }
  0x24   : > { %955 = vmatpush1.bf16.msra.mxu0 %v3198_v18  ;;  %2990 = vmatpush3.bf16.msra.mxu1 %v3199_v19  ;;  %v2804_v44 = vld [vmem:[%s4159_s3] ss:$0 sm:$0xff] }
  0x25   : > { %2991 = vmatprep.subr.bf16.mxu1 %v3414_v4  ;;  %956 = vmatprep.subr.bf16.mxu0 %v3200_v20  ;;  %v2805_v48 = vld [vmem:[%s4160_s4] ss:$0 sm:$0xff] }
  0x28   : > { %957 = vmatpush1.bf16.msra.mxu0 %v3202_v21  ;;  %2992 = vmatpush3.bf16.msra.mxu1 %v3203_v22 }
  0x29   : > { %958 = vmatprep.subr.bf16.mxu0 %v3204_v23  ;;  %2993 = vmatprep.subr.bf16.mxu1 %v3414_v4 }
  0x2c   : > { %959 = vmatpush1.bf16.msra.mxu0 %v3206_v24  ;;  %2994 = vmatpush3.bf16.msra.mxu1 %v3207_v25 }
  0x2d   : > { %960 = vmatprep.subr.bf16.mxu0 %v3208_v26  ;;  %2995 = vmatprep.subr.bf16.mxu1 %v3414_v4 }
  0x30   : > { %961 = vmatpush1.bf16.msra.mxu0 %v3210_v28  ;;  %2996 = vmatpush3.bf16.msra.mxu1 %v3211_v29 }
  0x31   : > { %962 = vmatprep.subr.bf16.mxu0 %v3212_v30  ;;  %2997 = vmatprep.subr.bf16.mxu1 %v3414_v4 }
  0x34   : > { %963 = vmatpush1.bf16.msra.mxu0 %v3214_v31  ;;  %2998 = vmatpush3.bf16.msra.mxu1 %v3215_v32 }
  0x35   : > { %964 = vmatprep.subr.bf16.mxu0 %v3216_v33  ;;  %2999 = vmatprep.subr.bf16.mxu1 %v3414_v4 }
  0x38   : > { %965 = vmatpush1.bf16.msra.mxu0 %v3218_v34  ;;  %3000 = vmatpush3.bf16.msra.mxu1 %v3219_v35 }
  0x39   : > { %3011 = vmatprep.subr.bf16.mxu1 %v3414_v4  ;;  %3005 = vmatprep.subr.bf16.mxu0 %v3414_v4 }
  0xa8   : > { %v751_v6 = vpop.xlane.xlu0 %750 }
  0xa9   : > { %v755_v7 = vmul.f32 0.0078125, %v751_v6 }
  0xab   : > { %v3585_v8 = vsub.f32 %v3567_v0, %v755_v7  ;;  %v1088_v7 = vlaneseq }
  0xac   : > { %v753_v9 = vpop.xlane.xlu0 %752 }
  0xad   : > { %v756_v10 = vmul.f32 0.0078125, %v753_v9  ;;  %v759_v11 = vmul.f32 %v3585_v8, %v3585_v8 }
  0xaf   : > { %v3590_v12 = vsub.f32 %v3569_v1, %v756_v10  ;;  %761 = vadd.xlane.f32.xlu1 %v759_v11  ;;  %v3710_v10 = vshrl.u32 %v1088_v7, 7 }
  0xb1   : > { %v760_v13 = vmul.f32 %v3590_v12, %v3590_v12 }
  0xb3   : > { %763 = vadd.xlane.f32.xlu1 %v760_v13 }
 0x138   : > { %v762_v36 = vpop.xlane.xlu1 %761 }
 0x139   : > { %v765_v37 = vmul.f32 0.0078125, %v762_v36 }
 0x13b   : > { %v767_v38 = vadd.f32 1e-06, %v765_v37 }
 0x13c   : > { %v764_v39 = vpop.xlane.xlu1 %763 }
 0x13d   : > { %3284 = vrsqrt.f32 %v767_v38  ;;  %v766_v40 = vmul.f32 0.0078125, %v764_v39 }
 0x13f   : > { %v768_v41 = vadd.f32 1e-06, %v766_v40 }
 0x141   : > { %3286 = vrsqrt.f32 %v768_v41 }
 0x14a   : > { %v3285_v42 = vpop.eup %3284 }
 0x14b   : > { %v771_v43 = vmul.f32 %v3285_v42, %v3585_v8  ;;  %v743_v8 = vld [vmem:[%s679_s20] sm:$0x1]  ;;  %s4190_s20 = sand.u32 1, %s3396_s19  }
 0x14c   : > { %v2803_v9 = vadd.f32 -1.0, %v743_v8  ;;  %s2510_s26 = scalar_lea.sflag [#allocation3], %s4190_s20 }
 0x14d   : > { %v779_v47 = vmul.f32 %v2804_v44, %v771_v43 }
 0x14e   : > { %v3287_v45 = vpop.eup %3286  ;;  %v747_v11 = vmul.f32 1e+09, %v2803_v9 }
 0x14f   : > { %v772_v46 = vmul.f32 %v3287_v45, %v3590_v12  ;;  %v787_v50 = vadd.f32 %v2805_v48, %v779_v47  ;;  %v1090_v12 = vsub.s32 0, %v3710_v10 }
 0x151   : > { %v780_v49 = vmul.f32 %v2804_v44, %v772_v46  ;;  %v3715_v13 = vrot.slane %v747_v11, %v1090_v12 }
 0x153   : > { %v788_v51 = vadd.f32 %v2805_v48, %v780_v49 }
 0x155   : > { %v789_v52 = vpack.c.bf16 %v788_v51, %v787_v50 }
 0x157   : > { %983 = vmatmul.mubr.bf16.vlgmr.msra.gmra.mxu0 %v789_v52  ;;  %3002 = vmatmul.mubr.bf16.vlgmr.msra.gmra.mxu1 %v789_v52 }
 0x158   : > { %3007 = vmatprep.mubr.msk.bf16.mxu0 %vm3416_vm0, %v3414_v4  ;;  %3013 = vmatprep.mubr.msk.bf16.mxu1 %vm3416_vm0, %v3414_v4 }
 0x217   : > { %v984_v53 = vpop.f32.mrf.mxu0  ;;  %v1027_v54 = vpop.f32.mrf.mxu1 }
 0x219   : > { %v986_v55 = vpop.f32.mrf.mxu0  ;;  %v3003_v56 = vpop.f32.mrf.mxu1 }
 0x21b   : > { %v988_v57 = vpop.f32.mrf.mxu0  ;;  %v1030_v58 = vpop.f32.mrf.mxu1 }
 0x21c   : > { %v3682_v59 = vpack.c.bf16 %v988_v57, %v984_v53  ;;  %v3684_v60 = vpack.c.bf16 %v1030_v58, %v1027_v54 }
 0x21d   : > { %v990_v61 = vpop.f32.mrf.mxu0  ;;  %v3004_v62 = vpop.f32.mrf.mxu1 }
 0x21e   : > { %v3686_v63 = vpack.c.bf16 %v990_v61, %v986_v55  ;;  %3012 = vmatpush3.bf16.msra.mxu1 %v3684_v60  ;;  %1191 = vrot.lane.b32.xlu1 %v3682_v59, %s3417_s29 }
 0x21f   : > { %3023 = vmatprep.subr.bf16.mxu1 %v3414_v4 }
 0x220   : > { %1194 = vrot.lane.b32.xlu0 %v3686_v63, %s3417_s29  ;;  %v1042_v2 = vsel %vm1037_vm1, %v3686_v63, 0 }
 0x221   : > { %3006 = vmatpush3.bf16.xpose.msra.mxu0 %v1042_v2 }
 0x222   : > { %3017 = vmatprep.subr.bf16.mxu0 %v3414_v4 }
 0x228   : > { %3008 = vmatmul.mubr.msk.bf16.vlgmr.msra.gmra.mxu0 %vm1037_vm1, %v3682_v59 }
 0x229   : > { %3019 = vmatprep.mubr.msk.bf16.mxu0 %vm3416_vm0, %v3414_v4 }
 0x290   : > { %v1192_v6 = vpop.permute.xlu1 %1191 }
 0x292   : > { %v1195_v3 = vpop.permute.xlu0 %1194 }
 0x293   : > { %v1200_v5 = vsel %vm1037_vm1, %v1195_v3, 0  ;;  %v3222_v3 = vld [vmem:[%s4162_s6 + $0x18] sm:$0xff]  }
 0x294   : > { %3018 = vmatpush3.bf16.xpose.msra.mxu0 %v1200_v5 }
 0x295   : > { %3029 = vmatprep.subr.bf16.mxu0 %v3414_v4 }
 0x29b   : > { %3020 = vmatmul.mubr.msk.bf16.vlgmr.msra.gmra.mxu0 %vm1037_vm1, %v1192_v6 }
 0x29c   : > { %3033 = vmatprep.mubr.msk.bf16.mxu0 %vm3416_vm0, %v3414_v4  ;;  %3030 = vmatpush3.bf16.msra.mxu0 %v3222_v3 }
 0x29d   : > { %3031 = vmatprep.subr.bf16.mxu0 %v3414_v4 }
 0x2e8   : > { %v1078_v14 = vpop.f32.mrf.mxu0 }
 0x2e9   : > { %v1085_v15 = vmul.f32 0.17677669, %v1078_v14 }
 0x2ea   : > { %v3009_v16 = vpop.f32.mrf.mxu0 }
 0x2eb   : > { %v1093_v17 = vadd.f32 %v3715_v13, %v1085_v15  ;;  %v3220_v15 = vld [vmem:[%s4162_s6 + $0x8] sm:$0xff]  }
 0x2ec   : > { %v1081_v18 = vpop.f32.mrf.mxu0 }
 0x2ed   : > { %v1086_v19 = vmul.f32 0.17677669, %v1081_v18  ;;  %v1096_v20 = vsel %vm1095_vm2, %v1093_v17, -inf  ;;  %v3223_v18 = vld [vmem:[%s4162_s6 + $0x10] sm:$0xff]  }
 0x2ee   : > { %1097 = vmax.xlane.f32.xlu1 %v1096_v20  ;;  %v3010_v21 = vpop.f32.mrf.mxu0  ;;  %3032 = vmatpush3.bf16.msra.mxu0 %v3223_v18 }
 0x2ef   : > { %v1094_v22 = vadd.f32 %v3715_v13, %v1086_v19  ;;  %3045 = vmatprep.subr.bf16.mxu0 %v3414_v4 }
 0x2f1   : > { %v1099_v23 = vsel %vm1095_vm2, %v1094_v22, -inf }
 0x2f2   : > { %1100 = vmax.xlane.f32.xlu0 %v1099_v23 }
 0x35b   : > { %v1236_v24 = vpop.f32.mrf.mxu0 }
 0x35c   : > { %v1243_v25 = vmul.f32 0.17677669, %v1236_v24 }
 0x35d   : > { %v3021_v26 = vpop.f32.mrf.mxu0 }
 0x35e   : > { %v1245_v28 = vadd.f32 %v1243_v25, %v3715_v13 }
 0x35f   : > { %v1239_v29 = vpop.f32.mrf.mxu0 }
 0x360   : > { %v1244_v30 = vmul.f32 0.17677669, %v1239_v29  ;;  %v1247_v31 = vsel %vm1095_vm2, %v1245_v28, -inf }
 0x361   : > { %1248 = vmax.xlane.f32.xlu0 %v1247_v31  ;;  %v3022_v32 = vpop.f32.mrf.mxu0 }
 0x362   : > { %v1246_v33 = vadd.f32 %v1244_v30, %v3715_v13 }
 0x364   : > { %v1250_v34 = vsel %vm1095_vm2, %v1246_v33, -inf }
 0x365   : > { %1251 = vmax.xlane.f32.xlu1 %v1250_v34 }
 0x377   : > { %v1098_v35 = vpop.xlane.xlu1 %1097 }
 0x378   : > { %v1102_v36 = vsub.f32 %v1093_v17, %v1098_v35  ;;  %v3221_v17 = vld [vmem:[%s4162_s6] sm:$0xff]  }
 0x37a   : > { %v1104_v37 = vmul.f32 1.442695, %v1102_v36 }
 0x37b   : > { %v1101_v38 = vpop.xlane.xlu0 %1100 }
 0x37c   : > { %3288 = vpow2.f32 %v1104_v37  ;;  %v1103_v39 = vsub.f32 %v1094_v22, %v1101_v38 }
 0x37e   : > { %v1106_v40 = vmul.f32 1.442695, %v1103_v39 }
 0x380   : > { %3290 = vpow2.f32 %v1106_v40 }
 0x389   : > { %v3289_v41 = vpop.eup %3288 }
 0x38a   : > { %v1108_v42 = vsel %vm1095_vm2, %v3289_v41, 0.0 }
 0x38b   : > { %1109 = vadd.xlane.f32.xlu0 %v1108_v42 }
 0x38d   : > { %v3291_v43 = vpop.eup %3290 }
 0x38e   : > { %v1111_v44 = vsel %vm1095_vm2, %v3291_v43, 0.0 }
 0x38f   : > { %1112 = vadd.xlane.f32.xlu1 %v1111_v44 }
 0x3ea   : > { %v1249_v45 = vpop.xlane.xlu0 %1248 }
 0x3eb   : > { %v1253_v46 = vsub.f32 %v1245_v28, %v1249_v45 }
 0x3ed   : > { %v1255_v47 = vmul.f32 1.442695, %v1253_v46 }
 0x3ee   : > { %v1252_v48 = vpop.xlane.xlu1 %1251 }
 0x3ef   : > { %3292 = vpow2.f32 %v1255_v47  ;;  %v1254_v49 = vsub.f32 %v1246_v33, %v1252_v48 }
 0x3f1   : > { %v1257_v50 = vmul.f32 1.442695, %v1254_v49 }
 0x3f3   : > { %3294 = vpow2.f32 %v1257_v50 }
 0x3fc   : > { %v3293_v51 = vpop.eup %3292 }
 0x3fd   : > { %v1259_v52 = vsel %vm1095_vm2, %v3293_v51, 0.0 }
 0x3fe   : > { %1260 = vadd.xlane.f32.xlu0 %v1259_v52 }
 0x400   : > { %v3295_v53 = vpop.eup %3294 }
 0x401   : > { %v1262_v54 = vsel %vm1095_vm2, %v3295_v53, 0.0 }
 0x402   : > { %1263 = vadd.xlane.f32.xlu1 %v1262_v54 }
 0x413   : > { %1449 = vrot.lane.b32.xlu1 %v3686_v63, %s3418_s17 }
 0x414   : > { %1283 = vrot.lane.b32.xlu0 %v3684_v60, %s3417_s29  ;;  %v1110_v55 = vpop.xlane.xlu0 %1109 }
 0x415   : > { %3296 = vrcp.f32 %v1110_v55 }
 0x417   : > { %1447 = vrot.lane.b32.xlu1 %v3682_v59, %s3418_s17 }
 0x418   : > { %v1113_v56 = vpop.xlane.xlu1 %1112 }
 0x419   : > { %3298 = vrcp.f32 %v1113_v56 }
 0x422   : > { %v3297_v57 = vpop.eup %3296 }
 0x423   : > { %v3735_v61 = vmul.f32 %v3297_v57, %v3289_v41 }
 0x426   : > { %v3299_v58 = vpop.eup %3298 }
 0x427   : > { %v3737_v62 = vmul.f32 %v3299_v58, %v3291_v43 }
 0x429   : > { %v1140_v2 = vpack.c.bf16 %v3737_v62, %v3735_v61 }
 0x42b   : > { %3014 = vmatmul.mubr.msk.bf16.vlgmr.msra.gmra.mxu1 %vm1095_vm2, %v1140_v2 }
 0x42c   : > { %3025 = vmatprep.mubr.msk.bf16.mxu1 %vm3416_vm0, %v3414_v4 }
 0x487   : > { %v1261_v5 = vpop.xlane.xlu0 %1260 }
 0x488   : > { %3300 = vrcp.f32 %v1261_v5 }
 0x48b   : > { %v1284_v6 = vpop.permute.xlu0 %1283  ;;  %v1264_v7 = vpop.xlane.xlu1 %1263 }
 0x48c   : > { %3302 = vrcp.f32 %v1264_v7  ;;  %3024 = vmatpush3.bf16.msra.mxu1 %v1284_v6 }
 0x48d   : > { %3037 = vmatprep.subr.bf16.mxu1 %v3414_v4 }
 0x48f   : > { %v1450_v26 = vpop.permute.xlu1 %1449 }
 0x490   : > { %v1455_v31 = vsel %vm1037_vm1, %v1450_v26, 0 }
 0x493   : > { %v1448_v32 = vpop.permute.xlu1 %1447 }
 0x495   : > { %v3301_v8 = vpop.eup %3300 }
 0x496   : > { %v3749_v11 = vmul.f32 %v3301_v8, %v3293_v51 }
 0x499   : > { %v3303_v9 = vpop.eup %3302 }
 0x49a   : > { %v3751_v14 = vmul.f32 %v3303_v9, %v3295_v53 }
 0x49c   : > { %v1281_v16 = vpack.c.bf16 %v3751_v14, %v3749_v11 }
 0x49e   : > { %3026 = vmatmul.mubr.msk.bf16.vlgmr.msra.gmra.mxu1 %vm1095_vm2, %v1281_v16 }
 0x49f   : > { %3038 = vmatpush3.bf16.msra.mxu1 %v3220_v15  ;;  %3041 = vmatprep.mubr.msk.bf16.mxu1 %vm3416_vm0, %v3414_v4 }
 0x4a0   : > { %3039 = vmatprep.subr.bf16.mxu1 %v3414_v4 }
 0x4a3   : > { %3040 = vmatpush3.bf16.msra.mxu1 %v3221_v17 }
 0x4a4   : > { %3051 = vmatprep.subr.bf16.mxu1 %v3414_v4 }
 0x4eb   : > { %v1178_v19 = vpop.f32.mrf.mxu1 }
 0x4ed   : > { %v3015_v20 = vpop.f32.mrf.mxu1 }
 0x4ee   : > { %v3225_v20 = vld [vmem:[%s4162_s6 + $0x20] sm:$0xff]  }
 0x4ef   : > { %v1181_v21 = vpop.f32.mrf.mxu1 }
 0x4f0   : > { %v1185_v22 = vpack.c.bf16 %v1181_v21, %v1178_v19  ;;  %v3224_v19 = vld [vmem:[%s4162_s6 + $0x28] sm:$0xff]  }
 0x4f1   : > { %v3016_v23 = vpop.f32.mrf.mxu1 }
 0x4f2   : > { %3042 = vmatmul.mubr.msk.bf16.vlgmr.msra.gmra.mxu1 %vm1037_vm1, %v1185_v22 }
 0x4f3   : > { %3053 = vmatprep.mubr.msk.bf16.mxu1 %vm3416_vm0, %v3414_v4 }
 0x55e   : > { %v1323_v24 = vpop.f32.mrf.mxu1 }
 0x560   : > { %v3027_v25 = vpop.f32.mrf.mxu1 }
 0x562   : > { %v1326_v28 = vpop.f32.mrf.mxu1 }
 0x563   : > { %v1330_v29 = vpack.c.bf16 %v1326_v28, %v1323_v24 }
 0x564   : > { %v3028_v30 = vpop.f32.mrf.mxu1 }
 0x565   : > { %3034 = vmatmul.mubr.msk.bf16.vlgmr.msra.gmra.mxu0 %vm1037_vm1, %v1330_v29 }
 0x566   : > { %3046 = vmatpush3.bf16.xpose.msra.mxu0 %v1455_v31  ;;  %3047 = vmatprep.mubr.msk.bf16.mxu0 %vm3416_vm0, %v3414_v4 }
 0x567   : > { %3057 = vmatprep.subr.bf16.mxu0 %v3414_v4 }
 0x56d   : > { %3048 = vmatmul.mubr.msk.bf16.vlgmr.msra.gmra.mxu0 %vm1037_vm1, %v1448_v32 }
 0x56e   : > { %3061 = vmatprep.mubr.msk.bf16.mxu0 %vm3416_vm0, %v3414_v4  ;;  %3058 = vmatpush3.bf16.msra.mxu0 %v3224_v19 }
 0x56f   : > { %3059 = vmatprep.subr.bf16.mxu0 %v3414_v4 }
 0x572   : > { %3060 = vmatpush3.bf16.msra.mxu0 %v3225_v20  ;;  %v2850_v20 = vld [vmem:[%s4163_s7] ss:$0 sm:$0xff] }
 0x573   : > { %3071 = vmatprep.subr.bf16.mxu0 %v3414_v4 }
 0x5b2   : > { %v3781_v33 = vpop.f32.mrf.mxu1 }
 0x5b4   : > { %v3043_v34 = vpop.f32.mrf.mxu1 }
 0x5b6   : > { %v3783_v35 = vpop.f32.mrf.mxu1 }
 0x5b8   : > { %v3044_v36 = vpop.f32.mrf.mxu1 }
 0x625   : > { %v3785_v37 = vpop.f32.mrf.mxu0 }
 0x627   : > { %v3035_v38 = vpop.f32.mrf.mxu0 }
 0x629   : > { %v3787_v39 = vpop.f32.mrf.mxu0 }
 0x62b   : > { %v3036_v40 = vpop.f32.mrf.mxu0 }
 0x62d   : > { %v1491_v41 = vpop.f32.mrf.mxu0 }
 0x62e   : > { %v1498_v42 = vmul.f32 0.17677669, %v1491_v41 }
 0x62f   : > { %v3049_v43 = vpop.f32.mrf.mxu0 }
 0x630   : > { %v1500_v44 = vadd.f32 %v1498_v42, %v3715_v13 }
 0x631   : > { %v1494_v45 = vpop.f32.mrf.mxu0 }
 0x632   : > { %v1499_v46 = vmul.f32 0.17677669, %v1494_v45  ;;  %v1502_v47 = vsel %vm1095_vm2, %v1500_v44, -inf }
 0x633   : > { %1503 = vmax.xlane.f32.xlu1 %v1502_v47  ;;  %v3050_v48 = vpop.f32.mrf.mxu0 }
 0x634   : > { %v1501_v49 = vadd.f32 %v1499_v46, %v3715_v13 }
 0x636   : > { %v1505_v50 = vsel %vm1095_vm2, %v1501_v49, -inf }
 0x637   : > { %1506 = vmax.xlane.f32.xlu0 %v1505_v50 }
 0x644   : > { %1537 = vrot.lane.b32.xlu1 %v3684_v60, %s3418_s17  ;;  %s4177_s17 = sand.u32 1, %s3396_s19  }
 0x645   : > { %s3996_s22 = scalar_lea.vmem [#allocation2], %s4177_s17  ;;  %s2902_s17 = sshll.u32 %s3404_s21, 4 }
 0x646   : > { %s2525_s25 = sshll.u32 %s3996_s22, 4  ;;  %s2526_s25 = int_to_ptr.vmem [resolvable:$true] %s2525_s25 }
 0x647   : > { %s3336_s16 = scalar_lea.vmem %s2526_s25, 16 }
 0x648   : > { %1647 = vrot.lane.b32.xlu1 %v3682_v59, %s3419_s18  ;;  %p3337_p12 = scmp.ne.s32.totalorder %s2526_s25, %s3336_s16 }
 0x64a   : > { %p3338_p13 = pnand %p3337_p12, %p3541_p4 }
 0x64c   : > { %p3339_p0 = pneg %p3338_p13 }
 0x6bc   : > { %v1504_v51 = vpop.xlane.xlu1 %1503 }
 0x6bd   : > { %v1508_v52 = vsub.f32 %v1500_v44, %v1504_v51  ;;  %v1441_v51 = vadd.f32 %v3781_v33, %v3785_v37 }
 0x6bf   : > { %v1510_v53 = vmul.f32 1.442695, %v1508_v52 }
 0x6c0   : > { %v1538_v54 = vpop.permute.xlu1 %1537  ;;  %v1507_v55 = vpop.xlane.xlu0 %1506 }
 0x6c1   : > { %3304 = vpow2.f32 %v1510_v53  ;;  %v1509_v56 = vsub.f32 %v1501_v49, %v1507_v55  ;;  %3052 = vmatpush3.bf16.msra.mxu1 %v1538_v54  ;;  %v1444_v55 = vadd.f32 %v3783_v35, %v3787_v39  ;;  %v3226_v35 = vld [vmem:[%s4162_s6 + $0x38] sm:$0xff]   ;;  %v3227_v39 = vld [vmem:[%s4162_s6 + $0x30] sm:$0xff]  }
 0x6c2   : > { %3065 = vmatprep.subr.bf16.mxu1 %v3414_v4 }
 0x6c3   : > { %v1512_v57 = vmul.f32 1.442695, %v1509_v56 }
 0x6c5   : > { %3306 = vpow2.f32 %v1512_v57 }
 0x6ce   : > { %v3305_v58 = vpop.eup %3304 }
 0x6cf   : > { %v1514_v2 = vsel %vm1095_vm2, %v3305_v58, 0.0 }
 0x6d0   : > { %1515 = vadd.xlane.f32.xlu0 %v1514_v2 }
 0x6d2   : > { %v3307_v3 = vpop.eup %3306 }
 0x6d3   : > { %v1517_v5 = vsel %vm1095_vm2, %v3307_v3, 0.0 }
 0x6d4   : > { %1518 = vadd.xlane.f32.xlu0 %v1517_v5 }
 0x6ea   : > { %1649 = vrot.lane.b32.xlu0 %v3686_v63, %s3419_s18  ;;  %v1648_v63 = vpop.permute.xlu1 %1647 }
 0x759   : > { %v1516_v59 = vpop.xlane.xlu0 %1515 }
 0x75a   : > { %3308 = vrcp.f32 %v1516_v59 }
 0x75d   : > { %v1519_v6 = vpop.xlane.xlu0 %1518 }
 0x75e   : > { %3310 = vrcp.f32 %v1519_v6 }
 0x761   : > { %v1650_v16 = vpop.permute.xlu0 %1649 }
 0x762   : > { %v1655_v18 = vsel %vm1037_vm1, %v1650_v16, 0 }
 0x767   : > { %v3309_v7 = vpop.eup %3308 }
 0x768   : > { %v3802_v9 = vmul.f32 %v3309_v7, %v3305_v58 }
 0x76b   : > { %v3311_v8 = vpop.eup %3310 }
 0x76c   : > { %v3804_v15 = vmul.f32 %v3311_v8, %v3307_v3 }
 0x76e   : > { %v1536_v17 = vpack.c.bf16 %v3804_v15, %v3802_v9 }
 0x770   : > { %3054 = vmatmul.mubr.msk.bf16.vlgmr.msra.gmra.mxu1 %vm1095_vm2, %v1536_v17 }
 0x771   : > { %3066 = vmatpush3.bf16.xpose.msra.mxu1 %v1655_v18  ;;  %3067 = vmatprep.mubr.msk.bf16.mxu1 %vm3416_vm0, %v3414_v4 }
 0x772   : > { %3077 = vmatprep.subr.bf16.mxu1 %v3414_v4 }
 0x778   : > { %3068 = vmatmul.mubr.msk.bf16.vlgmr.msra.gmra.mxu1 %vm1037_vm1, %v1648_v63 }
 0x779   : > { %3081 = vmatprep.mubr.msk.bf16.mxu1 %vm3416_vm0, %v3414_v4  ;;  %3078 = vmatpush3.bf16.msra.mxu1 %v3226_v35 }
 0x77a   : > { %3079 = vmatprep.subr.bf16.mxu1 %v3414_v4 }
 0x77d   : > { %3080 = vmatpush3.bf16.msra.mxu1 %v3227_v39 }
 0x77e   : > { %3085 = vmatprep.subr.bf16.mxu1 %v3414_v4 }
 0x830   : > { %v1577_v21 = vpop.f32.mrf.mxu1 }
 0x832   : > { %v3055_v22 = vpop.f32.mrf.mxu1 }
 0x834   : > { %v1580_v23 = vpop.f32.mrf.mxu1 }
 0x835   : > { %v1584_v24 = vpack.c.bf16 %v1580_v23, %v1577_v21 }
 0x836   : > { %v3056_v25 = vpop.f32.mrf.mxu1 }
 0x837   : > { %3062 = vmatmul.mubr.msk.bf16.vlgmr.msra.gmra.mxu0 %vm1037_vm1, %v1584_v24 }
 0x838   : > { %v1691_v26 = vpop.f32.mrf.mxu1  ;;  %3073 = vmatprep.mubr.msk.bf16.mxu0 %vm3416_vm0, %v3414_v4 }
 0x839   : > { %v1698_v28 = vmul.f32 0.17677669, %v1691_v26 }
 0x83a   : > { %v3069_v29 = vpop.f32.mrf.mxu1 }
 0x83b   : > { %v1700_v30 = vadd.f32 %v1698_v28, %v3715_v13  ;;  %v3228_v29 = vld [vmem:[%s4166_s10 + $0xa8] ss:$12 sps:$4 sm:$0xff]  }
 0x83c   : > { %v1694_v31 = vpop.f32.mrf.mxu1 }
 0x83d   : > { %v1699_v32 = vmul.f32 0.17677669, %v1694_v31  ;;  %v1702_v34 = vsel %vm1095_vm2, %v1700_v30, -inf }
 0x83e   : > { %1703 = vmax.xlane.f32.xlu1 %v1702_v34  ;;  %v3070_v36 = vpop.f32.mrf.mxu1 }
 0x83f   : > { %v1701_v38 = vadd.f32 %v1699_v32, %v3715_v13  ;;  %v745_v13 = vld [vmem:[%s3837_s0 + $0x8] sm:$0xff] }
 0x841   : > { %v1705_v40 = vsel %vm1095_vm2, %v1701_v38, -inf }
 0x842   : > { %1706 = vmax.xlane.f32.xlu0 %v1705_v40 }
 0x8c7   : > { %v1704_v41 = vpop.xlane.xlu1 %1703 }
 0x8c8   : > { %v1708_v42 = vsub.f32 %v1700_v30, %v1704_v41  ;;  %v3231_v30 = vld [vmem:[%s4166_s10 + $0xb0] ss:$12 sps:$4 sm:$0xff]  }
 0x8ca   : > { %v1710_v43 = vmul.f32 1.442695, %v1708_v42  ;;  %v3234_v42 = vld [vmem:[%s4166_s10 + $0x94] ss:$12 sps:$4 sm:$0xff]  }
 0x8cb   : > { %v1707_v44 = vpop.xlane.xlu0 %1706 }
 0x8cc   : > { %3312 = vpow2.f32 %v1710_v43  ;;  %v1709_v45 = vsub.f32 %v1701_v38, %v1707_v44  ;;  %v3232_v43 = vld [vmem:[%s4166_s10 + $0x90] ss:$12 sps:$4 sm:$0xff]   ;;  %v3235_v44 = vld [vmem:[%s4166_s10 + $0x98] ss:$12 sps:$4 sm:$0xff]  }
 0x8ce   : > { %v1712_v46 = vmul.f32 1.442695, %v1709_v45  ;;  %v3238_v45 = vld [vmem:[%s4166_s10 + $0x7c] ss:$12 sps:$4 sm:$0xff]  }
 0x8d0   : > { %3314 = vpow2.f32 %v1712_v46  ;;  %v3236_v46 = vld [vmem:[%s4166_s10 + $0x78] ss:$12 sps:$4 sm:$0xff]  }
 0x8d9   : > { %v3313_v47 = vpop.eup %3312 }
 0x8da   : > { %v1714_v48 = vsel %vm1095_vm2, %v3313_v47, 0.0 }
 0x8db   : > { %1715 = vadd.xlane.f32.xlu0 %v1714_v48  ;;  %v744_v48 = vld [vmem:[%s3837_s0] sm:$0xff]  ;;  %s3340_s0 = sshll.u32 %s3420_s27, 4  ;;  %s3341_s0 = int_to_ptr.vmem [resolvable:$false] %s3340_s0 }
 0x8dc   : > { %s3342_s1 = scalar_lea.vmem %s3341_s0, 32  ;;  %p3343_p1 = scmp.lt.s32.totalorder %s2526_s25, %s3341_s0 }
 0x8dd   : > { %v3315_v49 = vpop.eup %3314  ;;  %p3344_p2 = scmp.lt.s32.totalorder %s3342_s1, %s3336_s16 }
 0x8de   : > { %v1717_v50 = vsel %vm1095_vm2, %v3315_v49, 0.0 }
 0x8df   : > { %1718 = vadd.xlane.f32.xlu1 %v1717_v50  ;;  %v3240_v50 = vld [vmem:[%s4166_s10 + $0x60] ss:$12 sps:$4 sm:$0xff]   ;;  %p3345_p3 = por %p3344_p2, %p3343_p1 }
 0x8e1   : > { %p3346_p5 = pnand %p3345_p3, %p3339_p0 }
 0x8f1   : > { %1737 = vrot.lane.b32.xlu0 %v3684_v60, %s3419_s18  ;;  %s2523_s18 = scalar_lea.hbm %s4171_s15, %s2902_s17 }
 0x8f5   : > { %1125 = vperm.xlu0 %3187, %v745_v13   ;;  %v3243_v13 = vld [vmem:[%s4166_s10 + $0x68] ss:$12 sps:$4 sm:$0xff]  }
 0x8f7   : > { %v1638_v52 = vpop.f32.mrf.mxu0 }
 0x8f8   : > { %v1645_v53 = vadd.f32 %v1638_v52, %v1441_v51  ;;  %v3246_v51 = vld [vmem:[%s4166_s10 + $0x4c] ss:$12 sps:$4 sm:$0xff]   ;;  %v3244_v52 = vld [vmem:[%s4166_s10 + $0x48] ss:$12 sps:$4 sm:$0xff]  }
 0x8f9   : > { %v3063_v54 = vpop.f32.mrf.mxu0 }
 0x8fa   : > { %v3250_v54 = vld [vmem:[%s4166_s10 + $0x34] ss:$12 sps:$4 sm:$0xff]  }
 0x8fb   : > { %v1641_v56 = vpop.f32.mrf.mxu0 }
 0x8fc   : > { %v1646_v57 = vadd.f32 %v1641_v56, %v1444_v55  ;;  %v3248_v55 = vld [vmem:[%s4166_s10 + $0x30] ss:$12 sps:$4 sm:$0xff]   ;;  %v3251_v56 = vld [vmem:[%s4166_s10 + $0x38] ss:$12 sps:$4 sm:$0xff]  }
 0x8fd   : > { %v3064_v58 = vpop.f32.mrf.mxu0 }
 0x8fe   : > { %v3252_v58 = vld [vmem:[%s4166_s10 + $0x18] ss:$12 sps:$4 sm:$0xff]  }
 0x964   : > { %v1716_v2 = vpop.xlane.xlu0 %1715 }
 0x965   : > { %3316 = vrcp.f32 %v1716_v2  ;;  %v3255_v2 = vld [vmem:[%s4166_s10 + $0x20] ss:$12 sps:$4 sm:$0xff]  }
 0x968   : > { %v1719_v3 = vpop.xlane.xlu1 %1718  ;;  %v1738_v5 = vpop.permute.xlu0 %1737 }
 0x969   : > { %3318 = vrcp.f32 %v1719_v3  ;;  %3072 = vmatpush3.bf16.msra.mxu0 %v1738_v5  ;;  %v3258_v3 = vld [vmem:[%s4166_s10 + $0x4] ss:$12 sps:$4 sm:$0xff]   ;;  %v3256_v5 = vld [vmem:[%s4166_s10] ss:$12 sps:$4 sm:$0xff]  }
 0x970   : > { %v1126_v35 = vpop.permute.xlu0 %1125 }
 0x972   : > { %v3317_v60 = vpop.eup %3316 }
 0x973   : > { %v3846_v6 = vmul.f32 %v3317_v60, %v3313_v47  ;;  %v3239_v47 = vld [vmem:[%s4166_s10 + $0x80] ss:$12 sps:$4 sm:$0xff]   ;;  %v3259_v60 = vld [vmem:[%s4166_s10 + $0x8] ss:$12 sps:$4 sm:$0xff]  }
 0x976   : > { %v3319_v59 = vpop.eup %3318 }
 0x977   : > { %v3848_v33 = vmul.f32 %v3319_v59, %v3315_v49  ;;  %v3242_v49 = vld [vmem:[%s4166_s10 + $0x64] ss:$12 sps:$4 sm:$0xff]  }
 0x979   : > { %v1736_v37 = vpack.c.bf16 %v3848_v33, %v3846_v6 }
 0x97b   : > { %3074 = vmatmul.mubr.msk.bf16.vlgmr.msra.gmra.mxu0 %vm1095_vm2, %v1736_v37 }
 0x97c   : > { %2108 = vmatprep.mubr.bf16.mxu0 %v3415_v27 }
 0xa3b   : > { %v1777_v7 = vpop.f32.mrf.mxu0 }
 0xa3d   : > { %v3075_v8 = vpop.f32.mrf.mxu0 }
 0xa3f   : > { %v1780_v16 = vpop.f32.mrf.mxu0 }
 0xa40   : > { %v1784_v17 = vpack.c.bf16 %v1780_v16, %v1777_v7  ;;  %v1129_v16 = vmul.f32 %v1126_v35, %v3737_v62 }
 0xa41   : > { %v3076_v18 = vpop.f32.mrf.mxu0 }
 0xa42   : > { %3082 = vmatmul.mubr.msk.bf16.vlgmr.msra.gmra.mxu1 %vm1037_vm1, %v1784_v17  ;;  %v1270_v17 = vmul.f32 %v3751_v14, %v1126_v35  ;;  %v1525_v18 = vmul.f32 %v3804_v15, %v1126_v35 }
 0xa43   : > { %3101 = vmatprep.mubr.msk.bf16.mxu1 %vm3416_vm0, %v3414_v4  ;;  %3086 = vmatpush3.bf16.msra.mxu1 %v3231_v30 }
 0xa44   : > { %3087 = vmatprep.subr.bf16.mxu1 %v3414_v4  ;;  %v1527_v62 = vsel %vm1095_vm2, %v1525_v18, 0.0  ;;  %v3261_v18 = vld [vmem:[%s4168_s12 + $0x78] sm:$0xff]  }
 0xa47   : > { %3088 = vmatpush3.bf16.msra.mxu1 %v3235_v44 }
 0xa48   : > { %3089 = vmatprep.subr.bf16.mxu1 %v3414_v4 }
 0xa4b   : > { %3090 = vmatpush3.bf16.msra.mxu1 %v3239_v47 }
 0xa4c   : > { %3091 = vmatprep.subr.bf16.mxu1 %v3414_v4 }
 0xa4f   : > { %3092 = vmatpush3.bf16.msra.mxu1 %v3243_v13 }
 0xa50   : > { %3093 = vmatprep.subr.bf16.mxu1 %v3414_v4 }
 0xb02   : > { %v1838_v27 = vpop.f32.mrf.mxu1 }
 0xb03   : > { %v1845_v63 = vadd.f32 %v1838_v27, %v1645_v53  ;;  %v3247_v53 = vld [vmem:[%s4166_s10 + $0x50] ss:$12 sps:$4 sm:$0xff]   ;;  %v1725_v27 = vmul.f32 %v3848_v33, %v1126_v35 }
 0xb04   : > { %v3083_v19 = vpop.f32.mrf.mxu1  ;;  %3094 = vmatpush3.bf16.msra.mxu1 %v3247_v53 }
 0xb05   : > { %v1847_v21 = vadd.f32 %v1845_v63, %v3567_v0  ;;  %v3230_v0 = vld [vmem:[%s4166_s10 + $0xac] ss:$12 sps:$4 sm:$0xff]   ;;  %3095 = vmatprep.subr.bf16.mxu1 %v3414_v4  ;;  %v1727_v15 = vsel %vm1095_vm2, %v1725_v27, 0.0 }
 0xb06   : > { %v1841_v22 = vpop.f32.mrf.mxu1  ;;  %2076 = vmatprep.subr.bf16.mxu0 %v3230_v0  ;;  %v3262_v27 = vld [vmem:[%s4168_s12 + $0x38] sm:$0xff]  }
 0xb07   : > { %v1846_v23 = vadd.f32 %v1841_v22, %v1646_v57  ;;  %v3869_v24 = vadd.f32 %v2850_v20, %v1847_v21  ;;  %2077 = vmatpush1.bf16.msra.mxu0 %v3228_v29  ;;  %v3254_v57 = vld [vmem:[%s4166_s10 + $0x1c] ss:$12 sps:$4 sm:$0xff]  }
 0xb08   : > { %v3084_v25 = vpop.f32.mrf.mxu1  ;;  %2078 = vmatprep.subr.bf16.mxu0 %v3234_v42  ;;  %3096 = vmatpush3.bf16.msra.mxu1 %v3251_v56 }
 0xb09   : > { %v1848_v26 = vadd.f32 %v1846_v23, %v3569_v1  ;;  %1860 = vadd.xlane.f32.xlu1 %v3869_v24  ;;  %3097 = vmatprep.subr.bf16.mxu1 %v3414_v4  ;;  %v1131_v23 = vsel %vm1095_vm2, %v1129_v16, 0.0  ;;  %v1272_v25 = vsel %vm1095_vm2, %v1270_v17, 0.0  ;;  %v3260_v17 = vld [vmem:[%s4168_s12 + $0xb8] sm:$0xff]  }
 0xb0b   : > { %v3873_v28 = vadd.f32 %v2850_v20, %v1848_v26  ;;  %2079 = vmatpush1.bf16.msra.mxu0 %v3232_v43 }
 0xb0c   : > { %2080 = vmatprep.subr.bf16.mxu0 %v3238_v45  ;;  %3098 = vmatpush3.bf16.msra.mxu1 %v3255_v2 }
 0xb0d   : > { %1862 = vadd.xlane.f32.xlu1 %v3873_v28  ;;  %3099 = vmatprep.subr.bf16.mxu1 %v3414_v4 }
 0xb0f   : > { %2081 = vmatpush1.bf16.msra.mxu0 %v3236_v46 }
 0xb10   : > { %2082 = vmatprep.subr.bf16.mxu0 %v3242_v49  ;;  %3100 = vmatpush3.bf16.msra.mxu1 %v3259_v60 }
 0xb11   : > { %3105 = vmatprep.subr.bf16.mxu1 %v3414_v4 }
 0xb13   : > { %2083 = vmatpush1.bf16.msra.mxu0 %v3240_v50 }
 0xb14   : > { %2084 = vmatprep.subr.bf16.mxu0 %v3246_v51  ;;  %v2851_v51 = vld [vmem:[%s4164_s8] ss:$0 sm:$0xff] }
 0xb17   : > { %2085 = vmatpush1.bf16.msra.mxu0 %v3244_v52 }
 0xb18   : > { %2086 = vmatprep.subr.bf16.mxu0 %v3250_v54 }
 0xb1b   : > { %2087 = vmatpush1.bf16.msra.mxu0 %v3248_v55 }
 0xb1c   : > { %2088 = vmatprep.subr.bf16.mxu0 %v3254_v57 }
 0xb1f   : > { %2089 = vmatpush1.bf16.msra.mxu0 %v3252_v58 }
 0xb20   : > { %2090 = vmatprep.subr.bf16.mxu0 %v3258_v3 }
 0xb23   : > { %2091 = vmatpush1.bf16.msra.mxu0 %v3256_v5 }
 0xb24   : > { %2954 = vmatprep.subr.bf16.mxu0 %v3261_v18 }
 0xb92   : > { %v1861_v1 = vpop.xlane.xlu1 %1860 }
 0xb93   : > { %v1864_v31 = vmul.f32 0.0078125, %v1861_v1 }
 0xb95   : > { %v3887_v32 = vsub.f32 %v3869_v24, %v1864_v31 }
 0xb96   : > { %v1863_v34 = vpop.xlane.xlu1 %1862 }
 0xb97   : > { %v1865_v36 = vmul.f32 0.0078125, %v1863_v34  ;;  %v1868_v38 = vmul.f32 %v3887_v32, %v3887_v32 }
 0xb99   : > { %v3892_v40 = vsub.f32 %v3873_v28, %v1865_v36  ;;  %1870 = vadd.xlane.f32.xlu1 %v1868_v38 }
 0xb9b   : > { %v1869_v41 = vmul.f32 %v3892_v40, %v3892_v40 }
 0xb9d   : > { %1872 = vadd.xlane.f32.xlu1 %v1869_v41 }
 0xbae   : > { %1120 = vperm.xlu1 %3186, %v744_v48  }
 0xc22   : > { %v1871_v59 = vpop.xlane.xlu1 %1870 }
 0xc23   : > { %v1874_v37 = vmul.f32 0.0078125, %v1871_v59 }
 0xc25   : > { %v1876_v39 = vadd.f32 1e-06, %v1874_v37 }
 0xc26   : > { %v1873_v7 = vpop.xlane.xlu1 %1872 }
 0xc27   : > { %3320 = vrsqrt.f32 %v1876_v39  ;;  %v1875_v8 = vmul.f32 0.0078125, %v1873_v7 }
 0xc29   : > { %v1877_v63 = vadd.f32 1e-06, %v1875_v8 }
 0xc2a   : > { %v1121_v19 = vpop.permute.xlu1 %1120 }
 0xc2b   : > { %3322 = vrsqrt.f32 %v1877_v63  ;;  %v1128_v20 = vmul.f32 %v1121_v19, %v3735_v61  ;;  %v1269_v21 = vmul.f32 %v3749_v11, %v1121_v19  ;;  %v1524_v22 = vmul.f32 %v3802_v9, %v1121_v19  ;;  %v3263_v63 = vld [vmem:[%s4168_s12 + $0xb0] sm:$0xff]  }
 0xc2c   : > { %v1724_v14 = vmul.f32 %v3846_v6, %v1121_v19  ;;  %v3264_v19 = vld [vmem:[%s4168_s12 + $0x70] sm:$0xff]  }
 0xc2d   : > { %v1130_v33 = vsel %vm1095_vm2, %v1128_v20, 0.0  ;;  %v1271_v26 = vsel %vm1095_vm2, %v1269_v21, 0.0  ;;  %v1526_v61 = vsel %vm1095_vm2, %v1524_v22, 0.0  ;;  %v3265_v20 = vld [vmem:[%s4168_s12 + $0x30] sm:$0xff]   ;;  %v3266_v21 = vld [vmem:[%s4168_s12 + $0xa8] sm:$0xff]  }
 0xc2e   : > { %v1132_v29 = vadd.f32 %v1131_v23, %v1130_v33  ;;  %v1273_v11 = vadd.f32 %v1272_v25, %v1271_v26  ;;  %v1528_v0 = vadd.f32 %v1527_v62, %v1526_v61  ;;  %v1726_v9 = vsel %vm1095_vm2, %v1724_v14, 0.0  ;;  %v3267_v22 = vld [vmem:[%s4168_s12 + $0x68] sm:$0xff]   ;;  %v3269_v25 = vld [vmem:[%s4168_s12 + $0xa0] sm:$0xff]   ;;  %v3273_v33 = vld [vmem:[%s4168_s12 + $0x58] sm:$0xff]  }
 0xc2f   : > { %v1728_v30 = vadd.f32 %v1727_v15, %v1726_v9  ;;  %v3268_v23 = vld [vmem:[%s4168_s12 + $0x28] sm:$0xff]   ;;  %v3270_v62 = vld [vmem:[%s4168_s12 + $0x60] sm:$0xff]   ;;  %v3272_v15 = vld [vmem:[%s4168_s12 + $0x98] sm:$0xff]  }
 0xc30   : > { %v1133_v1 = vrot.slane %v1132_v29, 4  ;;  %v1274_v31 = vrot.slane %v1273_v11, 4  ;;  %v1529_v34 = vrot.slane %v1528_v0, 4  ;;  %v3271_v14 = vld [vmem:[%s4168_s12 + $0x20] sm:$0xff]   ;;  %v3274_v26 = vld [vmem:[%s4168_s12 + $0x18] sm:$0xff]   ;;  %v3275_v61 = vld [vmem:[%s4168_s12 + $0x90] sm:$0xff]  }
 0xc31   : > { %v1729_v36 = vrot.slane %v1728_v30, 4  ;;  %v3279_v9 = vld [vmem:[%s4168_s12 + $0x48] sm:$0xff]  }
 0xc32   : > { %v1134_v38 = vadd.f32 %v1133_v1, %v1132_v29  ;;  %v1275_v6 = vadd.f32 %v1274_v31, %v1273_v11  ;;  %v1530_v41 = vadd.f32 %v1529_v34, %v1528_v0  ;;  %v3276_v29 = vld [vmem:[%s4168_s12 + $0x50] sm:$0xff]   ;;  %v3278_v0 = vld [vmem:[%s4168_s12 + $0x88] sm:$0xff]   ;;  %v3281_v1 = vld [vmem:[%s4168_s12 + $0x80] sm:$0xff]  }
 0xc33   : > { %v1730_v42 = vadd.f32 %v1729_v36, %v1728_v30  ;;  %v3277_v11 = vld [vmem:[%s4168_s12 + $0x10] sm:$0xff]   ;;  %v3280_v30 = vld [vmem:[%s4168_s12 + $0x8] sm:$0xff]   ;;  %v3282_v31 = vld [vmem:[%s4168_s12 + $0x40] sm:$0xff]   ;;  %v1943_v36 = vsub.s32 2, %v3710_v10 }
 0xc34   : > { %v3321_v43 = vpop.eup %3320  ;;  %v1135_v44 = vrot.slane %v1134_v38, 2  ;;  %v1276_v45 = vrot.slane %v1275_v6, 2  ;;  %v1531_v46 = vrot.slane %v1530_v41, 2  ;;  %v3283_v34 = vld [vmem:[%s4168_s12] sm:$0xff]  }
 0xc35   : > { %v1731_v47 = vrot.slane %v1730_v42, 2  ;;  %v1880_v48 = vmul.f32 %v3321_v43, %v3887_v32  ;;  %v2852_v32 = vld [vmem:[%s4165_s9] ss:$0 sm:$0xff] }
 0xc36   : > { %v1136_v49 = vadd.f32 %v1135_v44, %v1134_v38  ;;  %v1277_v50 = vadd.f32 %v1276_v45, %v1275_v6  ;;  %v1532_v13 = vadd.f32 %v1531_v46, %v1530_v41  ;;  %v1939_v38 = vsub.s32 1, %v3710_v10 }
 0xc37   : > { %v1732_v52 = vadd.f32 %v1731_v47, %v1730_v42  ;;  %v1888_v58 = vmul.f32 %v2851_v51, %v1880_v48 }
 0xc38   : > { %v3323_v53 = vpop.eup %3322  ;;  %v1137_v54 = vrot.slane %v1136_v49, 1  ;;  %v1278_v55 = vrot.slane %v1277_v50, 1  ;;  %v1533_v56 = vrot.slane %v1532_v13, 1 }
 0xc39   : > { %v1881_v57 = vmul.f32 %v3323_v53, %v3892_v40  ;;  %v1733_v5 = vrot.slane %v1732_v52, 1  ;;  %v1896_v35 = vadd.f32 %v2852_v32, %v1888_v58 }
 0xc3a   : > { %v1138_v2 = vadd.f32 %v1137_v54, %v1136_v49  ;;  %v1279_v3 = vadd.f32 %v1278_v55, %v1277_v50  ;;  %v1534_v37 = vadd.f32 %v1533_v56, %v1532_v13 }
 0xc3b   : > { %v1889_v60 = vmul.f32 %v2851_v51, %v1881_v57  ;;  %v1734_v8 = vadd.f32 %v1733_v5, %v1732_v52 }
 0xc3c   : > { %v1280_v59 = vadd.f32 %v1279_v3, %v1138_v2 }
 0xc3d   : > { %v1897_v39 = vadd.f32 %v2852_v32, %v1889_v60 }
 0xc3e   : > { %v1535_v7 = vadd.f32 %v1534_v37, %v1280_v59 }
 0xc3f   : > { %v1898_v16 = vpack.c.bf16 %v1897_v39, %v1896_v35 }
 0xc40   : > { %v1735_v40 = vadd.f32 %v1734_v8, %v1535_v7 }
 0xc41   : > { %2109 = vmatmul.mubr.bf16.vlgmr.msra.gmra.mxu0 %v1898_v16  ;;  %3102 = vmatmul.mubr.bf16.vlgmr.msra.gmra.mxu1 %v1898_v16 }
 0xc42   : > { %3121 = vmatprep.mubr.msk.bf16.mxu1 %vm3416_vm0, %v3414_v4  ;;  %2503 = vst.msk [vmem:[%s3996_s22] sm:$0x1] %vm2502_vm3, %v1735_v40  ;;  %3106 = vmatpush3.bf16.msra.mxu1 %v3260_v17 }
 0xc43   : > { %3107 = vmatprep.subr.bf16.mxu1 %v3414_v4  ;;  %2955 = vmatpush3.bf16.msra.mxu0 %v3262_v27 }
 0xc44   : > { %2956 = vmatprep.subr.bf16.mxu0 %v3264_v19 }
 0xc46   : > { %3108 = vmatpush3.bf16.msra.mxu1 %v3263_v63 }
 0xc47   : > { %3109 = vmatprep.subr.bf16.mxu1 %v3414_v4  ;;  %2957 = vmatpush3.bf16.msra.mxu0 %v3265_v20 }
 0xc48   : > { %2958 = vmatprep.subr.bf16.mxu0 %v3267_v22 }
 0xc4a   : > { %3110 = vmatpush3.bf16.msra.mxu1 %v3266_v21 }
 0xc4b   : > { %3111 = vmatprep.subr.bf16.mxu1 %v3414_v4  ;;  %2959 = vmatpush3.bf16.msra.mxu0 %v3268_v23 }
 0xc4c   : > { %2960 = vmatprep.subr.bf16.mxu0 %v3270_v62 }
 0xc4e   : > { %3112 = vmatpush3.bf16.msra.mxu1 %v3269_v25 }
 0xc4f   : > { %3113 = vmatprep.subr.bf16.mxu1 %v3414_v4  ;;  %2961 = vmatpush3.bf16.msra.mxu0 %v3271_v14 }
 0xc50   : > { %2962 = vmatprep.subr.bf16.mxu0 %v3273_v33 }
 0xc52   : > { %3114 = vmatpush3.bf16.msra.mxu1 %v3272_v15 }
 0xc53   : > { %3115 = vmatprep.subr.bf16.mxu1 %v3414_v4  ;;  %2963 = vmatpush3.bf16.msra.mxu0 %v3274_v26 }
 0xc54   : > { %2964 = vmatprep.subr.bf16.mxu0 %v3276_v29 }
 0xc56   : > { %3116 = vmatpush3.bf16.msra.mxu1 %v3275_v61 }
 0xc57   : > { %3117 = vmatprep.subr.bf16.mxu1 %v3414_v4  ;;  %2965 = vmatpush3.bf16.msra.mxu0 %v3277_v11 }
 0xc58   : > { %2966 = vmatprep.subr.bf16.mxu0 %v3279_v9 }
 0xc5a   : > { %3118 = vmatpush3.bf16.msra.mxu1 %v3278_v0 }
 0xc5b   : > { %3119 = vmatprep.subr.bf16.mxu1 %v3414_v4  ;;  %2967 = vmatpush3.bf16.msra.mxu0 %v3280_v30  ;;  %v1931_v4 = vld [vmem:[%s4167_s11] sm:$0x7] }
 0xc5c   : > { %2968 = vmatprep.subr.bf16.mxu0 %v3282_v31  ;;  %v1936_v6 = vrot.slane %v1931_v4, %v1090_v12  ;;  %v1944_v41 = vrot.slane %v1931_v4, %v1943_v36  ;;  %v1940_v42 = vrot.slane %v1931_v4, %v1939_v38 }
 0xc5e   : > { %3120 = vmatpush3.bf16.msra.mxu1 %v3281_v1 }
 0xc5f   : > { %2969 = vmatpush3.bf16.msra.mxu0 %v3283_v34 }
 0xd01   : > { %v2110_v43 = vpop.f32.mrf.mxu0  ;;  %v2153_v44 = vpop.f32.mrf.mxu1 }
 0xd02   : > { %v4085_v45 = vadd.f32 %v2110_v43, %v1936_v6  ;;  %v4087_v46 = vadd.f32 %v2153_v44, %v1944_v41 }
 0xd03   : > { %v2112_v47 = vpop.f32.mrf.mxu0  ;;  %v3103_v48 = vpop.f32.mrf.mxu1 }
 0xd04   : > { %v2160_v49 = vmul.f32 %v4085_v45, %v4085_v45  ;;  %v2162_v50 = vmul.f32 %v4087_v46, %v4087_v46  ;;  %v4093_v13 = vadd.f32 %v2112_v47, %v1940_v42 }
 0xd05   : > { %v2114_v10 = vpop.f32.mrf.mxu0  ;;  %v2156_v12 = vpop.f32.mrf.mxu1 }
 0xd06   : > { %v2166_v51 = vmul.f32 %v2160_v49, %v4085_v45  ;;  %v2168_v52 = vmul.f32 %v2162_v50, %v4087_v46  ;;  %v2161_v53 = vmul.f32 %v4093_v13, %v4093_v13  ;;  %v2115_v54 = vadd.f32 %v2114_v10, %v1936_v6 }
 0xd07   : > { %v2157_v55 = vadd.f32 %v2156_v12, %v1944_v41  ;;  %v2116_v56 = vpop.f32.mrf.mxu0  ;;  %v3104_v57 = vpop.f32.mrf.mxu1 }
 0xd08   : > { %v2172_v58 = vmul.f32 0.044715, %v2166_v51  ;;  %v2174_v2 = vmul.f32 0.044715, %v2168_v52  ;;  %v2167_v3 = vmul.f32 %v2161_v53, %v4093_v13  ;;  %v2163_v32 = vmul.f32 %v2115_v54, %v2115_v54 }
 0xd09   : > { %v2165_v5 = vmul.f32 %v2157_v55, %v2157_v55  ;;  %v2117_v60 = vadd.f32 %v2116_v56, %v1940_v42 }
 0xd0a   : > { %v2178_v59 = vadd.f32 %v2172_v58, %v4085_v45  ;;  %v2180_v37 = vadd.f32 %v2174_v2, %v4087_v46  ;;  %v2173_v35 = vmul.f32 0.044715, %v2167_v3  ;;  %v2169_v39 = vmul.f32 %v2163_v32, %v2115_v54 }
 0xd0b   : > { %v2171_v7 = vmul.f32 %v2165_v5, %v2157_v55  ;;  %v2164_v8 = vmul.f32 %v2117_v60, %v2117_v60 }
 0xd0c   : > { %v2184_v16 = vmul.f32 0.7978846, %v2178_v59  ;;  %v2186_v40 = vmul.f32 0.7978846, %v2180_v37  ;;  %v2179_v17 = vadd.f32 %v2173_v35, %v4093_v13  ;;  %v2175_v18 = vmul.f32 0.044715, %v2169_v39 }
 0xd0d   : > { %v2177_v27 = vmul.f32 0.044715, %v2171_v7  ;;  %v2170_v63 = vmul.f32 %v2164_v8, %v2117_v60 }
 0xd0e   : > { %3324 = vtanh.f32 %v2184_v16  ;;  %v2185_v19 = vmul.f32 0.7978846, %v2179_v17  ;;  %v2181_v20 = vadd.f32 %v2175_v18, %v2115_v54 }
 0xd0f   : > { %3326 = vtanh.f32 %v2186_v40  ;;  %v2183_v21 = vadd.f32 %v2177_v27, %v2157_v55  ;;  %v2176_v22 = vmul.f32 0.044715, %v2170_v63 }
 0xd10   : > { %3328 = vtanh.f32 %v2185_v19  ;;  %v2187_v23 = vmul.f32 0.7978846, %v2181_v20 }
 0xd11   : > { %v2189_v25 = vmul.f32 0.7978846, %v2183_v21  ;;  %v2182_v62 = vadd.f32 %v2176_v22, %v2117_v60 }
 0xd12   : > { %3330 = vtanh.f32 %v2187_v23 }
 0xd13   : > { %3332 = vtanh.f32 %v2189_v25  ;;  %v2188_v14 = vmul.f32 0.7978846, %v2182_v62 }
 0xd15   : > { %3334 = vtanh.f32 %v2188_v14 }
 0xd1b   : > { %v3325_v15 = vpop.eup %3324 }
 0xd1c   : > { %v3327_v33 = vpop.eup %3326  ;;  %v2196_v9 = vadd.f32 1.0, %v3325_v15 }
 0xd1d   : > { %v3329_v26 = vpop.eup %3328  ;;  %v2198_v61 = vadd.f32 1.0, %v3327_v33 }
 0xd1e   : > { %v2197_v11 = vadd.f32 1.0, %v3329_v26  ;;  %v2202_v41 = vmul.f32 0.5, %v2196_v9 }
 0xd1f   : > { %v3331_v29 = vpop.eup %3330  ;;  %v2204_v1 = vmul.f32 0.5, %v2198_v61 }
 0xd20   : > { %v3333_v0 = vpop.eup %3332  ;;  %v2199_v30 = vadd.f32 1.0, %v3331_v29  ;;  %v2203_v6 = vmul.f32 0.5, %v2197_v11  ;;  %v2208_v10 = vmul.f32 %v2202_v41, %v4085_v45 }
 0xd21   : > { %v2201_v31 = vadd.f32 1.0, %v3333_v0  ;;  %v2210_v42 = vmul.f32 %v2204_v1, %v4087_v46 }
 0xd22   : > { %v3335_v34 = vpop.eup %3334  ;;  %v2205_v36 = vmul.f32 0.5, %v2199_v30  ;;  %v2209_v49 = vmul.f32 %v2203_v6, %v4093_v13 }
 0xd23   : > { %v2207_v4 = vmul.f32 0.5, %v2201_v31  ;;  %v2200_v38 = vadd.f32 1.0, %v3335_v34 }
 0xd24   : > { %v2211_v47 = vmul.f32 %v2205_v36, %v2115_v54 }
 0xd25   : > { %v2213_v43 = vmul.f32 %v2207_v4, %v2157_v55  ;;  %v2206_v44 = vmul.f32 0.5, %v2200_v38 }
 0xd26   : > { %v2214_v51 = vpack.c.bf16 %v2211_v47, %v2208_v10 }
 0xd27   : > { %v2216_v48 = vpack.c.bf16 %v2213_v43, %v2210_v42  ;;  %v2212_v50 = vmul.f32 %v2206_v44, %v2117_v60 }
 0xd29   : > { %3122 = vmatmul.mubr.bf16.vlgmr.msra.gmra.mxu1 %v2216_v48  ;;  %v2215_v12 = vpack.c.bf16 %v2212_v50, %v2209_v49 }
 0xd2b   : > { %2448 = vmatprep.mubr.bf16.mxu0 %v2215_v12 }
 0xd2c   : > { %2449 = vmatmul.mubr.bf16.vlgmr.msra.gmra.mxu0 %v2214_v51 }
 0xd2d   : > { %3349 = shalt.err (!%p3346_p5)
}
 0xd2e   : > { %s3350_s21 = scalar_lea.hbm %s2523_s18, 16  ;;  %s3354_s29 = scalar_lea.hbm %s4171_s15, 32 }
 0xd2f   : > { %p3351_p6 = scmp.ne.s32.totalorder %s2523_s18, %s3350_s21  ;;  %p3355_p10 = scmp.lt.s32.totalorder %s2523_s18, %s4171_s15 }
 0xd30   : > { %p3356_p11 = scmp.lt.s32.totalorder %s3354_s29, %s3350_s21 }
 0xd31   : > { %p3352_p7 = pnand %p3351_p6, %p3541_p4 }
 0xd32   : > { %p3357_p12 = por %p3356_p11, %p3355_p10 }
 0xd33   : > { %p3353_p9 = pneg %p3352_p7 }
 0xd35   : > { %p3358_p13 = pnand %p3357_p12, %p3353_p9 }
 0xd37   : > { %3361 = shalt.err (!%p3358_p13)
}
 0xd38   : > { %3125 = dma.vmem_to_hbm [thread:$0]  (%p3541_p4), %s2526_s25, 16, %s2523_s18, %s2510_s26   ;;  %v2877_v53 = vld [vmem:[%s4169_s13] ss:$0 sm:$0xff] }
 0xd39   : > { %s731_s25 = scalar_lea.vmem %s4170_s14, %s3561_s24 }
 0xde9   : > { %v2491_v45 = vpop.f32.mrf.mxu1 }
 0xdeb   : > { %v3123_v46 = vpop.f32.mrf.mxu1 }
 0xdec   : > { %v2970_v13 = vpop.f32.mrf.mxu0 }
 0xded   : > { %v2494_v52 = vpop.f32.mrf.mxu1 }
 0xdee   : > { %v2971_v54 = vpop.f32.mrf.mxu0 }
 0xdef   : > { %v2972_v55 = vadd.f32 %v2971_v54, %v2970_v13  ;;  %v3124_v56 = vpop.f32.mrf.mxu1 }
 0xdf0   : > { %v2973_v57 = vpop.f32.mrf.mxu0 }
 0xdf1   : > { %v2451_v58 = vadd.f32 %v2972_v55, %v2877_v53 }
 0xdf2   : > { %v2974_v2 = vpop.f32.mrf.mxu0 }
 0xdf3   : > { %v2492_v3 = vadd.f32 %v2491_v45, %v2451_v58  ;;  %v2975_v32 = vadd.f32 %v2974_v2, %v2973_v57 }
 0xdf5   : > { %v2498_v5 = vadd.f32 %v2492_v3, %v3869_v24  ;;  %v2454_v60 = vadd.f32 %v2975_v32, %v2877_v53 }
 0xdf7   : > { %2500 = vst [vmem:[%s731_s25] sm:$0xff] %v2498_v5  ;;  %v2495_v59 = vadd.f32 %v2494_v52, %v2454_v60 }
 0xdf9   : > { %v2499_v37 = vadd.f32 %v2495_v59, %v3873_v28 }
 0xdfb   : > { %2501 = vst [vmem:[%s731_s25 + $0x8] sm:$0xff] %v2499_v37 }
 0xdfc PF: > { %s4191_s18 = sld [smem:[#allocation5_spill]]  ;;  %p3131_p4 = scmp.ge.s32.totalorder %s3412_s23, 2 }
 0xdfe   : > { %p3128_p0 = pnand %p3131_p4, %p3548_p8 }
 0xe00   : > { %p3129_p1 = pneg %p3128_p0 }
 0xe02   : > { %s2545_s0 = sand.u32 1, %s4191_s18  }
 0xe03   : > { %s2546_s21 = scalar_lea.sflag [#allocation3], %s2545_s0 }
 0xe04   : > { %3387 = dma.done.wait (%p3129_p1), %s2546_s21, 16  }
 0xe05   : > { %3389 = vsyncadd (%p3129_p1), %s2546_s21, 4294967280  ;;  %s29_s23 = sadd.s32 1, %s3412_s23   ;;  %s4193_s24 = sld [smem:[#allocation6_spill]] }
 0xe06   : > { %p26_p2 = scmp.ge.s32.totalorder %s29_s23, 4   ;;  %s4194_s20 = sld [smem:[#allocation10_spill]] }
 0xe07   : > { %s4195_s21 = sld [smem:[#allocation7_spill]]  ;;  %s4197_s18 = smov %s3396_s19 }
 0xe08   : > { %s4196_s22 = sld [smem:[#allocation8_spill]]  ;;  %28 = sbr.rel (!%p26_p2) target bundleno = 7 (0x7), region = 166 }
 0xe0b   : > { %s4198_s19 = smov %s4193_s24 }
 0xe0d   :  { %2550 = vsyncpa [#allocation3], 1 }
 0xe0e   :  { %2552 = vsyncpa [#allocation3 + $0x1], 1 }

</bundles_post_ra>
